<compile_context>
chip_gen: v6e
topology: v6e:2x2x1
jax: 0.10.0
libtpu: 0.0.40
codegen_flags: <defaults>
</compile_context>

<pallas_src>
import functools
import math

import jax
import jax.numpy as jnp
import numpy as np
from jax.experimental import pallas as pl
from jax.experimental.pallas import tpu as pltpu

VMEM = pl.BlockSpec(memory_space=pltpu.MemorySpace.VMEM)

# per layer: wqkv,bqkv,wo,bo, cwv,cbv,cwo,cbo, ln1g,ln1b,ln2g,ln2b,
#            w1,b1,w2,b2, ln3g,ln3b
REFS_PER_LAYER = 18


# --------------------------- fused Pallas kernel -----------------------------

def _fused_decoder_kernel(*refs, B, T, H, nhead, nlayers, eps):
    (x_ref, enc_ref, encw_ref, encb_ref, fcw_ref, fcb_ref) = refs[:6]
    o_ref = refs[-1]
    layer_refs = refs[6:-1]
    assert len(layer_refs) == REFS_PER_LAYER * nlayers

    dh = H // nhead
    scale = 1.0 / math.sqrt(dh)

    def layer_norm(y, g, b):
        m = jnp.mean(y, axis=-1, keepdims=True)
        c = y - m
        var = jnp.mean(c * c, axis=-1, keepdims=True)
        return c * jax.lax.rsqrt(var + eps) * g + b

    # residual stream, batch-major: row = b*T + t
    x = x_ref[...].astype(jnp.float32)                                # [B*T, H]

    # memory = encoder_projection(encoder_outputs)  -> [B, H]
    mem = (jnp.dot(enc_ref[...].astype(jnp.float32), encw_ref[...],
                   preferred_element_type=jnp.float32) + encb_ref[...])

    # causal (square subsequent) mask built in-kernel: 0 on/below diag, -1e30 above
    rows = jax.lax.broadcasted_iota(jnp.int32, (T, T), 0)
    cols = jax.lax.broadcasted_iota(jnp.int32, (T, T), 1)
    causal = jnp.where(cols <= rows, 0.0, -1e30).astype(jnp.float32)  # [T, T]

    for l in range(nlayers):
        (wqkv, bqkv, wo, bo,
         cwv, cbv, cwo, cbo,
         ln1g, ln1b, ln2g, ln2b,
         w1, b1, w2, b2,
         ln3g, ln3b) = layer_refs[REFS_PER_LAYER * l:REFS_PER_LAYER * (l + 1)]

        # ---- self attention (fused QKV projection) ----
        qkv = (jnp.dot(x, wqkv[...], preferred_element_type=jnp.float32)
               + bqkv[...])                                            # [B*T, 3H]
        head_outs = []
        for h in range(nhead):
            q_h = (qkv[:, h * dh:(h + 1) * dh] * scale).reshape(B, T, dh)
            k_h = qkv[:, H + h * dh:H + (h + 1) * dh].reshape(B, T, dh)
            v_h = qkv[:, 2 * H + h * dh:2 * H + (h + 1) * dh].reshape(B, T, dh)
            s = jnp.einsum('btd,bsd->bts', q_h, k_h,
                           preferred_element_type=jnp.float32)         # [B, T, T]
            s = s + causal[None]
            mx = jnp.max(s, axis=-1, keepdims=True)
            p = jnp.exp(s - mx)
            inv = pl.reciprocal(jnp.sum(p, axis=-1, keepdims=True), approx=True)
            p = p * inv
            oh = jnp.einsum('bts,bsd->btd', p, v_h,
                            preferred_element_type=jnp.float32)        # [B, T, dh]
            head_outs.append(oh.reshape(B * T, dh))
        attn = jnp.concatenate(head_outs, axis=-1)                     # [B*T, H]
        sa = jnp.dot(attn, wo[...], preferred_element_type=jnp.float32) + bo[...]
        x = layer_norm(x + sa, ln1g[...], ln1b[...])

        # ---- cross attention: S == 1 => softmax is identity ----
        #      output = Wo(Wv(mem) + bv) + bo, broadcast over T
        ca_b = (jnp.dot(jnp.dot(mem, cwv[...],
                                preferred_element_type=jnp.float32) + cbv[...],
                        cwo[...], preferred_element_type=jnp.float32)
                + cbo[...])                                            # [B, H]
        x3 = x.reshape(B, T, H) + ca_b[:, None, :]
        x = layer_norm(x3.reshape(B * T, H), ln2g[...], ln2b[...])

        # ---- feed-forward (relu) ----
        h1 = jnp.maximum(
            jnp.dot(x, w1[...], preferred_element_type=jnp.float32) + b1[...], 0.0)
        ff = jnp.dot(h1, w2[...], preferred_element_type=jnp.float32) + b2[...]
        x = layer_norm(x + ff, ln3g[...], ln3b[...])

    # ---- output projection (only value that leaves VMEM) ----
    o_ref[...] = (jnp.dot(x, fcw_ref[...], preferred_element_type=jnp.float32)
                  + fcb_ref[...]).astype(o_ref.dtype)


def decoder_forward_pallas(params, input_ids, encoder_outputs, *, nhead=8):
    # TODO(synk): tgt_key_padding_mask path not implemented (forward is called
    # with tgt_attention_mask=None, the default).  Embedding gather + PE add are
    # done as two tiny XLA ops outside the fused kernel.
    B, T = input_ids.shape
    H = params['embedding'].shape[1]
    V = params['fc_out_w'].shape[1]
    nlayers = len(params['layers'])

    emb = jnp.take(params['embedding'], input_ids, axis=0)          # [B, T, H]
    pe = params['pe'][:T, 0, :]                                     # [T, H]
    x0 = (emb + pe[None]).reshape(B * T, H)                         # batch-major

    def b2d(b):  # biases as (1, N) rows for clean lane layout
        return b.reshape(1, -1)

    inputs = [x0, encoder_outputs,
              params['enc_proj_w'], b2d(params['enc_proj_b']),
              params['fc_out_w'], b2d(params['fc_out_b'])]
    for p in params['layers']:
        sa, ca = p['self_attn'], p['cross_attn']
        wqkv = jnp.concatenate([sa['wq'], sa['wk'], sa['wv']], axis=1)   # [H, 3H]
        bqkv = jnp.concatenate([sa['bq'], sa['bk'], sa['bv']])
        inputs += [wqkv, b2d(bqkv), sa['wo'], b2d(sa['bo']),
                   ca['wv'], b2d(ca['bv']), ca['wo'], b2d(ca['bo']),
                   b2d(p['ln1_g']), b2d(p['ln1_b']),
                   b2d(p['ln2_g']), b2d(p['ln2_b']),
                   p['w1'], b2d(p['b1']), p['w2'], b2d(p['b2']),
                   b2d(p['ln3_g']), b2d(p['ln3_b'])]

    kernel = functools.partial(_fused_decoder_kernel, B=B, T=T, H=H,
                               nhead=nhead, nlayers=nlayers, eps=1e-5)
    logits = pl.pallas_call(
        kernel,
        out_shape=jax.ShapeDtypeStruct((B * T, V), jnp.float32),
        in_specs=[VMEM] * len(inputs),
        out_specs=VMEM,
    )(*inputs)
    return logits.reshape(B, T, V)


# --------------------------- pure-JAX reference ------------------------------
# Full-fidelity math (including the degenerate S=1 cross-attention softmax and
# its q/k projections) to validate the kernel's simplifications.

def decoder_forward_reference(params, input_ids, encoder_outputs, *, nhead=8):
    B, T = input_ids.shape
    H = params['embedding'].shape[1]
    dh = H // nhead

    emb = jnp.take(params['embedding'], input_ids, axis=0)          # [B, T, H]
    x = jnp.transpose(emb, (1, 0, 2)) + params['pe'][:T]            # [T, B, H]
    mem = (encoder_outputs @ params['enc_proj_w'] + params['enc_proj_b'])[None]

    row = jnp.arange(T)[:, None]
    col = jnp.arange(T)[None, :]
    tgt_mask = jnp.where(col <= row, 0.0, -jnp.inf)                 # [T, T]

    def mha(query, key, value, mask, w):
        Tq, Bq, _ = query.shape
        S = key.shape[0]
        q = query @ w['wq'] + w['bq']
        k = key @ w['wk'] + w['bk']
        v = value @ w['wv'] + w['bv']

        def heads(t, L):
            return t.reshape(L, Bq, nhead, dh).transpose(1, 2, 0, 3)  # [B,nh,L,dh]

        qh, kh, vh = heads(q, Tq), heads(k, S), heads(v, S)
        s = jnp.einsum('bhtd,bhsd->bhts', qh, kh) / math.sqrt(dh)
        if mask is not None:
            s = s + mask
        p = jax.nn.softmax(s, axis=-1)
        o = jnp.einsum('bhts,bhsd->bhtd', p, vh)
        o = o.transpose(2, 0, 1, 3).reshape(Tq, Bq, H)
        return o @ w['wo'] + w['bo']

    def layer_norm(y, g, b, eps=1e-5):
        m = y.mean(-1, keepdims=True)
        v = ((y - m) ** 2).mean(-1, keepdims=True)
        return (y - m) / jnp.sqrt(v + eps) * g + b

    for p in params['layers']:
        sa = mha(x, x, x, tgt_mask, p['self_attn'])
        x = layer_norm(x + sa, p['ln1_g'], p['ln1_b'])
        ca = mha(x, mem, mem, None, p['cross_attn'])
        x = layer_norm(x + ca, p['ln2_g'], p['ln2_b'])
        ff = jnp.maximum(x @ p['w1'] + p['b1'], 0.0) @ p['w2'] + p['b2']
        x = layer_norm(x + ff, p['ln3_g'], p['ln3_b'])

    logits = x @ params['fc_out_w'] + params['fc_out_b']            # [T, B, V]
    return jnp.transpose(logits, (1, 0, 2))                         # [B, T, V]


# --------------------------- parameter init ----------------------------------

def init_params(key, vocab, hidden, encoder_dim, num_layers, ffn_dim, max_len=64):
    keys = iter(jax.random.split(key, 256))

    def w(shape, scale=0.02):
        return (scale * jax.random.normal(next(keys), shape)).astype(jnp.float32)

    def zeros(n):
        return jnp.zeros((n,), jnp.float32)

    def attn_block():
        return {'wq': w((hidden, hidden)), 'bq': zeros(hidden),
                'wk': w((hidden, hidden)), 'bk': zeros(hidden),
                'wv': w((hidden, hidden)), 'bv': zeros(hidden),
                'wo': w((hidden, hidden)), 'bo': zeros(hidden)}

    params = {
        'embedding': w((vocab, hidden)),
        'enc_proj_w': w((encoder_dim, hidden)), 'enc_proj_b': zeros(hidden),
        'fc_out_w': w((hidden, vocab)), 'fc_out_b': zeros(vocab),
        'layers': [],
    }
    for _ in range(num_layers):
        params['layers'].append({
            'self_attn': attn_block(),
            'cross_attn': attn_block(),
            'w1': w((hidden, ffn_dim)), 'b1': zeros(ffn_dim),
            'w2': w((ffn_dim, hidden)), 'b2': zeros(hidden),
            'ln1_g': jnp.ones((hidden,), jnp.float32), 'ln1_b': zeros(hidden),
            'ln2_g': jnp.ones((hidden,), jnp.float32), 'ln2_b': zeros(hidden),
            'ln3_g': jnp.ones((hidden,), jnp.float32), 'ln3_b': zeros(hidden),
        })

    # sinusoidal positional encoding (same formula as the PyTorch module)
    position = jnp.arange(max_len, dtype=jnp.float32)[:, None]
    div_term = jnp.exp(jnp.arange(0, hidden, 2, dtype=jnp.float32)
                       * (-math.log(10000.0) / hidden))
    pe = jnp.zeros((max_len, hidden), jnp.float32)
    pe = pe.at[:, 0::2].set(jnp.sin(position * div_term))
    pe = pe.at[:, 1::2].set(jnp.cos(position * div_term))
    params['pe'] = pe[:, None, :]                                   # [max_len, 1, H]
    return params


# --------------------------- main ---------------------------------------------

if __name__ == "__main__":
    VOCAB, HIDDEN, ENC_DIM = 128, 64, 48       # vocab=128 -> lane-dense logits
    NUM_LAYERS, NHEAD, FFN_DIM = 2, 8, 2048    # FFN_DIM = PyTorch default
    B, T = 2, 8

    root = jax.random.PRNGKey(0)
    k_par, k_ids, k_enc = jax.random.split(root, 3)

    params = init_params(k_par, VOCAB, HIDDEN, ENC_DIM, NUM_LAYERS, FFN_DIM)
    input_ids = jax.random.randint(k_ids, (B, T), 0, VOCAB, dtype=jnp.int32)
    encoder_outputs = jax.random.normal(k_enc, (B, ENC_DIM), dtype=jnp.float32)

    pallas_fwd = jax.jit(decoder_forward_pallas)
    ref_fwd = jax.jit(decoder_forward_reference)

    out = jax.block_until_ready(pallas_fwd(params, input_ids, encoder_outputs))
    assert out.shape == (B, T, VOCAB), out.shape

    ref = jax.block_until_ready(ref_fwd(params, input_ids, encoder_outputs))

    err = float(jnp.max(jnp.abs(out - ref)))
    assert np.isfinite(err) and err < 2e-3, f"max abs diff vs reference = {err}"

    print("KERNEL_OK")
</pallas_src>

<mosaic_0001>
module attributes {stable_mosaic.version = 11 : i64} {
  func.func @_fused_decoder_kernel(%arg0: memref<16x64xf32, #tpu.memory_space<vmem>>, %arg1: memref<2x48xf32, #tpu.memory_space<vmem>>, %arg2: memref<48x64xf32, #tpu.memory_space<vmem>>, %arg3: memref<1x64xf32, #tpu.memory_space<vmem>>, %arg4: memref<64x128xf32, #tpu.memory_space<vmem>>, %arg5: memref<1x128xf32, #tpu.memory_space<vmem>>, %arg6: memref<64x192xf32, #tpu.memory_space<vmem>>, %arg7: memref<1x192xf32, #tpu.memory_space<vmem>>, %arg8: memref<64x64xf32, #tpu.memory_space<vmem>>, %arg9: memref<1x64xf32, #tpu.memory_space<vmem>>, %arg10: memref<64x64xf32, #tpu.memory_space<vmem>>, %arg11: memref<1x64xf32, #tpu.memory_space<vmem>>, %arg12: memref<64x64xf32, #tpu.memory_space<vmem>>, %arg13: memref<1x64xf32, #tpu.memory_space<vmem>>, %arg14: memref<1x64xf32, #tpu.memory_space<vmem>>, %arg15: memref<1x64xf32, #tpu.memory_space<vmem>>, %arg16: memref<1x64xf32, #tpu.memory_space<vmem>>, %arg17: memref<1x64xf32, #tpu.memory_space<vmem>>, %arg18: memref<64x2048xf32, #tpu.memory_space<vmem>>, %arg19: memref<1x2048xf32, #tpu.memory_space<vmem>>, %arg20: memref<2048x64xf32, #tpu.memory_space<vmem>>, %arg21: memref<1x64xf32, #tpu.memory_space<vmem>>, %arg22: memref<1x64xf32, #tpu.memory_space<vmem>>, %arg23: memref<1x64xf32, #tpu.memory_space<vmem>>, %arg24: memref<64x192xf32, #tpu.memory_space<vmem>>, %arg25: memref<1x192xf32, #tpu.memory_space<vmem>>, %arg26: memref<64x64xf32, #tpu.memory_space<vmem>>, %arg27: memref<1x64xf32, #tpu.memory_space<vmem>>, %arg28: memref<64x64xf32, #tpu.memory_space<vmem>>, %arg29: memref<1x64xf32, #tpu.memory_space<vmem>>, %arg30: memref<64x64xf32, #tpu.memory_space<vmem>>, %arg31: memref<1x64xf32, #tpu.memory_space<vmem>>, %arg32: memref<1x64xf32, #tpu.memory_space<vmem>>, %arg33: memref<1x64xf32, #tpu.memory_space<vmem>>, %arg34: memref<1x64xf32, #tpu.memory_space<vmem>>, %arg35: memref<1x64xf32, #tpu.memory_space<vmem>>, %arg36: memref<64x2048xf32, #tpu.memory_space<vmem>>, %arg37: memref<1x2048xf32, #tpu.memory_space<vmem>>, %arg38: memref<2048x64xf32, #tpu.memory_space<vmem>>, %arg39: memref<1x64xf32, #tpu.memory_space<vmem>>, %arg40: memref<1x64xf32, #tpu.memory_space<vmem>>, %arg41: memref<1x64xf32, #tpu.memory_space<vmem>>, %arg42: memref<16x128xf32, #tpu.memory_space<vmem>>) attributes {dimension_semantics = [], scalar_prefetch = 0 : i64, scratch_operands = 0 : i64, tpu.core_type = #tpu.core_type<tc>} {
    %c0 = arith.constant 0 : index
    %c0_0 = arith.constant 0 : index
    %0 = vector.load %arg0[%c0, %c0_0] : memref<16x64xf32, #tpu.memory_space<vmem>>, vector<16x64xf32>
    %c0_1 = arith.constant 0 : index
    %c0_2 = arith.constant 0 : index
    %1 = vector.load %arg1[%c0_1, %c0_2] : memref<2x48xf32, #tpu.memory_space<vmem>>, vector<2x48xf32>
    %c0_3 = arith.constant 0 : index
    %c0_4 = arith.constant 0 : index
    %2 = vector.load %arg2[%c0_3, %c0_4] : memref<48x64xf32, #tpu.memory_space<vmem>>, vector<48x64xf32>
    %cst = arith.constant dense<0.000000e+00> : vector<2x64xf32>
    %3 = tpu.matmul %1, %2, %cst {dimension_numbers = #tpu.dot_dimension_numbers<[1], [0], [0], [1], [0, 0, 1, 1], [], []>} : vector<2x48xf32>, vector<48x64xf32>, vector<2x64xf32> -> vector<2x64xf32>
    %c0_5 = arith.constant 0 : index
    %c0_6 = arith.constant 0 : index
    %4 = vector.load %arg3[%c0_5, %c0_6] : memref<1x64xf32, #tpu.memory_space<vmem>>, vector<1x64xf32>
    %5 = vector.broadcast %4 : vector<1x64xf32> to vector<2x64xf32>
    %6 = arith.addf %3, %5 : vector<2x64xf32>
    %7 = tpu.iota {dimensions = array<i32: 0>} : vector<8x8xi32>
    %8 = tpu.iota {dimensions = array<i32: 1>} : vector<8x8xi32>
    %9 = arith.cmpi sle, %8, %7 : vector<8x8xi32>
    %cst_7 = arith.constant 0.000000e+00 : f32
    %cst_8 = arith.constant -1.000000e+30 : f32
    %10 = vector.broadcast %cst_7 : f32 to vector<8x8xf32>
    %11 = vector.broadcast %cst_8 : f32 to vector<8x8xf32>
    %12 = arith.select %9, %10, %11 : vector<8x8xi1>, vector<8x8xf32>
    %c0_9 = arith.constant 0 : index
    %c0_10 = arith.constant 0 : index
    %13 = vector.load %arg6[%c0_9, %c0_10] : memref<64x192xf32, #tpu.memory_space<vmem>>, vector<64x192xf32>
    %cst_11 = arith.constant dense<0.000000e+00> : vector<16x192xf32>
    %14 = tpu.matmul %0, %13, %cst_11 {dimension_numbers = #tpu.dot_dimension_numbers<[1], [0], [0], [1], [0, 0, 1, 1], [], []>} : vector<16x64xf32>, vector<64x192xf32>, vector<16x192xf32> -> vector<16x192xf32>
    %c0_12 = arith.constant 0 : index
    %c0_13 = arith.constant 0 : index
    %15 = vector.load %arg7[%c0_12, %c0_13] : memref<1x192xf32, #tpu.memory_space<vmem>>, vector<1x192xf32>
    %16 = vector.broadcast %15 : vector<1x192xf32> to vector<16x192xf32>
    %17 = arith.addf %14, %16 : vector<16x192xf32>
    %18 = vector.extract_strided_slice %17 {offsets = [0, 0], sizes = [16, 8], strides = [1, 1]} : vector<16x192xf32> to vector<16x8xf32>
    %cst_14 = arith.constant 0.353553385 : f32
    %19 = vector.broadcast %cst_14 : f32 to vector<16x8xf32>
    %20 = arith.mulf %18, %19 : vector<16x8xf32>
    %21 = vector.shape_cast %20 : vector<16x8xf32> to vector<2x8x8xf32>
    %22 = vector.extract_strided_slice %17 {offsets = [0, 64], sizes = [16, 8], strides = [1, 1]} : vector<16x192xf32> to vector<16x8xf32>
    %23 = vector.shape_cast %22 : vector<16x8xf32> to vector<2x8x8xf32>
    %24 = vector.extract_strided_slice %17 {offsets = [0, 128], sizes = [16, 8], strides = [1, 1]} : vector<16x192xf32> to vector<16x8xf32>
    %25 = vector.shape_cast %24 : vector<16x8xf32> to vector<2x8x8xf32>
    "tpu.trace_start"() <{level = 10 : i32, message = "btd,bsd->bts"}> : () -> ()
    %cst_15 = arith.constant dense<0.000000e+00> : vector<2x8x8xf32>
    %26 = tpu.matmul %21, %23, %cst_15 {dimension_numbers = #tpu.dot_dimension_numbers<[2], [2], [1], [1], [0, 0, 0, 1, 1, 1], [0], [0]>} : vector<2x8x8xf32>, vector<2x8x8xf32>, vector<2x8x8xf32> -> vector<2x8x8xf32>
    "tpu.trace_stop"() : () -> ()
    %27 = vector.shape_cast %12 : vector<8x8xf32> to vector<1x8x8xf32>
    %28 = vector.broadcast %27 : vector<1x8x8xf32> to vector<2x8x8xf32>
    %29 = arith.addf %26, %28 : vector<2x8x8xf32>
    %cst_16 = arith.constant dense<0xFF800000> : vector<2x8xf32>
    %30 = vector.multi_reduction <maximumf>, %29, %cst_16 [2] : vector<2x8x8xf32> to vector<2x8xf32>
    %31 = vector.shape_cast %30 : vector<2x8xf32> to vector<2x8x1xf32>
    %32 = vector.broadcast %31 : vector<2x8x1xf32> to vector<2x8x8xf32>
    %33 = arith.subf %29, %32 : vector<2x8x8xf32>
    %34 = math.exp %33 : vector<2x8x8xf32>
    %cst_17 = arith.constant dense<0.000000e+00> : vector<2x8xf32>
    %35 = vector.multi_reduction <add>, %34, %cst_17 [2] : vector<2x8x8xf32> to vector<2x8xf32>
    %36 = vector.shape_cast %35 : vector<2x8xf32> to vector<2x8x1xf32>
    %37 = tpu.reciprocal %36 {approx = true} : vector<2x8x1xf32> -> vector<2x8x1xf32>
    %38 = vector.broadcast %37 : vector<2x8x1xf32> to vector<2x8x8xf32>
    %39 = arith.mulf %34, %38 : vector<2x8x8xf32>
    "tpu.trace_start"() <{level = 10 : i32, message = "bts,bsd->btd"}> : () -> ()
    %cst_18 = arith.constant dense<0.000000e+00> : vector<2x8x8xf32>
    %40 = tpu.matmul %39, %25, %cst_18 {dimension_numbers = #tpu.dot_dimension_numbers<[2], [1], [1], [2], [0, 0, 0, 1, 1, 2], [0], [0]>} : vector<2x8x8xf32>, vector<2x8x8xf32>, vector<2x8x8xf32> -> vector<2x8x8xf32>
    "tpu.trace_stop"() : () -> ()
    %41 = vector.shape_cast %40 : vector<2x8x8xf32> to vector<16x8xf32>
    %42 = vector.extract_strided_slice %17 {offsets = [0, 8], sizes = [16, 8], strides = [1, 1]} : vector<16x192xf32> to vector<16x8xf32>
    %cst_19 = arith.constant 0.353553385 : f32
    %43 = vector.broadcast %cst_19 : f32 to vector<16x8xf32>
    %44 = arith.mulf %42, %43 : vector<16x8xf32>
    %45 = vector.shape_cast %44 : vector<16x8xf32> to vector<2x8x8xf32>
    %46 = vector.extract_strided_slice %17 {offsets = [0, 72], sizes = [16, 8], strides = [1, 1]} : vector<16x192xf32> to vector<16x8xf32>
    %47 = vector.shape_cast %46 : vector<16x8xf32> to vector<2x8x8xf32>
    %48 = vector.extract_strided_slice %17 {offsets = [0, 136], sizes = [16, 8], strides = [1, 1]} : vector<16x192xf32> to vector<16x8xf32>
    %49 = vector.shape_cast %48 : vector<16x8xf32> to vector<2x8x8xf32>
    "tpu.trace_start"() <{level = 10 : i32, message = "btd,bsd->bts"}> : () -> ()
    %cst_20 = arith.constant dense<0.000000e+00> : vector<2x8x8xf32>
    %50 = tpu.matmul %45, %47, %cst_20 {dimension_numbers = #tpu.dot_dimension_numbers<[2], [2], [1], [1], [0, 0, 0, 1, 1, 1], [0], [0]>} : vector<2x8x8xf32>, vector<2x8x8xf32>, vector<2x8x8xf32> -> vector<2x8x8xf32>
    "tpu.trace_stop"() : () -> ()
    %51 = vector.shape_cast %12 : vector<8x8xf32> to vector<1x8x8xf32>
    %52 = vector.broadcast %51 : vector<1x8x8xf32> to vector<2x8x8xf32>
    %53 = arith.addf %50, %52 : vector<2x8x8xf32>
    %cst_21 = arith.constant dense<0xFF800000> : vector<2x8xf32>
    %54 = vector.multi_reduction <maximumf>, %53, %cst_21 [2] : vector<2x8x8xf32> to vector<2x8xf32>
    %55 = vector.shape_cast %54 : vector<2x8xf32> to vector<2x8x1xf32>
    %56 = vector.broadcast %55 : vector<2x8x1xf32> to vector<2x8x8xf32>
    %57 = arith.subf %53, %56 : vector<2x8x8xf32>
    %58 = math.exp %57 : vector<2x8x8xf32>
    %cst_22 = arith.constant dense<0.000000e+00> : vector<2x8xf32>
    %59 = vector.multi_reduction <add>, %58, %cst_22 [2] : vector<2x8x8xf32> to vector<2x8xf32>
    %60 = vector.shape_cast %59 : vector<2x8xf32> to vector<2x8x1xf32>
    %61 = tpu.reciprocal %60 {approx = true} : vector<2x8x1xf32> -> vector<2x8x1xf32>
    %62 = vector.broadcast %61 : vector<2x8x1xf32> to vector<2x8x8xf32>
    %63 = arith.mulf %58, %62 : vector<2x8x8xf32>
    "tpu.trace_start"() <{level = 10 : i32, message = "bts,bsd->btd"}> : () -> ()
    %cst_23 = arith.constant dense<0.000000e+00> : vector<2x8x8xf32>
    %64 = tpu.matmul %63, %49, %cst_23 {dimension_numbers = #tpu.dot_dimension_numbers<[2], [1], [1], [2], [0, 0, 0, 1, 1, 2], [0], [0]>} : vector<2x8x8xf32>, vector<2x8x8xf32>, vector<2x8x8xf32> -> vector<2x8x8xf32>
    "tpu.trace_stop"() : () -> ()
    %65 = vector.shape_cast %64 : vector<2x8x8xf32> to vector<16x8xf32>
    %66 = vector.extract_strided_slice %17 {offsets = [0, 16], sizes = [16, 8], strides = [1, 1]} : vector<16x192xf32> to vector<16x8xf32>
    %cst_24 = arith.constant 0.353553385 : f32
    %67 = vector.broadcast %cst_24 : f32 to vector<16x8xf32>
    %68 = arith.mulf %66, %67 : vector<16x8xf32>
    %69 = vector.shape_cast %68 : vector<16x8xf32> to vector<2x8x8xf32>
    %70 = vector.extract_strided_slice %17 {offsets = [0, 80], sizes = [16, 8], strides = [1, 1]} : vector<16x192xf32> to vector<16x8xf32>
    %71 = vector.shape_cast %70 : vector<16x8xf32> to vector<2x8x8xf32>
    %72 = vector.extract_strided_slice %17 {offsets = [0, 144], sizes = [16, 8], strides = [1, 1]} : vector<16x192xf32> to vector<16x8xf32>
    %73 = vector.shape_cast %72 : vector<16x8xf32> to vector<2x8x8xf32>
    "tpu.trace_start"() <{level = 10 : i32, message = "btd,bsd->bts"}> : () -> ()
    %cst_25 = arith.constant dense<0.000000e+00> : vector<2x8x8xf32>
    %74 = tpu.matmul %69, %71, %cst_25 {dimension_numbers = #tpu.dot_dimension_numbers<[2], [2], [1], [1], [0, 0, 0, 1, 1, 1], [0], [0]>} : vector<2x8x8xf32>, vector<2x8x8xf32>, vector<2x8x8xf32> -> vector<2x8x8xf32>
    "tpu.trace_stop"() : () -> ()
    %75 = vector.shape_cast %12 : vector<8x8xf32> to vector<1x8x8xf32>
    %76 = vector.broadcast %75 : vector<1x8x8xf32> to vector<2x8x8xf32>
    %77 = arith.addf %74, %76 : vector<2x8x8xf32>
    %cst_26 = arith.constant dense<0xFF800000> : vector<2x8xf32>
    %78 = vector.multi_reduction <maximumf>, %77, %cst_26 [2] : vector<2x8x8xf32> to vector<2x8xf32>
    %79 = vector.shape_cast %78 : vector<2x8xf32> to vector<2x8x1xf32>
    %80 = vector.broadcast %79 : vector<2x8x1xf32> to vector<2x8x8xf32>
    %81 = arith.subf %77, %80 : vector<2x8x8xf32>
    %82 = math.exp %81 : vector<2x8x8xf32>
    %cst_27 = arith.constant dense<0.000000e+00> : vector<2x8xf32>
    %83 = vector.multi_reduction <add>, %82, %cst_27 [2] : vector<2x8x8xf32> to vector<2x8xf32>
    %84 = vector.shape_cast %83 : vector<2x8xf32> to vector<2x8x1xf32>
    %85 = tpu.reciprocal %84 {approx = true} : vector<2x8x1xf32> -> vector<2x8x1xf32>
    %86 = vector.broadcast %85 : vector<2x8x1xf32> to vector<2x8x8xf32>
    %87 = arith.mulf %82, %86 : vector<2x8x8xf32>
    "tpu.trace_start"() <{level = 10 : i32, message = "bts,bsd->btd"}> : () -> ()
    %cst_28 = arith.constant dense<0.000000e+00> : vector<2x8x8xf32>
    %88 = tpu.matmul %87, %73, %cst_28 {dimension_numbers = #tpu.dot_dimension_numbers<[2], [1], [1], [2], [0, 0, 0, 1, 1, 2], [0], [0]>} : vector<2x8x8xf32>, vector<2x8x8xf32>, vector<2x8x8xf32> -> vector<2x8x8xf32>
    "tpu.trace_stop"() : () -> ()
    %89 = vector.shape_cast %88 : vector<2x8x8xf32> to vector<16x8xf32>
    %90 = vector.extract_strided_slice %17 {offsets = [0, 24], sizes = [16, 8], strides = [1, 1]} : vector<16x192xf32> to vector<16x8xf32>
    %cst_29 = arith.constant 0.353553385 : f32
    %91 = vector.broadcast %cst_29 : f32 to vector<16x8xf32>
    %92 = arith.mulf %90, %91 : vector<16x8xf32>
    %93 = vector.shape_cast %92 : vector<16x8xf32> to vector<2x8x8xf32>
    %94 = vector.extract_strided_slice %17 {offsets = [0, 88], sizes = [16, 8], strides = [1, 1]} : vector<16x192xf32> to vector<16x8xf32>
    %95 = vector.shape_cast %94 : vector<16x8xf32> to vector<2x8x8xf32>
    %96 = vector.extract_strided_slice %17 {offsets = [0, 152], sizes = [16, 8], strides = [1, 1]} : vector<16x192xf32> to vector<16x8xf32>
    %97 = vector.shape_cast %96 : vector<16x8xf32> to vector<2x8x8xf32>
    "tpu.trace_start"() <{level = 10 : i32, message = "btd,bsd->bts"}> : () -> ()
    %cst_30 = arith.constant dense<0.000000e+00> : vector<2x8x8xf32>
    %98 = tpu.matmul %93, %95, %cst_30 {dimension_numbers = #tpu.dot_dimension_numbers<[2], [2], [1], [1], [0, 0, 0, 1, 1, 1], [0], [0]>} : vector<2x8x8xf32>, vector<2x8x8xf32>, vector<2x8x8xf32> -> vector<2x8x8xf32>
    "tpu.trace_stop"() : () -> ()
    %99 = vector.shape_cast %12 : vector<8x8xf32> to vector<1x8x8xf32>
    %100 = vector.broadcast %99 : vector<1x8x8xf32> to vector<2x8x8xf32>
    %101 = arith.addf %98, %100 : vector<2x8x8xf32>
    %cst_31 = arith.constant dense<0xFF800000> : vector<2x8xf32>
    %102 = vector.multi_reduction <maximumf>, %101, %cst_31 [2] : vector<2x8x8xf32> to vector<2x8xf32>
    %103 = vector.shape_cast %102 : vector<2x8xf32> to vector<2x8x1xf32>
    %104 = vector.broadcast %103 : vector<2x8x1xf32> to vector<2x8x8xf32>
    %105 = arith.subf %101, %104 : vector<2x8x8xf32>
    %106 = math.exp %105 : vector<2x8x8xf32>
    %cst_32 = arith.constant dense<0.000000e+00> : vector<2x8xf32>
    %107 = vector.multi_reduction <add>, %106, %cst_32 [2] : vector<2x8x8xf32> to vector<2x8xf32>
    %108 = vector.shape_cast %107 : vector<2x8xf32> to vector<2x8x1xf32>
    %109 = tpu.reciprocal %108 {approx = true} : vector<2x8x1xf32> -> vector<2x8x1xf32>
    %110 = vector.broadcast %109 : vector<2x8x1xf32> to vector<2x8x8xf32>
    %111 = arith.mulf %106, %110 : vector<2x8x8xf32>
    "tpu.trace_start"() <{level = 10 : i32, message = "bts,bsd->btd"}> : () -> ()
    %cst_33 = arith.constant dense<0.000000e+00> : vector<2x8x8xf32>
    %112 = tpu.matmul %111, %97, %cst_33 {dimension_numbers = #tpu.dot_dimension_numbers<[2], [1], [1], [2], [0, 0, 0, 1, 1, 2], [0], [0]>} : vector<2x8x8xf32>, vector<2x8x8xf32>, vector<2x8x8xf32> -> vector<2x8x8xf32>
    "tpu.trace_stop"() : () -> ()
    %113 = vector.shape_cast %112 : vector<2x8x8xf32> to vector<16x8xf32>
    %114 = vector.extract_strided_slice %17 {offsets = [0, 32], sizes = [16, 8], strides = [1, 1]} : vector<16x192xf32> to vector<16x8xf32>
    %cst_34 = arith.constant 0.353553385 : f32
    %115 = vector.broadcast %cst_34 : f32 to vector<16x8xf32>
    %116 = arith.mulf %114, %115 : vector<16x8xf32>
    %117 = vector.shape_cast %116 : vector<16x8xf32> to vector<2x8x8xf32>
    %118 = vector.extract_strided_slice %17 {offsets = [0, 96], sizes = [16, 8], strides = [1, 1]} : vector<16x192xf32> to vector<16x8xf32>
    %119 = vector.shape_cast %118 : vector<16x8xf32> to vector<2x8x8xf32>
    %120 = vector.extract_strided_slice %17 {offsets = [0, 160], sizes = [16, 8], strides = [1, 1]} : vector<16x192xf32> to vector<16x8xf32>
    %121 = vector.shape_cast %120 : vector<16x8xf32> to vector<2x8x8xf32>
    "tpu.trace_start"() <{level = 10 : i32, message = "btd,bsd->bts"}> : () -> ()
    %cst_35 = arith.constant dense<0.000000e+00> : vector<2x8x8xf32>
    %122 = tpu.matmul %117, %119, %cst_35 {dimension_numbers = #tpu.dot_dimension_numbers<[2], [2], [1], [1], [0, 0, 0, 1, 1, 1], [0], [0]>} : vector<2x8x8xf32>, vector<2x8x8xf32>, vector<2x8x8xf32> -> vector<2x8x8xf32>
    "tpu.trace_stop"() : () -> ()
    %123 = vector.shape_cast %12 : vector<8x8xf32> to vector<1x8x8xf32>
    %124 = vector.broadcast %123 : vector<1x8x8xf32> to vector<2x8x8xf32>
    %125 = arith.addf %122, %124 : vector<2x8x8xf32>
    %cst_36 = arith.constant dense<0xFF800000> : vector<2x8xf32>
    %126 = vector.multi_reduction <maximumf>, %125, %cst_36 [2] : vector<2x8x8xf32> to vector<2x8xf32>
    %127 = vector.shape_cast %126 : vector<2x8xf32> to vector<2x8x1xf32>
    %128 = vector.broadcast %127 : vector<2x8x1xf32> to vector<2x8x8xf32>
    %129 = arith.subf %125, %128 : vector<2x8x8xf32>
    %130 = math.exp %129 : vector<2x8x8xf32>
    %cst_37 = arith.constant dense<0.000000e+00> : vector<2x8xf32>
    %131 = vector.multi_reduction <add>, %130, %cst_37 [2] : vector<2x8x8xf32> to vector<2x8xf32>
    %132 = vector.shape_cast %131 : vector<2x8xf32> to vector<2x8x1xf32>
    %133 = tpu.reciprocal %132 {approx = true} : vector<2x8x1xf32> -> vector<2x8x1xf32>
    %134 = vector.broadcast %133 : vector<2x8x1xf32> to vector<2x8x8xf32>
    %135 = arith.mulf %130, %134 : vector<2x8x8xf32>
    "tpu.trace_start"() <{level = 10 : i32, message = "bts,bsd->btd"}> : () -> ()
    %cst_38 = arith.constant dense<0.000000e+00> : vector<2x8x8xf32>
    %136 = tpu.matmul %135, %121, %cst_38 {dimension_numbers = #tpu.dot_dimension_numbers<[2], [1], [1], [2], [0, 0, 0, 1, 1, 2], [0], [0]>} : vector<2x8x8xf32>, vector<2x8x8xf32>, vector<2x8x8xf32> -> vector<2x8x8xf32>
    "tpu.trace_stop"() : () -> ()
    %137 = vector.shape_cast %136 : vector<2x8x8xf32> to vector<16x8xf32>
    %138 = vector.extract_strided_slice %17 {offsets = [0, 40], sizes = [16, 8], strides = [1, 1]} : vector<16x192xf32> to vector<16x8xf32>
    %cst_39 = arith.constant 0.353553385 : f32
    %139 = vector.broadcast %cst_39 : f32 to vector<16x8xf32>
    %140 = arith.mulf %138, %139 : vector<16x8xf32>
    %141 = vector.shape_cast %140 : vector<16x8xf32> to vector<2x8x8xf32>
    %142 = vector.extract_strided_slice %17 {offsets = [0, 104], sizes = [16, 8], strides = [1, 1]} : vector<16x192xf32> to vector<16x8xf32>
    %143 = vector.shape_cast %142 : vector<16x8xf32> to vector<2x8x8xf32>
    %144 = vector.extract_strided_slice %17 {offsets = [0, 168], sizes = [16, 8], strides = [1, 1]} : vector<16x192xf32> to vector<16x8xf32>
    %145 = vector.shape_cast %144 : vector<16x8xf32> to vector<2x8x8xf32>
    "tpu.trace_start"() <{level = 10 : i32, message = "btd,bsd->bts"}> : () -> ()
    %cst_40 = arith.constant dense<0.000000e+00> : vector<2x8x8xf32>
    %146 = tpu.matmul %141, %143, %cst_40 {dimension_numbers = #tpu.dot_dimension_numbers<[2], [2], [1], [1], [0, 0, 0, 1, 1, 1], [0], [0]>} : vector<2x8x8xf32>, vector<2x8x8xf32>, vector<2x8x8xf32> -> vector<2x8x8xf32>
    "tpu.trace_stop"() : () -> ()
    %147 = vector.shape_cast %12 : vector<8x8xf32> to vector<1x8x8xf32>
    %148 = vector.broadcast %147 : vector<1x8x8xf32> to vector<2x8x8xf32>
    %149 = arith.addf %146, %148 : vector<2x8x8xf32>
    %cst_41 = arith.constant dense<0xFF800000> : vector<2x8xf32>
    %150 = vector.multi_reduction <maximumf>, %149, %cst_41 [2] : vector<2x8x8xf32> to vector<2x8xf32>
    %151 = vector.shape_cast %150 : vector<2x8xf32> to vector<2x8x1xf32>
    %152 = vector.broadcast %151 : vector<2x8x1xf32> to vector<2x8x8xf32>
    %153 = arith.subf %149, %152 : vector<2x8x8xf32>
    %154 = math.exp %153 : vector<2x8x8xf32>
    %cst_42 = arith.constant dense<0.000000e+00> : vector<2x8xf32>
    %155 = vector.multi_reduction <add>, %154, %cst_42 [2] : vector<2x8x8xf32> to vector<2x8xf32>
    %156 = vector.shape_cast %155 : vector<2x8xf32> to vector<2x8x1xf32>
    %157 = tpu.reciprocal %156 {approx = true} : vector<2x8x1xf32> -> vector<2x8x1xf32>
    %158 = vector.broadcast %157 : vector<2x8x1xf32> to vector<2x8x8xf32>
    %159 = arith.mulf %154, %158 : vector<2x8x8xf32>
    "tpu.trace_start"() <{level = 10 : i32, message = "bts,bsd->btd"}> : () -> ()
    %cst_43 = arith.constant dense<0.000000e+00> : vector<2x8x8xf32>
    %160 = tpu.matmul %159, %145, %cst_43 {dimension_numbers = #tpu.dot_dimension_numbers<[2], [1], [1], [2], [0, 0, 0, 1, 1, 2], [0], [0]>} : vector<2x8x8xf32>, vector<2x8x8xf32>, vector<2x8x8xf32> -> vector<2x8x8xf32>
    "tpu.trace_stop"() : () -> ()
    %161 = vector.shape_cast %160 : vector<2x8x8xf32> to vector<16x8xf32>
    %162 = vector.extract_strided_slice %17 {offsets = [0, 48], sizes = [16, 8], strides = [1, 1]} : vector<16x192xf32> to vector<16x8xf32>
    %cst_44 = arith.constant 0.353553385 : f32
    %163 = vector.broadcast %cst_44 : f32 to vector<16x8xf32>
    %164 = arith.mulf %162, %163 : vector<16x8xf32>
    %165 = vector.shape_cast %164 : vector<16x8xf32> to vector<2x8x8xf32>
    %166 = vector.extract_strided_slice %17 {offsets = [0, 112], sizes = [16, 8], strides = [1, 1]} : vector<16x192xf32> to vector<16x8xf32>
    %167 = vector.shape_cast %166 : vector<16x8xf32> to vector<2x8x8xf32>
    %168 = vector.extract_strided_slice %17 {offsets = [0, 176], sizes = [16, 8], strides = [1, 1]} : vector<16x192xf32> to vector<16x8xf32>
    %169 = vector.shape_cast %168 : vector<16x8xf32> to vector<2x8x8xf32>
    "tpu.trace_start"() <{level = 10 : i32, message = "btd,bsd->bts"}> : () -> ()
    %cst_45 = arith.constant dense<0.000000e+00> : vector<2x8x8xf32>
    %170 = tpu.matmul %165, %167, %cst_45 {dimension_numbers = #tpu.dot_dimension_numbers<[2], [2], [1], [1], [0, 0, 0, 1, 1, 1], [0], [0]>} : vector<2x8x8xf32>, vector<2x8x8xf32>, vector<2x8x8xf32> -> vector<2x8x8xf32>
    "tpu.trace_stop"() : () -> ()
    %171 = vector.shape_cast %12 : vector<8x8xf32> to vector<1x8x8xf32>
    %172 = vector.broadcast %171 : vector<1x8x8xf32> to vector<2x8x8xf32>
    %173 = arith.addf %170, %172 : vector<2x8x8xf32>
    %cst_46 = arith.constant dense<0xFF800000> : vector<2x8xf32>
    %174 = vector.multi_reduction <maximumf>, %173, %cst_46 [2] : vector<2x8x8xf32> to vector<2x8xf32>
    %175 = vector.shape_cast %174 : vector<2x8xf32> to vector<2x8x1xf32>
    %176 = vector.broadcast %175 : vector<2x8x1xf32> to vector<2x8x8xf32>
    %177 = arith.subf %173, %176 : vector<2x8x8xf32>
    %178 = math.exp %177 : vector<2x8x8xf32>
    %cst_47 = arith.constant dense<0.000000e+00> : vector<2x8xf32>
    %179 = vector.multi_reduction <add>, %178, %cst_47 [2] : vector<2x8x8xf32> to vector<2x8xf32>
    %180 = vector.shape_cast %179 : vector<2x8xf32> to vector<2x8x1xf32>
    %181 = tpu.reciprocal %180 {approx = true} : vector<2x8x1xf32> -> vector<2x8x1xf32>
    %182 = vector.broadcast %181 : vector<2x8x1xf32> to vector<2x8x8xf32>
    %183 = arith.mulf %178, %182 : vector<2x8x8xf32>
    "tpu.trace_start"() <{level = 10 : i32, message = "bts,bsd->btd"}> : () -> ()
    %cst_48 = arith.constant dense<0.000000e+00> : vector<2x8x8xf32>
    %184 = tpu.matmul %183, %169, %cst_48 {dimension_numbers = #tpu.dot_dimension_numbers<[2], [1], [1], [2], [0, 0, 0, 1, 1, 2], [0], [0]>} : vector<2x8x8xf32>, vector<2x8x8xf32>, vector<2x8x8xf32> -> vector<2x8x8xf32>
    "tpu.trace_stop"() : () -> ()
    %185 = vector.shape_cast %184 : vector<2x8x8xf32> to vector<16x8xf32>
    %186 = vector.extract_strided_slice %17 {offsets = [0, 56], sizes = [16, 8], strides = [1, 1]} : vector<16x192xf32> to vector<16x8xf32>
    %cst_49 = arith.constant 0.353553385 : f32
    %187 = vector.broadcast %cst_49 : f32 to vector<16x8xf32>
    %188 = arith.mulf %186, %187 : vector<16x8xf32>
    %189 = vector.shape_cast %188 : vector<16x8xf32> to vector<2x8x8xf32>
    %190 = vector.extract_strided_slice %17 {offsets = [0, 120], sizes = [16, 8], strides = [1, 1]} : vector<16x192xf32> to vector<16x8xf32>
    %191 = vector.shape_cast %190 : vector<16x8xf32> to vector<2x8x8xf32>
    %192 = vector.extract_strided_slice %17 {offsets = [0, 184], sizes = [16, 8], strides = [1, 1]} : vector<16x192xf32> to vector<16x8xf32>
    %193 = vector.shape_cast %192 : vector<16x8xf32> to vector<2x8x8xf32>
    "tpu.trace_start"() <{level = 10 : i32, message = "btd,bsd->bts"}> : () -> ()
    %cst_50 = arith.constant dense<0.000000e+00> : vector<2x8x8xf32>
    %194 = tpu.matmul %189, %191, %cst_50 {dimension_numbers = #tpu.dot_dimension_numbers<[2], [2], [1], [1], [0, 0, 0, 1, 1, 1], [0], [0]>} : vector<2x8x8xf32>, vector<2x8x8xf32>, vector<2x8x8xf32> -> vector<2x8x8xf32>
    "tpu.trace_stop"() : () -> ()
    %195 = vector.shape_cast %12 : vector<8x8xf32> to vector<1x8x8xf32>
    %196 = vector.broadcast %195 : vector<1x8x8xf32> to vector<2x8x8xf32>
    %197 = arith.addf %194, %196 : vector<2x8x8xf32>
    %cst_51 = arith.constant dense<0xFF800000> : vector<2x8xf32>
    %198 = vector.multi_reduction <maximumf>, %197, %cst_51 [2] : vector<2x8x8xf32> to vector<2x8xf32>
    %199 = vector.shape_cast %198 : vector<2x8xf32> to vector<2x8x1xf32>
    %200 = vector.broadcast %199 : vector<2x8x1xf32> to vector<2x8x8xf32>
    %201 = arith.subf %197, %200 : vector<2x8x8xf32>
    %202 = math.exp %201 : vector<2x8x8xf32>
    %cst_52 = arith.constant dense<0.000000e+00> : vector<2x8xf32>
    %203 = vector.multi_reduction <add>, %202, %cst_52 [2] : vector<2x8x8xf32> to vector<2x8xf32>
    %204 = vector.shape_cast %203 : vector<2x8xf32> to vector<2x8x1xf32>
    %205 = tpu.reciprocal %204 {approx = true} : vector<2x8x1xf32> -> vector<2x8x1xf32>
    %206 = vector.broadcast %205 : vector<2x8x1xf32> to vector<2x8x8xf32>
    %207 = arith.mulf %202, %206 : vector<2x8x8xf32>
    "tpu.trace_start"() <{level = 10 : i32, message = "bts,bsd->btd"}> : () -> ()
    %cst_53 = arith.constant dense<0.000000e+00> : vector<2x8x8xf32>
    %208 = tpu.matmul %207, %193, %cst_53 {dimension_numbers = #tpu.dot_dimension_numbers<[2], [1], [1], [2], [0, 0, 0, 1, 1, 2], [0], [0]>} : vector<2x8x8xf32>, vector<2x8x8xf32>, vector<2x8x8xf32> -> vector<2x8x8xf32>
    "tpu.trace_stop"() : () -> ()
    %209 = vector.shape_cast %208 : vector<2x8x8xf32> to vector<16x8xf32>
    %210 = tpu.concatenate %41, %65, %89, %113, %137, %161, %185, %209 in 1 : vector<16x8xf32>, vector<16x8xf32>, vector<16x8xf32>, vector<16x8xf32>, vector<16x8xf32>, vector<16x8xf32>, vector<16x8xf32>, vector<16x8xf32> -> vector<16x64xf32>
    %c0_54 = arith.constant 0 : index
    %c0_55 = arith.constant 0 : index
    %211 = vector.load %arg8[%c0_54, %c0_55] : memref<64x64xf32, #tpu.memory_space<vmem>>, vector<64x64xf32>
    %cst_56 = arith.constant dense<0.000000e+00> : vector<16x64xf32>
    %212 = tpu.matmul %210, %211, %cst_56 {dimension_numbers = #tpu.dot_dimension_numbers<[1], [0], [0], [1], [0, 0, 1, 1], [], []>} : vector<16x64xf32>, vector<64x64xf32>, vector<16x64xf32> -> vector<16x64xf32>
    %c0_57 = arith.constant 0 : index
    %c0_58 = arith.constant 0 : index
    %213 = vector.load %arg9[%c0_57, %c0_58] : memref<1x64xf32, #tpu.memory_space<vmem>>, vector<1x64xf32>
    %214 = vector.broadcast %213 : vector<1x64xf32> to vector<16x64xf32>
    %215 = arith.addf %212, %214 : vector<16x64xf32>
    %216 = arith.addf %0, %215 : vector<16x64xf32>
    %c0_59 = arith.constant 0 : index
    %c0_60 = arith.constant 0 : index
    %217 = vector.load %arg14[%c0_59, %c0_60] : memref<1x64xf32, #tpu.memory_space<vmem>>, vector<1x64xf32>
    %c0_61 = arith.constant 0 : index
    %c0_62 = arith.constant 0 : index
    %218 = vector.load %arg15[%c0_61, %c0_62] : memref<1x64xf32, #tpu.memory_space<vmem>>, vector<1x64xf32>
    %cst_63 = arith.constant dense<0.000000e+00> : vector<16xf32>
    %219 = vector.multi_reduction <add>, %216, %cst_63 [1] : vector<16x64xf32> to vector<16xf32>
    %220 = vector.shape_cast %219 : vector<16xf32> to vector<16x1xf32>
    %cst_64 = arith.constant 6.400000e+01 : f32
    %221 = vector.broadcast %cst_64 : f32 to vector<16x1xf32>
    %222 = arith.divf %220, %221 : vector<16x1xf32>
    %223 = vector.broadcast %222 : vector<16x1xf32> to vector<16x64xf32>
    %224 = arith.subf %216, %223 : vector<16x64xf32>
    %225 = arith.mulf %224, %224 : vector<16x64xf32>
    %cst_65 = arith.constant dense<0.000000e+00> : vector<16xf32>
    %226 = vector.multi_reduction <add>, %225, %cst_65 [1] : vector<16x64xf32> to vector<16xf32>
    %227 = vector.shape_cast %226 : vector<16xf32> to vector<16x1xf32>
    %cst_66 = arith.constant 6.400000e+01 : f32
    %228 = vector.broadcast %cst_66 : f32 to vector<16x1xf32>
    %229 = arith.divf %227, %228 : vector<16x1xf32>
    %cst_67 = arith.constant 9.99999974E-6 : f32
    %230 = vector.broadcast %cst_67 : f32 to vector<16x1xf32>
    %231 = arith.addf %229, %230 : vector<16x1xf32>
    %232 = math.rsqrt %231 : vector<16x1xf32>
    %233 = vector.broadcast %232 : vector<16x1xf32> to vector<16x64xf32>
    %234 = arith.mulf %224, %233 : vector<16x64xf32>
    %235 = vector.broadcast %217 : vector<1x64xf32> to vector<16x64xf32>
    %236 = arith.mulf %234, %235 : vector<16x64xf32>
    %237 = vector.broadcast %218 : vector<1x64xf32> to vector<16x64xf32>
    %238 = arith.addf %236, %237 : vector<16x64xf32>
    %c0_68 = arith.constant 0 : index
    %c0_69 = arith.constant 0 : index
    %239 = vector.load %arg10[%c0_68, %c0_69] : memref<64x64xf32, #tpu.memory_space<vmem>>, vector<64x64xf32>
    %cst_70 = arith.constant dense<0.000000e+00> : vector<2x64xf32>
    %240 = tpu.matmul %6, %239, %cst_70 {dimension_numbers = #tpu.dot_dimension_numbers<[1], [0], [0], [1], [0, 0, 1, 1], [], []>} : vector<2x64xf32>, vector<64x64xf32>, vector<2x64xf32> -> vector<2x64xf32>
    %c0_71 = arith.constant 0 : index
    %c0_72 = arith.constant 0 : index
    %241 = vector.load %arg11[%c0_71, %c0_72] : memref<1x64xf32, #tpu.memory_space<vmem>>, vector<1x64xf32>
    %242 = vector.broadcast %241 : vector<1x64xf32> to vector<2x64xf32>
    %243 = arith.addf %240, %242 : vector<2x64xf32>
    %c0_73 = arith.constant 0 : index
    %c0_74 = arith.constant 0 : index
    %244 = vector.load %arg12[%c0_73, %c0_74] : memref<64x64xf32, #tpu.memory_space<vmem>>, vector<64x64xf32>
    %cst_75 = arith.constant dense<0.000000e+00> : vector<2x64xf32>
    %245 = tpu.matmul %243, %244, %cst_75 {dimension_numbers = #tpu.dot_dimension_numbers<[1], [0], [0], [1], [0, 0, 1, 1], [], []>} : vector<2x64xf32>, vector<64x64xf32>, vector<2x64xf32> -> vector<2x64xf32>
    %c0_76 = arith.constant 0 : index
    %c0_77 = arith.constant 0 : index
    %246 = vector.load %arg13[%c0_76, %c0_77] : memref<1x64xf32, #tpu.memory_space<vmem>>, vector<1x64xf32>
    %247 = vector.broadcast %246 : vector<1x64xf32> to vector<2x64xf32>
    %248 = arith.addf %245, %247 : vector<2x64xf32>
    %249 = vector.shape_cast %238 : vector<16x64xf32> to vector<2x8x64xf32>
    %250 = vector.shape_cast %248 : vector<2x64xf32> to vector<2x1x64xf32>
    %251 = vector.broadcast %250 : vector<2x1x64xf32> to vector<2x8x64xf32>
    %252 = arith.addf %249, %251 : vector<2x8x64xf32>
    %253 = vector.shape_cast %252 : vector<2x8x64xf32> to vector<16x64xf32>
    %c0_78 = arith.constant 0 : index
    %c0_79 = arith.constant 0 : index
    %254 = vector.load %arg16[%c0_78, %c0_79] : memref<1x64xf32, #tpu.memory_space<vmem>>, vector<1x64xf32>
    %c0_80 = arith.constant 0 : index
    %c0_81 = arith.constant 0 : index
    %255 = vector.load %arg17[%c0_80, %c0_81] : memref<1x64xf32, #tpu.memory_space<vmem>>, vector<1x64xf32>
    %cst_82 = arith.constant dense<0.000000e+00> : vector<16xf32>
    %256 = vector.multi_reduction <add>, %253, %cst_82 [1] : vector<16x64xf32> to vector<16xf32>
    %257 = vector.shape_cast %256 : vector<16xf32> to vector<16x1xf32>
    %cst_83 = arith.constant 6.400000e+01 : f32
    %258 = vector.broadcast %cst_83 : f32 to vector<16x1xf32>
    %259 = arith.divf %257, %258 : vector<16x1xf32>
    %260 = vector.broadcast %259 : vector<16x1xf32> to vector<16x64xf32>
    %261 = arith.subf %253, %260 : vector<16x64xf32>
    %262 = arith.mulf %261, %261 : vector<16x64xf32>
    %cst_84 = arith.constant dense<0.000000e+00> : vector<16xf32>
    %263 = vector.multi_reduction <add>, %262, %cst_84 [1] : vector<16x64xf32> to vector<16xf32>
    %264 = vector.shape_cast %263 : vector<16xf32> to vector<16x1xf32>
    %cst_85 = arith.constant 6.400000e+01 : f32
    %265 = vector.broadcast %cst_85 : f32 to vector<16x1xf32>
    %266 = arith.divf %264, %265 : vector<16x1xf32>
    %cst_86 = arith.constant 9.99999974E-6 : f32
    %267 = vector.broadcast %cst_86 : f32 to vector<16x1xf32>
    %268 = arith.addf %266, %267 : vector<16x1xf32>
    %269 = math.rsqrt %268 : vector<16x1xf32>
    %270 = vector.broadcast %269 : vector<16x1xf32> to vector<16x64xf32>
    %271 = arith.mulf %261, %270 : vector<16x64xf32>
    %272 = vector.broadcast %254 : vector<1x64xf32> to vector<16x64xf32>
    %273 = arith.mulf %271, %272 : vector<16x64xf32>
    %274 = vector.broadcast %255 : vector<1x64xf32> to vector<16x64xf32>
    %275 = arith.addf %273, %274 : vector<16x64xf32>
    %c0_87 = arith.constant 0 : index
    %c0_88 = arith.constant 0 : index
    %276 = vector.load %arg18[%c0_87, %c0_88] : memref<64x2048xf32, #tpu.memory_space<vmem>>, vector<64x2048xf32>
    %cst_89 = arith.constant dense<0.000000e+00> : vector<16x2048xf32>
    %277 = tpu.matmul %275, %276, %cst_89 {dimension_numbers = #tpu.dot_dimension_numbers<[1], [0], [0], [1], [0, 0, 1, 1], [], []>} : vector<16x64xf32>, vector<64x2048xf32>, vector<16x2048xf32> -> vector<16x2048xf32>
    %c0_90 = arith.constant 0 : index
    %c0_91 = arith.constant 0 : index
    %278 = vector.load %arg19[%c0_90, %c0_91] : memref<1x2048xf32, #tpu.memory_space<vmem>>, vector<1x2048xf32>
    %279 = vector.broadcast %278 : vector<1x2048xf32> to vector<16x2048xf32>
    %280 = arith.addf %277, %279 : vector<16x2048xf32>
    %cst_92 = arith.constant 0.000000e+00 : f32
    %281 = vector.broadcast %cst_92 : f32 to vector<16x2048xf32>
    %282 = arith.maximumf %280, %281 : vector<16x2048xf32>
    %c0_93 = arith.constant 0 : index
    %c0_94 = arith.constant 0 : index
    %283 = vector.load %arg20[%c0_93, %c0_94] : memref<2048x64xf32, #tpu.memory_space<vmem>>, vector<2048x64xf32>
    %cst_95 = arith.constant dense<0.000000e+00> : vector<16x64xf32>
    %284 = tpu.matmul %282, %283, %cst_95 {dimension_numbers = #tpu.dot_dimension_numbers<[1], [0], [0], [1], [0, 0, 1, 1], [], []>} : vector<16x2048xf32>, vector<2048x64xf32>, vector<16x64xf32> -> vector<16x64xf32>
    %c0_96 = arith.constant 0 : index
    %c0_97 = arith.constant 0 : index
    %285 = vector.load %arg21[%c0_96, %c0_97] : memref<1x64xf32, #tpu.memory_space<vmem>>, vector<1x64xf32>
    %286 = vector.broadcast %285 : vector<1x64xf32> to vector<16x64xf32>
    %287 = arith.addf %284, %286 : vector<16x64xf32>
    %288 = arith.addf %275, %287 : vector<16x64xf32>
    %c0_98 = arith.constant 0 : index
    %c0_99 = arith.constant 0 : index
    %289 = vector.load %arg22[%c0_98, %c0_99] : memref<1x64xf32, #tpu.memory_space<vmem>>, vector<1x64xf32>
    %c0_100 = arith.constant 0 : index
    %c0_101 = arith.constant 0 : index
    %290 = vector.load %arg23[%c0_100, %c0_101] : memref<1x64xf32, #tpu.memory_space<vmem>>, vector<1x64xf32>
    %cst_102 = arith.constant dense<0.000000e+00> : vector<16xf32>
    %291 = vector.multi_reduction <add>, %288, %cst_102 [1] : vector<16x64xf32> to vector<16xf32>
    %292 = vector.shape_cast %291 : vector<16xf32> to vector<16x1xf32>
    %cst_103 = arith.constant 6.400000e+01 : f32
    %293 = vector.broadcast %cst_103 : f32 to vector<16x1xf32>
    %294 = arith.divf %292, %293 : vector<16x1xf32>
    %295 = vector.broadcast %294 : vector<16x1xf32> to vector<16x64xf32>
    %296 = arith.subf %288, %295 : vector<16x64xf32>
    %297 = arith.mulf %296, %296 : vector<16x64xf32>
    %cst_104 = arith.constant dense<0.000000e+00> : vector<16xf32>
    %298 = vector.multi_reduction <add>, %297, %cst_104 [1] : vector<16x64xf32> to vector<16xf32>
    %299 = vector.shape_cast %298 : vector<16xf32> to vector<16x1xf32>
    %cst_105 = arith.constant 6.400000e+01 : f32
    %300 = vector.broadcast %cst_105 : f32 to vector<16x1xf32>
    %301 = arith.divf %299, %300 : vector<16x1xf32>
    %cst_106 = arith.constant 9.99999974E-6 : f32
    %302 = vector.broadcast %cst_106 : f32 to vector<16x1xf32>
    %303 = arith.addf %301, %302 : vector<16x1xf32>
    %304 = math.rsqrt %303 : vector<16x1xf32>
    %305 = vector.broadcast %304 : vector<16x1xf32> to vector<16x64xf32>
    %306 = arith.mulf %296, %305 : vector<16x64xf32>
    %307 = vector.broadcast %289 : vector<1x64xf32> to vector<16x64xf32>
    %308 = arith.mulf %306, %307 : vector<16x64xf32>
    %309 = vector.broadcast %290 : vector<1x64xf32> to vector<16x64xf32>
    %310 = arith.addf %308, %309 : vector<16x64xf32>
    %c0_107 = arith.constant 0 : index
    %c0_108 = arith.constant 0 : index
    %311 = vector.load %arg24[%c0_107, %c0_108] : memref<64x192xf32, #tpu.memory_space<vmem>>, vector<64x192xf32>
    %cst_109 = arith.constant dense<0.000000e+00> : vector<16x192xf32>
    %312 = tpu.matmul %310, %311, %cst_109 {dimension_numbers = #tpu.dot_dimension_numbers<[1], [0], [0], [1], [0, 0, 1, 1], [], []>} : vector<16x64xf32>, vector<64x192xf32>, vector<16x192xf32> -> vector<16x192xf32>
    %c0_110 = arith.constant 0 : index
    %c0_111 = arith.constant 0 : index
    %313 = vector.load %arg25[%c0_110, %c0_111] : memref<1x192xf32, #tpu.memory_space<vmem>>, vector<1x192xf32>
    %314 = vector.broadcast %313 : vector<1x192xf32> to vector<16x192xf32>
    %315 = arith.addf %312, %314 : vector<16x192xf32>
    %316 = vector.extract_strided_slice %315 {offsets = [0, 0], sizes = [16, 8], strides = [1, 1]} : vector<16x192xf32> to vector<16x8xf32>
    %cst_112 = arith.constant 0.353553385 : f32
    %317 = vector.broadcast %cst_112 : f32 to vector<16x8xf32>
    %318 = arith.mulf %316, %317 : vector<16x8xf32>
    %319 = vector.shape_cast %318 : vector<16x8xf32> to vector<2x8x8xf32>
    %320 = vector.extract_strided_slice %315 {offsets = [0, 64], sizes = [16, 8], strides = [1, 1]} : vector<16x192xf32> to vector<16x8xf32>
    %321 = vector.shape_cast %320 : vector<16x8xf32> to vector<2x8x8xf32>
    %322 = vector.extract_strided_slice %315 {offsets = [0, 128], sizes = [16, 8], strides = [1, 1]} : vector<16x192xf32> to vector<16x8xf32>
    %323 = vector.shape_cast %322 : vector<16x8xf32> to vector<2x8x8xf32>
    "tpu.trace_start"() <{level = 10 : i32, message = "btd,bsd->bts"}> : () -> ()
    %cst_113 = arith.constant dense<0.000000e+00> : vector<2x8x8xf32>
    %324 = tpu.matmul %319, %321, %cst_113 {dimension_numbers = #tpu.dot_dimension_numbers<[2], [2], [1], [1], [0, 0, 0, 1, 1, 1], [0], [0]>} : vector<2x8x8xf32>, vector<2x8x8xf32>, vector<2x8x8xf32> -> vector<2x8x8xf32>
    "tpu.trace_stop"() : () -> ()
    %325 = vector.shape_cast %12 : vector<8x8xf32> to vector<1x8x8xf32>
    %326 = vector.broadcast %325 : vector<1x8x8xf32> to vector<2x8x8xf32>
    %327 = arith.addf %324, %326 : vector<2x8x8xf32>
    %cst_114 = arith.constant dense<0xFF800000> : vector<2x8xf32>
    %328 = vector.multi_reduction <maximumf>, %327, %cst_114 [2] : vector<2x8x8xf32> to vector<2x8xf32>
    %329 = vector.shape_cast %328 : vector<2x8xf32> to vector<2x8x1xf32>
    %330 = vector.broadcast %329 : vector<2x8x1xf32> to vector<2x8x8xf32>
    %331 = arith.subf %327, %330 : vector<2x8x8xf32>
    %332 = math.exp %331 : vector<2x8x8xf32>
    %cst_115 = arith.constant dense<0.000000e+00> : vector<2x8xf32>
    %333 = vector.multi_reduction <add>, %332, %cst_115 [2] : vector<2x8x8xf32> to vector<2x8xf32>
    %334 = vector.shape_cast %333 : vector<2x8xf32> to vector<2x8x1xf32>
    %335 = tpu.reciprocal %334 {approx = true} : vector<2x8x1xf32> -> vector<2x8x1xf32>
    %336 = vector.broadcast %335 : vector<2x8x1xf32> to vector<2x8x8xf32>
    %337 = arith.mulf %332, %336 : vector<2x8x8xf32>
    "tpu.trace_start"() <{level = 10 : i32, message = "bts,bsd->btd"}> : () -> ()
    %cst_116 = arith.constant dense<0.000000e+00> : vector<2x8x8xf32>
    %338 = tpu.matmul %337, %323, %cst_116 {dimension_numbers = #tpu.dot_dimension_numbers<[2], [1], [1], [2], [0, 0, 0, 1, 1, 2], [0], [0]>} : vector<2x8x8xf32>, vector<2x8x8xf32>, vector<2x8x8xf32> -> vector<2x8x8xf32>
    "tpu.trace_stop"() : () -> ()
    %339 = vector.shape_cast %338 : vector<2x8x8xf32> to vector<16x8xf32>
    %340 = vector.extract_strided_slice %315 {offsets = [0, 8], sizes = [16, 8], strides = [1, 1]} : vector<16x192xf32> to vector<16x8xf32>
    %cst_117 = arith.constant 0.353553385 : f32
    %341 = vector.broadcast %cst_117 : f32 to vector<16x8xf32>
    %342 = arith.mulf %340, %341 : vector<16x8xf32>
    %343 = vector.shape_cast %342 : vector<16x8xf32> to vector<2x8x8xf32>
    %344 = vector.extract_strided_slice %315 {offsets = [0, 72], sizes = [16, 8], strides = [1, 1]} : vector<16x192xf32> to vector<16x8xf32>
    %345 = vector.shape_cast %344 : vector<16x8xf32> to vector<2x8x8xf32>
    %346 = vector.extract_strided_slice %315 {offsets = [0, 136], sizes = [16, 8], strides = [1, 1]} : vector<16x192xf32> to vector<16x8xf32>
    %347 = vector.shape_cast %346 : vector<16x8xf32> to vector<2x8x8xf32>
    "tpu.trace_start"() <{level = 10 : i32, message = "btd,bsd->bts"}> : () -> ()
    %cst_118 = arith.constant dense<0.000000e+00> : vector<2x8x8xf32>
    %348 = tpu.matmul %343, %345, %cst_118 {dimension_numbers = #tpu.dot_dimension_numbers<[2], [2], [1], [1], [0, 0, 0, 1, 1, 1], [0], [0]>} : vector<2x8x8xf32>, vector<2x8x8xf32>, vector<2x8x8xf32> -> vector<2x8x8xf32>
    "tpu.trace_stop"() : () -> ()
    %349 = vector.shape_cast %12 : vector<8x8xf32> to vector<1x8x8xf32>
    %350 = vector.broadcast %349 : vector<1x8x8xf32> to vector<2x8x8xf32>
    %351 = arith.addf %348, %350 : vector<2x8x8xf32>
    %cst_119 = arith.constant dense<0xFF800000> : vector<2x8xf32>
    %352 = vector.multi_reduction <maximumf>, %351, %cst_119 [2] : vector<2x8x8xf32> to vector<2x8xf32>
    %353 = vector.shape_cast %352 : vector<2x8xf32> to vector<2x8x1xf32>
    %354 = vector.broadcast %353 : vector<2x8x1xf32> to vector<2x8x8xf32>
    %355 = arith.subf %351, %354 : vector<2x8x8xf32>
    %356 = math.exp %355 : vector<2x8x8xf32>
    %cst_120 = arith.constant dense<0.000000e+00> : vector<2x8xf32>
    %357 = vector.multi_reduction <add>, %356, %cst_120 [2] : vector<2x8x8xf32> to vector<2x8xf32>
    %358 = vector.shape_cast %357 : vector<2x8xf32> to vector<2x8x1xf32>
    %359 = tpu.reciprocal %358 {approx = true} : vector<2x8x1xf32> -> vector<2x8x1xf32>
    %360 = vector.broadcast %359 : vector<2x8x1xf32> to vector<2x8x8xf32>
    %361 = arith.mulf %356, %360 : vector<2x8x8xf32>
    "tpu.trace_start"() <{level = 10 : i32, message = "bts,bsd->btd"}> : () -> ()
    %cst_121 = arith.constant dense<0.000000e+00> : vector<2x8x8xf32>
    %362 = tpu.matmul %361, %347, %cst_121 {dimension_numbers = #tpu.dot_dimension_numbers<[2], [1], [1], [2], [0, 0, 0, 1, 1, 2], [0], [0]>} : vector<2x8x8xf32>, vector<2x8x8xf32>, vector<2x8x8xf32> -> vector<2x8x8xf32>
    "tpu.trace_stop"() : () -> ()
    %363 = vector.shape_cast %362 : vector<2x8x8xf32> to vector<16x8xf32>
    %364 = vector.extract_strided_slice %315 {offsets = [0, 16], sizes = [16, 8], strides = [1, 1]} : vector<16x192xf32> to vector<16x8xf32>
    %cst_122 = arith.constant 0.353553385 : f32
    %365 = vector.broadcast %cst_122 : f32 to vector<16x8xf32>
    %366 = arith.mulf %364, %365 : vector<16x8xf32>
    %367 = vector.shape_cast %366 : vector<16x8xf32> to vector<2x8x8xf32>
    %368 = vector.extract_strided_slice %315 {offsets = [0, 80], sizes = [16, 8], strides = [1, 1]} : vector<16x192xf32> to vector<16x8xf32>
    %369 = vector.shape_cast %368 : vector<16x8xf32> to vector<2x8x8xf32>
    %370 = vector.extract_strided_slice %315 {offsets = [0, 144], sizes = [16, 8], strides = [1, 1]} : vector<16x192xf32> to vector<16x8xf32>
    %371 = vector.shape_cast %370 : vector<16x8xf32> to vector<2x8x8xf32>
    "tpu.trace_start"() <{level = 10 : i32, message = "btd,bsd->bts"}> : () -> ()
    %cst_123 = arith.constant dense<0.000000e+00> : vector<2x8x8xf32>
    %372 = tpu.matmul %367, %369, %cst_123 {dimension_numbers = #tpu.dot_dimension_numbers<[2], [2], [1], [1], [0, 0, 0, 1, 1, 1], [0], [0]>} : vector<2x8x8xf32>, vector<2x8x8xf32>, vector<2x8x8xf32> -> vector<2x8x8xf32>
    "tpu.trace_stop"() : () -> ()
    %373 = vector.shape_cast %12 : vector<8x8xf32> to vector<1x8x8xf32>
    %374 = vector.broadcast %373 : vector<1x8x8xf32> to vector<2x8x8xf32>
    %375 = arith.addf %372, %374 : vector<2x8x8xf32>
    %cst_124 = arith.constant dense<0xFF800000> : vector<2x8xf32>
    %376 = vector.multi_reduction <maximumf>, %375, %cst_124 [2] : vector<2x8x8xf32> to vector<2x8xf32>
    %377 = vector.shape_cast %376 : vector<2x8xf32> to vector<2x8x1xf32>
    %378 = vector.broadcast %377 : vector<2x8x1xf32> to vector<2x8x8xf32>
    %379 = arith.subf %375, %378 : vector<2x8x8xf32>
    %380 = math.exp %379 : vector<2x8x8xf32>
    %cst_125 = arith.constant dense<0.000000e+00> : vector<2x8xf32>
    %381 = vector.multi_reduction <add>, %380, %cst_125 [2] : vector<2x8x8xf32> to vector<2x8xf32>
    %382 = vector.shape_cast %381 : vector<2x8xf32> to vector<2x8x1xf32>
    %383 = tpu.reciprocal %382 {approx = true} : vector<2x8x1xf32> -> vector<2x8x1xf32>
    %384 = vector.broadcast %383 : vector<2x8x1xf32> to vector<2x8x8xf32>
    %385 = arith.mulf %380, %384 : vector<2x8x8xf32>
    "tpu.trace_start"() <{level = 10 : i32, message = "bts,bsd->btd"}> : () -> ()
    %cst_126 = arith.constant dense<0.000000e+00> : vector<2x8x8xf32>
    %386 = tpu.matmul %385, %371, %cst_126 {dimension_numbers = #tpu.dot_dimension_numbers<[2], [1], [1], [2], [0, 0, 0, 1, 1, 2], [0], [0]>} : vector<2x8x8xf32>, vector<2x8x8xf32>, vector<2x8x8xf32> -> vector<2x8x8xf32>
    "tpu.trace_stop"() : () -> ()
    %387 = vector.shape_cast %386 : vector<2x8x8xf32> to vector<16x8xf32>
    %388 = vector.extract_strided_slice %315 {offsets = [0, 24], sizes = [16, 8], strides = [1, 1]} : vector<16x192xf32> to vector<16x8xf32>
    %cst_127 = arith.constant 0.353553385 : f32
    %389 = vector.broadcast %cst_127 : f32 to vector<16x8xf32>
    %390 = arith.mulf %388, %389 : vector<16x8xf32>
    %391 = vector.shape_cast %390 : vector<16x8xf32> to vector<2x8x8xf32>
    %392 = vector.extract_strided_slice %315 {offsets = [0, 88], sizes = [16, 8], strides = [1, 1]} : vector<16x192xf32> to vector<16x8xf32>
    %393 = vector.shape_cast %392 : vector<16x8xf32> to vector<2x8x8xf32>
    %394 = vector.extract_strided_slice %315 {offsets = [0, 152], sizes = [16, 8], strides = [1, 1]} : vector<16x192xf32> to vector<16x8xf32>
    %395 = vector.shape_cast %394 : vector<16x8xf32> to vector<2x8x8xf32>
    "tpu.trace_start"() <{level = 10 : i32, message = "btd,bsd->bts"}> : () -> ()
    %cst_128 = arith.constant dense<0.000000e+00> : vector<2x8x8xf32>
    %396 = tpu.matmul %391, %393, %cst_128 {dimension_numbers = #tpu.dot_dimension_numbers<[2], [2], [1], [1], [0, 0, 0, 1, 1, 1], [0], [0]>} : vector<2x8x8xf32>, vector<2x8x8xf32>, vector<2x8x8xf32> -> vector<2x8x8xf32>
    "tpu.trace_stop"() : () -> ()
    %397 = vector.shape_cast %12 : vector<8x8xf32> to vector<1x8x8xf32>
    %398 = vector.broadcast %397 : vector<1x8x8xf32> to vector<2x8x8xf32>
    %399 = arith.addf %396, %398 : vector<2x8x8xf32>
    %cst_129 = arith.constant dense<0xFF800000> : vector<2x8xf32>
    %400 = vector.multi_reduction <maximumf>, %399, %cst_129 [2] : vector<2x8x8xf32> to vector<2x8xf32>
    %401 = vector.shape_cast %400 : vector<2x8xf32> to vector<2x8x1xf32>
    %402 = vector.broadcast %401 : vector<2x8x1xf32> to vector<2x8x8xf32>
    %403 = arith.subf %399, %402 : vector<2x8x8xf32>
    %404 = math.exp %403 : vector<2x8x8xf32>
    %cst_130 = arith.constant dense<0.000000e+00> : vector<2x8xf32>
    %405 = vector.multi_reduction <add>, %404, %cst_130 [2] : vector<2x8x8xf32> to vector<2x8xf32>
    %406 = vector.shape_cast %405 : vector<2x8xf32> to vector<2x8x1xf32>
    %407 = tpu.reciprocal %406 {approx = true} : vector<2x8x1xf32> -> vector<2x8x1xf32>
    %408 = vector.broadcast %407 : vector<2x8x1xf32> to vector<2x8x8xf32>
    %409 = arith.mulf %404, %408 : vector<2x8x8xf32>
    "tpu.trace_start"() <{level = 10 : i32, message = "bts,bsd->btd"}> : () -> ()
    %cst_131 = arith.constant dense<0.000000e+00> : vector<2x8x8xf32>
    %410 = tpu.matmul %409, %395, %cst_131 {dimension_numbers = #tpu.dot_dimension_numbers<[2], [1], [1], [2], [0, 0, 0, 1, 1, 2], [0], [0]>} : vector<2x8x8xf32>, vector<2x8x8xf32>, vector<2x8x8xf32> -> vector<2x8x8xf32>
    "tpu.trace_stop"() : () -> ()
    %411 = vector.shape_cast %410 : vector<2x8x8xf32> to vector<16x8xf32>
    %412 = vector.extract_strided_slice %315 {offsets = [0, 32], sizes = [16, 8], strides = [1, 1]} : vector<16x192xf32> to vector<16x8xf32>
    %cst_132 = arith.constant 0.353553385 : f32
    %413 = vector.broadcast %cst_132 : f32 to vector<16x8xf32>
    %414 = arith.mulf %412, %413 : vector<16x8xf32>
    %415 = vector.shape_cast %414 : vector<16x8xf32> to vector<2x8x8xf32>
    %416 = vector.extract_strided_slice %315 {offsets = [0, 96], sizes = [16, 8], strides = [1, 1]} : vector<16x192xf32> to vector<16x8xf32>
    %417 = vector.shape_cast %416 : vector<16x8xf32> to vector<2x8x8xf32>
    %418 = vector.extract_strided_slice %315 {offsets = [0, 160], sizes = [16, 8], strides = [1, 1]} : vector<16x192xf32> to vector<16x8xf32>
    %419 = vector.shape_cast %418 : vector<16x8xf32> to vector<2x8x8xf32>
    "tpu.trace_start"() <{level = 10 : i32, message = "btd,bsd->bts"}> : () -> ()
    %cst_133 = arith.constant dense<0.000000e+00> : vector<2x8x8xf32>
    %420 = tpu.matmul %415, %417, %cst_133 {dimension_numbers = #tpu.dot_dimension_numbers<[2], [2], [1], [1], [0, 0, 0, 1, 1, 1], [0], [0]>} : vector<2x8x8xf32>, vector<2x8x8xf32>, vector<2x8x8xf32> -> vector<2x8x8xf32>
    "tpu.trace_stop"() : () -> ()
    %421 = vector.shape_cast %12 : vector<8x8xf32> to vector<1x8x8xf32>
    %422 = vector.broadcast %421 : vector<1x8x8xf32> to vector<2x8x8xf32>
    %423 = arith.addf %420, %422 : vector<2x8x8xf32>
    %cst_134 = arith.constant dense<0xFF800000> : vector<2x8xf32>
    %424 = vector.multi_reduction <maximumf>, %423, %cst_134 [2] : vector<2x8x8xf32> to vector<2x8xf32>
    %425 = vector.shape_cast %424 : vector<2x8xf32> to vector<2x8x1xf32>
    %426 = vector.broadcast %425 : vector<2x8x1xf32> to vector<2x8x8xf32>
    %427 = arith.subf %423, %426 : vector<2x8x8xf32>
    %428 = math.exp %427 : vector<2x8x8xf32>
    %cst_135 = arith.constant dense<0.000000e+00> : vector<2x8xf32>
    %429 = vector.multi_reduction <add>, %428, %cst_135 [2] : vector<2x8x8xf32> to vector<2x8xf32>
    %430 = vector.shape_cast %429 : vector<2x8xf32> to vector<2x8x1xf32>
    %431 = tpu.reciprocal %430 {approx = true} : vector<2x8x1xf32> -> vector<2x8x1xf32>
    %432 = vector.broadcast %431 : vector<2x8x1xf32> to vector<2x8x8xf32>
    %433 = arith.mulf %428, %432 : vector<2x8x8xf32>
    "tpu.trace_start"() <{level = 10 : i32, message = "bts,bsd->btd"}> : () -> ()
    %cst_136 = arith.constant dense<0.000000e+00> : vector<2x8x8xf32>
    %434 = tpu.matmul %433, %419, %cst_136 {dimension_numbers = #tpu.dot_dimension_numbers<[2], [1], [1], [2], [0, 0, 0, 1, 1, 2], [0], [0]>} : vector<2x8x8xf32>, vector<2x8x8xf32>, vector<2x8x8xf32> -> vector<2x8x8xf32>
    "tpu.trace_stop"() : () -> ()
    %435 = vector.shape_cast %434 : vector<2x8x8xf32> to vector<16x8xf32>
    %436 = vector.extract_strided_slice %315 {offsets = [0, 40], sizes = [16, 8], strides = [1, 1]} : vector<16x192xf32> to vector<16x8xf32>
    %cst_137 = arith.constant 0.353553385 : f32
    %437 = vector.broadcast %cst_137 : f32 to vector<16x8xf32>
    %438 = arith.mulf %436, %437 : vector<16x8xf32>
    %439 = vector.shape_cast %438 : vector<16x8xf32> to vector<2x8x8xf32>
    %440 = vector.extract_strided_slice %315 {offsets = [0, 104], sizes = [16, 8], strides = [1, 1]} : vector<16x192xf32> to vector<16x8xf32>
    %441 = vector.shape_cast %440 : vector<16x8xf32> to vector<2x8x8xf32>
    %442 = vector.extract_strided_slice %315 {offsets = [0, 168], sizes = [16, 8], strides = [1, 1]} : vector<16x192xf32> to vector<16x8xf32>
    %443 = vector.shape_cast %442 : vector<16x8xf32> to vector<2x8x8xf32>
    "tpu.trace_start"() <{level = 10 : i32, message = "btd,bsd->bts"}> : () -> ()
    %cst_138 = arith.constant dense<0.000000e+00> : vector<2x8x8xf32>
    %444 = tpu.matmul %439, %441, %cst_138 {dimension_numbers = #tpu.dot_dimension_numbers<[2], [2], [1], [1], [0, 0, 0, 1, 1, 1], [0], [0]>} : vector<2x8x8xf32>, vector<2x8x8xf32>, vector<2x8x8xf32> -> vector<2x8x8xf32>
    "tpu.trace_stop"() : () -> ()
    %445 = vector.shape_cast %12 : vector<8x8xf32> to vector<1x8x8xf32>
    %446 = vector.broadcast %445 : vector<1x8x8xf32> to vector<2x8x8xf32>
    %447 = arith.addf %444, %446 : vector<2x8x8xf32>
    %cst_139 = arith.constant dense<0xFF800000> : vector<2x8xf32>
    %448 = vector.multi_reduction <maximumf>, %447, %cst_139 [2] : vector<2x8x8xf32> to vector<2x8xf32>
    %449 = vector.shape_cast %448 : vector<2x8xf32> to vector<2x8x1xf32>
    %450 = vector.broadcast %449 : vector<2x8x1xf32> to vector<2x8x8xf32>
    %451 = arith.subf %447, %450 : vector<2x8x8xf32>
    %452 = math.exp %451 : vector<2x8x8xf32>
    %cst_140 = arith.constant dense<0.000000e+00> : vector<2x8xf32>
    %453 = vector.multi_reduction <add>, %452, %cst_140 [2] : vector<2x8x8xf32> to vector<2x8xf32>
    %454 = vector.shape_cast %453 : vector<2x8xf32> to vector<2x8x1xf32>
    %455 = tpu.reciprocal %454 {approx = true} : vector<2x8x1xf32> -> vector<2x8x1xf32>
    %456 = vector.broadcast %455 : vector<2x8x1xf32> to vector<2x8x8xf32>
    %457 = arith.mulf %452, %456 : vector<2x8x8xf32>
    "tpu.trace_start"() <{level = 10 : i32, message = "bts,bsd->btd"}> : () -> ()
    %cst_141 = arith.constant dense<0.000000e+00> : vector<2x8x8xf32>
    %458 = tpu.matmul %457, %443, %cst_141 {dimension_numbers = #tpu.dot_dimension_numbers<[2], [1], [1], [2], [0, 0, 0, 1, 1, 2], [0], [0]>} : vector<2x8x8xf32>, vector<2x8x8xf32>, vector<2x8x8xf32> -> vector<2x8x8xf32>
    "tpu.trace_stop"() : () -> ()
    %459 = vector.shape_cast %458 : vector<2x8x8xf32> to vector<16x8xf32>
    %460 = vector.extract_strided_slice %315 {offsets = [0, 48], sizes = [16, 8], strides = [1, 1]} : vector<16x192xf32> to vector<16x8xf32>
    %cst_142 = arith.constant 0.353553385 : f32
    %461 = vector.broadcast %cst_142 : f32 to vector<16x8xf32>
    %462 = arith.mulf %460, %461 : vector<16x8xf32>
    %463 = vector.shape_cast %462 : vector<16x8xf32> to vector<2x8x8xf32>
    %464 = vector.extract_strided_slice %315 {offsets = [0, 112], sizes = [16, 8], strides = [1, 1]} : vector<16x192xf32> to vector<16x8xf32>
    %465 = vector.shape_cast %464 : vector<16x8xf32> to vector<2x8x8xf32>
    %466 = vector.extract_strided_slice %315 {offsets = [0, 176], sizes = [16, 8], strides = [1, 1]} : vector<16x192xf32> to vector<16x8xf32>
    %467 = vector.shape_cast %466 : vector<16x8xf32> to vector<2x8x8xf32>
    "tpu.trace_start"() <{level = 10 : i32, message = "btd,bsd->bts"}> : () -> ()
    %cst_143 = arith.constant dense<0.000000e+00> : vector<2x8x8xf32>
    %468 = tpu.matmul %463, %465, %cst_143 {dimension_numbers = #tpu.dot_dimension_numbers<[2], [2], [1], [1], [0, 0, 0, 1, 1, 1], [0], [0]>} : vector<2x8x8xf32>, vector<2x8x8xf32>, vector<2x8x8xf32> -> vector<2x8x8xf32>
    "tpu.trace_stop"() : () -> ()
    %469 = vector.shape_cast %12 : vector<8x8xf32> to vector<1x8x8xf32>
    %470 = vector.broadcast %469 : vector<1x8x8xf32> to vector<2x8x8xf32>
    %471 = arith.addf %468, %470 : vector<2x8x8xf32>
    %cst_144 = arith.constant dense<0xFF800000> : vector<2x8xf32>
    %472 = vector.multi_reduction <maximumf>, %471, %cst_144 [2] : vector<2x8x8xf32> to vector<2x8xf32>
    %473 = vector.shape_cast %472 : vector<2x8xf32> to vector<2x8x1xf32>
    %474 = vector.broadcast %473 : vector<2x8x1xf32> to vector<2x8x8xf32>
    %475 = arith.subf %471, %474 : vector<2x8x8xf32>
    %476 = math.exp %475 : vector<2x8x8xf32>
    %cst_145 = arith.constant dense<0.000000e+00> : vector<2x8xf32>
    %477 = vector.multi_reduction <add>, %476, %cst_145 [2] : vector<2x8x8xf32> to vector<2x8xf32>
    %478 = vector.shape_cast %477 : vector<2x8xf32> to vector<2x8x1xf32>
    %479 = tpu.reciprocal %478 {approx = true} : vector<2x8x1xf32> -> vector<2x8x1xf32>
    %480 = vector.broadcast %479 : vector<2x8x1xf32> to vector<2x8x8xf32>
    %481 = arith.mulf %476, %480 : vector<2x8x8xf32>
    "tpu.trace_start"() <{level = 10 : i32, message = "bts,bsd->btd"}> : () -> ()
    %cst_146 = arith.constant dense<0.000000e+00> : vector<2x8x8xf32>
    %482 = tpu.matmul %481, %467, %cst_146 {dimension_numbers = #tpu.dot_dimension_numbers<[2], [1], [1], [2], [0, 0, 0, 1, 1, 2], [0], [0]>} : vector<2x8x8xf32>, vector<2x8x8xf32>, vector<2x8x8xf32> -> vector<2x8x8xf32>
    "tpu.trace_stop"() : () -> ()
    %483 = vector.shape_cast %482 : vector<2x8x8xf32> to vector<16x8xf32>
    %484 = vector.extract_strided_slice %315 {offsets = [0, 56], sizes = [16, 8], strides = [1, 1]} : vector<16x192xf32> to vector<16x8xf32>
    %cst_147 = arith.constant 0.353553385 : f32
    %485 = vector.broadcast %cst_147 : f32 to vector<16x8xf32>
    %486 = arith.mulf %484, %485 : vector<16x8xf32>
    %487 = vector.shape_cast %486 : vector<16x8xf32> to vector<2x8x8xf32>
    %488 = vector.extract_strided_slice %315 {offsets = [0, 120], sizes = [16, 8], strides = [1, 1]} : vector<16x192xf32> to vector<16x8xf32>
    %489 = vector.shape_cast %488 : vector<16x8xf32> to vector<2x8x8xf32>
    %490 = vector.extract_strided_slice %315 {offsets = [0, 184], sizes = [16, 8], strides = [1, 1]} : vector<16x192xf32> to vector<16x8xf32>
    %491 = vector.shape_cast %490 : vector<16x8xf32> to vector<2x8x8xf32>
    "tpu.trace_start"() <{level = 10 : i32, message = "btd,bsd->bts"}> : () -> ()
    %cst_148 = arith.constant dense<0.000000e+00> : vector<2x8x8xf32>
    %492 = tpu.matmul %487, %489, %cst_148 {dimension_numbers = #tpu.dot_dimension_numbers<[2], [2], [1], [1], [0, 0, 0, 1, 1, 1], [0], [0]>} : vector<2x8x8xf32>, vector<2x8x8xf32>, vector<2x8x8xf32> -> vector<2x8x8xf32>
    "tpu.trace_stop"() : () -> ()
    %493 = vector.shape_cast %12 : vector<8x8xf32> to vector<1x8x8xf32>
    %494 = vector.broadcast %493 : vector<1x8x8xf32> to vector<2x8x8xf32>
    %495 = arith.addf %492, %494 : vector<2x8x8xf32>
    %cst_149 = arith.constant dense<0xFF800000> : vector<2x8xf32>
    %496 = vector.multi_reduction <maximumf>, %495, %cst_149 [2] : vector<2x8x8xf32> to vector<2x8xf32>
    %497 = vector.shape_cast %496 : vector<2x8xf32> to vector<2x8x1xf32>
    %498 = vector.broadcast %497 : vector<2x8x1xf32> to vector<2x8x8xf32>
    %499 = arith.subf %495, %498 : vector<2x8x8xf32>
    %500 = math.exp %499 : vector<2x8x8xf32>
    %cst_150 = arith.constant dense<0.000000e+00> : vector<2x8xf32>
    %501 = vector.multi_reduction <add>, %500, %cst_150 [2] : vector<2x8x8xf32> to vector<2x8xf32>
    %502 = vector.shape_cast %501 : vector<2x8xf32> to vector<2x8x1xf32>
    %503 = tpu.reciprocal %502 {approx = true} : vector<2x8x1xf32> -> vector<2x8x1xf32>
    %504 = vector.broadcast %503 : vector<2x8x1xf32> to vector<2x8x8xf32>
    %505 = arith.mulf %500, %504 : vector<2x8x8xf32>
    "tpu.trace_start"() <{level = 10 : i32, message = "bts,bsd->btd"}> : () -> ()
    %cst_151 = arith.constant dense<0.000000e+00> : vector<2x8x8xf32>
    %506 = tpu.matmul %505, %491, %cst_151 {dimension_numbers = #tpu.dot_dimension_numbers<[2], [1], [1], [2], [0, 0, 0, 1, 1, 2], [0], [0]>} : vector<2x8x8xf32>, vector<2x8x8xf32>, vector<2x8x8xf32> -> vector<2x8x8xf32>
    "tpu.trace_stop"() : () -> ()
    %507 = vector.shape_cast %506 : vector<2x8x8xf32> to vector<16x8xf32>
    %508 = tpu.concatenate %339, %363, %387, %411, %435, %459, %483, %507 in 1 : vector<16x8xf32>, vector<16x8xf32>, vector<16x8xf32>, vector<16x8xf32>, vector<16x8xf32>, vector<16x8xf32>, vector<16x8xf32>, vector<16x8xf32> -> vector<16x64xf32>
    %c0_152 = arith.constant 0 : index
    %c0_153 = arith.constant 0 : index
    %509 = vector.load %arg26[%c0_152, %c0_153] : memref<64x64xf32, #tpu.memory_space<vmem>>, vector<64x64xf32>
    %cst_154 = arith.constant dense<0.000000e+00> : vector<16x64xf32>
    %510 = tpu.matmul %508, %509, %cst_154 {dimension_numbers = #tpu.dot_dimension_numbers<[1], [0], [0], [1], [0, 0, 1, 1], [], []>} : vector<16x64xf32>, vector<64x64xf32>, vector<16x64xf32> -> vector<16x64xf32>
    %c0_155 = arith.constant 0 : index
    %c0_156 = arith.constant 0 : index
    %511 = vector.load %arg27[%c0_155, %c0_156] : memref<1x64xf32, #tpu.memory_space<vmem>>, vector<1x64xf32>
    %512 = vector.broadcast %511 : vector<1x64xf32> to vector<16x64xf32>
    %513 = arith.addf %510, %512 : vector<16x64xf32>
    %514 = arith.addf %310, %513 : vector<16x64xf32>
    %c0_157 = arith.constant 0 : index
    %c0_158 = arith.constant 0 : index
    %515 = vector.load %arg32[%c0_157, %c0_158] : memref<1x64xf32, #tpu.memory_space<vmem>>, vector<1x64xf32>
    %c0_159 = arith.constant 0 : index
    %c0_160 = arith.constant 0 : index
    %516 = vector.load %arg33[%c0_159, %c0_160] : memref<1x64xf32, #tpu.memory_space<vmem>>, vector<1x64xf32>
    %cst_161 = arith.constant dense<0.000000e+00> : vector<16xf32>
    %517 = vector.multi_reduction <add>, %514, %cst_161 [1] : vector<16x64xf32> to vector<16xf32>
    %518 = vector.shape_cast %517 : vector<16xf32> to vector<16x1xf32>
    %cst_162 = arith.constant 6.400000e+01 : f32
    %519 = vector.broadcast %cst_162 : f32 to vector<16x1xf32>
    %520 = arith.divf %518, %519 : vector<16x1xf32>
    %521 = vector.broadcast %520 : vector<16x1xf32> to vector<16x64xf32>
    %522 = arith.subf %514, %521 : vector<16x64xf32>
    %523 = arith.mulf %522, %522 : vector<16x64xf32>
    %cst_163 = arith.constant dense<0.000000e+00> : vector<16xf32>
    %524 = vector.multi_reduction <add>, %523, %cst_163 [1] : vector<16x64xf32> to vector<16xf32>
    %525 = vector.shape_cast %524 : vector<16xf32> to vector<16x1xf32>
    %cst_164 = arith.constant 6.400000e+01 : f32
    %526 = vector.broadcast %cst_164 : f32 to vector<16x1xf32>
    %527 = arith.divf %525, %526 : vector<16x1xf32>
    %cst_165 = arith.constant 9.99999974E-6 : f32
    %528 = vector.broadcast %cst_165 : f32 to vector<16x1xf32>
    %529 = arith.addf %527, %528 : vector<16x1xf32>
    %530 = math.rsqrt %529 : vector<16x1xf32>
    %531 = vector.broadcast %530 : vector<16x1xf32> to vector<16x64xf32>
    %532 = arith.mulf %522, %531 : vector<16x64xf32>
    %533 = vector.broadcast %515 : vector<1x64xf32> to vector<16x64xf32>
    %534 = arith.mulf %532, %533 : vector<16x64xf32>
    %535 = vector.broadcast %516 : vector<1x64xf32> to vector<16x64xf32>
    %536 = arith.addf %534, %535 : vector<16x64xf32>
    %c0_166 = arith.constant 0 : index
    %c0_167 = arith.constant 0 : index
    %537 = vector.load %arg28[%c0_166, %c0_167] : memref<64x64xf32, #tpu.memory_space<vmem>>, vector<64x64xf32>
    %cst_168 = arith.constant dense<0.000000e+00> : vector<2x64xf32>
    %538 = tpu.matmul %6, %537, %cst_168 {dimension_numbers = #tpu.dot_dimension_numbers<[1], [0], [0], [1], [0, 0, 1, 1], [], []>} : vector<2x64xf32>, vector<64x64xf32>, vector<2x64xf32> -> vector<2x64xf32>
    %c0_169 = arith.constant 0 : index
    %c0_170 = arith.constant 0 : index
    %539 = vector.load %arg29[%c0_169, %c0_170] : memref<1x64xf32, #tpu.memory_space<vmem>>, vector<1x64xf32>
    %540 = vector.broadcast %539 : vector<1x64xf32> to vector<2x64xf32>
    %541 = arith.addf %538, %540 : vector<2x64xf32>
    %c0_171 = arith.constant 0 : index
    %c0_172 = arith.constant 0 : index
    %542 = vector.load %arg30[%c0_171, %c0_172] : memref<64x64xf32, #tpu.memory_space<vmem>>, vector<64x64xf32>
    %cst_173 = arith.constant dense<0.000000e+00> : vector<2x64xf32>
    %543 = tpu.matmul %541, %542, %cst_173 {dimension_numbers = #tpu.dot_dimension_numbers<[1], [0], [0], [1], [0, 0, 1, 1], [], []>} : vector<2x64xf32>, vector<64x64xf32>, vector<2x64xf32> -> vector<2x64xf32>
    %c0_174 = arith.constant 0 : index
    %c0_175 = arith.constant 0 : index
    %544 = vector.load %arg31[%c0_174, %c0_175] : memref<1x64xf32, #tpu.memory_space<vmem>>, vector<1x64xf32>
    %545 = vector.broadcast %544 : vector<1x64xf32> to vector<2x64xf32>
    %546 = arith.addf %543, %545 : vector<2x64xf32>
    %547 = vector.shape_cast %536 : vector<16x64xf32> to vector<2x8x64xf32>
    %548 = vector.shape_cast %546 : vector<2x64xf32> to vector<2x1x64xf32>
    %549 = vector.broadcast %548 : vector<2x1x64xf32> to vector<2x8x64xf32>
    %550 = arith.addf %547, %549 : vector<2x8x64xf32>
    %551 = vector.shape_cast %550 : vector<2x8x64xf32> to vector<16x64xf32>
    %c0_176 = arith.constant 0 : index
    %c0_177 = arith.constant 0 : index
    %552 = vector.load %arg34[%c0_176, %c0_177] : memref<1x64xf32, #tpu.memory_space<vmem>>, vector<1x64xf32>
    %c0_178 = arith.constant 0 : index
    %c0_179 = arith.constant 0 : index
    %553 = vector.load %arg35[%c0_178, %c0_179] : memref<1x64xf32, #tpu.memory_space<vmem>>, vector<1x64xf32>
    %cst_180 = arith.constant dense<0.000000e+00> : vector<16xf32>
    %554 = vector.multi_reduction <add>, %551, %cst_180 [1] : vector<16x64xf32> to vector<16xf32>
    %555 = vector.shape_cast %554 : vector<16xf32> to vector<16x1xf32>
    %cst_181 = arith.constant 6.400000e+01 : f32
    %556 = vector.broadcast %cst_181 : f32 to vector<16x1xf32>
    %557 = arith.divf %555, %556 : vector<16x1xf32>
    %558 = vector.broadcast %557 : vector<16x1xf32> to vector<16x64xf32>
    %559 = arith.subf %551, %558 : vector<16x64xf32>
    %560 = arith.mulf %559, %559 : vector<16x64xf32>
    %cst_182 = arith.constant dense<0.000000e+00> : vector<16xf32>
    %561 = vector.multi_reduction <add>, %560, %cst_182 [1] : vector<16x64xf32> to vector<16xf32>
    %562 = vector.shape_cast %561 : vector<16xf32> to vector<16x1xf32>
    %cst_183 = arith.constant 6.400000e+01 : f32
    %563 = vector.broadcast %cst_183 : f32 to vector<16x1xf32>
    %564 = arith.divf %562, %563 : vector<16x1xf32>
    %cst_184 = arith.constant 9.99999974E-6 : f32
    %565 = vector.broadcast %cst_184 : f32 to vector<16x1xf32>
    %566 = arith.addf %564, %565 : vector<16x1xf32>
    %567 = math.rsqrt %566 : vector<16x1xf32>
    %568 = vector.broadcast %567 : vector<16x1xf32> to vector<16x64xf32>
    %569 = arith.mulf %559, %568 : vector<16x64xf32>
    %570 = vector.broadcast %552 : vector<1x64xf32> to vector<16x64xf32>
    %571 = arith.mulf %569, %570 : vector<16x64xf32>
    %572 = vector.broadcast %553 : vector<1x64xf32> to vector<16x64xf32>
    %573 = arith.addf %571, %572 : vector<16x64xf32>
    %c0_185 = arith.constant 0 : index
    %c0_186 = arith.constant 0 : index
    %574 = vector.load %arg36[%c0_185, %c0_186] : memref<64x2048xf32, #tpu.memory_space<vmem>>, vector<64x2048xf32>
    %cst_187 = arith.constant dense<0.000000e+00> : vector<16x2048xf32>
    %575 = tpu.matmul %573, %574, %cst_187 {dimension_numbers = #tpu.dot_dimension_numbers<[1], [0], [0], [1], [0, 0, 1, 1], [], []>} : vector<16x64xf32>, vector<64x2048xf32>, vector<16x2048xf32> -> vector<16x2048xf32>
    %c0_188 = arith.constant 0 : index
    %c0_189 = arith.constant 0 : index
    %576 = vector.load %arg37[%c0_188, %c0_189] : memref<1x2048xf32, #tpu.memory_space<vmem>>, vector<1x2048xf32>
    %577 = vector.broadcast %576 : vector<1x2048xf32> to vector<16x2048xf32>
    %578 = arith.addf %575, %577 : vector<16x2048xf32>
    %cst_190 = arith.constant 0.000000e+00 : f32
    %579 = vector.broadcast %cst_190 : f32 to vector<16x2048xf32>
    %580 = arith.maximumf %578, %579 : vector<16x2048xf32>
    %c0_191 = arith.constant 0 : index
    %c0_192 = arith.constant 0 : index
    %581 = vector.load %arg38[%c0_191, %c0_192] : memref<2048x64xf32, #tpu.memory_space<vmem>>, vector<2048x64xf32>
    %cst_193 = arith.constant dense<0.000000e+00> : vector<16x64xf32>
    %582 = tpu.matmul %580, %581, %cst_193 {dimension_numbers = #tpu.dot_dimension_numbers<[1], [0], [0], [1], [0, 0, 1, 1], [], []>} : vector<16x2048xf32>, vector<2048x64xf32>, vector<16x64xf32> -> vector<16x64xf32>
    %c0_194 = arith.constant 0 : index
    %c0_195 = arith.constant 0 : index
    %583 = vector.load %arg39[%c0_194, %c0_195] : memref<1x64xf32, #tpu.memory_space<vmem>>, vector<1x64xf32>
    %584 = vector.broadcast %583 : vector<1x64xf32> to vector<16x64xf32>
    %585 = arith.addf %582, %584 : vector<16x64xf32>
    %586 = arith.addf %573, %585 : vector<16x64xf32>
    %c0_196 = arith.constant 0 : index
    %c0_197 = arith.constant 0 : index
    %587 = vector.load %arg40[%c0_196, %c0_197] : memref<1x64xf32, #tpu.memory_space<vmem>>, vector<1x64xf32>
    %c0_198 = arith.constant 0 : index
    %c0_199 = arith.constant 0 : index
    %588 = vector.load %arg41[%c0_198, %c0_199] : memref<1x64xf32, #tpu.memory_space<vmem>>, vector<1x64xf32>
    %cst_200 = arith.constant dense<0.000000e+00> : vector<16xf32>
    %589 = vector.multi_reduction <add>, %586, %cst_200 [1] : vector<16x64xf32> to vector<16xf32>
    %590 = vector.shape_cast %589 : vector<16xf32> to vector<16x1xf32>
    %cst_201 = arith.constant 6.400000e+01 : f32
    %591 = vector.broadcast %cst_201 : f32 to vector<16x1xf32>
    %592 = arith.divf %590, %591 : vector<16x1xf32>
    %593 = vector.broadcast %592 : vector<16x1xf32> to vector<16x64xf32>
    %594 = arith.subf %586, %593 : vector<16x64xf32>
    %595 = arith.mulf %594, %594 : vector<16x64xf32>
    %cst_202 = arith.constant dense<0.000000e+00> : vector<16xf32>
    %596 = vector.multi_reduction <add>, %595, %cst_202 [1] : vector<16x64xf32> to vector<16xf32>
    %597 = vector.shape_cast %596 : vector<16xf32> to vector<16x1xf32>
    %cst_203 = arith.constant 6.400000e+01 : f32
    %598 = vector.broadcast %cst_203 : f32 to vector<16x1xf32>
    %599 = arith.divf %597, %598 : vector<16x1xf32>
    %cst_204 = arith.constant 9.99999974E-6 : f32
    %600 = vector.broadcast %cst_204 : f32 to vector<16x1xf32>
    %601 = arith.addf %599, %600 : vector<16x1xf32>
    %602 = math.rsqrt %601 : vector<16x1xf32>
    %603 = vector.broadcast %602 : vector<16x1xf32> to vector<16x64xf32>
    %604 = arith.mulf %594, %603 : vector<16x64xf32>
    %605 = vector.broadcast %587 : vector<1x64xf32> to vector<16x64xf32>
    %606 = arith.mulf %604, %605 : vector<16x64xf32>
    %607 = vector.broadcast %588 : vector<1x64xf32> to vector<16x64xf32>
    %608 = arith.addf %606, %607 : vector<16x64xf32>
    %c0_205 = arith.constant 0 : index
    %c0_206 = arith.constant 0 : index
    %609 = vector.load %arg4[%c0_205, %c0_206] : memref<64x128xf32, #tpu.memory_space<vmem>>, vector<64x128xf32>
    %cst_207 = arith.constant dense<0.000000e+00> : vector<16x128xf32>
    %610 = tpu.matmul %608, %609, %cst_207 {dimension_numbers = #tpu.dot_dimension_numbers<[1], [0], [0], [1], [0, 0, 1, 1], [], []>} : vector<16x64xf32>, vector<64x128xf32>, vector<16x128xf32> -> vector<16x128xf32>
    %c0_208 = arith.constant 0 : index
    %c0_209 = arith.constant 0 : index
    %611 = vector.load %arg5[%c0_208, %c0_209] : memref<1x128xf32, #tpu.memory_space<vmem>>, vector<1x128xf32>
    %612 = vector.broadcast %611 : vector<1x128xf32> to vector<16x128xf32>
    %613 = arith.addf %610, %612 : vector<16x128xf32>
    %c0_210 = arith.constant 0 : index
    %c0_211 = arith.constant 0 : index
    %614 = vector.load %arg42[%c0_210, %c0_211] : memref<16x128xf32, #tpu.memory_space<vmem>>, vector<16x128xf32>
    tpu.vector_store %arg42[%c0_210, %c0_211], %613 {strides = array<i32>} : memref<16x128xf32, #tpu.memory_space<vmem>>, vector<16x128xf32>,
    return
  }
}

</mosaic_0001>

<bundles_post_ra>
// kernel: decoder_forward_pallas.1
= control target key start
LH: loop header
LB: loop body
LE: loop exit
PB: predicated region body
PF: predicated region fallthrough
CT: control target
= control target key end

     0   :  { %s12095_s6 = smov 1   ;;  %s12096_s10 = smov 2   ;;  %s14435_s0 = inlined_call_operand.smem [shape: u32[43], index: -1, kind: input, shape index: {}] }
   0x1   :  { %s12166_s5 = sld [smem:[%s14435_s0]]   ;;  %s12097_s14 = smov 3  }
   0x2   :  { %s12171_s9 = sld [smem:[%s14435_s0 + %s12095_s6]]   ;;  %s12098_s18 = smov 4  }
   0x3   :  { %s12176_s13 = sld [smem:[%s14435_s0 + %s12096_s10]]   ;;  %s12099_s22 = smov 5  }
   0x4   :  { %s12181_s17 = sld [smem:[%s14435_s0 + %s12097_s14]]   ;;  %s12100_s26 = smov 6  }
   0x5   :  { %s12186_s21 = sld [smem:[%s14435_s0 + %s12098_s18]]   ;;  %s12101_s30 = smov 7  }
   0x6   :  { %s12191_s25 = sld [smem:[%s14435_s0 + %s12099_s22]]   ;;  %s12102_s4 = smov 8  }
   0x7   :  { %s12196_s29 = sld [smem:[%s14435_s0 + %s12100_s26]]   ;;  %s12103_s10 = smov 9  }
   0x8   :  { %s12201_s3 = sld [smem:[%s14435_s0 + %s12101_s30]]   ;;  %s12104_s15 = smov 10  }
   0x9   :  { %s12206_s8 = sld [smem:[%s14435_s0 + %s12102_s4]]   ;;  %s12105_s20 = smov 11  }
   0xa   :  { %s12211_s14 = sld [smem:[%s14435_s0 + %s12103_s10]]   ;;  %s12106_s26 = smov 12  }
   0xb   :  { %14447 = sst [smem:[#allocation5_spill]] %s12186_s21  ;;  %s12107_s1 = smov 13  }
   0xc   :  { %14448 = sst [smem:[#allocation6_spill]] %s12191_s25  ;;  %s12108_s7 = smov 14  }
   0xd   :  { %s12216_s19 = sld [smem:[%s14435_s0 + %s12104_s15]]   ;;  %s12109_s15 = smov 15  }
   0xe   :  { %s12221_s24 = sld [smem:[%s14435_s0 + %s12105_s20]]   ;;  %s12110_s22 = smov 16  }
   0xf   :  { %s12226_s30 = sld [smem:[%s14435_s0 + %s12106_s26]]   ;;  %s12111_s28 = smov 17  }
  0x10   :  { %s12231_s6 = sld [smem:[%s14435_s0 + %s12107_s1]]  }
  0x11   :  { %s12236_s12 = sld [smem:[%s14435_s0 + %s12108_s7]]   ;;  %s12112_s7 = smov 18  }
  0x12   :  { %s12241_s20 = sld [smem:[%s14435_s0 + %s12109_s15]]   ;;  %s12113_s15 = smov 19  }
  0x13   :  { %s12246_s27 = sld [smem:[%s14435_s0 + %s12110_s22]]   ;;  %s12114_s22 = smov 20  }
  0x14   :  { %s12251_s4 = sld [smem:[%s14435_s0 + %s12111_s28]]   ;;  %s12115_s28 = smov 21  }
  0x15   :  { %s12256_s25 = sld [smem:[%s14435_s0 + %s12112_s7]]   ;;  %s12116_s7 = smov 22  }
  0x16   :  { %s12261_s21 = sld [smem:[%s14435_s0 + %s12113_s15]]   ;;  %s12117_s15 = smov 23  }
  0x19   :  { %14449 = sst [smem:[#allocation7_spill]] %s12246_s27 }
  0x1a   :  { %14450 = sst [smem:[#allocation8_spill]] %s12251_s4 }
  0x1b   :  { %14451 = sst [smem:[#allocation9_spill]] %s12256_s25 }
  0x1c   :  { %14452 = sst [smem:[#allocation10_spill]] %s12261_s21 }
  0x1d   :  { %s12266_s27 = sld [smem:[%s14435_s0 + %s12114_s22]]   ;;  %s12118_s22 = smov 24  }
  0x1e   :  { %s12271_s4 = sld [smem:[%s14435_s0 + %s12115_s28]]   ;;  %s12119_s28 = smov 25  }
  0x1f   :  { %s12276_s25 = sld [smem:[%s14435_s0 + %s12116_s7]]   ;;  %s12120_s7 = smov 26  }
  0x20   :  { %s12281_s21 = sld [smem:[%s14435_s0 + %s12117_s15]]   ;;  %s12121_s15 = smov 27  }
  0x23   :  { %14453 = sst [smem:[#allocation11_spill]] %s12266_s27 }
  0x24   :  { %14454 = sst [smem:[#allocation12_spill]] %s12271_s4 }
  0x25   :  { %14455 = sst [smem:[#allocation13_spill]] %s12276_s25 }
  0x26   :  { %14456 = sst [smem:[#allocation14_spill]] %s12281_s21 }
  0x27   :  { %s12286_s27 = sld [smem:[%s14435_s0 + %s12118_s22]]   ;;  %s12122_s22 = smov 28  }
  0x28   :  { %s12291_s4 = sld [smem:[%s14435_s0 + %s12119_s28]]   ;;  %s12123_s28 = smov 29  }
  0x29   :  { %s12296_s25 = sld [smem:[%s14435_s0 + %s12120_s7]]   ;;  %s12124_s7 = smov 30  }
  0x2a   :  { %s12301_s21 = sld [smem:[%s14435_s0 + %s12121_s15]]   ;;  %s12125_s15 = smov 31  }
  0x2d   :  { %14457 = sst [smem:[#allocation15_spill]] %s12286_s27 }
  0x2e   :  { %14458 = sst [smem:[#allocation16_spill]] %s12291_s4 }
  0x2f   :  { %14459 = sst [smem:[#allocation17_spill]] %s12296_s25 }
  0x30   :  { %14460 = sst [smem:[#allocation18_spill]] %s12301_s21 }
  0x31   :  { %s12306_s27 = sld [smem:[%s14435_s0 + %s12122_s22]]   ;;  %s12126_s22 = smov 32  }
  0x32   :  { %s12311_s4 = sld [smem:[%s14435_s0 + %s12123_s28]]   ;;  %s12127_s28 = smov 33  }
  0x33   :  { %s12316_s25 = sld [smem:[%s14435_s0 + %s12124_s7]]   ;;  %s12128_s7 = smov 34  }
  0x34   :  { %s12321_s21 = sld [smem:[%s14435_s0 + %s12125_s15]]   ;;  %s12129_s15 = smov 35  }
  0x37   :  { %14461 = sst [smem:[#allocation19_spill]] %s12306_s27 }
  0x38   :  { %14462 = sst [smem:[#allocation20_spill]] %s12311_s4 }
  0x39   :  { %14463 = sst [smem:[#allocation21_spill]] %s12316_s25 }
  0x3a   :  { %14464 = sst [smem:[#allocation22_spill]] %s12321_s21 }
  0x3b   :  { %s12326_s27 = sld [smem:[%s14435_s0 + %s12126_s22]]   ;;  %s12130_s22 = smov 36  }
  0x3c   :  { %s12331_s4 = sld [smem:[%s14435_s0 + %s12127_s28]]   ;;  %s12131_s28 = smov 37  }
  0x3d   :  { %s12336_s25 = sld [smem:[%s14435_s0 + %s12128_s7]]   ;;  %s12132_s7 = smov 38  }
  0x3e   :  { %s12341_s21 = sld [smem:[%s14435_s0 + %s12129_s15]]   ;;  %s12133_s15 = smov 39  }
  0x41   :  { %14465 = sst [smem:[#allocation23_spill]] %s12326_s27 }
  0x42   :  { %14466 = sst [smem:[#allocation24_spill]] %s12331_s4 }
  0x43   :  { %14467 = sst [smem:[#allocation25_spill]] %s12336_s25 }
  0x44   :  { %14468 = sst [smem:[#allocation26_spill]] %s12341_s21 }
  0x45   :  { %s12346_s27 = sld [smem:[%s14435_s0 + %s12130_s22]]   ;;  %s12134_s22 = smov 40  }
  0x46   :  { %s12351_s4 = sld [smem:[%s14435_s0 + %s12131_s28]]   ;;  %s12135_s28 = smov 41  }
  0x47   :  { %s12356_s25 = sld [smem:[%s14435_s0 + %s12132_s7]]   ;;  %s12136_s7 = smov 42  }
  0x48   :  { %s12361_s21 = sld [smem:[%s14435_s0 + %s12133_s15]]  }
  0x4b   :  { %14469 = sst [smem:[#allocation27_spill]] %s12346_s27 }
  0x4c   :  { %14470 = sst [smem:[#allocation28_spill]] %s12351_s4 }
  0x4d   :  { %14471 = sst [smem:[#allocation29_spill]] %s12356_s25 }
  0x4e   :  { %s12366_s27 = sld [smem:[%s14435_s0 + %s12134_s22]]  }
  0x4f   :  { %s12371_s4 = sld [smem:[%s14435_s0 + %s12135_s28]]  }
  0x50   :  { %s12376_s25 = sld [smem:[%s14435_s0 + %s12136_s7]]  }
  0x51   :  { %v286_v0 = vld [vmem:[%s12196_s29 + $0x78] sm:$0xff]  ;;  %v285_v1 = vld [vmem:[%s12196_s29 + $0x70] sm:$0xff]  ;;  %v284_v2 = vld [vmem:[%s12196_s29 + $0x68] sm:$0xff]  ;;  %v12137_v4 = vmov 0.0  }
  0x52   :  { %322 = vmatprep.subr.mxu1 %v286_v0  ;;  %v283_v3 = vld [vmem:[%s12196_s29 + $0x60] sm:$0xff]  ;;  %370 = vmatprep.mubr.f32.mxu1 %v12137_v4  ;;  %v282_v5 = vld [vmem:[%s12196_s29 + $0x58] sm:$0xff]  ;;  %v281_v6 = vld [vmem:[%s12196_s29 + $0x50] sm:$0xff] }
  0x53   :  { %323 = vmatpush1.msra.mxu1 %v285_v1  ;;  %11388 = vmatprep.subr.mxu0 %v12137_v4  ;;  %v280_v7 = vld [vmem:[%s12196_s29 + $0x48] sm:$0xff]  ;;  %v279_v8 = vld [vmem:[%s12196_s29 + $0x40] sm:$0xff]  ;;  %v278_v9 = vld [vmem:[%s12196_s29 + $0x38] sm:$0xff] }
  0x54   :  { %324 = vmatprep.subr.mxu1 %v284_v2 }
  0x55   :  { %325 = vmatpush1.msra.mxu1 %v283_v3 }
  0x56   :  { %326 = vmatprep.subr.mxu1 %v282_v5 }
  0x57   :  { %327 = vmatpush1.msra.mxu1 %v281_v6 }
  0x58   :  { %90 = vsyncpa [#allocation3], 0  ;;  %328 = vmatprep.subr.mxu1 %v280_v7  ;;  %v277_v10 = vld [vmem:[%s12196_s29 + $0x30] sm:$0xff]  ;;  %v276_v11 = vld [vmem:[%s12196_s29 + $0x28] sm:$0xff]  ;;  %vm299_vm0 = vcmask 523264   ;;  %vm12138_vm1 = vmmov 0   ;;  %v265_v26 = vlaneseq }
  0x59   :  { %329 = vmatpush1.msra.mxu1 %v279_v8  ;;  %v275_v12 = vld [vmem:[%s12196_s29 + $0x20] sm:$0xff]  ;;  %v274_v13 = vld [vmem:[%s12196_s29 + $0x18] sm:$0xff]  ;;  %v273_v14 = vld [vmem:[%s12196_s29 + $0x10] sm:$0xff]  ;;  %11400 = vmatprep.mubr.msk.f32.mxu0 %vm12138_vm1, %v12137_v4  ;;  %vm191_vm2 = vcmask 392192   ;;  %s12139_s0 = smov 64   ;;  %vm388_vm3 = vcmask 64512  }
  0x5a   :  { %330 = vmatprep.subr.mxu1 %v278_v9  ;;  %v272_v15 = vld [vmem:[%s12196_s29 + $0x8] sm:$0xff]  ;;  %v271_v16 = vld [vmem:[%s12196_s29] sm:$0xff]  ;;  %v181_v21 = vld [vmem:[%s12176_s13 + $0x18] sm:$0xff]  ;;  %v12422_v27 = vshrl.u32 %v265_v26, 7  ;;  %v268_v47 = vand.u32 127, %v265_v26  ;;  %s12143_s29 = smov 48  }
  0x5b   :  { %331 = vmatpush1.msra.mxu1 %v277_v10  ;;  %v175_v17 = vld [vmem:[%s12166_s5] sm:$0xff]  ;;  %v176_v18 = vld [vmem:[%s12166_s5 + $0x8] sm:$0xff]  ;;  %v180_v22 = vld [vmem:[%s12176_s13 + $0x10] sm:$0xff]  ;;  %v12140_v48 = vmov -1e+30   ;;  %s12145_s15 = smov 40  }
  0x5c   :  { %332 = vmatprep.subr.mxu1 %v276_v11  ;;  %v183_v19 = vld [vmem:[%s12176_s13 + $0x28] sm:$0xff]  ;;  %v182_v20 = vld [vmem:[%s12176_s13 + $0x20] sm:$0xff]  ;;  %v12425_v28 = vsub.s32 0, %v12422_v27  ;;  %v12432_v33 = vsub.s32 1, %v12422_v27  ;;  %vm269_vm4 = vcmp.le.s32.totalorder %v268_v47, %v12422_v27  ;;  %s12146_s16 = smov 104   ;;  %s12147_s18 = smov 32  }
  0x5d   :  { %333 = vmatpush1.msra.mxu1 %v275_v12  ;;  %11389 = vmatpush3.msra.mxu0 %v183_v19  ;;  %v179_v23 = vld [vmem:[%s12176_s13 + $0x8] sm:$0xff]  ;;  %v178_v24 = vld [vmem:[%s12176_s13] sm:$0xff]  ;;  %v12470_v49 = vsel %vm269_vm4, 0.0, %v12140_v48  ;;  %s12142_s13 = smov 120   ;;  %s12148_s22 = smov 96   ;;  %vm3080_vm5 = vcmask 130048  }
  0x5e   :  { %334 = vmatprep.subr.mxu1 %v274_v13  ;;  %11390 = vmatprep.subr.mxu0 %v12137_v4  ;;  %v177_v25 = vld [vmem:[%s12171_s9] sm:$0x3]  ;;  %s12141_s9 = smov 56   ;;  %s12149_s23 = smov 24   ;;  %vm3083_vm6 = vcmask 195584   ;;  %vm3086_vm7 = vcmask 261120  }
  0x5f   :  { %335 = vmatpush1.msra.mxu1 %v273_v14  ;;  %11391 = vmatpush3.msra.mxu0 %v182_v20  ;;  %v287_v29 = vld [vmem:[%s12201_s3] sm:$0x3]  ;;  %s12144_s3 = smov 112   ;;  %s12150_s26 = smov 88   ;;  %vm3089_vm8 = vcmask 326656   ;;  %vm3094_vm9 = vcmask 457728  }
  0x60   :  { %336 = vmatprep.subr.mxu1 %v272_v15  ;;  %11392 = vmatprep.subr.mxu0 %v12137_v4  ;;  %v292_v30 = vrot.slane %v287_v29, %v12425_v28  ;;  %v296_v36 = vrot.slane %v287_v29, %v12432_v33  ;;  %s12151_s28 = smov 16   ;;  %s12152_s1 = smov 80  }
  0x61   :  { %337 = vmatpush1.msra.mxu1 %v271_v16  ;;  %11393 = vmatpush3.msra.mxu0 %v181_v21  ;;  %s12153_s2 = smov 8   ;;  %s12154_s7 = smov 72  }
  0x62   :  { %10416 = vmatmul.mubr.msk.f32.vlgmr.msra.gmra.mxu1 %vm299_vm0, %v175_v17  ;;  %11418 = vmatprep.subr.mxu1 %v12137_v4  ;;  %s14482_s10 = sld [smem:[#allocation19_spill]] }
  0x63   :  { %376 = vmatprep.mubr.f32.mxu1 %v12137_v4  ;;  %11394 = vmatprep.subr.mxu0 %v12137_v4  ;;  %s14483_s11 = sld [smem:[#allocation17_spill]] }
  0x64   :  { %11395 = vmatpush3.msra.mxu0 %v180_v22 }
  0x65   :  { %11396 = vmatprep.subr.mxu0 %v12137_v4 }
  0x66   :  { %10417 = vmatmul.mubr.msk.f32.gmra.mxu1 %vm299_vm0, %v176_v18  ;;  %11397 = vmatpush3.msra.mxu0 %v179_v23 }
  0x67   :  { %11420 = vmatprep.mubr.msk.f32.mxu1 %vm12138_vm1, %v12137_v4  ;;  %11398 = vmatprep.subr.mxu0 %v12137_v4 }
  0x68   :  { %11399 = vmatpush3.msra.mxu0 %v178_v24 }
  0x69   :  { %11401 = vmatmul.mubr.msk.f32.vlgmr.msra.gmra.mxu0 %vm191_vm2, %v177_v25  ;;  %11403 = vmatprep.subr.mxu0 %v12137_v4 }
  0x6a   :  { %11405 = vmatprep.mubr.msk.f32.mxu0 %vm12138_vm1, %v12137_v4 }
 0x122   :  { %v372_v31 = vpop.f32.mrf.mxu1 }
 0x123   :  { %v12429_v32 = vadd.f32 %v372_v31, %v292_v30 }
 0x124   :  { %v374_v34 = vpop.f32.mrf.mxu1 }
 0x125   :  { %386 = vrot.lane.b32.xlu0 %v12429_v32, %s12139_s0  ;;  %v12450_v43 = vmul.f32 0.35355338, %v12429_v32  ;;  %v12461_v46 = vadd.f32 %v374_v34, %v296_v36 }
 0x126   :  { %v378_v35 = vpop.f32.mrf.mxu1 }
 0x127   :  { %v12437_v37 = vadd.f32 %v378_v35, %v292_v30 }
 0x128   :  { %v380_v38 = vpop.f32.mrf.mxu1 }
 0x129   :  { %v12439_v39 = vadd.f32 %v380_v38, %v296_v36  ;;  %465 = vrot.lane.b32.xlu0 %v12437_v37, %s12139_s0  ;;  %v12445_v40 = vpop.f32.mrf.mxu0  ;;  %v12458_v45 = vmul.f32 0.35355338, %v12437_v37 }
 0x12b   :  { %11419 = vmatpush3.msra.mxu1 %v12439_v39  ;;  %v11402_v41 = vpop.f32.mrf.mxu0 }
 0x12c   :  { %11428 = vmatprep.subr.mxu1 %v12137_v4 }
 0x197   :  { %v387_v42 = vpop.permute.xlu0 %386 }
 0x198   :  { %11404 = vmatpush3.xpose.msk.msra.mxu0 %vm388_vm3, %v387_v42 }
 0x199   :  { %11408 = vmatprep.subr.mxu0 %v12137_v4 }
 0x19b   :  { %v466_v44 = vpop.permute.xlu0 %465  ;;  %11406 = vmatmul.mubr.msk.f32.vlgmr.msra.gmra.mxu0 %vm388_vm3, %v12450_v43 }
 0x19c   :  { %11409 = vmatpush3.xpose.msk.msra.mxu0 %vm388_vm3, %v466_v44  ;;  %11410 = vmatprep.mubr.msk.f32.mxu0 %vm12138_vm1, %v12137_v4 }
 0x19d   :  { %11413 = vmatprep.subr.mxu0 %v12137_v4 }
 0x19f   :  { %11411 = vmatmul.mubr.msk.f32.vlgmr.msra.gmra.mxu0 %vm388_vm3, %v12458_v45 }
 0x1a0   :  { %11414 = vmatpush3.msra.mxu0 %v12461_v46  ;;  %11415 = vmatprep.mubr.msk.f32.mxu0 %vm12138_vm1, %v12137_v4 }
 0x1a1   :  { %11423 = vmatprep.subr.mxu0 %v12137_v4 }
 0x25b   :  { %v460_v50 = vpop.f32.mrf.mxu0 }
 0x25c   :  { %v461_v51 = vadd.f32 %v460_v50, %v12470_v49 }
 0x25d   :  { %v11407_v52 = vpop.f32.mrf.mxu0 }
 0x25e   :  { %v542_v53 = vsel %vm388_vm3, %v461_v51, -inf }
 0x25f   :  { %543 = vmax.xlane.f32.xlu1 %v542_v53  ;;  %v538_v54 = vpop.f32.mrf.mxu0 }
 0x260   :  { %v539_v55 = vadd.f32 %v538_v54, %v12470_v49 }
 0x261   :  { %v11412_v56 = vpop.f32.mrf.mxu0 }
 0x262   :  { %v545_v57 = vsel %vm388_vm3, %v539_v55, -inf }
 0x263   :  { %546 = vmax.xlane.f32.xlu1 %v545_v57 }
 0x274   :  { %712 = vrot.lane.b32.xlu1 %v12429_v32, %s12141_s9 }
 0x278   :  { %790 = vrot.lane.b32.xlu1 %v12437_v37, %s12141_s9 }
 0x27c   :  { %710 = vrot.lane.b32.xlu1 %v12450_v43, %s12142_s13 }
 0x2e8   :  { %v544_v58 = vpop.xlane.xlu1 %543 }
 0x2e9   :  { %v548_v59 = vsub.f32 %v461_v51, %v544_v58 }
 0x2eb   :  { %v550_v60 = vmul.f32 1.442695, %v548_v59 }
 0x2ec   :  { %v547_v61 = vpop.xlane.xlu1 %546 }
 0x2ed   :  { %11919 = vpow2.f32 %v550_v60  ;;  %v549_v62 = vsub.f32 %v539_v55, %v547_v61 }
 0x2ef   :  { %v552_v63 = vmul.f32 1.442695, %v549_v62 }
 0x2f0   :  { %v713_v5 = vpop.permute.xlu1 %712 }
 0x2f1   :  { %11921 = vpow2.f32 %v552_v63 }
 0x2f4   :  { %v791_v6 = vpop.permute.xlu1 %790 }
 0x2f8   :  { %v711_v7 = vpop.permute.xlu1 %710 }
 0x2fa   :  { %v11920_v0 = vpop.eup %11919 }
 0x2fb   :  { %v554_v1 = vsel %vm388_vm3, %v11920_v0, 0.0 }
 0x2fc   :  { %555 = vadd.xlane.f32.xlu0 %v554_v1 }
 0x2fe   :  { %v11922_v2 = vpop.eup %11921 }
 0x2ff   :  { %v557_v3 = vsel %vm388_vm3, %v11922_v2, 0.0 }
 0x300   :  { %558 = vadd.xlane.f32.xlu1 %v557_v3 }
 0x311   :  { %788 = vrot.lane.b32.xlu1 %v12458_v45, %s12142_s13 }
 0x385   :  { %v556_v8 = vpop.xlane.xlu0 %555 }
 0x386   :  { %11923 = vrcp.f32 %v556_v8 }
 0x389   :  { %v559_v9 = vpop.xlane.xlu1 %558 }
 0x38a   :  { %11925 = vrcp.f32 %v559_v9 }
 0x38d   :  { %v789_v14 = vpop.permute.xlu1 %788 }
 0x393   :  { %v11924_v10 = vpop.eup %11923 }
 0x394   :  { %v562_v11 = vmul.f32 %v11924_v10, %v11920_v0 }
 0x396   :  { %11416 = vmatmul.mubr.msk.f32.vlgmr.msra.gmra.mxu0 %vm388_vm3, %v562_v11 }
 0x397   :  { %v11926_v12 = vpop.eup %11925  ;;  %11424 = vmatpush3.xpose.msk.msra.mxu0 %vm388_vm3, %v713_v5  ;;  %11425 = vmatprep.mubr.msk.f32.mxu0 %vm12138_vm1, %v12137_v4 }
 0x398   :  { %v563_v13 = vmul.f32 %v11926_v12, %v11922_v2  ;;  %11433 = vmatprep.subr.mxu0 %v12137_v4 }
 0x39a   :  { %11421 = vmatmul.mubr.msk.f32.vlgmr.msra.gmra.mxu1 %vm388_vm3, %v563_v13  ;;  %11426 = vmatmul.mubr.msk.f32.vlgmr.msra.gmra.mxu0 %vm388_vm3, %v711_v7 }
 0x39b   :  { %11429 = vmatpush3.xpose.msk.msra.mxu1 %vm388_vm3, %v791_v6  ;;  %11430 = vmatprep.mubr.msk.f32.mxu1 %vm12138_vm1, %v12137_v4 }
 0x39c   :  { %11438 = vmatprep.subr.mxu1 %v12137_v4  ;;  %11435 = vmatprep.mubr.msk.f32.mxu0 %vm12138_vm1, %v12137_v4 }
 0x39e   :  { %11431 = vmatmul.mubr.msk.f32.vlgmr.msra.gmra.mxu1 %vm388_vm3, %v789_v14 }
 0x39f   :  { %11440 = vmatprep.mubr.msk.f32.mxu1 %vm12138_vm1, %v12137_v4 }
 0x456   :  { %v12502_v15 = vpop.f32.mrf.mxu0 }
 0x458   :  { %v11417_v16 = vpop.f32.mrf.mxu0 }
 0x45a   :  { %v12504_v17 = vpop.f32.mrf.mxu1  ;;  %v784_v18 = vpop.f32.mrf.mxu0 }
 0x45b   :  { %v785_v19 = vadd.f32 %v784_v18, %v12470_v49 }
 0x45c   :  { %v11422_v20 = vpop.f32.mrf.mxu1  ;;  %v11427_v21 = vpop.f32.mrf.mxu0 }
 0x45d   :  { %v866_v22 = vsel %vm388_vm3, %v785_v19, -inf }
 0x45e   :  { %v862_v23 = vpop.f32.mrf.mxu1  ;;  %867 = vmax.xlane.f32.xlu0 %v866_v22 }
 0x45f   :  { %v863_v24 = vadd.f32 %v862_v23, %v12470_v49 }
 0x460   :  { %v11432_v25 = vpop.f32.mrf.mxu1 }
 0x461   :  { %v869_v26 = vsel %vm388_vm3, %v863_v24, -inf }
 0x462   :  { %870 = vmax.xlane.f32.xlu1 %v869_v26 }
 0x473   :  { %1122 = vrot.lane.b32.xlu1 %v12437_v37, %s12143_s29 }
 0x474   :  { %889 = vrot.lane.b32.xlu0 %v12461_v46, %s12142_s13 }
 0x478   :  { %966 = vrot.lane.b32.xlu0 %v12439_v39, %s12142_s13 }
 0x47c   :  { %1044 = vrot.lane.b32.xlu0 %v12429_v32, %s12143_s29 }
 0x4e7   :  { %v868_v29 = vpop.xlane.xlu0 %867 }
 0x4e8   :  { %v872_v30 = vsub.f32 %v785_v19, %v868_v29 }
 0x4ea   :  { %v874_v31 = vmul.f32 1.442695, %v872_v30 }
 0x4eb   :  { %v871_v34 = vpop.xlane.xlu1 %870  ;;  %v890_v35 = vpop.permute.xlu0 %889 }
 0x4ec   :  { %11927 = vpow2.f32 %v874_v31  ;;  %v873_v36 = vsub.f32 %v863_v24, %v871_v34  ;;  %11434 = vmatpush3.msra.mxu0 %v890_v35 }
 0x4ed   :  { %11443 = vmatprep.subr.mxu0 %v12137_v4 }
 0x4ee   :  { %v876_v38 = vmul.f32 1.442695, %v873_v36 }
 0x4ef   :  { %v967_v41 = vpop.permute.xlu0 %966  ;;  %v1123_v58 = vpop.permute.xlu1 %1122 }
 0x4f0   :  { %11929 = vpow2.f32 %v876_v38  ;;  %11439 = vmatpush3.msra.mxu1 %v967_v41 }
 0x4f1   :  { %11448 = vmatprep.subr.mxu1 %v12137_v4 }
 0x4f3   :  { %v1045_v50 = vpop.permute.xlu0 %1044 }
 0x4f9   :  { %v11928_v42 = vpop.eup %11927 }
 0x4fa   :  { %v878_v44 = vsel %vm388_vm3, %v11928_v42, 0.0 }
 0x4fb   :  { %879 = vadd.xlane.f32.xlu0 %v878_v44 }
 0x4fd   :  { %v11930_v47 = vpop.eup %11929 }
 0x4fe   :  { %v881_v48 = vsel %vm388_vm3, %v11930_v47, 0.0 }
 0x4ff   :  { %882 = vadd.xlane.f32.xlu0 %v881_v48 }
 0x515   :  { %1042 = vrot.lane.b32.xlu0 %v12450_v43, %s12144_s3 }
 0x519   :  { %1120 = vrot.lane.b32.xlu0 %v12458_v45, %s12144_s3 }
 0x584   :  { %v880_v51 = vpop.xlane.xlu0 %879 }
 0x585   :  { %11931 = vrcp.f32 %v880_v51 }
 0x588   :  { %v883_v52 = vpop.xlane.xlu0 %882 }
 0x589   :  { %11933 = vrcp.f32 %v883_v52 }
 0x58c   :  { %v1043_v56 = vpop.permute.xlu0 %1042 }
 0x590   :  { %v1121_v59 = vpop.permute.xlu0 %1120 }
 0x592   :  { %v11932_v53 = vpop.eup %11931 }
 0x593   :  { %v886_v54 = vmul.f32 %v11932_v53, %v11928_v42 }
 0x595   :  { %11436 = vmatmul.mubr.msk.f32.vlgmr.msra.gmra.mxu0 %vm388_vm3, %v886_v54 }
 0x596   :  { %v11934_v55 = vpop.eup %11933  ;;  %11444 = vmatpush3.xpose.msk.msra.mxu0 %vm388_vm3, %v1045_v50  ;;  %11445 = vmatprep.mubr.msk.f32.mxu0 %vm12138_vm1, %v12137_v4 }
 0x597   :  { %v887_v57 = vmul.f32 %v11934_v55, %v11930_v47  ;;  %11453 = vmatprep.subr.mxu0 %v12137_v4 }
 0x599   :  { %11441 = vmatmul.mubr.msk.f32.vlgmr.msra.gmra.mxu1 %vm388_vm3, %v887_v57  ;;  %11446 = vmatmul.mubr.msk.f32.vlgmr.msra.gmra.mxu0 %vm388_vm3, %v1043_v56 }
 0x59a   :  { %11449 = vmatpush3.xpose.msk.msra.mxu1 %vm388_vm3, %v1123_v58  ;;  %11450 = vmatprep.mubr.msk.f32.mxu1 %vm12138_vm1, %v12137_v4 }
 0x59b   :  { %11458 = vmatprep.subr.mxu1 %v12137_v4  ;;  %11455 = vmatprep.mubr.msk.f32.mxu0 %vm12138_vm1, %v12137_v4 }
 0x59d   :  { %11451 = vmatmul.mubr.msk.f32.vlgmr.msra.gmra.mxu1 %vm388_vm3, %v1121_v59 }
 0x59e   :  { %11460 = vmatprep.mubr.msk.f32.mxu1 %vm12138_vm1, %v12137_v4 }
 0x655   :  { %v12542_v60 = vpop.f32.mrf.mxu0 }
 0x657   :  { %v11437_v61 = vpop.f32.mrf.mxu0 }
 0x659   :  { %v12544_v62 = vpop.f32.mrf.mxu1  ;;  %v1116_v63 = vpop.f32.mrf.mxu0 }
 0x65a   :  { %v1117_v0 = vadd.f32 %v1116_v63, %v12470_v49 }
 0x65b   :  { %v11442_v1 = vpop.f32.mrf.mxu1  ;;  %v11447_v2 = vpop.f32.mrf.mxu0 }
 0x65c   :  { %v1198_v3 = vsel %vm388_vm3, %v1117_v0, -inf }
 0x65d   :  { %v1194_v5 = vpop.f32.mrf.mxu1  ;;  %1199 = vmax.xlane.f32.xlu0 %v1198_v3 }
 0x65e   :  { %v1195_v6 = vadd.f32 %v1194_v5, %v12470_v49 }
 0x65f   :  { %v11452_v7 = vpop.f32.mrf.mxu1 }
 0x660   :  { %v1201_v8 = vsel %vm388_vm3, %v1195_v6, -inf }
 0x661   :  { %1202 = vmax.xlane.f32.xlu1 %v1201_v8 }
 0x672   :  { %1296 = vrot.lane.b32.xlu1 %v12439_v39, %s12144_s3 }
 0x673   :  { %1220 = vrot.lane.b32.xlu0 %v12461_v46, %s12144_s3 }
 0x676   :  { %1374 = vrot.lane.b32.xlu1 %v12429_v32, %s12145_s15 }
 0x67a   :  { %1372 = vrot.lane.b32.xlu1 %v12450_v43, %s12146_s16 }
 0x6e6   :  { %v1200_v9 = vpop.xlane.xlu0 %1199 }
 0x6e7   :  { %v1204_v10 = vsub.f32 %v1117_v0, %v1200_v9 }
 0x6e9   :  { %v1206_v11 = vmul.f32 1.442695, %v1204_v10 }
 0x6ea   :  { %v1203_v12 = vpop.xlane.xlu1 %1202  ;;  %v1221_v13 = vpop.permute.xlu0 %1220 }
 0x6eb   :  { %11935 = vpow2.f32 %v1206_v11  ;;  %v1205_v14 = vsub.f32 %v1195_v6, %v1203_v12  ;;  %11454 = vmatpush3.msra.mxu0 %v1221_v13 }
 0x6ec   :  { %11463 = vmatprep.subr.mxu0 %v12137_v4 }
 0x6ed   :  { %v1208_v16 = vmul.f32 1.442695, %v1205_v14 }
 0x6ee   :  { %v1297_v18 = vpop.permute.xlu1 %1296 }
 0x6ef   :  { %11937 = vpow2.f32 %v1208_v16  ;;  %11459 = vmatpush3.msra.mxu1 %v1297_v18 }
 0x6f0   :  { %11468 = vmatprep.subr.mxu1 %v12137_v4 }
 0x6f2   :  { %v1375_v26 = vpop.permute.xlu1 %1374 }
 0x6f6   :  { %v1373_v35 = vpop.permute.xlu1 %1372 }
 0x6f8   :  { %v11936_v19 = vpop.eup %11935 }
 0x6f9   :  { %v1210_v20 = vsel %vm388_vm3, %v11936_v19, 0.0 }
 0x6fa   :  { %1211 = vadd.xlane.f32.xlu0 %v1210_v20 }
 0x6fc   :  { %v11938_v21 = vpop.eup %11937 }
 0x6fd   :  { %v1213_v22 = vsel %vm388_vm3, %v11938_v21, 0.0 }
 0x6fe   :  { %1214 = vadd.xlane.f32.xlu0 %v1213_v22 }
 0x714   :  { %1452 = vrot.lane.b32.xlu0 %v12437_v37, %s12145_s15 }
 0x718   :  { %1450 = vrot.lane.b32.xlu0 %v12458_v45, %s12146_s16 }
 0x783   :  { %v1212_v23 = vpop.xlane.xlu0 %1211 }
 0x784   :  { %11939 = vrcp.f32 %v1212_v23 }
 0x787   :  { %v1215_v24 = vpop.xlane.xlu0 %1214 }
 0x788   :  { %11941 = vrcp.f32 %v1215_v24 }
 0x78b   :  { %v1453_v31 = vpop.permute.xlu0 %1452 }
 0x78f   :  { %v1451_v36 = vpop.permute.xlu0 %1450 }
 0x791   :  { %v11940_v25 = vpop.eup %11939 }
 0x792   :  { %v1218_v29 = vmul.f32 %v11940_v25, %v11936_v19 }
 0x794   :  { %11456 = vmatmul.mubr.msk.f32.vlgmr.msra.gmra.mxu0 %vm388_vm3, %v1218_v29 }
 0x795   :  { %v11942_v30 = vpop.eup %11941  ;;  %11464 = vmatpush3.xpose.msk.msra.mxu0 %vm388_vm3, %v1375_v26  ;;  %11465 = vmatprep.mubr.msk.f32.mxu0 %vm12138_vm1, %v12137_v4 }
 0x796   :  { %v1219_v34 = vmul.f32 %v11942_v30, %v11938_v21  ;;  %11473 = vmatprep.subr.mxu0 %v12137_v4 }
 0x798   :  { %11461 = vmatmul.mubr.msk.f32.vlgmr.msra.gmra.mxu1 %vm388_vm3, %v1219_v34  ;;  %11466 = vmatmul.mubr.msk.f32.vlgmr.msra.gmra.mxu0 %vm388_vm3, %v1373_v35 }
 0x799   :  { %11469 = vmatpush3.xpose.msk.msra.mxu1 %vm388_vm3, %v1453_v31  ;;  %11470 = vmatprep.mubr.msk.f32.mxu1 %vm12138_vm1, %v12137_v4 }
 0x79a   :  { %11478 = vmatprep.subr.mxu1 %v12137_v4  ;;  %11475 = vmatprep.mubr.msk.f32.mxu0 %vm12138_vm1, %v12137_v4 }
 0x79c   :  { %11471 = vmatmul.mubr.msk.f32.vlgmr.msra.gmra.mxu1 %vm388_vm3, %v1451_v36 }
 0x79d   :  { %11480 = vmatprep.mubr.msk.f32.mxu1 %vm12138_vm1, %v12137_v4 }
 0x854   :  { %v12582_v38 = vpop.f32.mrf.mxu0 }
 0x856   :  { %v11457_v41 = vpop.f32.mrf.mxu0 }
 0x858   :  { %v12584_v42 = vpop.f32.mrf.mxu1  ;;  %v1446_v44 = vpop.f32.mrf.mxu0 }
 0x859   :  { %v1447_v47 = vadd.f32 %v1446_v44, %v12470_v49 }
 0x85a   :  { %v11462_v48 = vpop.f32.mrf.mxu1  ;;  %v11467_v50 = vpop.f32.mrf.mxu0 }
 0x85b   :  { %v1528_v51 = vsel %vm388_vm3, %v1447_v47, -inf }
 0x85c   :  { %v1524_v52 = vpop.f32.mrf.mxu1  ;;  %1529 = vmax.xlane.f32.xlu1 %v1528_v51 }
 0x85d   :  { %v1525_v53 = vadd.f32 %v1524_v52, %v12470_v49 }
 0x85e   :  { %v11472_v54 = vpop.f32.mrf.mxu1 }
 0x85f   :  { %v1531_v55 = vsel %vm388_vm3, %v1525_v53, -inf }
 0x860   :  { %1532 = vmax.xlane.f32.xlu0 %v1531_v55 }
 0x86d   :  { %1626 = vrot.lane.b32.xlu1 %v12439_v39, %s12146_s16 }
 0x871   :  { %1704 = vrot.lane.b32.xlu1 %v12429_v32, %s12147_s18 }
 0x876   :  { %1550 = vrot.lane.b32.xlu0 %v12461_v46, %s12146_s16 }
 0x8e5   :  { %v1530_v56 = vpop.xlane.xlu1 %1529 }
 0x8e6   :  { %v1534_v57 = vsub.f32 %v1447_v47, %v1530_v56 }
 0x8e8   :  { %v1536_v58 = vmul.f32 1.442695, %v1534_v57 }
 0x8e9   :  { %v1533_v59 = vpop.xlane.xlu0 %1532  ;;  %v1627_v61 = vpop.permute.xlu1 %1626 }
 0x8ea   :  { %11943 = vpow2.f32 %v1536_v58  ;;  %v1535_v63 = vsub.f32 %v1525_v53, %v1533_v59  ;;  %11479 = vmatpush3.msra.mxu1 %v1627_v61 }
 0x8eb   :  { %11488 = vmatprep.subr.mxu1 %v12137_v4 }
 0x8ec   :  { %v1538_v0 = vmul.f32 1.442695, %v1535_v63 }
 0x8ed   :  { %v1551_v1 = vpop.permute.xlu0 %1550  ;;  %v1705_v7 = vpop.permute.xlu1 %1704 }
 0x8ee   :  { %11945 = vpow2.f32 %v1538_v0  ;;  %11474 = vmatpush3.msra.mxu0 %v1551_v1 }
 0x8ef   :  { %11483 = vmatprep.subr.mxu0 %v12137_v4 }
 0x8f7   :  { %v11944_v2 = vpop.eup %11943 }
 0x8f8   :  { %v1540_v3 = vsel %vm388_vm3, %v11944_v2, 0.0 }
 0x8f9   :  { %1541 = vadd.xlane.f32.xlu0 %v1540_v3 }
 0x8fb   :  { %v11946_v5 = vpop.eup %11945 }
 0x8fc   :  { %v1543_v6 = vsel %vm388_vm3, %v11946_v5, 0.0 }
 0x8fd   :  { %1544 = vadd.xlane.f32.xlu1 %v1543_v6 }
 0x90e   :  { %1702 = vrot.lane.b32.xlu1 %v12450_v43, %s12148_s22 }
 0x90f   :  { %1782 = vrot.lane.b32.xlu0 %v12437_v37, %s12147_s18 }
 0x913   :  { %1780 = vrot.lane.b32.xlu0 %v12458_v45, %s12148_s22 }
 0x982   :  { %v1542_v8 = vpop.xlane.xlu0 %1541 }
 0x983   :  { %11947 = vrcp.f32 %v1542_v8 }
 0x986   :  { %v1545_v9 = vpop.xlane.xlu1 %1544  ;;  %v1783_v13 = vpop.permute.xlu0 %1782 }
 0x987   :  { %11949 = vrcp.f32 %v1545_v9 }
 0x98a   :  { %v1703_v16 = vpop.permute.xlu1 %1702  ;;  %v1781_v18 = vpop.permute.xlu0 %1780 }
 0x990   :  { %v11948_v10 = vpop.eup %11947 }
 0x991   :  { %v1548_v11 = vmul.f32 %v11948_v10, %v11944_v2 }
 0x993   :  { %11476 = vmatmul.mubr.msk.f32.vlgmr.msra.gmra.mxu0 %vm388_vm3, %v1548_v11 }
 0x994   :  { %v11950_v12 = vpop.eup %11949  ;;  %11484 = vmatpush3.xpose.msk.msra.mxu0 %vm388_vm3, %v1705_v7  ;;  %11485 = vmatprep.mubr.msk.f32.mxu0 %vm12138_vm1, %v12137_v4 }
 0x995   :  { %v1549_v14 = vmul.f32 %v11950_v12, %v11946_v5  ;;  %11493 = vmatprep.subr.mxu0 %v12137_v4 }
 0x997   :  { %11481 = vmatmul.mubr.msk.f32.vlgmr.msra.gmra.mxu1 %vm388_vm3, %v1549_v14  ;;  %11486 = vmatmul.mubr.msk.f32.vlgmr.msra.gmra.mxu0 %vm388_vm3, %v1703_v16 }
 0x998   :  { %11489 = vmatpush3.xpose.msk.msra.mxu1 %vm388_vm3, %v1783_v13  ;;  %11490 = vmatprep.mubr.msk.f32.mxu1 %vm12138_vm1, %v12137_v4 }
 0x999   :  { %11498 = vmatprep.subr.mxu1 %v12137_v4  ;;  %11495 = vmatprep.mubr.msk.f32.mxu0 %vm12138_vm1, %v12137_v4 }
 0x99b   :  { %11491 = vmatmul.mubr.msk.f32.vlgmr.msra.gmra.mxu1 %vm388_vm3, %v1781_v18 }
 0x99c   :  { %11500 = vmatprep.mubr.msk.f32.mxu1 %vm12138_vm1, %v12137_v4 }
 0xa53   :  { %v12622_v19 = vpop.f32.mrf.mxu0 }
 0xa55   :  { %v11477_v20 = vpop.f32.mrf.mxu0 }
 0xa57   :  { %v12624_v21 = vpop.f32.mrf.mxu1  ;;  %v1776_v22 = vpop.f32.mrf.mxu0 }
 0xa58   :  { %v1777_v23 = vadd.f32 %v1776_v22, %v12470_v49 }
 0xa59   :  { %v11482_v24 = vpop.f32.mrf.mxu1  ;;  %v11487_v25 = vpop.f32.mrf.mxu0 }
 0xa5a   :  { %v1858_v26 = vsel %vm388_vm3, %v1777_v23, -inf }
 0xa5b   :  { %v1854_v29 = vpop.f32.mrf.mxu1  ;;  %1859 = vmax.xlane.f32.xlu1 %v1858_v26 }
 0xa5c   :  { %v1855_v30 = vadd.f32 %v1854_v29, %v12470_v49 }
 0xa5d   :  { %v11492_v31 = vpop.f32.mrf.mxu1 }
 0xa5e   :  { %v1861_v34 = vsel %vm388_vm3, %v1855_v30, -inf }
 0xa5f   :  { %1862 = vmax.xlane.f32.xlu0 %v1861_v34 }
 0xa6c   :  { %1956 = vrot.lane.b32.xlu1 %v12439_v39, %s12148_s22 }
 0xa70   :  { %2034 = vrot.lane.b32.xlu1 %v12429_v32, %s12149_s23 }
 0xa75   :  { %1880 = vrot.lane.b32.xlu0 %v12461_v46, %s12148_s22 }
 0xae4   :  { %v1860_v35 = vpop.xlane.xlu1 %1859 }
 0xae5   :  { %v1864_v36 = vsub.f32 %v1777_v23, %v1860_v35 }
 0xae7   :  { %v1866_v41 = vmul.f32 1.442695, %v1864_v36 }
 0xae8   :  { %v1863_v44 = vpop.xlane.xlu0 %1862  ;;  %v1957_v47 = vpop.permute.xlu1 %1956 }
 0xae9   :  { %11951 = vpow2.f32 %v1866_v41  ;;  %v1865_v48 = vsub.f32 %v1855_v30, %v1863_v44  ;;  %11499 = vmatpush3.msra.mxu1 %v1957_v47 }
 0xaea   :  { %11508 = vmatprep.subr.mxu1 %v12137_v4 }
 0xaeb   :  { %v1868_v50 = vmul.f32 1.442695, %v1865_v48 }
 0xaec   :  { %v1881_v51 = vpop.permute.xlu0 %1880  ;;  %v2035_v56 = vpop.permute.xlu1 %2034 }
 0xaed   :  { %11953 = vpow2.f32 %v1868_v50  ;;  %11494 = vmatpush3.msra.mxu0 %v1881_v51 }
 0xaee   :  { %11503 = vmatprep.subr.mxu0 %v12137_v4 }
 0xaf6   :  { %v11952_v52 = vpop.eup %11951 }
 0xaf7   :  { %v1870_v53 = vsel %vm388_vm3, %v11952_v52, 0.0 }
 0xaf8   :  { %1871 = vadd.xlane.f32.xlu0 %v1870_v53 }
 0xafa   :  { %v11954_v54 = vpop.eup %11953 }
 0xafb   :  { %v1873_v55 = vsel %vm388_vm3, %v11954_v54, 0.0 }
 0xafc   :  { %1874 = vadd.xlane.f32.xlu1 %v1873_v55 }
 0xb0d   :  { %2032 = vrot.lane.b32.xlu1 %v12450_v43, %s12150_s26 }
 0xb0e   :  { %2112 = vrot.lane.b32.xlu0 %v12437_v37, %s12149_s23 }
 0xb12   :  { %2110 = vrot.lane.b32.xlu0 %v12458_v45, %s12150_s26 }
 0xb81   :  { %v1872_v57 = vpop.xlane.xlu0 %1871 }
 0xb82   :  { %11955 = vrcp.f32 %v1872_v57 }
 0xb85   :  { %v1875_v58 = vpop.xlane.xlu1 %1874  ;;  %v2113_v0 = vpop.permute.xlu0 %2112 }
 0xb86   :  { %11957 = vrcp.f32 %v1875_v58 }
 0xb89   :  { %v2033_v2 = vpop.permute.xlu1 %2032  ;;  %v2111_v3 = vpop.permute.xlu0 %2110 }
 0xb8f   :  { %v11956_v59 = vpop.eup %11955 }
 0xb90   :  { %v1878_v61 = vmul.f32 %v11956_v59, %v11952_v52 }
 0xb92   :  { %11496 = vmatmul.mubr.msk.f32.vlgmr.msra.gmra.mxu0 %vm388_vm3, %v1878_v61 }
 0xb93   :  { %v11958_v63 = vpop.eup %11957  ;;  %11504 = vmatpush3.xpose.msk.msra.mxu0 %vm388_vm3, %v2035_v56  ;;  %11505 = vmatprep.mubr.msk.f32.mxu0 %vm12138_vm1, %v12137_v4 }
 0xb94   :  { %v1879_v1 = vmul.f32 %v11958_v63, %v11954_v54  ;;  %11513 = vmatprep.subr.mxu0 %v12137_v4 }
 0xb96   :  { %11501 = vmatmul.mubr.msk.f32.vlgmr.msra.gmra.mxu1 %vm388_vm3, %v1879_v1  ;;  %11506 = vmatmul.mubr.msk.f32.vlgmr.msra.gmra.mxu0 %vm388_vm3, %v2033_v2 }
 0xb97   :  { %11509 = vmatpush3.xpose.msk.msra.mxu1 %vm388_vm3, %v2113_v0  ;;  %11510 = vmatprep.mubr.msk.f32.mxu1 %vm12138_vm1, %v12137_v4 }
 0xb98   :  { %11518 = vmatprep.subr.mxu1 %v12137_v4  ;;  %11515 = vmatprep.mubr.msk.f32.mxu0 %vm12138_vm1, %v12137_v4 }
 0xb9a   :  { %11511 = vmatmul.mubr.msk.f32.vlgmr.msra.gmra.mxu1 %vm388_vm3, %v2111_v3 }
 0xb9b   :  { %11520 = vmatprep.mubr.msk.f32.mxu1 %vm12138_vm1, %v12137_v4 }
 0xc52   :  { %v12662_v5 = vpop.f32.mrf.mxu0 }
 0xc54   :  { %v11497_v6 = vpop.f32.mrf.mxu0 }
 0xc56   :  { %v12664_v7 = vpop.f32.mrf.mxu1  ;;  %v2106_v8 = vpop.f32.mrf.mxu0 }
 0xc57   :  { %v2107_v9 = vadd.f32 %v2106_v8, %v12470_v49 }
 0xc58   :  { %v11502_v10 = vpop.f32.mrf.mxu1  ;;  %v11507_v11 = vpop.f32.mrf.mxu0 }
 0xc59   :  { %v2188_v12 = vsel %vm388_vm3, %v2107_v9, -inf }
 0xc5a   :  { %v2184_v13 = vpop.f32.mrf.mxu1  ;;  %2189 = vmax.xlane.f32.xlu1 %v2188_v12 }
 0xc5b   :  { %v2185_v14 = vadd.f32 %v2184_v13, %v12470_v49 }
 0xc5c   :  { %v11512_v16 = vpop.f32.mrf.mxu1 }
 0xc5d   :  { %v2191_v18 = vsel %vm388_vm3, %v2185_v14, -inf }
 0xc5e   :  { %2192 = vmax.xlane.f32.xlu0 %v2191_v18 }
 0xc6b   :  { %2286 = vrot.lane.b32.xlu1 %v12439_v39, %s12150_s26 }
 0xc6f   :  { %2364 = vrot.lane.b32.xlu1 %v12429_v32, %s12151_s28 }
 0xc74   :  { %2210 = vrot.lane.b32.xlu0 %v12461_v46, %s12150_s26 }
 0xce3   :  { %v2190_v20 = vpop.xlane.xlu1 %2189 }
 0xce4   :  { %v2194_v22 = vsub.f32 %v2107_v9, %v2190_v20 }
 0xce6   :  { %v2196_v23 = vmul.f32 1.442695, %v2194_v22 }
 0xce7   :  { %v2193_v24 = vpop.xlane.xlu0 %2192  ;;  %v2287_v25 = vpop.permute.xlu1 %2286 }
 0xce8   :  { %11959 = vpow2.f32 %v2196_v23  ;;  %v2195_v26 = vsub.f32 %v2185_v14, %v2193_v24  ;;  %11519 = vmatpush3.msra.mxu1 %v2287_v25 }
 0xce9   :  { %11528 = vmatprep.subr.mxu1 %v12137_v4 }
 0xcea   :  { %v2198_v29 = vmul.f32 1.442695, %v2195_v26 }
 0xceb   :  { %v2211_v30 = vpop.permute.xlu0 %2210  ;;  %v2365_v41 = vpop.permute.xlu1 %2364 }
 0xcec   :  { %11961 = vpow2.f32 %v2198_v29  ;;  %11514 = vmatpush3.msra.mxu0 %v2211_v30 }
 0xced   :  { %11523 = vmatprep.subr.mxu0 %v12137_v4 }
 0xcf5   :  { %v11960_v31 = vpop.eup %11959 }
 0xcf6   :  { %v2200_v34 = vsel %vm388_vm3, %v11960_v31, 0.0 }
 0xcf7   :  { %2201 = vadd.xlane.f32.xlu0 %v2200_v34 }
 0xcf9   :  { %v11962_v35 = vpop.eup %11961 }
 0xcfa   :  { %v2203_v36 = vsel %vm388_vm3, %v11962_v35, 0.0 }
 0xcfb   :  { %2204 = vadd.xlane.f32.xlu1 %v2203_v36 }
 0xd0c   :  { %2362 = vrot.lane.b32.xlu1 %v12450_v43, %s12152_s1 }
 0xd0d   :  { %2442 = vrot.lane.b32.xlu0 %v12437_v37, %s12151_s28 }
 0xd11   :  { %2440 = vrot.lane.b32.xlu0 %v12458_v45, %s12152_s1 }
 0xd80   :  { %v2202_v44 = vpop.xlane.xlu0 %2201 }
 0xd81   :  { %11963 = vrcp.f32 %v2202_v44 }
 0xd84   :  { %v2205_v47 = vpop.xlane.xlu1 %2204  ;;  %v2443_v52 = vpop.permute.xlu0 %2442 }
 0xd85   :  { %11965 = vrcp.f32 %v2205_v47 }
 0xd88   :  { %v2363_v54 = vpop.permute.xlu1 %2362  ;;  %v2441_v55 = vpop.permute.xlu0 %2440 }
 0xd8e   :  { %v11964_v48 = vpop.eup %11963 }
 0xd8f   :  { %v2208_v50 = vmul.f32 %v11964_v48, %v11960_v31 }
 0xd91   :  { %11516 = vmatmul.mubr.msk.f32.vlgmr.msra.gmra.mxu0 %vm388_vm3, %v2208_v50 }
 0xd92   :  { %v11966_v51 = vpop.eup %11965  ;;  %11524 = vmatpush3.xpose.msk.msra.mxu0 %vm388_vm3, %v2365_v41  ;;  %11525 = vmatprep.mubr.msk.f32.mxu0 %vm12138_vm1, %v12137_v4 }
 0xd93   :  { %v2209_v53 = vmul.f32 %v11966_v51, %v11962_v35  ;;  %11533 = vmatprep.subr.mxu0 %v12137_v4 }
 0xd95   :  { %11521 = vmatmul.mubr.msk.f32.vlgmr.msra.gmra.mxu1 %vm388_vm3, %v2209_v53  ;;  %11526 = vmatmul.mubr.msk.f32.vlgmr.msra.gmra.mxu0 %vm388_vm3, %v2363_v54 }
 0xd96   :  { %11529 = vmatpush3.xpose.msk.msra.mxu1 %vm388_vm3, %v2443_v52  ;;  %11530 = vmatprep.mubr.msk.f32.mxu1 %vm12138_vm1, %v12137_v4 }
 0xd97   :  { %11538 = vmatprep.subr.mxu1 %v12137_v4  ;;  %11535 = vmatprep.mubr.msk.f32.mxu0 %vm12138_vm1, %v12137_v4 }
 0xd99   :  { %11531 = vmatmul.mubr.msk.f32.vlgmr.msra.gmra.mxu1 %vm388_vm3, %v2441_v55 }
 0xd9a   :  { %11540 = vmatprep.mubr.msk.f32.mxu1 %vm12138_vm1, %v12137_v4 }
 0xe51   :  { %v12702_v56 = vpop.f32.mrf.mxu0 }
 0xe53   :  { %v11517_v57 = vpop.f32.mrf.mxu0 }
 0xe55   :  { %v12704_v58 = vpop.f32.mrf.mxu1  ;;  %v2436_v59 = vpop.f32.mrf.mxu0 }
 0xe56   :  { %v2437_v61 = vadd.f32 %v2436_v59, %v12470_v49 }
 0xe57   :  { %v11522_v63 = vpop.f32.mrf.mxu1  ;;  %v11527_v0 = vpop.f32.mrf.mxu0 }
 0xe58   :  { %v2518_v1 = vsel %vm388_vm3, %v2437_v61, -inf }
 0xe59   :  { %v2514_v2 = vpop.f32.mrf.mxu1  ;;  %2519 = vmax.xlane.f32.xlu1 %v2518_v1 }
 0xe5a   :  { %v2515_v3 = vadd.f32 %v2514_v2, %v12470_v49 }
 0xe5b   :  { %v11532_v6 = vpop.f32.mrf.mxu1 }
 0xe5c   :  { %v2521_v8 = vsel %vm388_vm3, %v2515_v3, -inf }
 0xe5d   :  { %2522 = vmax.xlane.f32.xlu0 %v2521_v8 }
 0xe6a   :  { %2616 = vrot.lane.b32.xlu1 %v12439_v39, %s12152_s1 }
 0xe6e   :  { %2694 = vrot.lane.b32.xlu1 %v12429_v32, %s12153_s2 }
 0xe73   :  { %2540 = vrot.lane.b32.xlu0 %v12461_v46, %s12152_s1 }
 0xee2   :  { %v2520_v9 = vpop.xlane.xlu1 %2519 }
 0xee3   :  { %v2524_v10 = vsub.f32 %v2437_v61, %v2520_v9  ;;  %v3243_v9 = vld [vmem:[%s12216_s19 + $0x18] sm:$0xff] }
 0xee5   :  { %v2526_v11 = vmul.f32 1.442695, %v2524_v10  ;;  %v3242_v10 = vld [vmem:[%s12216_s19 + $0x10] sm:$0xff] }
 0xee6   :  { %v2523_v12 = vpop.xlane.xlu0 %2522  ;;  %v2617_v13 = vpop.permute.xlu1 %2616 }
 0xee7   :  { %11967 = vpow2.f32 %v2526_v11  ;;  %v2525_v14 = vsub.f32 %v2515_v3, %v2523_v12  ;;  %11539 = vmatpush3.msra.mxu1 %v2617_v13  ;;  %v3241_v11 = vld [vmem:[%s12216_s19 + $0x8] sm:$0xff]  ;;  %v10414_v12 = vld [vmem:[%s12181_s17] ss:$0 sm:$0xff]  ;;  %s14473_s17 = sld [smem:[#allocation7_spill]] }
 0xee8   :  { %11548 = vmatprep.subr.mxu1 %v12137_v4  ;;  %v3240_v13 = vld [vmem:[%s12216_s19] sm:$0xff] }
 0xee9   :  { %v2528_v16 = vmul.f32 1.442695, %v2525_v14  ;;  %v12795_v14 = vadd.f32 %v10414_v12, %v12445_v40  ;;  %v3101_v40 = vld [vmem:[%s12206_s8 + $0x20] sm:$0xff] }
 0xeea   :  { %v2541_v18 = vpop.permute.xlu0 %2540  ;;  %v2695_v24 = vpop.permute.xlu1 %2694 }
 0xeeb   :  { %11969 = vpow2.f32 %v2528_v16  ;;  %11534 = vmatpush3.msra.mxu0 %v2541_v18  ;;  %v3104_v16 = vld [vmem:[%s12206_s8 + $0x38] sm:$0xff]  ;;  %v3103_v18 = vld [vmem:[%s12206_s8 + $0x30] sm:$0xff] }
 0xeec   :  { %11543 = vmatprep.subr.mxu0 %v12137_v4 }
 0xef4   :  { %v11968_v32 = vpop.eup %11967 }
 0xef5   :  { %v2530_v20 = vsel %vm388_vm3, %v11968_v32, 0.0 }
 0xef6   :  { %2531 = vadd.xlane.f32.xlu0 %v2530_v20  ;;  %v3100_v20 = vld [vmem:[%s12206_s8 + $0x18] sm:$0xff] }
 0xef8   :  { %v11970_v22 = vpop.eup %11969 }
 0xef9   :  { %v2533_v23 = vsel %vm388_vm3, %v11970_v22, 0.0 }
 0xefa   :  { %2534 = vadd.xlane.f32.xlu1 %v2533_v23  ;;  %v3098_v23 = vld [vmem:[%s12206_s8 + $0x8] sm:$0xff] }
 0xf0b   :  { %2692 = vrot.lane.b32.xlu1 %v12450_v43, %s12154_s7 }
 0xf0c   :  { %2772 = vrot.lane.b32.xlu0 %v12437_v37, %s12153_s2 }
 0xf10   :  { %2770 = vrot.lane.b32.xlu0 %v12458_v45, %s12154_s7 }
 0xf7f   :  { %v2532_v25 = vpop.xlane.xlu0 %2531 }
 0xf80   :  { %11971 = vrcp.f32 %v2532_v25 }
 0xf83   :  { %v2535_v26 = vpop.xlane.xlu1 %2534  ;;  %v2773_v34 = vpop.permute.xlu0 %2772 }
 0xf84   :  { %11973 = vrcp.f32 %v2535_v26 }
 0xf87   :  { %v2693_v43 = vpop.permute.xlu1 %2692  ;;  %v2771_v45 = vpop.permute.xlu0 %2770 }
 0xf8d   :  { %v11972_v29 = vpop.eup %11971 }
 0xf8e   :  { %v2538_v30 = vmul.f32 %v11972_v29, %v11968_v32  ;;  %v3102_v32 = vld [vmem:[%s12206_s8 + $0x28] sm:$0xff] }
 0xf90   :  { %11536 = vmatmul.mubr.msk.f32.vlgmr.msra.gmra.mxu0 %vm388_vm3, %v2538_v30 }
 0xf91   :  { %v11974_v31 = vpop.eup %11973  ;;  %11544 = vmatpush3.xpose.msk.msra.mxu0 %vm388_vm3, %v2695_v24  ;;  %11545 = vmatprep.mubr.msk.f32.mxu0 %vm12138_vm1, %v12137_v4  ;;  %v3097_v24 = vld [vmem:[%s12206_s8] sm:$0xff] }
 0xf92   :  { %v2539_v37 = vmul.f32 %v11974_v31, %v11970_v22  ;;  %11553 = vmatprep.subr.mxu0 %v12137_v4  ;;  %v3099_v22 = vld [vmem:[%s12206_s8 + $0x10] sm:$0xff]  ;;  %s14474_s8 = sld [smem:[#allocation8_spill]] }
 0xf94   :  { %11541 = vmatmul.mubr.msk.f32.vlgmr.msra.gmra.mxu1 %vm388_vm3, %v2539_v37  ;;  %11546 = vmatmul.mubr.msk.f32.vlgmr.msra.gmra.mxu0 %vm388_vm3, %v2693_v43 }
 0xf95   :  { %11549 = vmatpush3.xpose.msk.msra.mxu1 %vm388_vm3, %v2773_v34  ;;  %11550 = vmatprep.mubr.msk.f32.mxu1 %vm12138_vm1, %v12137_v4 }
 0xf96   :  { %11558 = vmatprep.subr.mxu1 %v12137_v4  ;;  %11555 = vmatprep.mubr.msk.f32.mxu0 %vm12138_vm1, %v12137_v4 }
 0xf98   :  { %11551 = vmatmul.mubr.msk.f32.vlgmr.msra.gmra.mxu1 %vm388_vm3, %v2771_v45 }
 0xf99   :  { %11560 = vmatprep.mubr.msk.f32.mxu1 %vm12138_vm1, %v12137_v4 }
0x1050   :  { %v2612_v35 = vpop.f32.mrf.mxu0 }
0x1052   :  { %v11537_v36 = vpop.f32.mrf.mxu0 }
0x1054   :  { %v2688_v41 = vpop.f32.mrf.mxu1  ;;  %v2766_v44 = vpop.f32.mrf.mxu0 }
0x1055   :  { %v2767_v47 = vadd.f32 %v2766_v44, %v12470_v49 }
0x1056   :  { %v11542_v48 = vpop.f32.mrf.mxu1  ;;  %v11547_v50 = vpop.f32.mrf.mxu0 }
0x1057   :  { %v2848_v51 = vsel %vm388_vm3, %v2767_v47, -inf }
0x1058   :  { %v2844_v52 = vpop.f32.mrf.mxu1  ;;  %2849 = vmax.xlane.f32.xlu1 %v2848_v51 }
0x1059   :  { %v2845_v53 = vadd.f32 %v2844_v52, %v12470_v49 }
0x105a   :  { %v11552_v54 = vpop.f32.mrf.mxu1 }
0x105b   :  { %v2851_v55 = vsel %vm388_vm3, %v2845_v53, -inf }
0x105c   :  { %2852 = vmax.xlane.f32.xlu0 %v2851_v55 }
0x10e1   :  { %v2850_v57 = vpop.xlane.xlu1 %2849 }
0x10e2   :  { %v2854_v59 = vsub.f32 %v2767_v47, %v2850_v57 }
0x10e4   :  { %v2856_v61 = vmul.f32 1.442695, %v2854_v59 }
0x10e5   :  { %v2853_v63 = vpop.xlane.xlu0 %2852 }
0x10e6   :  { %11975 = vpow2.f32 %v2856_v61  ;;  %v2855_v0 = vsub.f32 %v2845_v53, %v2853_v63 }
0x10e8   :  { %v2858_v1 = vmul.f32 1.442695, %v2855_v0 }
0x10ea   :  { %11977 = vpow2.f32 %v2858_v1 }
0x10f3   :  { %v11976_v2 = vpop.eup %11975 }
0x10f4   :  { %v2860_v3 = vsel %vm388_vm3, %v11976_v2, 0.0 }
0x10f5   :  { %2861 = vadd.xlane.f32.xlu0 %v2860_v3 }
0x10f7   :  { %v11978_v6 = vpop.eup %11977 }
0x10f8   :  { %v2863_v8 = vsel %vm388_vm3, %v11978_v6, 0.0 }
0x10f9   :  { %2864 = vadd.xlane.f32.xlu1 %v2863_v8 }
0x110a   :  { %2946 = vrot.lane.b32.xlu1 %v12439_v39, %s12154_s7 }
0x110b   :  { %2870 = vrot.lane.b32.xlu0 %v12461_v46, %s12154_s7 }
0x110e   :  { %3024 = vrot.lane.b32.xlu1 %v12542_v60, %s12153_s2 }
0x110f   :  { %3026 = vrot.lane.b32.xlu0 %v12544_v62, %s12153_s2 }
0x1112   :  { %3032 = vrot.lane.b32.xlu1 %v12582_v38, %s12151_s28 }
0x1113   :  { %3034 = vrot.lane.b32.xlu0 %v12584_v42, %s12151_s28 }
0x1116   :  { %3040 = vrot.lane.b32.xlu1 %v12622_v19, %s12149_s23 }
0x1117   :  { %3042 = vrot.lane.b32.xlu0 %v12624_v21, %s12149_s23 }
0x111a   :  { %3048 = vrot.lane.b32.xlu1 %v12662_v5, %s12147_s18  ;;  %v3247_v5 = vld [vmem:[%s12216_s19 + $0x38] sm:$0xff] }
0x111b   :  { %3050 = vrot.lane.b32.xlu0 %v12664_v7, %s12147_s18  ;;  %v3246_v7 = vld [vmem:[%s12216_s19 + $0x30] sm:$0xff] }
0x111e   :  { %3056 = vrot.lane.b32.xlu1 %v12702_v56, %s12145_s15  ;;  %v3245_v56 = vld [vmem:[%s12216_s19 + $0x28] sm:$0xff] }
0x111f   :  { %3058 = vrot.lane.b32.xlu0 %v12704_v58, %s12145_s15  ;;  %v3244_v58 = vld [vmem:[%s12216_s19 + $0x20] sm:$0xff]  ;;  %s14476_s19 = sld [smem:[#allocation10_spill]] }
0x1122   :  { %3064 = vrot.lane.b32.xlu1 %v2612_v35, %s12143_s29 }
0x1123   :  { %3066 = vrot.lane.b32.xlu0 %v2688_v41, %s12143_s29 }
0x117e   :  { %v2862_v39 = vpop.xlane.xlu0 %2861 }
0x117f   :  { %11979 = vrcp.f32 %v2862_v39  ;;  %v3335_v39 = vld [vmem:[%s12226_s30 + $0x38] sm:$0xff] }
0x1182   :  { %v2871_v46 = vpop.permute.xlu0 %2870  ;;  %v2865_v60 = vpop.xlane.xlu1 %2864 }
0x1183   :  { %11981 = vrcp.f32 %v2865_v60  ;;  %11554 = vmatpush3.msra.mxu0 %v2871_v46  ;;  %v3334_v60 = vld [vmem:[%s12226_s30 + $0x30] sm:$0xff] }
0x1184   :  { %11563 = vmatprep.subr.mxu0 %v3104_v16 }
0x1186   :  { %v2947_v62 = vpop.permute.xlu1 %2946  ;;  %v3027_v43 = vpop.permute.xlu0 %3026 }
0x1187   :  { %11559 = vmatpush3.msra.mxu1 %v2947_v62  ;;  %v3079_v57 = vsel %vm388_vm3, %v12504_v17, %v3027_v43  ;;  %v3333_v62 = vld [vmem:[%s12226_s30 + $0x28] sm:$0xff] }
0x1188   :  { %11582 = vmatprep.subr.mxu1 %v12137_v4 }
0x118a   :  { %v3025_v37 = vpop.permute.xlu1 %3024  ;;  %v3035_v35 = vpop.permute.xlu0 %3034 }
0x118b   :  { %v3078_v51 = vsel %vm388_vm3, %v12502_v15, %v3025_v37  ;;  %v3082_v15 = vsel %vm3080_vm5, %v3079_v57, %v3035_v35  ;;  %v12155_v35 = vmov 1966171168  }
0x118c   :  { %v11980_v38 = vpop.eup %11979 }
0x118d   :  { %v2868_v42 = vmul.f32 %v11980_v38, %v11976_v2  ;;  %v3332_v38 = vld [vmem:[%s12226_s30 + $0x20] sm:$0xff] }
0x118e   :  { %v3033_v45 = vpop.permute.xlu1 %3032  ;;  %v3043_v41 = vpop.permute.xlu0 %3042 }
0x118f   :  { %11556 = vmatmul.mubr.msk.f32.vlgmr.msra.gmra.mxu0 %vm388_vm3, %v2868_v42  ;;  %v3081_v52 = vsel %vm3080_vm5, %v3078_v51, %v3033_v45  ;;  %v3085_v1 = vsel %vm3083_vm6, %v3082_v15, %v3043_v41  ;;  %v3331_v42 = vld [vmem:[%s12226_s30 + $0x18] sm:$0xff] }
0x1190   :  { %v11982_v19 = vpop.eup %11981  ;;  %11564 = vmatpush3.msra.mxu0 %v3104_v16 }
0x1191   :  { %v2869_v21 = vmul.f32 %v11982_v19, %v11978_v6  ;;  %11565 = vmatprep.subr.mxu0 %v3103_v18  ;;  %v3330_v19 = vld [vmem:[%s12226_s30 + $0x10] sm:$0xff] }
0x1192   :  { %11566 = vmatpush3.msra.mxu0 %v3103_v18  ;;  %v3041_v36 = vpop.permute.xlu1 %3040  ;;  %v3051_v47 = vpop.permute.xlu0 %3050 }
0x1193   :  { %11561 = vmatmul.mubr.msk.f32.vlgmr.msra.gmra.mxu1 %vm388_vm3, %v2869_v21  ;;  %11567 = vmatprep.subr.mxu0 %v3102_v32  ;;  %v3084_v54 = vsel %vm3083_vm6, %v3081_v52, %v3041_v36  ;;  %v3088_v3 = vsel %vm3086_vm7, %v3085_v1, %v3051_v47  ;;  %v3329_v21 = vld [vmem:[%s12226_s30 + $0x8] sm:$0xff]  ;;  %v3418_v36 = vunpack.c.l.s4 %v12155_v35  ;;  %v10473_v52 = vld [vmem:[%s12231_s6] ss:$0 sm:$0xff]  ;;  %s14479_s6 = sld [smem:[#allocation13_spill]] }
0x1194   :  { %11583 = vmatpush3.msra.mxu1 %v3247_v5  ;;  %11598 = vmatprep.mubr.msk.f32.mxu1 %vm12138_vm1, %v12137_v4  ;;  %v10471_v5 = vld [vmem:[%s12221_s24] ss:$0 sm:$0xff]  ;;  %s14477_s24 = sld [smem:[#allocation12_spill]] }
0x1195   :  { %11584 = vmatprep.subr.mxu1 %v12137_v4  ;;  %11568 = vmatpush3.msra.mxu0 %v3102_v32  ;;  %v12072_v32 = vld [vmem:[%s12166_s5] sm:$0xff] }
0x1196   :  { %11585 = vmatpush3.msra.mxu1 %v3246_v7  ;;  %11569 = vmatprep.subr.mxu0 %v3101_v40  ;;  %v3049_v44 = vpop.permute.xlu1 %3048  ;;  %v3059_v50 = vpop.permute.xlu0 %3058  ;;  %v3328_v7 = vld [vmem:[%s12226_s30] sm:$0xff]  ;;  %s14478_s30 = sld [smem:[#allocation15_spill]] }
0x1197   :  { %11586 = vmatprep.subr.mxu1 %v12137_v4  ;;  %11570 = vmatpush3.msra.mxu0 %v3101_v40  ;;  %v3087_v55 = vsel %vm3086_vm7, %v3084_v54, %v3049_v44  ;;  %v3091_v17 = vsel %vm3089_vm8, %v3088_v3, %v3059_v50 }
0x1198   :  { %11587 = vmatpush3.msra.mxu1 %v3245_v56  ;;  %11571 = vmatprep.subr.mxu0 %v3100_v20 }
0x1199   :  { %11588 = vmatprep.subr.mxu1 %v12137_v4  ;;  %11572 = vmatpush3.msra.mxu0 %v3100_v20 }
0x119a   :  { %11589 = vmatpush3.msra.mxu1 %v3244_v58  ;;  %11573 = vmatprep.subr.mxu0 %v3099_v22  ;;  %v3057_v48 = vpop.permute.xlu1 %3056  ;;  %v3067_v61 = vpop.permute.xlu0 %3066  ;;  %v10466_v58 = vld [vmem:[%s12211_s14] ss:$0 sm:$0xff]  ;;  %s14475_s14 = sld [smem:[#allocation11_spill]] }
0x119b   :  { %11590 = vmatprep.subr.mxu1 %v12137_v4  ;;  %11574 = vmatpush3.msra.mxu0 %v3099_v22  ;;  %v3090_v59 = vsel %vm3089_vm8, %v3087_v55, %v3057_v48  ;;  %v3093_v6 = vsel %vm191_vm2, %v3091_v17, %v3067_v61  ;;  %v3419_v48 = vunpack.c.0.s8 %v3418_v36  ;;  %v10469_v61 = vld [vmem:[%s12236_s12] ss:$0 sm:$0xff]  ;;  %s14480_s12 = sld [smem:[#allocation14_spill]] }
0x119c   :  { %11591 = vmatpush3.msra.mxu1 %v3243_v9  ;;  %11575 = vmatprep.subr.mxu0 %v3098_v23 }
0x119d   :  { %11592 = vmatprep.subr.mxu1 %v12137_v4  ;;  %11576 = vmatpush3.msra.mxu0 %v3098_v23  ;;  %v12859_v55 = vsub.s32 %v3419_v48, %v12422_v27 }
0x119e   :  { %11593 = vmatpush3.msra.mxu1 %v3242_v10  ;;  %11577 = vmatprep.subr.mxu0 %v3097_v24  ;;  %v3065_v53 = vpop.permute.xlu1 %3064 }
0x119f   :  { %11594 = vmatprep.subr.mxu1 %v12137_v4  ;;  %11578 = vmatpush3.msra.mxu0 %v3097_v24  ;;  %v3092_v63 = vsel %vm191_vm2, %v3090_v59, %v3065_v53 }
0x11a0   :  { %11595 = vmatpush3.msra.mxu1 %v3241_v11  ;;  %11601 = vmatprep.subr.mxu0 %v12137_v4 }
0x11a1   :  { %11596 = vmatprep.subr.mxu1 %v12137_v4 }
0x11a2   :  { %11597 = vmatpush3.msra.mxu1 %v3240_v13  ;;  %v12071_v13 = vld [vmem:[%s12166_s5 + $0x8] sm:$0xff]  ;;  %s14472_s5 = sld [smem:[#allocation9_spill]] }
0x11a3   :  { %11599 = vmatmul.mubr.msk.f32.vlgmr.msra.gmra.mxu1 %vm299_vm0, %v12795_v14 }
0x11a4   :  { %3777 = vmatprep.mubr.f32.mxu1 %v12137_v4 }
0x11a8   :  { %v3544_v35 = vld [vmem:[%s14472_s5 + $0x188] sm:$0xff]  ;;  %v3546_v36 = vld [vmem:[%s14472_s5 + $0x198] sm:$0xff] }
0x11a9   :  { %v3530_v48 = vld [vmem:[%s14472_s5 + $0x118] sm:$0xff] }
0x124f   :  { %v2942_v25 = vpop.f32.mrf.mxu0 }
0x1250   :  { %3072 = vrot.lane.b32.xlu1 %v2942_v25, %s12141_s9 }
0x1251   :  { %v11557_v26 = vpop.f32.mrf.mxu0 }
0x1253   :  { %v3018_v29 = vpop.f32.mrf.mxu1 }
0x1254   :  { %3074 = vrot.lane.b32.xlu0 %v3018_v29, %s12141_s9 }
0x1255   :  { %v11562_v30 = vpop.f32.mrf.mxu1 }
0x1263   :  { %v3324_v31 = vpop.f32.mrf.mxu1 }
0x1264   :  { %v3325_v56 = vadd.f32 %v10471_v5, %v3324_v31 }
0x1265   :  { %v11600_v34 = vpop.f32.mrf.mxu1 }
0x12c2   :  { %v3073_v0 = vpop.permute.xlu1 %3072 }
0x12c3   :  { %v3095_v2 = vsel %vm3094_vm9, %v3092_v63, %v3073_v0 }
0x12c4   :  { %11579 = vmatprep.mubr.msk.f32.mxu0 %vm299_vm0, %v3095_v2  ;;  %v10470_v2 = vld [vmem:[%s12241_s20] ss:$0 sm:$0xff]  ;;  %s14481_s20 = sld [smem:[#allocation16_spill]] }
0x12c6   :  { %v3075_v8 = vpop.permute.xlu0 %3074 }
0x12c7   :  { %v3096_v46 = vsel %vm3094_vm9, %v3093_v6, %v3075_v8 }
0x12c8   :  { %11580 = vmatmul.mubr.msk.f32.vlgmr.msra.gmra.mxu0 %vm299_vm0, %v3096_v46 }
0x12c9   :  { %11602 = vmatpush3.msra.mxu0 %v3335_v39  ;;  %11617 = vmatprep.mubr.msk.f32.mxu0 %vm12138_vm1, %v12137_v4 }
0x12ca   :  { %11603 = vmatprep.subr.mxu0 %v12137_v4 }
0x12cb   :  { %11604 = vmatpush3.msra.mxu0 %v3334_v60 }
0x12cc   :  { %11605 = vmatprep.subr.mxu0 %v12137_v4 }
0x12cd   :  { %11606 = vmatpush3.msra.mxu0 %v3333_v62 }
0x12ce   :  { %11607 = vmatprep.subr.mxu0 %v12137_v4 }
0x12cf   :  { %11608 = vmatpush3.msra.mxu0 %v3332_v38 }
0x12d0   :  { %11609 = vmatprep.subr.mxu0 %v12137_v4 }
0x12d1   :  { %11610 = vmatpush3.msra.mxu0 %v3331_v42 }
0x12d2   :  { %11611 = vmatprep.subr.mxu0 %v12137_v4 }
0x12d3   :  { %11612 = vmatpush3.msra.mxu0 %v3330_v19 }
0x12d4   :  { %11613 = vmatprep.subr.mxu0 %v12137_v4 }
0x12d5   :  { %11614 = vmatpush3.msra.mxu0 %v3329_v21 }
0x12d6   :  { %11615 = vmatprep.subr.mxu0 %v12137_v4 }
0x12d7   :  { %11616 = vmatpush3.msra.mxu0 %v3328_v7 }
0x12d8   :  { %11618 = vmatmul.mubr.msk.f32.vlgmr.msra.gmra.mxu0 %vm299_vm0, %v3325_v56 }
0x12d9   :  { %3854 = vmatprep.mubr.f32.mxu0 %v12137_v4 }
0x1388   :  { %v11581_v9 = vpop.f32.mrf.mxu0 }
0x1389   :  { %v3190_v10 = vadd.f32 %v11581_v9, %v10466_v58 }
0x138a   :  { %v3184_v11 = vpop.f32.mrf.mxu0 }
0x138b   :  { %v3185_v12 = vadd.f32 %v10466_v58, %v3184_v11  ;;  %v3194_v16 = vadd.f32 %v12071_v13, %v3190_v10 }
0x138d   :  { %v3200_v18 = vsel %vm299_vm0, %v3194_v16, 0.0  ;;  %v3193_v40 = vadd.f32 %v12072_v32, %v3185_v12  ;;  %v3610_v32 = vld [vmem:[%s14472_s5 + $0x398] sm:$0xff] }
0x138e   :  { %3201 = vadd.xlane.f32.xlu0 %v3200_v18  ;;  %v3608_v18 = vld [vmem:[%s14472_s5 + $0x388] sm:$0xff]  ;;  %3806 = vmatprep.subr.mxu0 %v3610_v32  ;;  %v3579_v32 = vld [vmem:[%s14472_s5 + $0x2a0] sm:$0xff] }
0x138f   :  { %v3197_v20 = vsel %vm299_vm0, %v3193_v40, 0.0  ;;  %3729 = vmatprep.subr.mxu1 %v3608_v18 }
0x1390   :  { %3198 = vadd.xlane.f32.xlu1 %v3197_v20  ;;  %v3609_v20 = vld [vmem:[%s14472_s5 + $0x390] sm:$0xff] }
0x1391   :  { %3807 = vmatpush1.msra.mxu0 %v3609_v20  ;;  %v3564_v20 = vld [vmem:[%s14472_s5 + $0x228] sm:$0xff] }
0x1398   :  { %v3412_v22 = vpop.f32.mrf.mxu0 }
0x1399   :  { %v3413_v54 = vadd.f32 %v10473_v52, %v3412_v22  ;;  %v3592_v22 = vld [vmem:[%s14472_s5 + $0x308] sm:$0xff] }
0x139a   :  { %v11619_v23 = vpop.f32.mrf.mxu0  ;;  %v3512_v52 = vld [vmem:[%s14472_s5 + $0x88] sm:$0xff] }
0x139b   :  { %v3423_v57 = vrot.slane %v3413_v54, %v12859_v55  ;;  %v3594_v23 = vld [vmem:[%s14472_s5 + $0x318] sm:$0xff]  ;;  %v3511_v54 = vld [vmem:[%s14472_s5 + $0x80] sm:$0xff] }
0x139c   :  { %3808 = vmatprep.subr.mxu0 %v3594_v23  ;;  %v3563_v23 = vld [vmem:[%s14472_s5 + $0x220] sm:$0xff] }
0x139d   :  { %v3424_v59 = vcombine.high %v3423_v57, %v3423_v57  ;;  %v3431_v3 = vrot.slane %v3423_v57, %v12859_v55  ;;  %v3513_v57 = vld [vmem:[%s14472_s5 + $0x90] sm:$0xff] }
0x139f   :  { %v3438_v0 = vrot.slane %v3424_v59, %v12859_v55  ;;  %v3442_v38 = vrot.slane %v3431_v3, %v12425_v28  ;;  %v3496_v59 = vld [vmem:[%s14472_s5 + $0x8] sm:$0xff] }
0x13a1   :  { %v3446_v39 = vrot.slane %v3438_v0, %v12425_v28  ;;  %v3612_v0 = vld [vmem:[%s14472_s5 + $0x3a8] sm:$0xff] }
0x1417   :  { %v3202_v24 = vpop.xlane.xlu0 %3201 }
0x1418   :  { %v3205_v25 = vmul.f32 0.015625, %v3202_v24  ;;  %v3591_v24 = vld [vmem:[%s14472_s5 + $0x300] sm:$0xff] }
0x1419   :  { %v3199_v26 = vpop.xlane.xlu1 %3198 }
0x141a   :  { %v3207_v29 = vsub.f32 %v3194_v16, %v3205_v25  ;;  %v3204_v30 = vmul.f32 0.015625, %v3199_v26  ;;  %v3593_v25 = vld [vmem:[%s14472_s5 + $0x310] sm:$0xff]  ;;  %v3576_v26 = vld [vmem:[%s14472_s5 + $0x288] sm:$0xff] }
0x141b   :  { %3809 = vmatpush1.msra.mxu0 %v3593_v25  ;;  %v3548_v25 = vld [vmem:[%s14472_s5 + $0x1a8] sm:$0xff] }
0x141c   :  { %v3206_v31 = vsub.f32 %v3193_v40, %v3204_v30  ;;  %v3209_v34 = vmul.f32 %v3207_v29, %v3207_v29  ;;  %v3607_v40 = vld [vmem:[%s14472_s5 + $0x380] sm:$0xff] }
0x141d   :  { %3730 = vmatpush1.msra.mxu1 %v3607_v40  ;;  %v3575_v30 = vld [vmem:[%s14472_s5 + $0x280] sm:$0xff]  ;;  %v3581_v40 = vld [vmem:[%s14472_s5 + $0x2b0] sm:$0xff] }
0x141e   :  { %v3213_v37 = vsel %vm299_vm0, %v3209_v34, 0.0  ;;  %v3208_v43 = vmul.f32 %v3206_v31, %v3206_v31  ;;  %3731 = vmatprep.subr.mxu1 %v3592_v22  ;;  %v3560_v34 = vld [vmem:[%s14472_s5 + $0x208] sm:$0xff]  ;;  %v3566_v22 = vld [vmem:[%s14472_s5 + $0x238] sm:$0xff] }
0x141f   :  { %3214 = vadd.xlane.f32.xlu1 %v3213_v37  ;;  %3732 = vmatpush1.msra.mxu1 %v3591_v24  ;;  %v3562_v37 = vld [vmem:[%s14472_s5 + $0x218] sm:$0xff]  ;;  %v3565_v24 = vld [vmem:[%s14472_s5 + $0x230] sm:$0xff] }
0x1420   :  { %v3210_v45 = vsel %vm299_vm0, %v3208_v43, 0.0  ;;  %3733 = vmatprep.subr.mxu1 %v3576_v26  ;;  %v3559_v43 = vld [vmem:[%s14472_s5 + $0x200] sm:$0xff]  ;;  %v3550_v26 = vld [vmem:[%s14472_s5 + $0x1b8] sm:$0xff] }
0x1421   :  { %3211 = vadd.xlane.f32.xlu0 %v3210_v45  ;;  %3734 = vmatpush1.msra.mxu1 %v3575_v30  ;;  %v3561_v45 = vld [vmem:[%s14472_s5 + $0x210] sm:$0xff] }
0x1422   :  { %3735 = vmatprep.subr.mxu1 %v3560_v34  ;;  %v3549_v30 = vld [vmem:[%s14472_s5 + $0x1b0] sm:$0xff]  ;;  %v3534_v34 = vld [vmem:[%s14472_s5 + $0x138] sm:$0xff] }
0x1423   :  { %3736 = vmatpush1.msra.mxu1 %v3559_v43  ;;  %v3533_v43 = vld [vmem:[%s14472_s5 + $0x130] sm:$0xff] }
0x1424   :  { %3737 = vmatprep.subr.mxu1 %v3544_v35  ;;  %v3518_v35 = vld [vmem:[%s14472_s5 + $0xb8] sm:$0xff] }
0x14a8   :  { %v3215_v41 = vpop.xlane.xlu1 %3214 }
0x14a9   :  { %v3217_v44 = vmul.f32 0.015625, %v3215_v41  ;;  %v3543_v41 = vld [vmem:[%s14472_s5 + $0x180] sm:$0xff] }
0x14aa   :  { %v3212_v47 = vpop.xlane.xlu0 %3211  ;;  %3738 = vmatpush1.msra.mxu1 %v3543_v41  ;;  %v3517_v41 = vld [vmem:[%s14472_s5 + $0xb0] sm:$0xff] }
0x14ab   :  { %v3219_v50 = vadd.f32 1e-05, %v3217_v44  ;;  %v3216_v51 = vmul.f32 0.015625, %v3212_v47  ;;  %v3545_v44 = vld [vmem:[%s14472_s5 + $0x190] sm:$0xff]  ;;  %v3528_v47 = vld [vmem:[%s14472_s5 + $0x108] sm:$0xff] }
0x14ac   :  { %3739 = vmatprep.subr.mxu1 %v3528_v47  ;;  %v3502_v47 = vld [vmem:[%s14472_s5 + $0x38] sm:$0xff] }
0x14ad   :  { %11983 = vrsqrt.f32 %v3219_v50  ;;  %v3218_v53 = vadd.f32 1e-05, %v3216_v51  ;;  %v3527_v50 = vld [vmem:[%s14472_s5 + $0x100] sm:$0xff]  ;;  %v3529_v51 = vld [vmem:[%s14472_s5 + $0x110] sm:$0xff] }
0x14ae   :  { %3740 = vmatpush1.msra.mxu1 %v3527_v50  ;;  %v3501_v50 = vld [vmem:[%s14472_s5 + $0x30] sm:$0xff] }
0x14af   :  { %11985 = vrsqrt.f32 %v3218_v53  ;;  %v3514_v53 = vld [vmem:[%s14472_s5 + $0x98] sm:$0xff]  ;;  %3741 = vmatprep.subr.mxu1 %v3512_v52 }
0x14b0   :  { %3742 = vmatpush1.msra.mxu1 %v3511_v54  ;;  %v3618_v52 = vld [vmem:[%s14472_s5 + $0x3d8] sm:$0xff]  ;;  %v3617_v54 = vld [vmem:[%s14472_s5 + $0x3d0] sm:$0xff] }
0x14b1   :  { %3743 = vmatprep.subr.mxu1 %v3496_v59  ;;  %v3602_v59 = vld [vmem:[%s14472_s5 + $0x358] sm:$0xff] }
0x14ba   :  { %v11984_v15 = vpop.eup %11983 }
0x14bb   :  { %v3223_v63 = vmul.f32 %v11984_v15, %v3207_v29  ;;  %v3578_v29 = vld [vmem:[%s14472_s5 + $0x298] sm:$0xff] }
0x14bc   :  { %v11986_v1 = vpop.eup %11985  ;;  %3810 = vmatprep.subr.mxu0 %v3578_v29  ;;  %v3498_v15 = vld [vmem:[%s14472_s5 + $0x18] sm:$0xff]  ;;  %v3547_v29 = vld [vmem:[%s14472_s5 + $0x1a0] sm:$0xff] }
0x14bd   :  { %v3231_v17 = vmul.f32 %v10469_v61, %v3223_v63  ;;  %v3222_v6 = vmul.f32 %v11986_v1, %v3206_v31  ;;  %v3577_v31 = vld [vmem:[%s14472_s5 + $0x290] sm:$0xff]  ;;  %v3614_v1 = vld [vmem:[%s14472_s5 + $0x3b8] sm:$0xff] }
0x14be   :  { %3811 = vmatpush1.msra.mxu0 %v3577_v31  ;;  %v3497_v63 = vld [vmem:[%s14472_s5 + $0x10] sm:$0xff]  ;;  %v3532_v31 = vld [vmem:[%s14472_s5 + $0x128] sm:$0xff] }
0x14bf   :  { %v3239_v8 = vadd.f32 %v10470_v2, %v3231_v17  ;;  %v3230_v46 = vmul.f32 %v10469_v61, %v3222_v6  ;;  %3812 = vmatprep.subr.mxu0 %v3562_v37  ;;  %v3495_v61 = vld [vmem:[%s14472_s5] sm:$0xff] }
0x14c0   :  { %3813 = vmatpush1.msra.mxu0 %v3561_v45  ;;  %3744 = vmatpush1.msra.mxu1 %v3495_v61  ;;  %v3531_v37 = vld [vmem:[%s14472_s5 + $0x120] sm:$0xff]  ;;  %v3516_v45 = vld [vmem:[%s14472_s5 + $0xa8] sm:$0xff]  ;;  %v3601_v61 = vld [vmem:[%s14472_s5 + $0x350] sm:$0xff] }
0x14c1   :  { %v3450_v60 = vadd.f32 %v3446_v39, %v3239_v8  ;;  %v3238_v62 = vadd.f32 %v10470_v2, %v3230_v46  ;;  %3814 = vmatprep.subr.mxu0 %v3546_v36  ;;  %3883 = vmatprep.subr.mxu1 %v3612_v0  ;;  %v3515_v36 = vld [vmem:[%s14472_s5 + $0xa0] sm:$0xff]  ;;  %v3586_v0 = vld [vmem:[%s14472_s5 + $0x2d8] sm:$0xff] }
0x14c2   :  { %3815 = vmatpush1.msra.mxu0 %v3545_v44  ;;  %v3500_v44 = vld [vmem:[%s14472_s5 + $0x28] sm:$0xff] }
0x14c3   :  { %v3456_v42 = vsel %vm299_vm0, %v3450_v60, 0.0  ;;  %v3449_v19 = vadd.f32 %v3442_v38, %v3238_v62  ;;  %3816 = vmatprep.subr.mxu0 %v3530_v48  ;;  %v10475_v38 = vld [vmem:[%s14473_s17] ss:$0 sm:$0xff] }
0x14c4   :  { %3457 = vadd.xlane.f32.xlu1 %v3456_v42  ;;  %3817 = vmatpush1.msra.mxu0 %v3529_v51  ;;  %v3499_v48 = vld [vmem:[%s14472_s5 + $0x20] sm:$0xff]  ;;  %v3616_v51 = vld [vmem:[%s14472_s5 + $0x3c8] sm:$0xff] }
0x14c5   :  { %v3453_v21 = vsel %vm299_vm0, %v3449_v19, 0.0  ;;  %3818 = vmatprep.subr.mxu0 %v3514_v53  ;;  %v3615_v53 = vld [vmem:[%s14472_s5 + $0x3c0] sm:$0xff] }
0x14c6   :  { %3454 = vadd.xlane.f32.xlu0 %v3453_v21  ;;  %3819 = vmatpush1.msra.mxu0 %v3513_v57  ;;  %v10476_v21 = vld [vmem:[%s14474_s8] ss:$0 sm:$0xff]  ;;  %v3600_v57 = vld [vmem:[%s14472_s5 + $0x348] sm:$0xff] }
0x14c7   :  { %3820 = vmatprep.subr.mxu0 %v3498_v15  ;;  %v3599_v15 = vld [vmem:[%s14472_s5 + $0x340] sm:$0xff] }
0x14c8   :  { %3821 = vmatpush1.msra.mxu0 %v3497_v63  ;;  %v3584_v63 = vld [vmem:[%s14472_s5 + $0x2c8] sm:$0xff] }
0x14c9   :  { %3960 = vmatprep.subr.mxu0 %v3614_v1  ;;  %v3583_v1 = vld [vmem:[%s14472_s5 + $0x2c0] sm:$0xff] }
0x154d   :  { %v3458_v5 = vpop.xlane.xlu1 %3457 }
0x154e   :  { %v3460_v7 = vmul.f32 0.015625, %v3458_v5 }
0x154f   :  { %v3455_v56 = vpop.xlane.xlu0 %3454 }
0x1550   :  { %v12870_v58 = vsub.f32 %v3450_v60, %v3460_v7  ;;  %v3459_v9 = vmul.f32 0.015625, %v3455_v56  ;;  %v3611_v7 = vld [vmem:[%s14472_s5 + $0x3a0] sm:$0xff]  ;;  %v3613_v56 = vld [vmem:[%s14472_s5 + $0x3b0] sm:$0xff] }
0x1552   :  { %v12872_v10 = vsub.f32 %v3449_v19, %v3459_v9  ;;  %v3464_v11 = vmul.f32 %v12870_v58, %v12870_v58  ;;  %v3596_v9 = vld [vmem:[%s14472_s5 + $0x328] sm:$0xff] }
0x1554   :  { %v3468_v12 = vsel %vm299_vm0, %v3464_v11, 0.0  ;;  %v3463_v13 = vmul.f32 %v12872_v10, %v12872_v10  ;;  %v3598_v11 = vld [vmem:[%s14472_s5 + $0x338] sm:$0xff] }
0x1555   :  { %3469 = vadd.xlane.f32.xlu1 %v3468_v12 }
0x1556   :  { %v3465_v16 = vsel %vm299_vm0, %v3463_v13, 0.0  ;;  %v3580_v13 = vld [vmem:[%s14472_s5 + $0x2a8] sm:$0xff] }
0x1557   :  { %3466 = vadd.xlane.f32.xlu0 %v3465_v16  ;;  %v3582_v16 = vld [vmem:[%s14472_s5 + $0x2b8] sm:$0xff] }
0x15de   :  { %v3470_v2 = vpop.xlane.xlu1 %3469 }
0x15df   :  { %v3472_v3 = vmul.f32 0.015625, %v3470_v2  ;;  %v3585_v2 = vld [vmem:[%s14472_s5 + $0x2d0] sm:$0xff] }
0x15e0   :  { %v3467_v17 = vpop.xlane.xlu0 %3466 }
0x15e1   :  { %v3474_v6 = vadd.f32 1e-05, %v3472_v3  ;;  %v3471_v8 = vmul.f32 0.015625, %v3467_v17  ;;  %v3568_v3 = vld [vmem:[%s14472_s5 + $0x248] sm:$0xff]  ;;  %v3570_v17 = vld [vmem:[%s14472_s5 + $0x258] sm:$0xff] }
0x15e3   :  { %v3473_v39 = vadd.f32 1e-05, %v3471_v8  ;;  %11987 = vrsqrt.f32 %v3474_v6  ;;  %v3567_v6 = vld [vmem:[%s14472_s5 + $0x240] sm:$0xff]  ;;  %v3569_v8 = vld [vmem:[%s14472_s5 + $0x250] sm:$0xff] }
0x15e5   :  { %11989 = vrsqrt.f32 %v3473_v39  ;;  %v3552_v39 = vld [vmem:[%s14472_s5 + $0x1c8] sm:$0xff] }
0x15f0   :  { %v11988_v46 = vpop.eup %11987 }
0x15f1   :  { %v3478_v42 = vmul.f32 %v11988_v46, %v12870_v58  ;;  %v3595_v58 = vld [vmem:[%s14472_s5 + $0x320] sm:$0xff]  ;;  %v3554_v46 = vld [vmem:[%s14472_s5 + $0x1d8] sm:$0xff] }
0x15f2   :  { %v11990_v60 = vpop.eup %11989 }
0x15f3   :  { %v3477_v62 = vmul.f32 %v11990_v60, %v12872_v10  ;;  %v3486_v12 = vmul.f32 %v10475_v38, %v3478_v42  ;;  %v3597_v10 = vld [vmem:[%s14472_s5 + $0x330] sm:$0xff]  ;;  %v3551_v60 = vld [vmem:[%s14472_s5 + $0x1c0] sm:$0xff]  ;;  %v3538_v42 = vld [vmem:[%s14472_s5 + $0x158] sm:$0xff] }
0x15f5   :  { %v3485_v19 = vmul.f32 %v10475_v38, %v3477_v62  ;;  %v12932_v18 = vadd.f32 %v10476_v21, %v3486_v12  ;;  %v3553_v62 = vld [vmem:[%s14472_s5 + $0x1d0] sm:$0xff]  ;;  %v3536_v38 = vld [vmem:[%s14472_s5 + $0x148] sm:$0xff] }
0x15f6   :  { %v3504_v12 = vld [vmem:[%s14472_s5 + $0x48] sm:$0xff] }
0x15f7   :  { %v12918_v5 = vadd.f32 %v10476_v21, %v3485_v19  ;;  %v3535_v19 = vld [vmem:[%s14472_s5 + $0x140] sm:$0xff]  ;;  %v3537_v21 = vld [vmem:[%s14472_s5 + $0x150] sm:$0xff] }
0x15f9   :  { %10477 = vmatmul.mubr.msk.f32.vlgmr.msra.gmra.mxu1 %vm299_vm0, %v12918_v5  ;;  %10479 = vmatmul.mubr.msk.f32.vlgmr.msra.gmra.mxu0 %vm299_vm0, %v12918_v5 }
0x15fa   :  { %3884 = vmatpush1.msra.mxu1 %v3611_v7  ;;  %3961 = vmatpush1.msra.mxu0 %v3613_v56  ;;  %v3520_v7 = vld [vmem:[%s14472_s5 + $0xc8] sm:$0xff]  ;;  %v3522_v56 = vld [vmem:[%s14472_s5 + $0xd8] sm:$0xff] }
0x15fb   :  { %3885 = vmatprep.subr.mxu1 %v3596_v9  ;;  %3962 = vmatprep.subr.mxu0 %v3598_v11  ;;  %v3519_v9 = vld [vmem:[%s14472_s5 + $0xc0] sm:$0xff]  ;;  %v3521_v11 = vld [vmem:[%s14472_s5 + $0xd0] sm:$0xff] }
0x15fc   :  { %3886 = vmatpush1.msra.mxu1 %v3595_v58  ;;  %3963 = vmatpush1.msra.mxu0 %v3597_v10  ;;  %v3506_v58 = vld [vmem:[%s14472_s5 + $0x58] sm:$0xff]  ;;  %v3503_v10 = vld [vmem:[%s14472_s5 + $0x40] sm:$0xff] }
0x15fd   :  { %3783 = vmatprep.mubr.f32.mxu1 %v12137_v4  ;;  %3860 = vmatprep.mubr.f32.mxu0 %v12137_v4 }
0x15fe   :  { %3887 = vmatprep.subr.mxu1 %v3580_v13  ;;  %3964 = vmatprep.subr.mxu0 %v3582_v16  ;;  %v3505_v13 = vld [vmem:[%s14472_s5 + $0x50] sm:$0xff]  ;;  %v3620_v16 = vld [vmem:[%s14472_s5 + $0x3e8] sm:$0xff] }
0x15ff   :  { %10478 = vmatmul.mubr.msk.f32.gmra.mxu1 %vm299_vm0, %v12932_v18  ;;  %10480 = vmatmul.mubr.msk.f32.gmra.mxu0 %vm299_vm0, %v12932_v18 }
0x1600   :  { %3888 = vmatpush1.msra.mxu1 %v3579_v32  ;;  %3965 = vmatpush1.msra.mxu0 %v3581_v40  ;;  %v3622_v32 = vld [vmem:[%s14472_s5 + $0x3f8] sm:$0xff]  ;;  %v3619_v40 = vld [vmem:[%s14472_s5 + $0x3e0] sm:$0xff] }
0x1601   :  { %3889 = vmatprep.subr.mxu1 %v3564_v20  ;;  %3966 = vmatprep.subr.mxu0 %v3566_v22  ;;  %v3621_v20 = vld [vmem:[%s14472_s5 + $0x3f0] sm:$0xff]  ;;  %v3604_v22 = vld [vmem:[%s14472_s5 + $0x368] sm:$0xff] }
0x1602   :  { %3890 = vmatpush1.msra.mxu1 %v3563_v23  ;;  %3967 = vmatpush1.msra.mxu0 %v3565_v24  ;;  %v3606_v23 = vld [vmem:[%s14472_s5 + $0x378] sm:$0xff]  ;;  %v3603_v24 = vld [vmem:[%s14472_s5 + $0x360] sm:$0xff] }
0x1603   :  { %3891 = vmatprep.subr.mxu1 %v3548_v25  ;;  %3968 = vmatprep.subr.mxu0 %v3550_v26  ;;  %v3605_v25 = vld [vmem:[%s14472_s5 + $0x370] sm:$0xff]  ;;  %v3588_v26 = vld [vmem:[%s14472_s5 + $0x2e8] sm:$0xff] }
0x1604   :  { %3892 = vmatpush1.msra.mxu1 %v3547_v29  ;;  %3969 = vmatpush1.msra.mxu0 %v3549_v30  ;;  %v3590_v29 = vld [vmem:[%s14472_s5 + $0x2f8] sm:$0xff]  ;;  %v3587_v30 = vld [vmem:[%s14472_s5 + $0x2e0] sm:$0xff] }
0x1605   :  { %3893 = vmatprep.subr.mxu1 %v3532_v31  ;;  %3970 = vmatprep.subr.mxu0 %v3534_v34  ;;  %v3589_v31 = vld [vmem:[%s14472_s5 + $0x2f0] sm:$0xff]  ;;  %v3572_v34 = vld [vmem:[%s14472_s5 + $0x268] sm:$0xff] }
0x1606   :  { %3894 = vmatpush1.msra.mxu1 %v3531_v37  ;;  %3971 = vmatpush1.msra.mxu0 %v3533_v43  ;;  %v3574_v37 = vld [vmem:[%s14472_s5 + $0x278] sm:$0xff]  ;;  %v3571_v43 = vld [vmem:[%s14472_s5 + $0x260] sm:$0xff] }
0x1607   :  { %3895 = vmatprep.subr.mxu1 %v3516_v45  ;;  %3972 = vmatprep.subr.mxu0 %v3518_v35  ;;  %v3573_v45 = vld [vmem:[%s14472_s5 + $0x270] sm:$0xff]  ;;  %v3556_v35 = vld [vmem:[%s14472_s5 + $0x1e8] sm:$0xff] }
0x1608   :  { %3896 = vmatpush1.msra.mxu1 %v3515_v36  ;;  %3973 = vmatpush1.msra.mxu0 %v3517_v41  ;;  %v3558_v36 = vld [vmem:[%s14472_s5 + $0x1f8] sm:$0xff]  ;;  %v3555_v41 = vld [vmem:[%s14472_s5 + $0x1e0] sm:$0xff] }
0x1609   :  { %3897 = vmatprep.subr.mxu1 %v3500_v44  ;;  %3974 = vmatprep.subr.mxu0 %v3502_v47  ;;  %v3557_v44 = vld [vmem:[%s14472_s5 + $0x1f0] sm:$0xff]  ;;  %v3540_v47 = vld [vmem:[%s14472_s5 + $0x168] sm:$0xff] }
0x160a   :  { %3898 = vmatpush1.msra.mxu1 %v3499_v48  ;;  %3931 = vmatprep.mubr.f32.mxu1 %v12137_v4  ;;  %v3542_v48 = vld [vmem:[%s14472_s5 + $0x178] sm:$0xff] }
0x160b   :  { %3975 = vmatpush1.msra.mxu0 %v3501_v50  ;;  %4008 = vmatprep.mubr.f32.mxu0 %v12137_v4  ;;  %v3539_v50 = vld [vmem:[%s14472_s5 + $0x160] sm:$0xff] }
0x160c   :  { %10481 = vmatmul.mubr.msk.f32.vlgmr.msra.gmra.mxu1 %vm299_vm0, %v12918_v5  ;;  %10483 = vmatmul.mubr.msk.f32.vlgmr.msra.gmra.mxu0 %vm299_vm0, %v12918_v5 }
0x160d   :  { %4037 = vmatprep.subr.mxu1 %v3616_v51  ;;  %4114 = vmatprep.subr.mxu0 %v3618_v52  ;;  %v3541_v51 = vld [vmem:[%s14472_s5 + $0x170] sm:$0xff]  ;;  %v3524_v52 = vld [vmem:[%s14472_s5 + $0xe8] sm:$0xff] }
0x160e   :  { %4038 = vmatpush1.msra.mxu1 %v3615_v53  ;;  %4115 = vmatpush1.msra.mxu0 %v3617_v54  ;;  %v3526_v53 = vld [vmem:[%s14472_s5 + $0xf8] sm:$0xff]  ;;  %v3523_v54 = vld [vmem:[%s14472_s5 + $0xe0] sm:$0xff] }
0x160f   :  { %4039 = vmatprep.subr.mxu1 %v3600_v57  ;;  %4116 = vmatprep.subr.mxu0 %v3602_v59  ;;  %v3525_v57 = vld [vmem:[%s14472_s5 + $0xf0] sm:$0xff]  ;;  %v3508_v59 = vld [vmem:[%s14472_s5 + $0x68] sm:$0xff] }
0x1610   :  { %3937 = vmatprep.mubr.f32.mxu1 %v12137_v4  ;;  %4014 = vmatprep.mubr.f32.mxu0 %v12137_v4 }
0x1611   :  { %4040 = vmatpush1.msra.mxu1 %v3599_v15  ;;  %4117 = vmatpush1.msra.mxu0 %v3601_v61  ;;  %v3510_v15 = vld [vmem:[%s14472_s5 + $0x78] sm:$0xff]  ;;  %v3507_v61 = vld [vmem:[%s14472_s5 + $0x60] sm:$0xff] }
0x1612   :  { %10482 = vmatmul.mubr.msk.f32.gmra.mxu1 %vm299_vm0, %v12932_v18  ;;  %10484 = vmatmul.mubr.msk.f32.gmra.mxu0 %vm299_vm0, %v12932_v18 }
0x1613   :  { %4041 = vmatprep.subr.mxu1 %v3584_v63  ;;  %4118 = vmatprep.subr.mxu0 %v3586_v0  ;;  %v3509_v63 = vld [vmem:[%s14472_s5 + $0x70] sm:$0xff]  ;;  %v4392_v0 = vld [vmem:[%s14475_s14 + $0xf8] sm:$0xff] }
0x1614   :  { %4042 = vmatpush1.msra.mxu1 %v3583_v1  ;;  %4119 = vmatpush1.msra.mxu0 %v3585_v2  ;;  %v4424_v1 = vld [vmem:[%s14475_s14 + $0x1f8] sm:$0xff] }
0x1615   :  { %4043 = vmatprep.subr.mxu1 %v3568_v3  ;;  %4120 = vmatprep.subr.mxu0 %v3570_v17  ;;  %v4376_v2 = vld [vmem:[%s14475_s14 + $0x78] sm:$0xff]  ;;  %v4391_v17 = vld [vmem:[%s14475_s14 + $0xf0] sm:$0xff] }
0x1616   :  { %4044 = vmatpush1.msra.mxu1 %v3567_v6  ;;  %4121 = vmatpush1.msra.mxu0 %v3569_v8  ;;  %v4408_v3 = vld [vmem:[%s14475_s14 + $0x178] sm:$0xff]  ;;  %v4423_v6 = vld [vmem:[%s14475_s14 + $0x1f0] sm:$0xff] }
0x1617   :  { %4045 = vmatprep.subr.mxu1 %v3552_v39  ;;  %4122 = vmatprep.subr.mxu0 %v3554_v46  ;;  %v4375_v8 = vld [vmem:[%s14475_s14 + $0x70] sm:$0xff]  ;;  %v4390_v46 = vld [vmem:[%s14475_s14 + $0xe8] sm:$0xff] }
0x1618   :  { %4046 = vmatpush1.msra.mxu1 %v3551_v60  ;;  %4123 = vmatpush1.msra.mxu0 %v3553_v62  ;;  %v4407_v39 = vld [vmem:[%s14475_s14 + $0x170] sm:$0xff]  ;;  %v4422_v60 = vld [vmem:[%s14475_s14 + $0x1e8] sm:$0xff] }
0x1619   :  { %4047 = vmatprep.subr.mxu1 %v3536_v38  ;;  %4124 = vmatprep.subr.mxu0 %v3538_v42  ;;  %v4374_v62 = vld [vmem:[%s14475_s14 + $0x68] sm:$0xff]  ;;  %v4389_v42 = vld [vmem:[%s14475_s14 + $0xe0] sm:$0xff] }
0x161a   :  { %4048 = vmatpush1.msra.mxu1 %v3535_v19  ;;  %4125 = vmatpush1.msra.mxu0 %v3537_v21  ;;  %v4406_v38 = vld [vmem:[%s14475_s14 + $0x168] sm:$0xff]  ;;  %v4421_v19 = vld [vmem:[%s14475_s14 + $0x1e0] sm:$0xff] }
0x161b   :  { %4049 = vmatprep.subr.mxu1 %v3520_v7  ;;  %4126 = vmatprep.subr.mxu0 %v3522_v56  ;;  %v4373_v21 = vld [vmem:[%s14475_s14 + $0x60] sm:$0xff]  ;;  %v4388_v56 = vld [vmem:[%s14475_s14 + $0xd8] sm:$0xff] }
0x161c   :  { %4050 = vmatpush1.msra.mxu1 %v3519_v9  ;;  %4127 = vmatpush1.msra.mxu0 %v3521_v11  ;;  %v4405_v7 = vld [vmem:[%s14475_s14 + $0x160] sm:$0xff]  ;;  %v4420_v9 = vld [vmem:[%s14475_s14 + $0x1d8] sm:$0xff] }
0x161d   :  { %4051 = vmatprep.subr.mxu1 %v3504_v12  ;;  %4128 = vmatprep.subr.mxu0 %v3506_v58  ;;  %v4372_v11 = vld [vmem:[%s14475_s14 + $0x58] sm:$0xff]  ;;  %v4387_v58 = vld [vmem:[%s14475_s14 + $0xd0] sm:$0xff] }
0x161e   :  { %4052 = vmatpush1.msra.mxu1 %v3503_v10  ;;  %4085 = vmatprep.mubr.f32.mxu1 %v12137_v4  ;;  %v4404_v12 = vld [vmem:[%s14475_s14 + $0x158] sm:$0xff]  ;;  %v4419_v10 = vld [vmem:[%s14475_s14 + $0x1d0] sm:$0xff] }
0x161f   :  { %4129 = vmatpush1.msra.mxu0 %v3505_v13  ;;  %4162 = vmatprep.mubr.f32.mxu0 %v12137_v4  ;;  %v4371_v13 = vld [vmem:[%s14475_s14 + $0x50] sm:$0xff] }
0x1620   :  { %10485 = vmatmul.mubr.msk.f32.vlgmr.msra.gmra.mxu1 %vm299_vm0, %v12918_v5  ;;  %10487 = vmatmul.mubr.msk.f32.vlgmr.msra.gmra.mxu0 %vm299_vm0, %v12918_v5 }
0x1621   :  { %4191 = vmatprep.subr.mxu1 %v3620_v16  ;;  %4268 = vmatprep.subr.mxu0 %v3622_v32  ;;  %v4403_v16 = vld [vmem:[%s14475_s14 + $0x150] sm:$0xff]  ;;  %v4386_v32 = vld [vmem:[%s14475_s14 + $0xc8] sm:$0xff] }
0x1622   :  { %4192 = vmatpush1.msra.mxu1 %v3619_v40  ;;  %4269 = vmatpush1.msra.mxu0 %v3621_v20  ;;  %v4418_v40 = vld [vmem:[%s14475_s14 + $0x1c8] sm:$0xff] }
0x1623   :  { %4193 = vmatprep.subr.mxu1 %v3604_v22  ;;  %4270 = vmatprep.subr.mxu0 %v3606_v23  ;;  %v4370_v20 = vld [vmem:[%s14475_s14 + $0x48] sm:$0xff]  ;;  %v4385_v23 = vld [vmem:[%s14475_s14 + $0xc0] sm:$0xff] }
0x1624   :  { %4091 = vmatprep.mubr.f32.mxu1 %v12137_v4  ;;  %4168 = vmatprep.mubr.f32.mxu0 %v12137_v4  ;;  %v4402_v22 = vld [vmem:[%s14475_s14 + $0x148] sm:$0xff] }
0x1625   :  { %4194 = vmatpush1.msra.mxu1 %v3603_v24  ;;  %4271 = vmatpush1.msra.mxu0 %v3605_v25  ;;  %v4417_v24 = vld [vmem:[%s14475_s14 + $0x1c0] sm:$0xff] }
0x1626   :  { %10486 = vmatmul.mubr.msk.f32.gmra.mxu1 %vm299_vm0, %v12932_v18  ;;  %10488 = vmatmul.mubr.msk.f32.gmra.mxu0 %vm299_vm0, %v12932_v18  ;;  %v4369_v25 = vld [vmem:[%s14475_s14 + $0x40] sm:$0xff] }
0x1627   :  { %4195 = vmatprep.subr.mxu1 %v3588_v26  ;;  %4272 = vmatprep.subr.mxu0 %v3590_v29  ;;  %v4401_v26 = vld [vmem:[%s14475_s14 + $0x140] sm:$0xff]  ;;  %v4384_v29 = vld [vmem:[%s14475_s14 + $0xb8] sm:$0xff] }
0x1628   :  { %4196 = vmatpush1.msra.mxu1 %v3587_v30  ;;  %4273 = vmatpush1.msra.mxu0 %v3589_v31  ;;  %v4416_v30 = vld [vmem:[%s14475_s14 + $0x1b8] sm:$0xff] }
0x1629   :  { %4197 = vmatprep.subr.mxu1 %v3572_v34  ;;  %4274 = vmatprep.subr.mxu0 %v3574_v37  ;;  %v4368_v31 = vld [vmem:[%s14475_s14 + $0x38] sm:$0xff]  ;;  %v4383_v37 = vld [vmem:[%s14475_s14 + $0xb0] sm:$0xff] }
0x162a   :  { %4198 = vmatpush1.msra.mxu1 %v3571_v43  ;;  %4275 = vmatpush1.msra.mxu0 %v3573_v45  ;;  %v4400_v34 = vld [vmem:[%s14475_s14 + $0x138] sm:$0xff]  ;;  %v4415_v43 = vld [vmem:[%s14475_s14 + $0x1b0] sm:$0xff] }
0x162b   :  { %4199 = vmatprep.subr.mxu1 %v3556_v35  ;;  %4276 = vmatprep.subr.mxu0 %v3558_v36  ;;  %v4367_v45 = vld [vmem:[%s14475_s14 + $0x30] sm:$0xff]  ;;  %v4382_v36 = vld [vmem:[%s14475_s14 + $0xa8] sm:$0xff] }
0x162c   :  { %4200 = vmatpush1.msra.mxu1 %v3555_v41  ;;  %4277 = vmatpush1.msra.mxu0 %v3557_v44  ;;  %v4399_v35 = vld [vmem:[%s14475_s14 + $0x130] sm:$0xff]  ;;  %v4414_v41 = vld [vmem:[%s14475_s14 + $0x1a8] sm:$0xff] }
0x162d   :  { %4201 = vmatprep.subr.mxu1 %v3540_v47  ;;  %4278 = vmatprep.subr.mxu0 %v3542_v48  ;;  %v4366_v44 = vld [vmem:[%s14475_s14 + $0x28] sm:$0xff]  ;;  %v4381_v48 = vld [vmem:[%s14475_s14 + $0xa0] sm:$0xff] }
0x162e   :  { %4202 = vmatpush1.msra.mxu1 %v3539_v50  ;;  %4279 = vmatpush1.msra.mxu0 %v3541_v51  ;;  %v4398_v47 = vld [vmem:[%s14475_s14 + $0x128] sm:$0xff]  ;;  %v4413_v50 = vld [vmem:[%s14475_s14 + $0x1a0] sm:$0xff] }
0x162f   :  { %4203 = vmatprep.subr.mxu1 %v3524_v52  ;;  %4280 = vmatprep.subr.mxu0 %v3526_v53  ;;  %v4365_v51 = vld [vmem:[%s14475_s14 + $0x20] sm:$0xff]  ;;  %v4380_v53 = vld [vmem:[%s14475_s14 + $0x98] sm:$0xff] }
0x1630   :  { %4204 = vmatpush1.msra.mxu1 %v3523_v54  ;;  %4281 = vmatpush1.msra.mxu0 %v3525_v57  ;;  %v4397_v52 = vld [vmem:[%s14475_s14 + $0x120] sm:$0xff]  ;;  %v4412_v54 = vld [vmem:[%s14475_s14 + $0x198] sm:$0xff] }
0x1631   :  { %4205 = vmatprep.subr.mxu1 %v3508_v59  ;;  %4282 = vmatprep.subr.mxu0 %v3510_v15  ;;  %v4364_v57 = vld [vmem:[%s14475_s14 + $0x18] sm:$0xff]  ;;  %v4379_v15 = vld [vmem:[%s14475_s14 + $0x90] sm:$0xff] }
0x1632   :  { %4206 = vmatpush1.msra.mxu1 %v3507_v61  ;;  %4239 = vmatprep.mubr.f32.mxu1 %v12137_v4  ;;  %v4396_v59 = vld [vmem:[%s14475_s14 + $0x118] sm:$0xff]  ;;  %v4411_v61 = vld [vmem:[%s14475_s14 + $0x190] sm:$0xff] }
0x1633   :  { %4283 = vmatpush1.msra.mxu0 %v3509_v63  ;;  %4316 = vmatprep.mubr.f32.mxu0 %v12137_v4  ;;  %v4363_v63 = vld [vmem:[%s14475_s14 + $0x10] sm:$0xff] }
0x1634   :  { %10489 = vmatmul.mubr.msk.f32.vlgmr.msra.gmra.mxu1 %vm299_vm0, %v12918_v5  ;;  %10491 = vmatmul.mubr.msk.f32.vlgmr.msra.gmra.mxu0 %vm299_vm0, %v12918_v5 }
0x1635   :  { %4245 = vmatprep.mubr.f32.mxu1 %v12137_v4  ;;  %4322 = vmatprep.mubr.f32.mxu0 %v12137_v4 }
0x1636   :  { %10678 = vmatprep.subr.mxu1 %v4392_v0  ;;  %10716 = vmatprep.subr.mxu0 %v4424_v1  ;;  %v4395_v0 = vld [vmem:[%s14475_s14 + $0x110] sm:$0xff]  ;;  %v4378_v1 = vld [vmem:[%s14475_s14 + $0x88] sm:$0xff] }
0x1637   :  { %10679 = vmatpush3.msra.mxu1 %v4376_v2  ;;  %10717 = vmatpush3.msra.mxu0 %v4408_v3  ;;  %v4410_v2 = vld [vmem:[%s14475_s14 + $0x188] sm:$0xff] }
0x1638   :  { %10490 = vmatmul.mubr.msk.f32.gmra.mxu1 %vm299_vm0, %v12932_v18  ;;  %10492 = vmatmul.mubr.msk.f32.gmra.mxu0 %vm299_vm0, %v12932_v18  ;;  %v4362_v3 = vld [vmem:[%s14475_s14 + $0x8] sm:$0xff] }
0x1639   :  { %10680 = vmatprep.subr.mxu1 %v4391_v17  ;;  %10718 = vmatprep.subr.mxu0 %v4423_v6  ;;  %v4394_v17 = vld [vmem:[%s14475_s14 + $0x108] sm:$0xff]  ;;  %v4377_v6 = vld [vmem:[%s14475_s14 + $0x80] sm:$0xff] }
0x163a   :  { %10681 = vmatpush3.msra.mxu1 %v4375_v8  ;;  %10719 = vmatpush3.msra.mxu0 %v4407_v39  ;;  %v4409_v8 = vld [vmem:[%s14475_s14 + $0x180] sm:$0xff] }
0x163b   :  { %10682 = vmatprep.subr.mxu1 %v4390_v46  ;;  %10720 = vmatprep.subr.mxu0 %v4422_v60  ;;  %v4361_v39 = vld [vmem:[%s14475_s14] sm:$0xff]  ;;  %v4456_v60 = vld [vmem:[%s14475_s14 + $0x2f8] sm:$0xff] }
0x163c   :  { %10683 = vmatpush3.msra.mxu1 %v4374_v62  ;;  %10721 = vmatpush3.msra.mxu0 %v4406_v38  ;;  %v4393_v46 = vld [vmem:[%s14475_s14 + $0x100] sm:$0xff]  ;;  %v4488_v62 = vld [vmem:[%s14475_s14 + $0x3f8] sm:$0xff]  ;;  %v13129_v38 = vsub.s32 2, %v12422_v27 }
0x163d   :  { %10684 = vmatprep.subr.mxu1 %v4389_v42  ;;  %10722 = vmatprep.subr.mxu0 %v4421_v19  ;;  %v13132_v42 = vld [vmem:[%s14476_s19] sm:$0xff]  ;;  %v13135_v19 = vsub.s32 3, %v12422_v27 }
0x163e   :  { %10685 = vmatpush3.msra.mxu1 %v4373_v21  ;;  %10723 = vmatpush3.msra.mxu0 %v4405_v7  ;;  %v3630_v21 = vrot.slane %v13132_v42, %v12425_v28  ;;  %v3638_v7 = vrot.slane %v13132_v42, %v13129_v38 }
0x163f   :  { %10686 = vmatprep.subr.mxu1 %v4388_v56  ;;  %10724 = vmatprep.subr.mxu0 %v4420_v9  ;;  %v3634_v56 = vrot.slane %v13132_v42, %v12432_v33  ;;  %v3642_v9 = vrot.slane %v13132_v42, %v13135_v19 }
0x1640   :  { %10687 = vmatpush3.msra.mxu1 %v4372_v11  ;;  %10725 = vmatpush3.msra.mxu0 %v4404_v12 }
0x1641   :  { %10688 = vmatprep.subr.mxu1 %v4387_v58  ;;  %10726 = vmatprep.subr.mxu0 %v4419_v10 }
0x1642   :  { %10689 = vmatpush3.msra.mxu1 %v4371_v13  ;;  %10727 = vmatpush3.msra.mxu0 %v4403_v16 }
0x1643   :  { %10690 = vmatprep.subr.mxu1 %v4386_v32  ;;  %10728 = vmatprep.subr.mxu0 %v4418_v40 }
0x1644   :  { %10691 = vmatpush3.msra.mxu1 %v4370_v20  ;;  %10729 = vmatpush3.msra.mxu0 %v4402_v22 }
0x1645   :  { %10692 = vmatprep.subr.mxu1 %v4385_v23  ;;  %10730 = vmatprep.subr.mxu0 %v4417_v24 }
0x1646   :  { %10693 = vmatpush3.msra.mxu1 %v4369_v25  ;;  %10731 = vmatpush3.msra.mxu0 %v4401_v26 }
0x1647   :  { %10694 = vmatprep.subr.mxu1 %v4384_v29  ;;  %10732 = vmatprep.subr.mxu0 %v4416_v30  ;;  %v4440_v29 = vld [vmem:[%s14475_s14 + $0x278] sm:$0xff] }
0x1648   :  { %10695 = vmatpush3.msra.mxu1 %v4368_v31  ;;  %10733 = vmatpush3.msra.mxu0 %v4400_v34  ;;  %v4472_v30 = vld [vmem:[%s14475_s14 + $0x378] sm:$0xff]  ;;  %v4455_v31 = vld [vmem:[%s14475_s14 + $0x2f0] sm:$0xff] }
0x1649   :  { %10696 = vmatprep.subr.mxu1 %v4383_v37  ;;  %10734 = vmatprep.subr.mxu0 %v4415_v43  ;;  %v4487_v34 = vld [vmem:[%s14475_s14 + $0x3f0] sm:$0xff] }
0x164a   :  { %10697 = vmatpush3.msra.mxu1 %v4367_v45  ;;  %10735 = vmatpush3.msra.mxu0 %v4399_v35 }
0x164b   :  { %10698 = vmatprep.subr.mxu1 %v4382_v36  ;;  %10736 = vmatprep.subr.mxu0 %v4414_v41  ;;  %v4439_v36 = vld [vmem:[%s14475_s14 + $0x270] sm:$0xff] }
0x164c   :  { %10699 = vmatpush3.msra.mxu1 %v4366_v44  ;;  %10737 = vmatpush3.msra.mxu0 %v4398_v47  ;;  %v4471_v41 = vld [vmem:[%s14475_s14 + $0x370] sm:$0xff] }
0x164d   :  { %10700 = vmatprep.subr.mxu1 %v4381_v48  ;;  %10738 = vmatprep.subr.mxu0 %v4413_v50  ;;  %v4454_v48 = vld [vmem:[%s14475_s14 + $0x2e8] sm:$0xff] }
0x164e   :  { %10701 = vmatpush3.msra.mxu1 %v4365_v51  ;;  %10739 = vmatpush3.msra.mxu0 %v4397_v52  ;;  %v4486_v50 = vld [vmem:[%s14475_s14 + $0x3e8] sm:$0xff] }
0x164f   :  { %10702 = vmatprep.subr.mxu1 %v4380_v53  ;;  %10740 = vmatprep.subr.mxu0 %v4412_v54 }
0x1650   :  { %10703 = vmatpush3.msra.mxu1 %v4364_v57  ;;  %10741 = vmatpush3.msra.mxu0 %v4396_v59  ;;  %v4438_v57 = vld [vmem:[%s14475_s14 + $0x268] sm:$0xff] }
0x1651   :  { %10704 = vmatprep.subr.mxu1 %v4379_v15  ;;  %10742 = vmatprep.subr.mxu0 %v4411_v61  ;;  %v4470_v59 = vld [vmem:[%s14475_s14 + $0x368] sm:$0xff]  ;;  %v4453_v15 = vld [vmem:[%s14475_s14 + $0x2e0] sm:$0xff] }
0x1652   :  { %10705 = vmatpush3.msra.mxu1 %v4363_v63  ;;  %10743 = vmatpush3.msra.mxu0 %v4395_v0  ;;  %v4485_v61 = vld [vmem:[%s14475_s14 + $0x3e0] sm:$0xff] }
0x1653   :  { %10706 = vmatprep.subr.mxu1 %v4378_v1  ;;  %10744 = vmatprep.subr.mxu0 %v4410_v2  ;;  %v4437_v63 = vld [vmem:[%s14475_s14 + $0x260] sm:$0xff]  ;;  %v13160_v1 = vsub.s32 5, %v12422_v27  ;;  %v13163_v2 = vsub.s32 7, %v12422_v27 }
0x1654   :  { %10707 = vmatpush3.msra.mxu1 %v4362_v3  ;;  %10745 = vmatpush3.msra.mxu0 %v4394_v17  ;;  %v4469_v0 = vld [vmem:[%s14475_s14 + $0x360] sm:$0xff]  ;;  %v4452_v3 = vld [vmem:[%s14475_s14 + $0x2d8] sm:$0xff] }
0x1655   :  { %10708 = vmatprep.subr.mxu1 %v4377_v6  ;;  %10746 = vmatprep.subr.mxu0 %v4409_v8  ;;  %v4484_v17 = vld [vmem:[%s14475_s14 + $0x3d8] sm:$0xff] }
0x1656   :  { %10709 = vmatpush3.msra.mxu1 %v4361_v39  ;;  %10747 = vmatpush3.msra.mxu0 %v4393_v46  ;;  %v4436_v6 = vld [vmem:[%s14475_s14 + $0x258] sm:$0xff]  ;;  %v4451_v39 = vld [vmem:[%s14475_s14 + $0x2d0] sm:$0xff] }
0x1657   :  { %10754 = vmatprep.subr.mxu1 %v4456_v60  ;;  %10792 = vmatprep.subr.mxu0 %v4488_v62  ;;  %v4468_v8 = vld [vmem:[%s14475_s14 + $0x358] sm:$0xff]  ;;  %v4483_v46 = vld [vmem:[%s14475_s14 + $0x3d0] sm:$0xff]  ;;  %v13173_v60 = vrot.slane %v13132_v42, %v13160_v1  ;;  %v13177_v62 = vrot.slane %v13132_v42, %v13163_v2 }
0x16b9   :  { %v3779_v11 = vpop.f32.mrf.mxu1  ;;  %v3856_v12 = vpop.f32.mrf.mxu0 }
0x16ba   :  { %v3780_v58 = vadd.f32 %v3779_v11, %v3630_v21  ;;  %v3857_v10 = vadd.f32 %v3856_v12, %v3638_v7  ;;  %v4450_v11 = vld [vmem:[%s14475_s14 + $0x2c8] sm:$0xff] }
0x16bb   :  { %v3781_v13 = vpop.f32.mrf.mxu1  ;;  %v3858_v16 = vpop.f32.mrf.mxu0  ;;  %v4482_v12 = vld [vmem:[%s14475_s14 + $0x3c8] sm:$0xff] }
0x16bc   :  { %v3782_v32 = vadd.f32 %v3781_v13, %v3634_v56  ;;  %v3859_v40 = vadd.f32 %v3858_v16, %v3642_v9  ;;  %v4329_v23 = vmax.f32 %v3780_v58, 0.0  ;;  %v4331_v24 = vmax.f32 %v3857_v10, 0.0  ;;  %v4434_v58 = vld [vmem:[%s14475_s14 + $0x248] sm:$0xff] }
0x16bd   :  { %v4466_v10 = vld [vmem:[%s14475_s14 + $0x348] sm:$0xff] }
0x16be   :  { %v4330_v20 = vmax.f32 %v3782_v32, 0.0  ;;  %v4332_v22 = vmax.f32 %v3859_v40, 0.0  ;;  %v4449_v32 = vld [vmem:[%s14475_s14 + $0x2c0] sm:$0xff] }
0x16bf   :  { %v3785_v25 = vpop.f32.mrf.mxu1  ;;  %v3862_v26 = vpop.f32.mrf.mxu0  ;;  %v4481_v40 = vld [vmem:[%s14475_s14 + $0x3c0] sm:$0xff] }
0x16c0   :  { %4688 = vmatprep.mubr.f32.mxu1 %v4330_v20  ;;  %4763 = vmatprep.mubr.f32.mxu0 %v4332_v22  ;;  %v3786_v37 = vadd.f32 %v3785_v25, %v3630_v21  ;;  %v3863_v43 = vadd.f32 %v3862_v26, %v3638_v7  ;;  %v4435_v21 = vld [vmem:[%s14475_s14 + $0x250] sm:$0xff] }
0x16c1   :  { %v3787_v45 = vpop.f32.mrf.mxu1  ;;  %v3864_v35 = vpop.f32.mrf.mxu0  ;;  %4689 = vmatmul.mubr.f32.vlgmr.msra.gmra.mxu1 %v4329_v23  ;;  %4764 = vmatmul.mubr.f32.vlgmr.msra.gmra.mxu0 %v4331_v24  ;;  %v4467_v7 = vld [vmem:[%s14475_s14 + $0x350] sm:$0xff]  ;;  %v4433_v23 = vld [vmem:[%s14475_s14 + $0x240] sm:$0xff] }
0x16c2   :  { %v3788_v44 = vadd.f32 %v3787_v45, %v3634_v56  ;;  %v3865_v47 = vadd.f32 %v3864_v35, %v3642_v9  ;;  %10755 = vmatpush3.msra.mxu1 %v4440_v29  ;;  %10793 = vmatpush3.msra.mxu0 %v4472_v30  ;;  %v4345_v53 = vmax.f32 %v3786_v37, 0.0  ;;  %v4347_v54 = vmax.f32 %v3863_v43, 0.0  ;;  %v4465_v24 = vld [vmem:[%s14475_s14 + $0x340] sm:$0xff]  ;;  %v4448_v29 = vld [vmem:[%s14475_s14 + $0x2b8] sm:$0xff]  ;;  %v4447_v37 = vld [vmem:[%s14475_s14 + $0x2b0] sm:$0xff] }
0x16c3   :  { %10756 = vmatprep.subr.mxu1 %v4455_v31  ;;  %10794 = vmatprep.subr.mxu0 %v4487_v34  ;;  %v4480_v30 = vld [vmem:[%s14475_s14 + $0x3b8] sm:$0xff]  ;;  %v4479_v43 = vld [vmem:[%s14475_s14 + $0x3b0] sm:$0xff] }
0x16c4   :  { %v4346_v51 = vmax.f32 %v3788_v44, 0.0  ;;  %v4348_v52 = vmax.f32 %v3865_v47, 0.0  ;;  %10757 = vmatpush3.msra.mxu1 %v4439_v36  ;;  %10795 = vmatpush3.msra.mxu0 %v4471_v41  ;;  %v4432_v31 = vld [vmem:[%s14475_s14 + $0x238] sm:$0xff]  ;;  %v4431_v45 = vld [vmem:[%s14475_s14 + $0x230] sm:$0xff]  ;;  %v4446_v36 = vld [vmem:[%s14475_s14 + $0x2a8] sm:$0xff]  ;;  %v13206_v44 = vsub.s32 4, %v12422_v27 }
0x16c5   :  { %10758 = vmatprep.subr.mxu1 %v4454_v48  ;;  %10796 = vmatprep.subr.mxu0 %v4486_v50  ;;  %v4464_v34 = vld [vmem:[%s14475_s14 + $0x338] sm:$0xff]  ;;  %v4463_v35 = vld [vmem:[%s14475_s14 + $0x330] sm:$0xff]  ;;  %v4478_v41 = vld [vmem:[%s14475_s14 + $0x3a8] sm:$0xff]  ;;  %v13209_v47 = vsub.s32 6, %v12422_v27 }
0x16c6   :  { %4693 = vmatprep.mubr.f32.mxu1 %v4346_v51  ;;  %4768 = vmatprep.mubr.f32.mxu0 %v4348_v52  ;;  %v4430_v48 = vld [vmem:[%s14475_s14 + $0x228] sm:$0xff]  ;;  %v4445_v51 = vld [vmem:[%s14475_s14 + $0x2a0] sm:$0xff] }
0x16c7   :  { %4694 = vmatmul.mubr.f32.gmra.mxu1 %v4345_v53  ;;  %4769 = vmatmul.mubr.f32.gmra.mxu0 %v4347_v54  ;;  %v4462_v50 = vld [vmem:[%s14475_s14 + $0x328] sm:$0xff]  ;;  %v4477_v52 = vld [vmem:[%s14475_s14 + $0x3a0] sm:$0xff] }
0x16c8   :  { %10759 = vmatpush3.msra.mxu1 %v4438_v57  ;;  %10797 = vmatpush3.msra.mxu0 %v4470_v59  ;;  %v4429_v53 = vld [vmem:[%s14475_s14 + $0x220] sm:$0xff]  ;;  %v4444_v59 = vld [vmem:[%s14475_s14 + $0x298] sm:$0xff] }
0x16c9   :  { %10760 = vmatprep.subr.mxu1 %v4453_v15  ;;  %10798 = vmatprep.subr.mxu0 %v4485_v61  ;;  %v4461_v54 = vld [vmem:[%s14475_s14 + $0x320] sm:$0xff]  ;;  %v4476_v15 = vld [vmem:[%s14475_s14 + $0x398] sm:$0xff]  ;;  %v3646_v61 = vrot.slane %v13132_v42, %v13206_v44 }
0x16ca   :  { %10761 = vmatpush3.msra.mxu1 %v4437_v63  ;;  %10799 = vmatpush3.msra.mxu0 %v4469_v0  ;;  %v3654_v63 = vrot.slane %v13132_v42, %v13209_v47  ;;  %v4428_v0 = vld [vmem:[%s14475_s14 + $0x218] sm:$0xff] }
0x16cb   :  { %10762 = vmatprep.subr.mxu1 %v4452_v3  ;;  %10800 = vmatprep.subr.mxu0 %v4484_v17  ;;  %v4460_v3 = vld [vmem:[%s14475_s14 + $0x318] sm:$0xff]  ;;  %v4443_v17 = vld [vmem:[%s14475_s14 + $0x290] sm:$0xff] }
0x16cc   :  { %v13181_v56 = vpop.f32.mrf.mxu1  ;;  %v13183_v9 = vpop.f32.mrf.mxu0  ;;  %10763 = vmatpush3.msra.mxu1 %v4436_v6  ;;  %10801 = vmatpush3.msra.mxu0 %v4468_v8  ;;  %v4475_v6 = vld [vmem:[%s14475_s14 + $0x390] sm:$0xff] }
0x16cd   :  { %10764 = vmatprep.subr.mxu1 %v4451_v39  ;;  %10802 = vmatprep.subr.mxu0 %v4483_v46  ;;  %v4427_v8 = vld [vmem:[%s14475_s14 + $0x210] sm:$0xff] }
0x16ce   :  { %v3935_v13 = vpop.f32.mrf.mxu1  ;;  %v4012_v16 = vpop.f32.mrf.mxu0  ;;  %10765 = vmatpush3.msra.mxu1 %v4435_v21  ;;  %10803 = vmatpush3.msra.mxu0 %v4467_v7  ;;  %v4459_v39 = vld [vmem:[%s14475_s14 + $0x310] sm:$0xff]  ;;  %v4442_v21 = vld [vmem:[%s14475_s14 + $0x288] sm:$0xff] }
0x16cf   :  { %v3936_v20 = vadd.f32 %v3935_v13, %v13173_v60  ;;  %v4013_v22 = vadd.f32 %v4012_v16, %v13177_v62  ;;  %10766 = vmatprep.subr.mxu1 %v4450_v11  ;;  %10804 = vmatprep.subr.mxu0 %v4482_v12  ;;  %v4474_v7 = vld [vmem:[%s14475_s14 + $0x388] sm:$0xff]  ;;  %v3934_v11 = vadd.f32 %v13181_v56, %v3646_v61  ;;  %v4441_v13 = vld [vmem:[%s14475_s14 + $0x280] sm:$0xff] }
0x16d0   :  { %10767 = vmatpush3.msra.mxu1 %v4434_v58  ;;  %10805 = vmatpush3.msra.mxu0 %v4466_v10  ;;  %v4011_v12 = vadd.f32 %v13183_v9, %v3654_v63  ;;  %v4426_v58 = vld [vmem:[%s14475_s14 + $0x208] sm:$0xff]  ;;  %v4473_v16 = vld [vmem:[%s14475_s14 + $0x380] sm:$0xff] }
0x16d1   :  { %v4334_v25 = vmax.f32 %v3936_v20, 0.0  ;;  %v4336_v26 = vmax.f32 %v4013_v22, 0.0  ;;  %10768 = vmatprep.subr.mxu1 %v4449_v32  ;;  %10806 = vmatprep.subr.mxu0 %v4481_v40  ;;  %v4458_v10 = vld [vmem:[%s14475_s14 + $0x308] sm:$0xff]  ;;  %v4425_v9 = vld [vmem:[%s14475_s14 + $0x200] sm:$0xff] }
0x16d2   :  { %10769 = vmatpush3.msra.mxu1 %v4433_v23  ;;  %10807 = vmatpush3.msra.mxu0 %v4465_v24  ;;  %v3939_v27 = vpop.f32.mrf.mxu1  ;;  %v4016_v57 = vpop.f32.mrf.mxu0  ;;  %v4457_v22 = vld [vmem:[%s14475_s14 + $0x300] sm:$0xff]  ;;  %v13246_v23 = vld [vmem:[%s14476_s19 + $0x8] sm:$0xff]  ;;  %v4333_v24 = vmax.f32 %v3934_v11, 0.0  ;;  %v4547_v11 = vld [vmem:[%s14475_s14 + $0x5d0] sm:$0xff] }
0x16d3   :  { %4838 = vmatprep.mubr.f32.mxu1 %v4334_v25  ;;  %4913 = vmatprep.mubr.f32.mxu0 %v4336_v26  ;;  %v4335_v25 = vmax.f32 %v4011_v12, 0.0  ;;  %v4552_v26 = vld [vmem:[%s14475_s14 + $0x5f8] sm:$0xff]  ;;  %v4499_v12 = vld [vmem:[%s14475_s14 + $0x450] sm:$0xff] }
0x16d4   :  { %10770 = vmatprep.subr.mxu1 %v4448_v29  ;;  %10808 = vmatprep.subr.mxu0 %v4480_v30  ;;  %v3941_v46 = vpop.f32.mrf.mxu1  ;;  %v4018_v42 = vpop.f32.mrf.mxu0  ;;  %v13256_v30 = vrot.slane %v13246_v23, %v13135_v19 }
0x16d5   :  { %10771 = vmatpush3.msra.mxu1 %v4432_v31  ;;  %10809 = vmatpush3.msra.mxu0 %v4464_v34  ;;  %v3942_v32 = vadd.f32 %v3941_v46, %v13173_v60  ;;  %v4019_v40 = vadd.f32 %v4018_v42, %v13177_v62  ;;  %v13250_v60 = vrot.slane %v13246_v23, %v12432_v33  ;;  %v4520_v62 = vld [vmem:[%s14475_s14 + $0x4f8] sm:$0xff] }
0x16d6   :  { %10772 = vmatprep.subr.mxu1 %v4447_v37  ;;  %10810 = vmatprep.subr.mxu0 %v4479_v43  ;;  %v3940_v31 = vadd.f32 %v3939_v27, %v3646_v61  ;;  %v4017_v34 = vadd.f32 %v4016_v57, %v3654_v63  ;;  %v4518_v57 = vld [vmem:[%s14475_s14 + $0x4e8] sm:$0xff]  ;;  %v4548_v46 = vld [vmem:[%s14475_s14 + $0x5d8] sm:$0xff] }
0x16d7   :  { %10773 = vmatpush3.msra.mxu1 %v4431_v45  ;;  %10811 = vmatpush3.msra.mxu0 %v4463_v35  ;;  %v4350_v37 = vmax.f32 %v3942_v32, 0.0  ;;  %v4352_v43 = vmax.f32 %v4019_v40, 0.0  ;;  %v4504_v35 = vld [vmem:[%s14475_s14 + $0x478] sm:$0xff]  ;;  %v4534_v63 = vld [vmem:[%s14475_s14 + $0x568] sm:$0xff]  ;;  %v4513_v40 = vld [vmem:[%s14475_s14 + $0x4c0] sm:$0xff] }
0x16d8   :  { %10774 = vmatprep.subr.mxu1 %v4446_v36  ;;  %10812 = vmatprep.subr.mxu0 %v4478_v41  ;;  %v4536_v36 = vld [vmem:[%s14475_s14 + $0x578] sm:$0xff]  ;;  %v4519_v41 = vld [vmem:[%s14475_s14 + $0x4f0] sm:$0xff]  ;;  %v4351_v27 = vmax.f32 %v4017_v34, 0.0  ;;  %v4530_v32 = vld [vmem:[%s14475_s14 + $0x548] sm:$0xff] }
0x16d9   :  { %10775 = vmatpush3.msra.mxu1 %v4430_v48  ;;  %10813 = vmatpush3.msra.mxu0 %v4462_v50  ;;  %v4551_v48 = vld [vmem:[%s14475_s14 + $0x5f0] sm:$0xff]  ;;  %v4500_v42 = vld [vmem:[%s14475_s14 + $0x458] sm:$0xff] }
0x16da   :  { %10776 = vmatprep.subr.mxu1 %v4445_v51  ;;  %10814 = vmatprep.subr.mxu0 %v4477_v52  ;;  %v4503_v51 = vld [vmem:[%s14475_s14 + $0x470] sm:$0xff] }
0x16db   :  { %10777 = vmatpush3.msra.mxu1 %v4429_v53  ;;  %10815 = vmatpush3.msra.mxu0 %v4461_v54  ;;  %v4535_v52 = vld [vmem:[%s14475_s14 + $0x570] sm:$0xff]  ;;  %v4349_v54 = vmax.f32 %v3940_v31, 0.0 }
0x16dc   :  { %10778 = vmatprep.subr.mxu1 %v4444_v59  ;;  %10816 = vmatprep.subr.mxu0 %v4476_v15  ;;  %v4550_v59 = vld [vmem:[%s14475_s14 + $0x5e8] sm:$0xff]  ;;  %v4511_v31 = vld [vmem:[%s14475_s14 + $0x4b0] sm:$0xff] }
0x16dd   :  { %10779 = vmatpush3.msra.mxu1 %v4428_v0  ;;  %10817 = vmatpush3.msra.mxu0 %v4460_v3  ;;  %v4502_v15 = vld [vmem:[%s14475_s14 + $0x468] sm:$0xff]  ;;  %v4517_v3 = vld [vmem:[%s14475_s14 + $0x4e0] sm:$0xff]  ;;  %v4543_v34 = vld [vmem:[%s14475_s14 + $0x5b0] sm:$0xff] }
0x16de   :  { %10780 = vmatprep.subr.mxu1 %v4443_v17  ;;  %10818 = vmatprep.subr.mxu0 %v4475_v6  ;;  %v4549_v17 = vld [vmem:[%s14475_s14 + $0x5e0] sm:$0xff] }
0x16df   :  { %10781 = vmatpush3.msra.mxu1 %v4427_v8  ;;  %10819 = vmatpush3.msra.mxu0 %v4459_v39  ;;  %v4501_v6 = vld [vmem:[%s14475_s14 + $0x460] sm:$0xff]  ;;  %v4516_v39 = vld [vmem:[%s14475_s14 + $0x4d8] sm:$0xff] }
0x16e0   :  { %v13239_v56 = vpop.f32.mrf.mxu1  ;;  %v13241_v20 = vpop.f32.mrf.mxu0  ;;  %10782 = vmatprep.subr.mxu1 %v4442_v21  ;;  %10820 = vmatprep.subr.mxu0 %v4474_v7  ;;  %v4533_v8 = vld [vmem:[%s14475_s14 + $0x560] sm:$0xff]  ;;  %v4532_v21 = vld [vmem:[%s14475_s14 + $0x558] sm:$0xff]  ;;  %v4515_v7 = vld [vmem:[%s14475_s14 + $0x4d0] sm:$0xff] }
0x16e1   :  { %10783 = vmatpush3.msra.mxu1 %v4426_v58  ;;  %10821 = vmatpush3.msra.mxu0 %v4458_v10  ;;  %v4531_v58 = vld [vmem:[%s14475_s14 + $0x550] sm:$0xff]  ;;  %v4514_v10 = vld [vmem:[%s14475_s14 + $0x4c8] sm:$0xff] }
0x16e2   :  { %10784 = vmatprep.subr.mxu1 %v4441_v13  ;;  %10822 = vmatprep.subr.mxu0 %v4473_v16  ;;  %v4089_v29 = vpop.f32.mrf.mxu1  ;;  %v4166_v45 = vpop.f32.mrf.mxu0  ;;  %v4546_v13 = vld [vmem:[%s14475_s14 + $0x5c8] sm:$0xff] }
0x16e3   :  { %10785 = vmatpush3.msra.mxu1 %v4425_v9  ;;  %10823 = vmatpush3.msra.mxu0 %v4457_v22  ;;  %v4090_v50 = vadd.f32 %v4089_v29, %v13250_v60  ;;  %v4167_v53 = vadd.f32 %v4166_v45, %v13256_v30  ;;  %v4498_v16 = vld [vmem:[%s14475_s14 + $0x448] sm:$0xff]  ;;  %v4545_v9 = vld [vmem:[%s14475_s14 + $0x5c0] sm:$0xff]  ;;  %v4528_v29 = vld [vmem:[%s14475_s14 + $0x538] sm:$0xff] }
0x16e4   :  { %4839 = vmatmul.mubr.f32.vlgmr.msra.gmra.mxu1 %v4333_v24  ;;  %4914 = vmatmul.mubr.f32.vlgmr.msra.gmra.mxu0 %v4335_v25  ;;  %v4497_v22 = vld [vmem:[%s14475_s14 + $0x440] sm:$0xff]  ;;  %v4512_v25 = vld [vmem:[%s14475_s14 + $0x4b8] sm:$0xff]  ;;  %v4510_v45 = vld [vmem:[%s14475_s14 + $0x4a8] sm:$0xff] }
0x16e5   :  { %10830 = vmatprep.subr.mxu1 %v4520_v62  ;;  %10868 = vmatprep.subr.mxu0 %v4552_v26  ;;  %v4338_v61 = vmax.f32 %v4090_v50, 0.0  ;;  %v4340_v0 = vmax.f32 %v4167_v53, 0.0  ;;  %v4529_v24 = vld [vmem:[%s14475_s14 + $0x540] sm:$0xff]  ;;  %v4544_v62 = vld [vmem:[%s14475_s14 + $0x5b8] sm:$0xff] }
0x16e6   :  { %4843 = vmatprep.mubr.f32.mxu1 %v4350_v37  ;;  %4918 = vmatprep.mubr.f32.mxu0 %v4352_v43  ;;  %v4496_v26 = vld [vmem:[%s14475_s14 + $0x438] sm:$0xff]  ;;  %v4495_v37 = vld [vmem:[%s14475_s14 + $0x430] sm:$0xff]  ;;  %v4541_v50 = vld [vmem:[%s14475_s14 + $0x5a0] sm:$0xff]  ;;  %v4093_v53 = vpop.f32.mrf.mxu1 }
0x16e7   :  { %10831 = vmatpush3.msra.mxu1 %v4504_v35  ;;  %10869 = vmatpush3.msra.mxu0 %v4536_v36  ;;  %v4527_v43 = vld [vmem:[%s14475_s14 + $0x530] sm:$0xff]  ;;  %v4542_v35 = vld [vmem:[%s14475_s14 + $0x5a8] sm:$0xff] }
0x16e8   :  { %10832 = vmatprep.subr.mxu1 %v4519_v41  ;;  %10870 = vmatprep.subr.mxu0 %v4551_v48  ;;  %v4494_v36 = vld [vmem:[%s14475_s14 + $0x428] sm:$0xff]  ;;  %v4509_v48 = vld [vmem:[%s14475_s14 + $0x4a0] sm:$0xff] }
0x16e9   :  { %10833 = vmatpush3.msra.mxu1 %v4503_v51  ;;  %10871 = vmatpush3.msra.mxu0 %v4535_v52  ;;  %v4526_v41 = vld [vmem:[%s14475_s14 + $0x528] sm:$0xff]  ;;  %v4493_v51 = vld [vmem:[%s14475_s14 + $0x420] sm:$0xff] }
0x16ea   :  { %4844 = vmatmul.mubr.f32.gmra.mxu1 %v4349_v54  ;;  %4919 = vmatmul.mubr.f32.gmra.mxu0 %v4351_v27  ;;  %v4525_v52 = vld [vmem:[%s14475_s14 + $0x520] sm:$0xff]  ;;  %v4170_v54 = vpop.f32.mrf.mxu0  ;;  %v4508_v27 = vld [vmem:[%s14475_s14 + $0x498] sm:$0xff] }
0x16eb   :  { %10834 = vmatprep.subr.mxu1 %v4518_v57  ;;  %10872 = vmatprep.subr.mxu0 %v4550_v59  ;;  %v4540_v57 = vld [vmem:[%s14475_s14 + $0x598] sm:$0xff]  ;;  %v3662_v59 = vrot.slane %v13246_v23, %v12425_v28 }
0x16ec   :  { %10835 = vmatpush3.msra.mxu1 %v4502_v15  ;;  %4988 = vmatprep.mubr.f32.mxu1 %v4338_v61  ;;  %v3670_v15 = vrot.slane %v13246_v23, %v13129_v38  ;;  %v4492_v61 = vld [vmem:[%s14475_s14 + $0x418] sm:$0xff] }
0x16ed   :  { %10873 = vmatpush3.msra.mxu0 %v4534_v63  ;;  %5063 = vmatprep.mubr.f32.mxu0 %v4340_v0  ;;  %v4524_v63 = vld [vmem:[%s14475_s14 + $0x518] sm:$0xff]  ;;  %v4507_v0 = vld [vmem:[%s14475_s14 + $0x490] sm:$0xff] }
0x16ee   :  { %10836 = vmatprep.subr.mxu1 %v4517_v3  ;;  %10874 = vmatprep.subr.mxu0 %v4549_v17  ;;  %v4539_v3 = vld [vmem:[%s14475_s14 + $0x590] sm:$0xff] }
0x16ef   :  { %10837 = vmatpush3.msra.mxu1 %v4501_v6  ;;  %10875 = vmatpush3.msra.mxu0 %v4533_v8  ;;  %v4491_v17 = vld [vmem:[%s14475_s14 + $0x410] sm:$0xff]  ;;  %v4095_v8 = vpop.f32.mrf.mxu1 }
0x16f0   :  { %10838 = vmatprep.subr.mxu1 %v4516_v39  ;;  %10876 = vmatprep.subr.mxu0 %v4548_v46  ;;  %v4523_v6 = vld [vmem:[%s14475_s14 + $0x510] sm:$0xff]  ;;  %v4172_v39 = vpop.f32.mrf.mxu0  ;;  %v4506_v46 = vld [vmem:[%s14475_s14 + $0x488] sm:$0xff] }
0x16f1   :  { %10839 = vmatpush3.msra.mxu1 %v4500_v42  ;;  %10877 = vmatpush3.msra.mxu0 %v4532_v21  ;;  %v4538_v42 = vld [vmem:[%s14475_s14 + $0x588] sm:$0xff]  ;;  %v4088_v21 = vadd.f32 %v13239_v56, %v3662_v59  ;;  %v4173_v56 = vadd.f32 %v4172_v39, %v13256_v30  ;;  %v4616_v30 = vld [vmem:[%s14475_s14 + $0x7f8] sm:$0xff] }
0x16f2   :  { %10840 = vmatprep.subr.mxu1 %v4515_v7  ;;  %10878 = vmatprep.subr.mxu0 %v4547_v11  ;;  %v4165_v7 = vadd.f32 %v13241_v20, %v3670_v15  ;;  %v4490_v11 = vld [vmem:[%s14475_s14 + $0x408] sm:$0xff]  ;;  %v4489_v20 = vld [vmem:[%s14475_s14 + $0x400] sm:$0xff]  ;;  %v4564_v39 = vld [vmem:[%s14475_s14 + $0x658] sm:$0xff] }
0x16f3   :  { %10841 = vmatpush3.msra.mxu1 %v4499_v12  ;;  %10879 = vmatpush3.msra.mxu0 %v4531_v58  ;;  %v4522_v12 = vld [vmem:[%s14475_s14 + $0x508] sm:$0xff] }
0x16f4   :  { %10842 = vmatprep.subr.mxu1 %v4514_v10  ;;  %10880 = vmatprep.subr.mxu0 %v4546_v13  ;;  %v13324_v58 = vpop.f32.mrf.mxu1  ;;  %v4505_v10 = vld [vmem:[%s14475_s14 + $0x480] sm:$0xff] }
0x16f5   :  { %10843 = vmatpush3.msra.mxu1 %v4498_v16  ;;  %10881 = vmatpush3.msra.mxu0 %v4530_v32  ;;  %v4537_v13 = vld [vmem:[%s14475_s14 + $0x580] sm:$0xff]  ;;  %v4096_v16 = vadd.f32 %v4095_v8, %v13250_v60  ;;  %v13330_v32 = vpop.f32.mrf.mxu0  ;;  %v4584_v60 = vld [vmem:[%s14475_s14 + $0x6f8] sm:$0xff] }
0x16f6   :  { %10844 = vmatprep.subr.mxu1 %v4513_v40  ;;  %10882 = vmatprep.subr.mxu0 %v4545_v9  ;;  %v4521_v40 = vld [vmem:[%s14475_s14 + $0x500] sm:$0xff]  ;;  %v4337_v9 = vmax.f32 %v4088_v21, 0.0  ;;  %v4612_v8 = vld [vmem:[%s14475_s14 + $0x7d8] sm:$0xff]  ;;  %v4611_v21 = vld [vmem:[%s14475_s14 + $0x7d0] sm:$0xff] }
0x16f7   :  { %10845 = vmatpush3.msra.mxu1 %v4497_v22  ;;  %10883 = vmatpush3.msra.mxu0 %v4529_v24  ;;  %v4339_v22 = vmax.f32 %v4165_v7, 0.0  ;;  %v13336_v24 = vrot.slane %v13246_v23, %v13160_v1  ;;  %v4563_v7 = vld [vmem:[%s14475_s14 + $0x650] sm:$0xff] }
0x16f8   :  { %10846 = vmatprep.subr.mxu1 %v4512_v25  ;;  %10884 = vmatprep.subr.mxu0 %v4544_v62  ;;  %v4243_v25 = vpop.f32.mrf.mxu1  ;;  %v13342_v62 = vrot.slane %v13246_v23, %v13163_v2 }
0x16f9   :  { %10847 = vmatpush3.msra.mxu1 %v4496_v26  ;;  %10885 = vmatpush3.msra.mxu0 %v4528_v29  ;;  %v4094_v26 = vadd.f32 %v4093_v53, %v3662_v59  ;;  %v4171_v29 = vadd.f32 %v4170_v54, %v3670_v15  ;;  %v4582_v54 = vld [vmem:[%s14475_s14 + $0x6e8] sm:$0xff] }
0x16fa   :  { %10848 = vmatprep.subr.mxu1 %v4511_v31  ;;  %10886 = vmatprep.subr.mxu0 %v4543_v34  ;;  %v4354_v31 = vmax.f32 %v4096_v16, 0.0  ;;  %v4356_v34 = vmax.f32 %v4173_v56, 0.0  ;;  %v4598_v15 = vld [vmem:[%s14475_s14 + $0x768] sm:$0xff]  ;;  %v4577_v56 = vld [vmem:[%s14475_s14 + $0x6c0] sm:$0xff] }
0x16fb   :  { %10849 = vmatpush3.msra.mxu1 %v4495_v37  ;;  %10887 = vmatpush3.msra.mxu0 %v4527_v43  ;;  %v4320_v37 = vpop.f32.mrf.mxu0  ;;  %v4568_v43 = vld [vmem:[%s14475_s14 + $0x678] sm:$0xff]  ;;  %v4355_v53 = vmax.f32 %v4171_v29, 0.0  ;;  %v4594_v16 = vld [vmem:[%s14475_s14 + $0x748] sm:$0xff]  ;;  %v4607_v29 = vld [vmem:[%s14475_s14 + $0x7b0] sm:$0xff] }
0x16fc   :  { %10850 = vmatprep.subr.mxu1 %v4510_v45  ;;  %10888 = vmatprep.subr.mxu0 %v4542_v35  ;;  %v4600_v45 = vld [vmem:[%s14475_s14 + $0x778] sm:$0xff]  ;;  %v4583_v35 = vld [vmem:[%s14475_s14 + $0x6f0] sm:$0xff] }
0x16fd   :  { %10851 = vmatpush3.msra.mxu1 %v4494_v36  ;;  %10889 = vmatpush3.msra.mxu0 %v4526_v41  ;;  %v4615_v36 = vld [vmem:[%s14475_s14 + $0x7f0] sm:$0xff]  ;;  %v4244_v41 = vadd.f32 %v4243_v25, %v13336_v24  ;;  %v4592_v25 = vld [vmem:[%s14475_s14 + $0x738] sm:$0xff] }
0x16fe   :  { %10852 = vmatprep.subr.mxu1 %v4509_v48  ;;  %10890 = vmatprep.subr.mxu0 %v4541_v50  ;;  %v4567_v48 = vld [vmem:[%s14475_s14 + $0x670] sm:$0xff] }
0x16ff   :  { %10853 = vmatpush3.msra.mxu1 %v4493_v51  ;;  %10891 = vmatpush3.msra.mxu0 %v4525_v52  ;;  %v4599_v50 = vld [vmem:[%s14475_s14 + $0x770] sm:$0xff]  ;;  %v4321_v51 = vadd.f32 %v4320_v37, %v13342_v62  ;;  %v4353_v52 = vmax.f32 %v4094_v26, 0.0  ;;  %v4342_v59 = vmax.f32 %v4244_v41, 0.0  ;;  %v4574_v37 = vld [vmem:[%s14475_s14 + $0x6a8] sm:$0xff]  ;;  %v4605_v41 = vld [vmem:[%s14475_s14 + $0x7a0] sm:$0xff] }
0x1700   :  { %10854 = vmatprep.subr.mxu1 %v4508_v27  ;;  %10892 = vmatprep.subr.mxu0 %v4540_v57  ;;  %v4614_v27 = vld [vmem:[%s14475_s14 + $0x7e8] sm:$0xff]  ;;  %v4575_v26 = vld [vmem:[%s14475_s14 + $0x6b0] sm:$0xff] }
0x1701   :  { %10855 = vmatpush3.msra.mxu1 %v4492_v61  ;;  %10893 = vmatpush3.msra.mxu0 %v4524_v63  ;;  %v4566_v57 = vld [vmem:[%s14475_s14 + $0x668] sm:$0xff]  ;;  %v4344_v61 = vmax.f32 %v4321_v51, 0.0  ;;  %v4581_v63 = vld [vmem:[%s14475_s14 + $0x6e0] sm:$0xff] }
0x1702   :  { %10856 = vmatprep.subr.mxu1 %v4507_v0  ;;  %10894 = vmatprep.subr.mxu0 %v4539_v3  ;;  %v4613_v0 = vld [vmem:[%s14475_s14 + $0x7e0] sm:$0xff] }
0x1703   :  { %10857 = vmatpush3.msra.mxu1 %v4491_v17  ;;  %10895 = vmatpush3.msra.mxu0 %v4523_v6  ;;  %v4565_v3 = vld [vmem:[%s14475_s14 + $0x660] sm:$0xff]  ;;  %v4580_v6 = vld [vmem:[%s14475_s14 + $0x6d8] sm:$0xff] }
0x1704   :  { %10858 = vmatprep.subr.mxu1 %v4506_v46  ;;  %10896 = vmatprep.subr.mxu0 %v4538_v42  ;;  %v4597_v17 = vld [vmem:[%s14475_s14 + $0x760] sm:$0xff]  ;;  %v4596_v46 = vld [vmem:[%s14475_s14 + $0x758] sm:$0xff]  ;;  %v4579_v42 = vld [vmem:[%s14475_s14 + $0x6d0] sm:$0xff] }
0x1705   :  { %10859 = vmatpush3.msra.mxu1 %v4490_v11  ;;  %10897 = vmatpush3.msra.mxu0 %v4522_v12  ;;  %v4595_v11 = vld [vmem:[%s14475_s14 + $0x750] sm:$0xff]  ;;  %v4578_v12 = vld [vmem:[%s14475_s14 + $0x6c8] sm:$0xff]  ;;  %v4557_v51 = vld [vmem:[%s14475_s14 + $0x620] sm:$0xff] }
0x1706   :  { %10860 = vmatprep.subr.mxu1 %v4505_v10  ;;  %10898 = vmatprep.subr.mxu0 %v4537_v13  ;;  %v4610_v10 = vld [vmem:[%s14475_s14 + $0x7c8] sm:$0xff] }
0x1707   :  { %10861 = vmatpush3.msra.mxu1 %v4489_v20  ;;  %10899 = vmatpush3.msra.mxu0 %v4521_v40  ;;  %v4562_v13 = vld [vmem:[%s14475_s14 + $0x648] sm:$0xff]  ;;  %v4609_v20 = vld [vmem:[%s14475_s14 + $0x7c0] sm:$0xff] }
0x1708   :  { %4989 = vmatmul.mubr.f32.vlgmr.msra.gmra.mxu1 %v4337_v9  ;;  %5064 = vmatmul.mubr.f32.vlgmr.msra.gmra.mxu0 %v4339_v22  ;;  %v4561_v40 = vld [vmem:[%s14475_s14 + $0x640] sm:$0xff]  ;;  %v4576_v22 = vld [vmem:[%s14475_s14 + $0x6b8] sm:$0xff] }
0x1709   :  { %10906 = vmatprep.subr.mxu1 %v4584_v60  ;;  %10944 = vmatprep.subr.mxu0 %v4616_v30  ;;  %v4593_v9 = vld [vmem:[%s14475_s14 + $0x740] sm:$0xff]  ;;  %v4608_v60 = vld [vmem:[%s14475_s14 + $0x7b8] sm:$0xff] }
0x170a   :  { %4993 = vmatprep.mubr.f32.mxu1 %v4354_v31  ;;  %5068 = vmatprep.mubr.f32.mxu0 %v4356_v34  ;;  %v4560_v30 = vld [vmem:[%s14475_s14 + $0x638] sm:$0xff]  ;;  %v4559_v31 = vld [vmem:[%s14475_s14 + $0x630] sm:$0xff] }
0x170b   :  { %10907 = vmatpush3.msra.mxu1 %v4568_v43  ;;  %10945 = vmatpush3.msra.mxu0 %v4600_v45  ;;  %v4591_v34 = vld [vmem:[%s14475_s14 + $0x730] sm:$0xff]  ;;  %v4606_v43 = vld [vmem:[%s14475_s14 + $0x7a8] sm:$0xff] }
0x170c   :  { %10908 = vmatprep.subr.mxu1 %v4583_v35  ;;  %10946 = vmatprep.subr.mxu0 %v4615_v36  ;;  %v4558_v45 = vld [vmem:[%s14475_s14 + $0x628] sm:$0xff]  ;;  %v4573_v36 = vld [vmem:[%s14475_s14 + $0x6a0] sm:$0xff] }
0x170d   :  { %10909 = vmatpush3.msra.mxu1 %v4567_v48  ;;  %10947 = vmatpush3.msra.mxu0 %v4599_v50  ;;  %v4590_v35 = vld [vmem:[%s14475_s14 + $0x728] sm:$0xff]  ;;  %v4247_v48 = vpop.f32.mrf.mxu1  ;;  %v4324_v50 = vpop.f32.mrf.mxu0 }
0x170e   :  { %4994 = vmatmul.mubr.f32.gmra.mxu1 %v4353_v52  ;;  %5069 = vmatmul.mubr.f32.gmra.mxu0 %v4355_v53  ;;  %v4589_v52 = vld [vmem:[%s14475_s14 + $0x720] sm:$0xff]  ;;  %v4572_v53 = vld [vmem:[%s14475_s14 + $0x698] sm:$0xff] }
0x170f   :  { %10910 = vmatprep.subr.mxu1 %v4582_v54  ;;  %10948 = vmatprep.subr.mxu0 %v4614_v27  ;;  %v4604_v54 = vld [vmem:[%s14475_s14 + $0x798] sm:$0xff]  ;;  %v3678_v27 = vrot.slane %v13246_v23, %v13206_v44 }
0x1710   :  { %10911 = vmatpush3.msra.mxu1 %v4566_v57  ;;  %5138 = vmatprep.mubr.f32.mxu1 %v4342_v59  ;;  %v3686_v57 = vrot.slane %v13246_v23, %v13209_v47  ;;  %v4556_v59 = vld [vmem:[%s14475_s14 + $0x618] sm:$0xff]  ;;  %v4570_v23 = vld [vmem:[%s14475_s14 + $0x688] sm:$0xff] }
0x1711   :  { %10949 = vmatpush3.msra.mxu0 %v4598_v15  ;;  %5213 = vmatprep.mubr.f32.mxu0 %v4344_v61  ;;  %v4588_v15 = vld [vmem:[%s14475_s14 + $0x718] sm:$0xff]  ;;  %v4571_v61 = vld [vmem:[%s14475_s14 + $0x690] sm:$0xff] }
0x1712   :  { %10912 = vmatprep.subr.mxu1 %v4581_v63  ;;  %10950 = vmatprep.subr.mxu0 %v4613_v0  ;;  %v4603_v63 = vld [vmem:[%s14475_s14 + $0x790] sm:$0xff]  ;;  %v4249_v0 = vpop.f32.mrf.mxu1 }
0x1713   :  { %10913 = vmatpush3.msra.mxu1 %v4565_v3  ;;  %10951 = vmatpush3.msra.mxu0 %v4597_v17  ;;  %v4326_v3 = vpop.f32.mrf.mxu0  ;;  %v4555_v17 = vld [vmem:[%s14475_s14 + $0x610] sm:$0xff] }
0x1714   :  { %10914 = vmatprep.subr.mxu1 %v4580_v6  ;;  %10952 = vmatprep.subr.mxu0 %v4612_v8  ;;  %v4587_v6 = vld [vmem:[%s14475_s14 + $0x710] sm:$0xff]  ;;  %v4602_v8 = vld [vmem:[%s14475_s14 + $0x788] sm:$0xff] }
0x1715   :  { %10915 = vmatpush3.msra.mxu1 %v4564_v39  ;;  %10953 = vmatpush3.msra.mxu0 %v4596_v46  ;;  %v4242_v39 = vadd.f32 %v13324_v58, %v3678_v27  ;;  %v4319_v46 = vadd.f32 %v13330_v32, %v3686_v57 }
0x1716   :  { %10916 = vmatprep.subr.mxu1 %v4579_v42  ;;  %10954 = vmatprep.subr.mxu0 %v4611_v21  ;;  %v4554_v42 = vld [vmem:[%s14475_s14 + $0x608] sm:$0xff] }
0x1717   :  { %10917 = vmatpush3.msra.mxu1 %v4563_v7  ;;  %10955 = vmatpush3.msra.mxu0 %v4595_v11  ;;  %v4586_v21 = vld [vmem:[%s14475_s14 + $0x708] sm:$0xff]  ;;  %v4250_v7 = vadd.f32 %v4249_v0, %v13336_v24  ;;  %v4327_v11 = vadd.f32 %v4326_v3, %v13342_v62  ;;  %v4341_v58 = vmax.f32 %v4242_v39, 0.0  ;;  %v4343_v32 = vmax.f32 %v4319_v46, 0.0 }
0x1718   :  { %10918 = vmatprep.subr.mxu1 %v4578_v12  ;;  %10956 = vmatprep.subr.mxu0 %v4610_v10  ;;  %v4569_v12 = vld [vmem:[%s14475_s14 + $0x680] sm:$0xff] }
0x1719   :  { %10919 = vmatpush3.msra.mxu1 %v4562_v13  ;;  %10957 = vmatpush3.msra.mxu0 %v4594_v16  ;;  %v4601_v10 = vld [vmem:[%s14475_s14 + $0x780] sm:$0xff]  ;;  %v4360_v24 = vmax.f32 %v4327_v11, 0.0 }
0x171a   :  { %10920 = vmatprep.subr.mxu1 %v4577_v56  ;;  %10958 = vmatprep.subr.mxu0 %v4609_v20  ;;  %v4553_v13 = vld [vmem:[%s14475_s14 + $0x600] sm:$0xff]  ;;  %v4248_v56 = vadd.f32 %v4247_v48, %v3678_v27  ;;  %v4325_v20 = vadd.f32 %v4324_v50, %v3686_v57 }
0x171b   :  { %10921 = vmatpush3.msra.mxu1 %v4561_v40  ;;  %10959 = vmatpush3.msra.mxu0 %v4593_v9  ;;  %v4585_v16 = vld [vmem:[%s14475_s14 + $0x700] sm:$0xff]  ;;  %v4358_v40 = vmax.f32 %v4250_v7, 0.0 }
0x171c   :  { %10922 = vmatprep.subr.mxu1 %v4576_v22  ;;  %10960 = vmatprep.subr.mxu0 %v4608_v60  ;;  %v4357_v62 = vmax.f32 %v4248_v56, 0.0  ;;  %v4359_v9 = vmax.f32 %v4325_v20, 0.0 }
0x171d   :  { %10923 = vmatpush3.msra.mxu1 %v4560_v30  ;;  %10961 = vmatpush3.msra.mxu0 %v4592_v25 }
0x171e   :  { %10924 = vmatprep.subr.mxu1 %v4575_v26  ;;  %10962 = vmatprep.subr.mxu0 %v4607_v29 }
0x171f   :  { %10925 = vmatpush3.msra.mxu1 %v4559_v31  ;;  %10963 = vmatpush3.msra.mxu0 %v4591_v34 }
0x1720   :  { %10926 = vmatprep.subr.mxu1 %v4574_v37  ;;  %10964 = vmatprep.subr.mxu0 %v4606_v43 }
0x1721   :  { %10927 = vmatpush3.msra.mxu1 %v4558_v45  ;;  %10965 = vmatpush3.msra.mxu0 %v4590_v35 }
0x1722   :  { %10928 = vmatprep.subr.mxu1 %v4573_v36  ;;  %10966 = vmatprep.subr.mxu0 %v4605_v41 }
0x1723   :  { %10929 = vmatpush3.msra.mxu1 %v4557_v51  ;;  %10967 = vmatpush3.msra.mxu0 %v4589_v52  ;;  %v10493_v51 = vld [vmem:[%s14477_s24] ss:$0 sm:$0xff] }
0x1724   :  { %10930 = vmatprep.subr.mxu1 %v4572_v53  ;;  %10968 = vmatprep.subr.mxu0 %v4604_v54 }
0x1725   :  { %10931 = vmatpush3.msra.mxu1 %v4556_v59  ;;  %10969 = vmatpush3.msra.mxu0 %v4588_v15 }
0x1726   :  { %10932 = vmatprep.subr.mxu1 %v4571_v61  ;;  %10970 = vmatprep.subr.mxu0 %v4603_v63 }
0x1727   :  { %10933 = vmatpush3.msra.mxu1 %v4555_v17  ;;  %10971 = vmatpush3.msra.mxu0 %v4587_v6 }
0x1728   :  { %10934 = vmatprep.subr.mxu1 %v4570_v23  ;;  %10972 = vmatprep.subr.mxu0 %v4602_v8 }
0x1729   :  { %10935 = vmatpush3.msra.mxu1 %v4554_v42  ;;  %10973 = vmatpush3.msra.mxu0 %v4586_v21 }
0x172a   :  { %10936 = vmatprep.subr.mxu1 %v4569_v12  ;;  %10974 = vmatprep.subr.mxu0 %v4601_v10 }
0x172b   :  { %10937 = vmatpush3.msra.mxu1 %v4553_v13  ;;  %10975 = vmatpush3.msra.mxu0 %v4585_v16 }
0x172c   :  { %5139 = vmatmul.mubr.f32.vlgmr.msra.gmra.mxu1 %v4341_v58  ;;  %5214 = vmatmul.mubr.f32.vlgmr.msra.gmra.mxu0 %v4343_v32 }
0x172d   :  { %5143 = vmatprep.mubr.f32.mxu1 %v4358_v40  ;;  %5218 = vmatprep.mubr.f32.mxu0 %v4360_v24 }
0x172e   :  { %11620 = vmatprep.subr.mxu0 %v12137_v4 }
0x1730   :  { %5144 = vmatmul.mubr.f32.gmra.mxu1 %v4357_v62  ;;  %5219 = vmatmul.mubr.f32.gmra.mxu0 %v4359_v9 }
0x1731   :  { %5368 = vmatprep.mubr.f32.mxu1 %v12137_v4  ;;  %11622 = vmatprep.mubr.msk.f32.mxu0 %vm12138_vm1, %v12137_v4 }
0x1781   :  { %v10710_v22 = vpop.f32.mrf.mxu1  ;;  %v10748_v60 = vpop.f32.mrf.mxu0 }
0x1783   :  { %v10711_v30 = vpop.f32.mrf.mxu1  ;;  %v10749_v25 = vpop.f32.mrf.mxu0 }
0x1784   :  { %v10712_v50 = vadd.f32 %v10711_v30, %v10710_v22  ;;  %v10750_v15 = vadd.f32 %v10749_v25, %v10748_v60 }
0x1786   :  { %v4691_v27 = vadd.f32 %v10712_v50, %v10493_v51 }
0x1787   :  { %v10713_v26 = vpop.f32.mrf.mxu1  ;;  %v10751_v29 = vpop.f32.mrf.mxu0 }
0x1788   :  { %v4766_v0 = vadd.f32 %v10750_v15, %v4691_v27 }
0x1789   :  { %v10714_v31 = vpop.f32.mrf.mxu1  ;;  %v10752_v34 = vpop.f32.mrf.mxu0 }
0x178a   :  { %v10715_v57 = vadd.f32 %v10714_v31, %v10713_v26  ;;  %v10753_v6 = vadd.f32 %v10752_v34, %v10751_v29 }
0x178c   :  { %v4696_v3 = vadd.f32 %v10715_v57, %v10493_v51 }
0x178e   :  { %v4771_v46 = vadd.f32 %v10753_v6, %v4696_v3  ;;  %v5285_v3 = vld [vmem:[%s14478_s30 + $0x78] sm:$0xff]  ;;  %v5283_v6 = vld [vmem:[%s14478_s30 + $0x68] sm:$0xff] }
0x178f   :  { %5320 = vmatprep.subr.mxu1 %v5285_v3 }
0x17a4   :  { %v10786_v37 = vpop.f32.mrf.mxu1  ;;  %v10824_v43 = vpop.f32.mrf.mxu0 }
0x17a6   :  { %v10787_v45 = vpop.f32.mrf.mxu1  ;;  %v10825_v35 = vpop.f32.mrf.mxu0 }
0x17a7   :  { %v10788_v61 = vadd.f32 %v10787_v45, %v10786_v37  ;;  %v10826_v42 = vadd.f32 %v10825_v35, %v10824_v43 }
0x17a9   :  { %v4841_v23 = vadd.f32 %v10788_v61, %v4766_v0 }
0x17aa   :  { %v10789_v36 = vpop.f32.mrf.mxu1  ;;  %v10827_v41 = vpop.f32.mrf.mxu0 }
0x17ab   :  { %v4916_v11 = vadd.f32 %v10826_v42, %v4841_v23  ;;  %v5282_v23 = vld [vmem:[%s14478_s30 + $0x60] sm:$0xff] }
0x17ac   :  { %v10790_v48 = vpop.f32.mrf.mxu1  ;;  %v10828_v52 = vpop.f32.mrf.mxu0  ;;  %v5278_v42 = vld [vmem:[%s14478_s30 + $0x40] sm:$0xff] }
0x17ad   :  { %v10791_v8 = vadd.f32 %v10790_v48, %v10789_v36  ;;  %v10829_v13 = vadd.f32 %v10828_v52, %v10827_v41 }
0x17af   :  { %v4846_v12 = vadd.f32 %v10791_v8, %v4771_v46  ;;  %v5281_v8 = vld [vmem:[%s14478_s30 + $0x58] sm:$0xff]  ;;  %v5279_v46 = vld [vmem:[%s14478_s30 + $0x48] sm:$0xff] }
0x17b1   :  { %v4921_v20 = vadd.f32 %v10829_v13, %v4846_v12  ;;  %v5274_v12 = vld [vmem:[%s14478_s30 + $0x20] sm:$0xff]  ;;  %v5272_v13 = vld [vmem:[%s14478_s30 + $0x10] sm:$0xff] }
0x17c8   :  { %v10862_v53 = vpop.f32.mrf.mxu1  ;;  %v10900_v54 = vpop.f32.mrf.mxu0 }
0x17ca   :  { %v10863_v59 = vpop.f32.mrf.mxu1  ;;  %v10901_v63 = vpop.f32.mrf.mxu0 }
0x17cb   :  { %v10864_v21 = vadd.f32 %v10863_v59, %v10862_v53  ;;  %v10902_v40 = vadd.f32 %v10901_v63, %v10900_v54 }
0x17cd   :  { %v4991_v16 = vadd.f32 %v10864_v21, %v4916_v11  ;;  %v5277_v21 = vld [vmem:[%s14478_s30 + $0x38] sm:$0xff]  ;;  %v5275_v11 = vld [vmem:[%s14478_s30 + $0x28] sm:$0xff] }
0x17ce   :  { %v10865_v17 = vpop.f32.mrf.mxu1  ;;  %v10903_v39 = vpop.f32.mrf.mxu0 }
0x17cf   :  { %v5066_v9 = vadd.f32 %v10902_v40, %v4991_v16  ;;  %v5271_v16 = vld [vmem:[%s14478_s30 + $0x8] sm:$0xff] }
0x17d0   :  { %v10866_v7 = vpop.f32.mrf.mxu1  ;;  %v10904_v10 = vpop.f32.mrf.mxu0 }
0x17d1   :  { %v10867_v58 = vadd.f32 %v10866_v7, %v10865_v17  ;;  %v10905_v26 = vadd.f32 %v10904_v10, %v10903_v39  ;;  %v5284_v17 = vld [vmem:[%s14478_s30 + $0x70] sm:$0xff]  ;;  %v5273_v10 = vld [vmem:[%s14478_s30 + $0x18] sm:$0xff] }
0x17d2   :  { %5321 = vmatpush1.msra.mxu1 %v5284_v17  ;;  %v5280_v39 = vld [vmem:[%s14478_s30 + $0x50] sm:$0xff] }
0x17d3   :  { %v4996_v22 = vadd.f32 %v10867_v58, %v4921_v20  ;;  %5322 = vmatprep.subr.mxu1 %v5283_v6  ;;  %v5276_v7 = vld [vmem:[%s14478_s30 + $0x30] sm:$0xff]  ;;  %v5270_v58 = vld [vmem:[%s14478_s30] sm:$0xff] }
0x17d4   :  { %5323 = vmatpush1.msra.mxu1 %v5282_v23 }
0x17d5   :  { %v5071_v43 = vadd.f32 %v10905_v26, %v4996_v22  ;;  %5324 = vmatprep.subr.mxu1 %v5281_v8  ;;  %v10494_v22 = vld [vmem:[%s14479_s6] ss:$0 sm:$0xff] }
0x17d6   :  { %5325 = vmatpush1.msra.mxu1 %v5280_v39 }
0x17d7   :  { %5326 = vmatprep.subr.mxu1 %v5279_v46 }
0x17d8   :  { %5327 = vmatpush1.msra.mxu1 %v5278_v42 }
0x17d9   :  { %5328 = vmatprep.subr.mxu1 %v5277_v21 }
0x17da   :  { %5329 = vmatpush1.msra.mxu1 %v5276_v7 }
0x17db   :  { %5330 = vmatprep.subr.mxu1 %v5275_v11 }
0x17dc   :  { %5331 = vmatpush1.msra.mxu1 %v5274_v12 }
0x17dd   :  { %5332 = vmatprep.subr.mxu1 %v5273_v10 }
0x17de   :  { %5333 = vmatpush1.msra.mxu1 %v5272_v13 }
0x17df   :  { %5334 = vmatprep.subr.mxu1 %v5271_v16 }
0x17e0   :  { %5335 = vmatpush1.msra.mxu1 %v5270_v58 }
0x17e1   :  { %11625 = vmatprep.subr.mxu1 %v12137_v4 }
0x17ec   :  { %v10938_v32 = vpop.f32.mrf.mxu1  ;;  %v10976_v56 = vpop.f32.mrf.mxu0 }
0x17ee   :  { %v10939_v24 = vpop.f32.mrf.mxu1  ;;  %v10977_v62 = vpop.f32.mrf.mxu0 }
0x17ef   :  { %v10940_v60 = vadd.f32 %v10939_v24, %v10938_v32  ;;  %v10978_v31 = vadd.f32 %v10977_v62, %v10976_v56 }
0x17f0   :  { %v10941_v30 = vpop.f32.mrf.mxu1  ;;  %v10979_v25 = vpop.f32.mrf.mxu0 }
0x17f1   :  { %v5141_v29 = vadd.f32 %v10940_v60, %v5066_v9 }
0x17f2   :  { %v10942_v34 = vpop.f32.mrf.mxu1  ;;  %v10980_v37 = vpop.f32.mrf.mxu0 }
0x17f3   :  { %v5216_v45 = vadd.f32 %v10978_v31, %v5141_v29  ;;  %v10943_v35 = vadd.f32 %v10942_v34, %v10941_v30  ;;  %v10981_v41 = vadd.f32 %v10980_v37, %v10979_v25  ;;  %v10495_v30 = vld [vmem:[%s14480_s12] ss:$0 sm:$0xff] }
0x17f5   :  { %v5146_v36 = vadd.f32 %v10943_v35, %v5071_v43  ;;  %v5224_v48 = vadd.f32 %v5216_v45, %v12918_v5  ;;  %v5286_v43 = vld [vmem:[%s14481_s20] sm:$0x3] }
0x17f6   :  { %v5291_v45 = vrot.slane %v5286_v43, %v12425_v28 }
0x17f7   :  { %v5221_v50 = vadd.f32 %v10981_v41, %v5146_v36  ;;  %v5228_v51 = vsel %vm299_vm0, %v5224_v48, 0.0 }
0x17f8   :  { %5229 = vadd.xlane.f32.xlu0 %v5228_v51  ;;  %v5295_v51 = vrot.slane %v5286_v43, %v12432_v33 }
0x17f9   :  { %v5225_v52 = vadd.f32 %v5221_v50, %v12932_v18 }
0x17fb   :  { %v5231_v53 = vsel %vm299_vm0, %v5225_v52, 0.0 }
0x17fc   :  { %5232 = vadd.xlane.f32.xlu1 %v5231_v53 }
0x1881   :  { %v5230_v54 = vpop.xlane.xlu0 %5229 }
0x1882   :  { %v5234_v27 = vmul.f32 0.015625, %v5230_v54 }
0x1884   :  { %v5236_v57 = vsub.f32 %v5224_v48, %v5234_v27 }
0x1885   :  { %v5233_v59 = vpop.xlane.xlu1 %5232 }
0x1886   :  { %v5235_v15 = vmul.f32 0.015625, %v5233_v59  ;;  %v5238_v5 = vmul.f32 %v5236_v57, %v5236_v57 }
0x1888   :  { %v5237_v61 = vsub.f32 %v5225_v52, %v5235_v15  ;;  %v5240_v63 = vsel %vm299_vm0, %v5238_v5, 0.0 }
0x1889   :  { %5241 = vadd.xlane.f32.xlu0 %v5240_v63 }
0x188a   :  { %v5239_v18 = vmul.f32 %v5237_v61, %v5237_v61 }
0x188c   :  { %v5243_v0 = vsel %vm299_vm0, %v5239_v18, 0.0 }
0x188d   :  { %5244 = vadd.xlane.f32.xlu1 %v5243_v0 }
0x1912   :  { %v5242_v32 = vpop.xlane.xlu0 %5241 }
0x1913   :  { %v5246_v56 = vmul.f32 0.015625, %v5242_v32 }
0x1915   :  { %v5248_v20 = vadd.f32 1e-05, %v5246_v56 }
0x1916   :  { %v5245_v40 = vpop.xlane.xlu1 %5244 }
0x1917   :  { %11991 = vrsqrt.f32 %v5248_v20  ;;  %v5247_v24 = vmul.f32 0.015625, %v5245_v40 }
0x1919   :  { %v5249_v62 = vadd.f32 1e-05, %v5247_v24 }
0x191b   :  { %11993 = vrsqrt.f32 %v5249_v62 }
0x1924   :  { %v11992_v9 = vpop.eup %11991 }
0x1925   :  { %v5252_v60 = vmul.f32 %v11992_v9, %v5236_v57 }
0x1927   :  { %v5260_v25 = vmul.f32 %v10494_v22, %v5252_v60 }
0x1928   :  { %v11994_v26 = vpop.eup %11993 }
0x1929   :  { %v13446_v29 = vadd.f32 %v10495_v30, %v5260_v25  ;;  %v5253_v31 = vmul.f32 %v11994_v26, %v5237_v61 }
0x192b   :  { %10496 = vmatmul.mubr.msk.f32.vlgmr.msra.gmra.mxu1 %vm299_vm0, %v13446_v29  ;;  %v5261_v34 = vmul.f32 %v10494_v22, %v5253_v31 }
0x192c   :  { %5374 = vmatprep.mubr.f32.mxu1 %v12137_v4 }
0x192d   :  { %v13451_v37 = vadd.f32 %v10495_v30, %v5261_v34 }
0x192f   :  { %10497 = vmatmul.mubr.msk.f32.gmra.mxu1 %vm299_vm0, %v13451_v37 }
0x1930   :  { %11627 = vmatprep.mubr.msk.f32.mxu1 %vm12138_vm1, %v12137_v4 }
0x19eb   :  { %v5370_v35 = vpop.f32.mrf.mxu1 }
0x19ec   :  { %v13459_v36 = vadd.f32 %v5370_v35, %v5291_v45 }
0x19ed   :  { %v5372_v41 = vpop.f32.mrf.mxu1 }
0x19ee   :  { %5384 = vrot.lane.b32.xlu0 %v13459_v36, %s12139_s0  ;;  %v13470_v53 = vmul.f32 0.35355338, %v13459_v36  ;;  %v13473_v54 = vadd.f32 %v5372_v41, %v5295_v51 }
0x19ef   :  { %v5376_v48 = vpop.f32.mrf.mxu1 }
0x19f0   :  { %v13463_v50 = vadd.f32 %v5376_v48, %v5291_v45 }
0x19f1   :  { %v5378_v27 = vpop.f32.mrf.mxu1 }
0x19f2   :  { %5462 = vrot.lane.b32.xlu1 %v13463_v50, %s12139_s0  ;;  %v13480_v59 = vmul.f32 0.35355338, %v13463_v50  ;;  %v13485_v15 = vadd.f32 %v5378_v27, %v5295_v51  ;;  %s14484_s0 = sld [smem:[#allocation21_spill]] }
0x1a60   :  { %v5385_v52 = vpop.permute.xlu0 %5384 }
0x1a61   :  { %11621 = vmatpush3.xpose.msk.msra.mxu0 %vm388_vm3, %v5385_v52 }
0x1a62   :  { %11630 = vmatprep.subr.mxu0 %v12137_v4 }
0x1a64   :  { %11623 = vmatmul.mubr.msk.f32.vlgmr.msra.gmra.mxu0 %vm388_vm3, %v13470_v53  ;;  %v5463_v57 = vpop.permute.xlu1 %5462 }
0x1a65   :  { %11626 = vmatpush3.xpose.msk.msra.mxu1 %vm388_vm3, %v5463_v57  ;;  %11631 = vmatpush3.msra.mxu0 %v13473_v54 }
0x1a66   :  { %11635 = vmatprep.subr.mxu1 %v12137_v4  ;;  %11632 = vmatprep.mubr.msk.f32.mxu0 %vm12138_vm1, %v12137_v4 }
0x1a67   :  { %11640 = vmatprep.subr.mxu0 %v12137_v4 }
0x1a68   :  { %11628 = vmatmul.mubr.msk.f32.vlgmr.msra.gmra.mxu1 %vm388_vm3, %v13480_v59 }
0x1a69   :  { %11636 = vmatpush3.msra.mxu1 %v13485_v15  ;;  %11637 = vmatprep.mubr.msk.f32.mxu1 %vm12138_vm1, %v12137_v4 }
0x1a6a   :  { %11645 = vmatprep.subr.mxu1 %v12137_v4 }
0x1b24   :  { %v5457_v5 = vpop.f32.mrf.mxu0 }
0x1b25   :  { %v5458_v61 = vadd.f32 %v5457_v5, %v12470_v49 }
0x1b26   :  { %v11624_v63 = vpop.f32.mrf.mxu0 }
0x1b27   :  { %v5539_v18 = vsel %vm388_vm3, %v5458_v61, -inf }
0x1b28   :  { %5540 = vmax.xlane.f32.xlu1 %v5539_v18  ;;  %v5535_v0 = vpop.f32.mrf.mxu1 }
0x1b29   :  { %v5536_v3 = vadd.f32 %v5535_v0, %v12470_v49 }
0x1b2a   :  { %v11629_v17 = vpop.f32.mrf.mxu1 }
0x1b2b   :  { %v5542_v6 = vsel %vm388_vm3, %v5536_v3, -inf }
0x1b2c   :  { %5543 = vmax.xlane.f32.xlu0 %v5542_v6 }
0x1b39   :  { %5787 = vrot.lane.b32.xlu1 %v13463_v50, %s12141_s9 }
0x1bb1   :  { %v5541_v23 = vpop.xlane.xlu1 %5540 }
0x1bb2   :  { %v5545_v8 = vsub.f32 %v5458_v61, %v5541_v23 }
0x1bb4   :  { %v5547_v39 = vmul.f32 1.442695, %v5545_v8 }
0x1bb5   :  { %v5544_v46 = vpop.xlane.xlu0 %5543  ;;  %v5788_v13 = vpop.permute.xlu1 %5787 }
0x1bb6   :  { %11995 = vpow2.f32 %v5547_v39  ;;  %v5546_v42 = vsub.f32 %v5536_v3, %v5544_v46 }
0x1bb8   :  { %v5549_v21 = vmul.f32 1.442695, %v5546_v42 }
0x1bba   :  { %11997 = vpow2.f32 %v5549_v21 }
0x1bc3   :  { %v11996_v7 = vpop.eup %11995 }
0x1bc4   :  { %v5551_v11 = vsel %vm388_vm3, %v11996_v7, 0.0 }
0x1bc5   :  { %5552 = vadd.xlane.f32.xlu0 %v5551_v11 }
0x1bc7   :  { %v11998_v12 = vpop.eup %11997 }
0x1bc8   :  { %v5554_v10 = vsel %vm388_vm3, %v11998_v12, 0.0 }
0x1bc9   :  { %5555 = vadd.xlane.f32.xlu1 %v5554_v10 }
0x1bda   :  { %5707 = vrot.lane.b32.xlu1 %v13470_v53, %s12142_s13 }
0x1bdb   :  { %5709 = vrot.lane.b32.xlu0 %v13459_v36, %s12141_s9 }
0x1bdf   :  { %5785 = vrot.lane.b32.xlu0 %v13480_v59, %s12142_s13 }
0x1c4e   :  { %v5553_v16 = vpop.xlane.xlu0 %5552 }
0x1c4f   :  { %11999 = vrcp.f32 %v5553_v16 }
0x1c52   :  { %v5556_v58 = vpop.xlane.xlu1 %5555  ;;  %v5710_v20 = vpop.permute.xlu0 %5709 }
0x1c53   :  { %12001 = vrcp.f32 %v5556_v58 }
0x1c56   :  { %v5708_v62 = vpop.permute.xlu1 %5707  ;;  %v5786_v9 = vpop.permute.xlu0 %5785 }
0x1c5c   :  { %v12000_v32 = vpop.eup %11999 }
0x1c5d   :  { %v5559_v56 = vmul.f32 %v12000_v32, %v11996_v7 }
0x1c5f   :  { %11633 = vmatmul.mubr.msk.f32.vlgmr.msra.gmra.mxu0 %vm388_vm3, %v5559_v56 }
0x1c60   :  { %v12002_v40 = vpop.eup %12001  ;;  %11641 = vmatpush3.xpose.msk.msra.mxu0 %vm388_vm3, %v5710_v20  ;;  %11642 = vmatprep.mubr.msk.f32.mxu0 %vm12138_vm1, %v12137_v4 }
0x1c61   :  { %v5560_v24 = vmul.f32 %v12002_v40, %v11998_v12  ;;  %11650 = vmatprep.subr.mxu0 %v12137_v4 }
0x1c63   :  { %11638 = vmatmul.mubr.msk.f32.vlgmr.msra.gmra.mxu1 %vm388_vm3, %v5560_v24  ;;  %11643 = vmatmul.mubr.msk.f32.vlgmr.msra.gmra.mxu0 %vm388_vm3, %v5708_v62 }
0x1c64   :  { %11646 = vmatpush3.xpose.msk.msra.mxu1 %vm388_vm3, %v5788_v13  ;;  %11647 = vmatprep.mubr.msk.f32.mxu1 %vm12138_vm1, %v12137_v4 }
0x1c65   :  { %11655 = vmatprep.subr.mxu1 %v12137_v4  ;;  %11652 = vmatprep.mubr.msk.f32.mxu0 %vm12138_vm1, %v12137_v4 }
0x1c67   :  { %11648 = vmatmul.mubr.msk.f32.vlgmr.msra.gmra.mxu1 %vm388_vm3, %v5786_v9 }
0x1c68   :  { %11657 = vmatprep.mubr.msk.f32.mxu1 %vm12138_vm1, %v12137_v4 }
0x1d1f   :  { %v13524_v22 = vpop.f32.mrf.mxu0 }
0x1d21   :  { %v11634_v60 = vpop.f32.mrf.mxu0 }
0x1d23   :  { %v13526_v30 = vpop.f32.mrf.mxu1  ;;  %v5781_v25 = vpop.f32.mrf.mxu0 }
0x1d24   :  { %v5782_v26 = vadd.f32 %v5781_v25, %v12470_v49 }
0x1d25   :  { %v11639_v31 = vpop.f32.mrf.mxu1  ;;  %v11644_v34 = vpop.f32.mrf.mxu0 }
0x1d26   :  { %v5863_v43 = vsel %vm388_vm3, %v5782_v26, -inf }
0x1d27   :  { %5864 = vmax.xlane.f32.xlu1 %v5863_v43  ;;  %v5859_v45 = vpop.f32.mrf.mxu1 }
0x1d28   :  { %v5860_v35 = vadd.f32 %v5859_v45, %v12470_v49 }
0x1d29   :  { %v11649_v41 = vpop.f32.mrf.mxu1 }
0x1d2a   :  { %v5866_v48 = vsel %vm388_vm3, %v5860_v35, -inf }
0x1d2b   :  { %5867 = vmax.xlane.f32.xlu0 %v5866_v48 }
0x1d38   :  { %5963 = vrot.lane.b32.xlu1 %v13485_v15, %s12142_s13 }
0x1d3c   :  { %6041 = vrot.lane.b32.xlu1 %v13459_v36, %s12143_s29 }
0x1d41   :  { %5886 = vrot.lane.b32.xlu0 %v13473_v54, %s12142_s13  ;;  %s14486_s13 = sld [smem:[#allocation18_spill]] }
0x1db0   :  { %v5865_v51 = vpop.xlane.xlu1 %5864 }
0x1db1   :  { %v5869_v52 = vsub.f32 %v5782_v26, %v5865_v51 }
0x1db3   :  { %v5871_v27 = vmul.f32 1.442695, %v5869_v52 }
0x1db4   :  { %v5964_v57 = vpop.permute.xlu1 %5963  ;;  %v5868_v5 = vpop.xlane.xlu0 %5867 }
0x1db5   :  { %12003 = vpow2.f32 %v5871_v27  ;;  %v5870_v61 = vsub.f32 %v5860_v35, %v5868_v5  ;;  %11656 = vmatpush3.msra.mxu1 %v5964_v57 }
0x1db6   :  { %11665 = vmatprep.subr.mxu1 %v12137_v4 }
0x1db7   :  { %v5873_v63 = vmul.f32 1.442695, %v5870_v61 }
0x1db8   :  { %v5887_v18 = vpop.permute.xlu0 %5886  ;;  %v6042_v23 = vpop.permute.xlu1 %6041 }
0x1db9   :  { %12005 = vpow2.f32 %v5873_v63  ;;  %11651 = vmatpush3.msra.mxu0 %v5887_v18 }
0x1dba   :  { %11660 = vmatprep.subr.mxu0 %v12137_v4 }
0x1dc2   :  { %v12004_v0 = vpop.eup %12003 }
0x1dc3   :  { %v5875_v3 = vsel %vm388_vm3, %v12004_v0, 0.0 }
0x1dc4   :  { %5876 = vadd.xlane.f32.xlu0 %v5875_v3 }
0x1dc6   :  { %v12006_v17 = vpop.eup %12005 }
0x1dc7   :  { %v5878_v6 = vsel %vm388_vm3, %v12006_v17, 0.0 }
0x1dc8   :  { %5879 = vadd.xlane.f32.xlu1 %v5878_v6 }
0x1dd9   :  { %6039 = vrot.lane.b32.xlu1 %v13470_v53, %s12144_s3 }
0x1dda   :  { %6119 = vrot.lane.b32.xlu0 %v13463_v50, %s12143_s29 }
0x1dde   :  { %6117 = vrot.lane.b32.xlu0 %v13480_v59, %s12144_s3 }
0x1e4d   :  { %v5877_v8 = vpop.xlane.xlu0 %5876 }
0x1e4e   :  { %12007 = vrcp.f32 %v5877_v8 }
0x1e51   :  { %v5880_v39 = vpop.xlane.xlu1 %5879  ;;  %v6120_v7 = vpop.permute.xlu0 %6119 }
0x1e52   :  { %12009 = vrcp.f32 %v5880_v39 }
0x1e55   :  { %v6040_v12 = vpop.permute.xlu1 %6039  ;;  %v6118_v10 = vpop.permute.xlu0 %6117 }
0x1e5b   :  { %v12008_v46 = vpop.eup %12007 }
0x1e5c   :  { %v5883_v42 = vmul.f32 %v12008_v46, %v12004_v0 }
0x1e5e   :  { %11653 = vmatmul.mubr.msk.f32.vlgmr.msra.gmra.mxu0 %vm388_vm3, %v5883_v42 }
0x1e5f   :  { %v12010_v21 = vpop.eup %12009  ;;  %11661 = vmatpush3.xpose.msk.msra.mxu0 %vm388_vm3, %v6042_v23  ;;  %11662 = vmatprep.mubr.msk.f32.mxu0 %vm12138_vm1, %v12137_v4 }
0x1e60   :  { %v5884_v11 = vmul.f32 %v12010_v21, %v12006_v17  ;;  %11670 = vmatprep.subr.mxu0 %v12137_v4 }
0x1e62   :  { %11658 = vmatmul.mubr.msk.f32.vlgmr.msra.gmra.mxu1 %vm388_vm3, %v5884_v11  ;;  %11663 = vmatmul.mubr.msk.f32.vlgmr.msra.gmra.mxu0 %vm388_vm3, %v6040_v12 }
0x1e63   :  { %11666 = vmatpush3.xpose.msk.msra.mxu1 %vm388_vm3, %v6120_v7  ;;  %11667 = vmatprep.mubr.msk.f32.mxu1 %vm12138_vm1, %v12137_v4 }
0x1e64   :  { %11675 = vmatprep.subr.mxu1 %v12137_v4  ;;  %11672 = vmatprep.mubr.msk.f32.mxu0 %vm12138_vm1, %v12137_v4 }
0x1e66   :  { %11668 = vmatmul.mubr.msk.f32.vlgmr.msra.gmra.mxu1 %vm388_vm3, %v6118_v10 }
0x1e67   :  { %11677 = vmatprep.mubr.msk.f32.mxu1 %vm12138_vm1, %v12137_v4 }
0x1f1e   :  { %v13564_v13 = vpop.f32.mrf.mxu0 }
0x1f20   :  { %v11654_v16 = vpop.f32.mrf.mxu0 }
0x1f22   :  { %v13566_v58 = vpop.f32.mrf.mxu1  ;;  %v6113_v32 = vpop.f32.mrf.mxu0 }
0x1f23   :  { %v6114_v56 = vadd.f32 %v6113_v32, %v12470_v49 }
0x1f24   :  { %v11659_v20 = vpop.f32.mrf.mxu1  ;;  %v11664_v40 = vpop.f32.mrf.mxu0 }
0x1f25   :  { %v6195_v24 = vsel %vm388_vm3, %v6114_v56, -inf }
0x1f26   :  { %6196 = vmax.xlane.f32.xlu1 %v6195_v24  ;;  %v6191_v62 = vpop.f32.mrf.mxu1 }
0x1f27   :  { %v6192_v9 = vadd.f32 %v6191_v62, %v12470_v49 }
0x1f28   :  { %v11669_v60 = vpop.f32.mrf.mxu1 }
0x1f29   :  { %v6198_v25 = vsel %vm388_vm3, %v6192_v9, -inf }
0x1f2a   :  { %6199 = vmax.xlane.f32.xlu0 %v6198_v25 }
0x1f37   :  { %6293 = vrot.lane.b32.xlu1 %v13485_v15, %s12144_s3 }
0x1f3b   :  { %6371 = vrot.lane.b32.xlu1 %v13459_v36, %s12145_s15 }
0x1f40   :  { %6217 = vrot.lane.b32.xlu0 %v13473_v54, %s12144_s3  ;;  %s14488_s3 = sld [smem:[#allocation23_spill]] }
0x1faf   :  { %v6197_v26 = vpop.xlane.xlu1 %6196 }
0x1fb0   :  { %v6201_v31 = vsub.f32 %v6114_v56, %v6197_v26 }
0x1fb2   :  { %v6203_v34 = vmul.f32 1.442695, %v6201_v31 }
0x1fb3   :  { %v6294_v43 = vpop.permute.xlu1 %6293  ;;  %v6200_v45 = vpop.xlane.xlu0 %6199 }
0x1fb4   :  { %12011 = vpow2.f32 %v6203_v34  ;;  %v6202_v35 = vsub.f32 %v6192_v9, %v6200_v45  ;;  %11676 = vmatpush3.msra.mxu1 %v6294_v43 }
0x1fb5   :  { %11685 = vmatprep.subr.mxu1 %v12137_v4 }
0x1fb6   :  { %v6205_v41 = vmul.f32 1.442695, %v6202_v35 }
0x1fb7   :  { %v6218_v48 = vpop.permute.xlu0 %6217  ;;  %v6372_v5 = vpop.permute.xlu1 %6371 }
0x1fb8   :  { %12013 = vpow2.f32 %v6205_v41  ;;  %11671 = vmatpush3.msra.mxu0 %v6218_v48 }
0x1fb9   :  { %11680 = vmatprep.subr.mxu0 %v12137_v4 }
0x1fc1   :  { %v12012_v51 = vpop.eup %12011 }
0x1fc2   :  { %v6207_v52 = vsel %vm388_vm3, %v12012_v51, 0.0 }
0x1fc3   :  { %6208 = vadd.xlane.f32.xlu0 %v6207_v52 }
0x1fc5   :  { %v12014_v27 = vpop.eup %12013 }
0x1fc6   :  { %v6210_v57 = vsel %vm388_vm3, %v12014_v27, 0.0 }
0x1fc7   :  { %6211 = vadd.xlane.f32.xlu1 %v6210_v57 }
0x1fd8   :  { %6369 = vrot.lane.b32.xlu1 %v13470_v53, %s12146_s16 }
0x1fd9   :  { %6449 = vrot.lane.b32.xlu0 %v13463_v50, %s12145_s15 }
0x1fdd   :  { %6447 = vrot.lane.b32.xlu0 %v13480_v59, %s12146_s16 }
0x204c   :  { %v6209_v61 = vpop.xlane.xlu0 %6208 }
0x204d   :  { %12015 = vrcp.f32 %v6209_v61 }
0x2050   :  { %v6212_v63 = vpop.xlane.xlu1 %6211  ;;  %v6450_v17 = vpop.permute.xlu0 %6449 }
0x2051   :  { %12017 = vrcp.f32 %v6212_v63 }
0x2054   :  { %v6370_v23 = vpop.permute.xlu1 %6369  ;;  %v6448_v8 = vpop.permute.xlu0 %6447 }
0x205a   :  { %v12016_v18 = vpop.eup %12015 }
0x205b   :  { %v6215_v0 = vmul.f32 %v12016_v18, %v12012_v51 }
0x205d   :  { %11673 = vmatmul.mubr.msk.f32.vlgmr.msra.gmra.mxu0 %vm388_vm3, %v6215_v0 }
0x205e   :  { %v12018_v3 = vpop.eup %12017  ;;  %11681 = vmatpush3.xpose.msk.msra.mxu0 %vm388_vm3, %v6372_v5  ;;  %11682 = vmatprep.mubr.msk.f32.mxu0 %vm12138_vm1, %v12137_v4 }
0x205f   :  { %v6216_v6 = vmul.f32 %v12018_v3, %v12014_v27  ;;  %11690 = vmatprep.subr.mxu0 %v12137_v4 }
0x2061   :  { %11678 = vmatmul.mubr.msk.f32.vlgmr.msra.gmra.mxu1 %vm388_vm3, %v6216_v6  ;;  %11683 = vmatmul.mubr.msk.f32.vlgmr.msra.gmra.mxu0 %vm388_vm3, %v6370_v23 }
0x2062   :  { %11686 = vmatpush3.xpose.msk.msra.mxu1 %vm388_vm3, %v6450_v17  ;;  %11687 = vmatprep.mubr.msk.f32.mxu1 %vm12138_vm1, %v12137_v4 }
0x2063   :  { %11695 = vmatprep.subr.mxu1 %v12137_v4  ;;  %11692 = vmatprep.mubr.msk.f32.mxu0 %vm12138_vm1, %v12137_v4 }
0x2065   :  { %11688 = vmatmul.mubr.msk.f32.vlgmr.msra.gmra.mxu1 %vm388_vm3, %v6448_v8 }
0x2066   :  { %11697 = vmatprep.mubr.msk.f32.mxu1 %vm12138_vm1, %v12137_v4 }
0x211d   :  { %v13604_v39 = vpop.f32.mrf.mxu0 }
0x211f   :  { %v11674_v46 = vpop.f32.mrf.mxu0 }
0x2121   :  { %v13606_v42 = vpop.f32.mrf.mxu1  ;;  %v6443_v21 = vpop.f32.mrf.mxu0 }
0x2122   :  { %v6444_v7 = vadd.f32 %v6443_v21, %v12470_v49 }
0x2123   :  { %v11679_v11 = vpop.f32.mrf.mxu1  ;;  %v11684_v12 = vpop.f32.mrf.mxu0 }
0x2124   :  { %v6525_v10 = vsel %vm388_vm3, %v6444_v7, -inf }
0x2125   :  { %6526 = vmax.xlane.f32.xlu1 %v6525_v10  ;;  %v6521_v16 = vpop.f32.mrf.mxu1 }
0x2126   :  { %v6522_v32 = vadd.f32 %v6521_v16, %v12470_v49 }
0x2127   :  { %v11689_v56 = vpop.f32.mrf.mxu1 }
0x2128   :  { %v6528_v20 = vsel %vm388_vm3, %v6522_v32, -inf }
0x2129   :  { %6529 = vmax.xlane.f32.xlu0 %v6528_v20 }
0x2136   :  { %6623 = vrot.lane.b32.xlu1 %v13485_v15, %s12146_s16 }
0x213a   :  { %6701 = vrot.lane.b32.xlu1 %v13459_v36, %s12147_s18 }
0x213f   :  { %6547 = vrot.lane.b32.xlu0 %v13473_v54, %s12146_s16  ;;  %s14490_s16 = sld [smem:[#allocation27_spill]] }
0x21ae   :  { %v6527_v40 = vpop.xlane.xlu1 %6526 }
0x21af   :  { %v6531_v24 = vsub.f32 %v6444_v7, %v6527_v40 }
0x21b1   :  { %v6533_v62 = vmul.f32 1.442695, %v6531_v24 }
0x21b2   :  { %v6624_v9 = vpop.permute.xlu1 %6623  ;;  %v6530_v60 = vpop.xlane.xlu0 %6529 }
0x21b3   :  { %12019 = vpow2.f32 %v6533_v62  ;;  %v6532_v25 = vsub.f32 %v6522_v32, %v6530_v60  ;;  %11696 = vmatpush3.msra.mxu1 %v6624_v9 }
0x21b4   :  { %11705 = vmatprep.subr.mxu1 %v12137_v4 }
0x21b5   :  { %v6535_v26 = vmul.f32 1.442695, %v6532_v25 }
0x21b6   :  { %v6548_v31 = vpop.permute.xlu0 %6547  ;;  %v6702_v41 = vpop.permute.xlu1 %6701 }
0x21b7   :  { %12021 = vpow2.f32 %v6535_v26  ;;  %11691 = vmatpush3.msra.mxu0 %v6548_v31 }
0x21b8   :  { %11700 = vmatprep.subr.mxu0 %v12137_v4 }
0x21c0   :  { %v12020_v34 = vpop.eup %12019 }
0x21c1   :  { %v6537_v43 = vsel %vm388_vm3, %v12020_v34, 0.0 }
0x21c2   :  { %6538 = vadd.xlane.f32.xlu0 %v6537_v43 }
0x21c4   :  { %v12022_v45 = vpop.eup %12021 }
0x21c5   :  { %v6540_v35 = vsel %vm388_vm3, %v12022_v45, 0.0 }
0x21c6   :  { %6541 = vadd.xlane.f32.xlu1 %v6540_v35 }
0x21d7   :  { %6699 = vrot.lane.b32.xlu1 %v13470_v53, %s12148_s22 }
0x21d8   :  { %6779 = vrot.lane.b32.xlu0 %v13463_v50, %s12147_s18 }
0x21dc   :  { %6777 = vrot.lane.b32.xlu0 %v13480_v59, %s12148_s22 }
0x224b   :  { %v6539_v48 = vpop.xlane.xlu0 %6538 }
0x224c   :  { %12023 = vrcp.f32 %v6539_v48 }
0x224f   :  { %v6542_v51 = vpop.xlane.xlu1 %6541  ;;  %v6780_v5 = vpop.permute.xlu0 %6779 }
0x2250   :  { %12025 = vrcp.f32 %v6542_v51 }
0x2253   :  { %v6700_v63 = vpop.permute.xlu1 %6699  ;;  %v6778_v18 = vpop.permute.xlu0 %6777 }
0x2259   :  { %v12024_v52 = vpop.eup %12023 }
0x225a   :  { %v6545_v27 = vmul.f32 %v12024_v52, %v12020_v34 }
0x225c   :  { %11693 = vmatmul.mubr.msk.f32.vlgmr.msra.gmra.mxu0 %vm388_vm3, %v6545_v27 }
0x225d   :  { %v12026_v57 = vpop.eup %12025  ;;  %11701 = vmatpush3.xpose.msk.msra.mxu0 %vm388_vm3, %v6702_v41  ;;  %11702 = vmatprep.mubr.msk.f32.mxu0 %vm12138_vm1, %v12137_v4 }
0x225e   :  { %v6546_v61 = vmul.f32 %v12026_v57, %v12022_v45  ;;  %11710 = vmatprep.subr.mxu0 %v12137_v4 }
0x2260   :  { %11698 = vmatmul.mubr.msk.f32.vlgmr.msra.gmra.mxu1 %vm388_vm3, %v6546_v61  ;;  %11703 = vmatmul.mubr.msk.f32.vlgmr.msra.gmra.mxu0 %vm388_vm3, %v6700_v63 }
0x2261   :  { %11706 = vmatpush3.xpose.msk.msra.mxu1 %vm388_vm3, %v6780_v5  ;;  %11707 = vmatprep.mubr.msk.f32.mxu1 %vm12138_vm1, %v12137_v4 }
0x2262   :  { %11715 = vmatprep.subr.mxu1 %v12137_v4  ;;  %11712 = vmatprep.mubr.msk.f32.mxu0 %vm12138_vm1, %v12137_v4 }
0x2264   :  { %11708 = vmatmul.mubr.msk.f32.vlgmr.msra.gmra.mxu1 %vm388_vm3, %v6778_v18 }
0x2265   :  { %11717 = vmatprep.mubr.msk.f32.mxu1 %vm12138_vm1, %v12137_v4 }
0x231c   :  { %v13644_v0 = vpop.f32.mrf.mxu0 }
0x231e   :  { %v11694_v3 = vpop.f32.mrf.mxu0 }
0x2320   :  { %v13646_v17 = vpop.f32.mrf.mxu1  ;;  %v6773_v6 = vpop.f32.mrf.mxu0 }
0x2321   :  { %v6774_v23 = vadd.f32 %v6773_v6, %v12470_v49 }
0x2322   :  { %v11699_v8 = vpop.f32.mrf.mxu1  ;;  %v11704_v46 = vpop.f32.mrf.mxu0 }
0x2323   :  { %v6855_v21 = vsel %vm388_vm3, %v6774_v23, -inf }
0x2324   :  { %6856 = vmax.xlane.f32.xlu1 %v6855_v21  ;;  %v6851_v7 = vpop.f32.mrf.mxu1 }
0x2325   :  { %v6852_v11 = vadd.f32 %v6851_v7, %v12470_v49 }
0x2326   :  { %v11709_v12 = vpop.f32.mrf.mxu1 }
0x2327   :  { %v6858_v10 = vsel %vm388_vm3, %v6852_v11, -inf }
0x2328   :  { %6859 = vmax.xlane.f32.xlu0 %v6858_v10 }
0x2335   :  { %6953 = vrot.lane.b32.xlu1 %v13485_v15, %s12148_s22 }
0x2339   :  { %7031 = vrot.lane.b32.xlu1 %v13459_v36, %s12149_s23 }
0x233e   :  { %6877 = vrot.lane.b32.xlu0 %v13473_v54, %s12148_s22  ;;  %s14492_s22 = sld [smem:[#allocation26_spill]] }
0x23ad   :  { %v6857_v16 = vpop.xlane.xlu1 %6856 }
0x23ae   :  { %v6861_v32 = vsub.f32 %v6774_v23, %v6857_v16 }
0x23b0   :  { %v6863_v56 = vmul.f32 1.442695, %v6861_v32 }
0x23b1   :  { %v6954_v20 = vpop.permute.xlu1 %6953  ;;  %v6860_v40 = vpop.xlane.xlu0 %6859 }
0x23b2   :  { %12027 = vpow2.f32 %v6863_v56  ;;  %v6862_v24 = vsub.f32 %v6852_v11, %v6860_v40  ;;  %11716 = vmatpush3.msra.mxu1 %v6954_v20 }
0x23b3   :  { %11725 = vmatprep.subr.mxu1 %v12137_v4 }
0x23b4   :  { %v6865_v62 = vmul.f32 1.442695, %v6862_v24 }
0x23b5   :  { %v6878_v9 = vpop.permute.xlu0 %6877  ;;  %v7032_v34 = vpop.permute.xlu1 %7031 }
0x23b6   :  { %12029 = vpow2.f32 %v6865_v62  ;;  %11711 = vmatpush3.msra.mxu0 %v6878_v9 }
0x23b7   :  { %11720 = vmatprep.subr.mxu0 %v12137_v4 }
0x23bf   :  { %v12028_v60 = vpop.eup %12027 }
0x23c0   :  { %v6867_v25 = vsel %vm388_vm3, %v12028_v60, 0.0 }
0x23c1   :  { %6868 = vadd.xlane.f32.xlu0 %v6867_v25 }
0x23c3   :  { %v12030_v26 = vpop.eup %12029 }
0x23c4   :  { %v6870_v31 = vsel %vm388_vm3, %v12030_v26, 0.0 }
0x23c5   :  { %6871 = vadd.xlane.f32.xlu1 %v6870_v31 }
0x23d6   :  { %7029 = vrot.lane.b32.xlu1 %v13470_v53, %s12150_s26 }
0x23d7   :  { %7109 = vrot.lane.b32.xlu0 %v13463_v50, %s12149_s23 }
0x23db   :  { %7107 = vrot.lane.b32.xlu0 %v13480_v59, %s12150_s26 }
0x244a   :  { %v6869_v43 = vpop.xlane.xlu0 %6868 }
0x244b   :  { %12031 = vrcp.f32 %v6869_v43 }
0x244e   :  { %v6872_v45 = vpop.xlane.xlu1 %6871  ;;  %v7110_v51 = vpop.permute.xlu0 %7109 }
0x244f   :  { %12033 = vrcp.f32 %v6872_v45 }
0x2452   :  { %v7030_v27 = vpop.permute.xlu1 %7029  ;;  %v7108_v57 = vpop.permute.xlu0 %7107 }
0x2458   :  { %v12032_v35 = vpop.eup %12031 }
0x2459   :  { %v6875_v41 = vmul.f32 %v12032_v35, %v12028_v60 }
0x245b   :  { %11713 = vmatmul.mubr.msk.f32.vlgmr.msra.gmra.mxu0 %vm388_vm3, %v6875_v41 }
0x245c   :  { %v12034_v48 = vpop.eup %12033  ;;  %11721 = vmatpush3.xpose.msk.msra.mxu0 %vm388_vm3, %v7032_v34  ;;  %11722 = vmatprep.mubr.msk.f32.mxu0 %vm12138_vm1, %v12137_v4 }
0x245d   :  { %v6876_v52 = vmul.f32 %v12034_v48, %v12030_v26  ;;  %11730 = vmatprep.subr.mxu0 %v12137_v4 }
0x245f   :  { %11718 = vmatmul.mubr.msk.f32.vlgmr.msra.gmra.mxu1 %vm388_vm3, %v6876_v52  ;;  %11723 = vmatmul.mubr.msk.f32.vlgmr.msra.gmra.mxu0 %vm388_vm3, %v7030_v27 }
0x2460   :  { %11726 = vmatpush3.xpose.msk.msra.mxu1 %vm388_vm3, %v7110_v51  ;;  %11727 = vmatprep.mubr.msk.f32.mxu1 %vm12138_vm1, %v12137_v4 }
0x2461   :  { %11735 = vmatprep.subr.mxu1 %v12137_v4  ;;  %11732 = vmatprep.mubr.msk.f32.mxu0 %vm12138_vm1, %v12137_v4 }
0x2463   :  { %11728 = vmatmul.mubr.msk.f32.vlgmr.msra.gmra.mxu1 %vm388_vm3, %v7108_v57 }
0x2464   :  { %11737 = vmatprep.mubr.msk.f32.mxu1 %vm12138_vm1, %v12137_v4 }
0x251b   :  { %v13684_v5 = vpop.f32.mrf.mxu0 }
0x251d   :  { %v11714_v61 = vpop.f32.mrf.mxu0 }
0x251f   :  { %v13686_v63 = vpop.f32.mrf.mxu1  ;;  %v7103_v18 = vpop.f32.mrf.mxu0 }
0x2520   :  { %v7104_v3 = vadd.f32 %v7103_v18, %v12470_v49 }
0x2521   :  { %v11719_v6 = vpop.f32.mrf.mxu1  ;;  %v11724_v23 = vpop.f32.mrf.mxu0 }
0x2522   :  { %v7185_v8 = vsel %vm388_vm3, %v7104_v3, -inf }
0x2523   :  { %7186 = vmax.xlane.f32.xlu1 %v7185_v8  ;;  %v7181_v46 = vpop.f32.mrf.mxu1 }
0x2524   :  { %v7182_v21 = vadd.f32 %v7181_v46, %v12470_v49 }
0x2525   :  { %v11729_v7 = vpop.f32.mrf.mxu1 }
0x2526   :  { %v7188_v11 = vsel %vm388_vm3, %v7182_v21, -inf }
0x2527   :  { %7189 = vmax.xlane.f32.xlu0 %v7188_v11 }
0x2534   :  { %7283 = vrot.lane.b32.xlu1 %v13485_v15, %s12150_s26 }
0x2538   :  { %7361 = vrot.lane.b32.xlu1 %v13459_v36, %s12151_s28 }
0x253d   :  { %7207 = vrot.lane.b32.xlu0 %v13473_v54, %s12150_s26  ;;  %s14494_s26 = sld [smem:[#allocation28_spill]] }
0x25ac   :  { %v7187_v12 = vpop.xlane.xlu1 %7186 }
0x25ad   :  { %v7191_v10 = vsub.f32 %v7104_v3, %v7187_v12 }
0x25af   :  { %v7193_v16 = vmul.f32 1.442695, %v7191_v10 }
0x25b0   :  { %v7284_v32 = vpop.permute.xlu1 %7283  ;;  %v7190_v56 = vpop.xlane.xlu0 %7189 }
0x25b1   :  { %12035 = vpow2.f32 %v7193_v16  ;;  %v7192_v20 = vsub.f32 %v7182_v21, %v7190_v56  ;;  %11736 = vmatpush3.msra.mxu1 %v7284_v32 }
0x25b2   :  { %11745 = vmatprep.subr.mxu1 %v12137_v4 }
0x25b3   :  { %v7195_v40 = vmul.f32 1.442695, %v7192_v20 }
0x25b4   :  { %v7208_v24 = vpop.permute.xlu0 %7207  ;;  %v7362_v26 = vpop.permute.xlu1 %7361 }
0x25b5   :  { %12037 = vpow2.f32 %v7195_v40  ;;  %11731 = vmatpush3.msra.mxu0 %v7208_v24 }
0x25b6   :  { %11740 = vmatprep.subr.mxu0 %v12137_v4 }
0x25be   :  { %v12036_v62 = vpop.eup %12035 }
0x25bf   :  { %v7197_v9 = vsel %vm388_vm3, %v12036_v62, 0.0 }
0x25c0   :  { %7198 = vadd.xlane.f32.xlu0 %v7197_v9 }
0x25c2   :  { %v12038_v60 = vpop.eup %12037 }
0x25c3   :  { %v7200_v25 = vsel %vm388_vm3, %v12038_v60, 0.0 }
0x25c4   :  { %7201 = vadd.xlane.f32.xlu1 %v7200_v25 }
0x25d5   :  { %7359 = vrot.lane.b32.xlu1 %v13470_v53, %s12152_s1 }
0x25d6   :  { %7439 = vrot.lane.b32.xlu0 %v13463_v50, %s12151_s28 }
0x25da   :  { %7437 = vrot.lane.b32.xlu0 %v13480_v59, %s12152_s1 }
0x2649   :  { %v7199_v31 = vpop.xlane.xlu0 %7198 }
0x264a   :  { %12039 = vrcp.f32 %v7199_v31 }
0x264d   :  { %v7202_v34 = vpop.xlane.xlu1 %7201  ;;  %v7440_v41 = vpop.permute.xlu0 %7439 }
0x264e   :  { %12041 = vrcp.f32 %v7202_v34 }
0x2651   :  { %v7360_v51 = vpop.permute.xlu1 %7359  ;;  %v7438_v52 = vpop.permute.xlu0 %7437 }
0x2657   :  { %v12040_v43 = vpop.eup %12039 }
0x2658   :  { %v7205_v45 = vmul.f32 %v12040_v43, %v12036_v62 }
0x265a   :  { %11733 = vmatmul.mubr.msk.f32.vlgmr.msra.gmra.mxu0 %vm388_vm3, %v7205_v45 }
0x265b   :  { %v12042_v35 = vpop.eup %12041  ;;  %11741 = vmatpush3.xpose.msk.msra.mxu0 %vm388_vm3, %v7362_v26  ;;  %11742 = vmatprep.mubr.msk.f32.mxu0 %vm12138_vm1, %v12137_v4 }
0x265c   :  { %v7206_v48 = vmul.f32 %v12042_v35, %v12038_v60  ;;  %11750 = vmatprep.subr.mxu0 %v12137_v4 }
0x265e   :  { %11738 = vmatmul.mubr.msk.f32.vlgmr.msra.gmra.mxu1 %vm388_vm3, %v7206_v48  ;;  %11743 = vmatmul.mubr.msk.f32.vlgmr.msra.gmra.mxu0 %vm388_vm3, %v7360_v51 }
0x265f   :  { %11746 = vmatpush3.xpose.msk.msra.mxu1 %vm388_vm3, %v7440_v41  ;;  %11747 = vmatprep.mubr.msk.f32.mxu1 %vm12138_vm1, %v12137_v4 }
0x2660   :  { %11755 = vmatprep.subr.mxu1 %v12137_v4  ;;  %11752 = vmatprep.mubr.msk.f32.mxu0 %vm12138_vm1, %v12137_v4 }
0x2662   :  { %11748 = vmatmul.mubr.msk.f32.vlgmr.msra.gmra.mxu1 %vm388_vm3, %v7438_v52 }
0x2663   :  { %11757 = vmatprep.mubr.msk.f32.mxu1 %vm12138_vm1, %v12137_v4 }
0x271a   :  { %v13724_v27 = vpop.f32.mrf.mxu0 }
0x271c   :  { %v11734_v57 = vpop.f32.mrf.mxu0 }
0x271e   :  { %v13726_v61 = vpop.f32.mrf.mxu1  ;;  %v7433_v18 = vpop.f32.mrf.mxu0 }
0x271f   :  { %v7434_v3 = vadd.f32 %v7433_v18, %v12470_v49 }
0x2720   :  { %v11739_v6 = vpop.f32.mrf.mxu1  ;;  %v11744_v23 = vpop.f32.mrf.mxu0 }
0x2721   :  { %v7515_v8 = vsel %vm388_vm3, %v7434_v3, -inf }
0x2722   :  { %7516 = vmax.xlane.f32.xlu1 %v7515_v8  ;;  %v7511_v46 = vpop.f32.mrf.mxu1 }
0x2723   :  { %v7512_v21 = vadd.f32 %v7511_v46, %v12470_v49 }
0x2724   :  { %v11749_v7 = vpop.f32.mrf.mxu1 }
0x2725   :  { %v7518_v11 = vsel %vm388_vm3, %v7512_v21, -inf }
0x2726   :  { %7519 = vmax.xlane.f32.xlu0 %v7518_v11 }
0x2733   :  { %7613 = vrot.lane.b32.xlu1 %v13485_v15, %s12152_s1 }
0x2737   :  { %7691 = vrot.lane.b32.xlu1 %v13459_v36, %s12153_s2 }
0x273c   :  { %7537 = vrot.lane.b32.xlu0 %v13473_v54, %s12152_s1  ;;  %s12156_s1 = smov [#allocation2]  }
0x27ab   :  { %v7517_v12 = vpop.xlane.xlu1 %7516 }
0x27ac   :  { %v7521_v10 = vsub.f32 %v7434_v3, %v7517_v12 }
0x27ae   :  { %v7523_v16 = vmul.f32 1.442695, %v7521_v10 }
0x27af   :  { %v7614_v32 = vpop.permute.xlu1 %7613  ;;  %v7520_v56 = vpop.xlane.xlu0 %7519 }
0x27b0   :  { %12043 = vpow2.f32 %v7523_v16  ;;  %v7522_v20 = vsub.f32 %v7512_v21, %v7520_v56  ;;  %11756 = vmatpush3.msra.mxu1 %v7614_v32 }
0x27b1   :  { %11765 = vmatprep.subr.mxu1 %v12137_v4 }
0x27b2   :  { %v7525_v40 = vmul.f32 1.442695, %v7522_v20 }
0x27b3   :  { %v7538_v24 = vpop.permute.xlu0 %7537  ;;  %v7692_v25 = vpop.permute.xlu1 %7691 }
0x27b4   :  { %12045 = vpow2.f32 %v7525_v40  ;;  %11751 = vmatpush3.msra.mxu0 %v7538_v24 }
0x27b5   :  { %11760 = vmatprep.subr.mxu0 %v12137_v4 }
0x27bd   :  { %v12044_v36 = vpop.eup %12043 }
0x27be   :  { %v7527_v62 = vsel %vm388_vm3, %v12044_v36, 0.0 }
0x27bf   :  { %7528 = vadd.xlane.f32.xlu0 %v7527_v62  ;;  %v8232_v62 = vld [vmem:[%s14482_s10 + $0x8] sm:$0xff] }
0x27c1   :  { %v12046_v9 = vpop.eup %12045 }
0x27c2   :  { %v7530_v60 = vsel %vm388_vm3, %v12046_v9, 0.0 }
0x27c3   :  { %7531 = vadd.xlane.f32.xlu1 %v7530_v60  ;;  %v8096_v60 = vld [vmem:[%s14483_s11 + $0x38] sm:$0xff] }
0x27d4   :  { %7689 = vrot.lane.b32.xlu1 %v13470_v53, %s12154_s7 }
0x27d5   :  { %7769 = vrot.lane.b32.xlu0 %v13463_v50, %s12153_s2 }
0x27d9   :  { %7767 = vrot.lane.b32.xlu0 %v13480_v59, %s12154_s7 }
0x2848   :  { %v7529_v26 = vpop.xlane.xlu0 %7528 }
0x2849   :  { %12047 = vrcp.f32 %v7529_v26  ;;  %v8094_v26 = vld [vmem:[%s14483_s11 + $0x28] sm:$0xff] }
0x284c   :  { %v7532_v31 = vpop.xlane.xlu1 %7531  ;;  %v7770_v35 = vpop.permute.xlu0 %7769 }
0x284d   :  { %12049 = vrcp.f32 %v7532_v31  ;;  %v8093_v31 = vld [vmem:[%s14483_s11 + $0x20] sm:$0xff] }
0x2850   :  { %v7690_v53 = vpop.permute.xlu1 %7689  ;;  %v7768_v59 = vpop.permute.xlu0 %7767 }
0x2856   :  { %v12048_v34 = vpop.eup %12047 }
0x2857   :  { %v7535_v43 = vmul.f32 %v12048_v34, %v12044_v36  ;;  %v8233_v36 = vld [vmem:[%s14482_s10 + $0x10] sm:$0xff]  ;;  %v8092_v34 = vld [vmem:[%s14483_s11 + $0x18] sm:$0xff] }
0x2859   :  { %11753 = vmatmul.mubr.msk.f32.vlgmr.msra.gmra.mxu0 %vm388_vm3, %v7535_v43  ;;  %v8091_v43 = vld [vmem:[%s14483_s11 + $0x10] sm:$0xff] }
0x285a   :  { %v12050_v45 = vpop.eup %12049  ;;  %11761 = vmatpush3.xpose.msk.msra.mxu0 %vm388_vm3, %v7692_v25  ;;  %11762 = vmatprep.mubr.msk.f32.mxu0 %vm12138_vm1, %v12137_v4  ;;  %v8095_v25 = vld [vmem:[%s14483_s11 + $0x30] sm:$0xff] }
0x285b   :  { %v7536_v50 = vmul.f32 %v12050_v45, %v12046_v9  ;;  %11770 = vmatprep.subr.mxu0 %v12137_v4  ;;  %v8231_v9 = vld [vmem:[%s14482_s10] sm:$0xff] }
0x285c   :  { %v8089_v45 = vld [vmem:[%s14483_s11] sm:$0xff] }
0x285d   :  { %11758 = vmatmul.mubr.msk.f32.vlgmr.msra.gmra.mxu1 %vm388_vm3, %v7536_v50  ;;  %11763 = vmatmul.mubr.msk.f32.vlgmr.msra.gmra.mxu0 %vm388_vm3, %v7690_v53 }
0x285e   :  { %11766 = vmatpush3.xpose.msk.msra.mxu1 %vm388_vm3, %v7770_v35  ;;  %11767 = vmatprep.mubr.msk.f32.mxu1 %vm12138_vm1, %v12137_v4 }
0x285f   :  { %11775 = vmatprep.subr.mxu1 %v12137_v4  ;;  %11772 = vmatprep.mubr.msk.f32.mxu0 %vm12138_vm1, %v12137_v4 }
0x2861   :  { %11768 = vmatmul.mubr.msk.f32.vlgmr.msra.gmra.mxu1 %vm388_vm3, %v7768_v59 }
0x2862   :  { %11777 = vmatprep.mubr.msk.f32.mxu1 %vm12138_vm1, %v12137_v4 }
0x2919   :  { %v7609_v41 = vpop.f32.mrf.mxu0 }
0x291b   :  { %v11754_v48 = vpop.f32.mrf.mxu0 }
0x291d   :  { %v7685_v51 = vpop.f32.mrf.mxu1  ;;  %v7763_v52 = vpop.f32.mrf.mxu0 }
0x291e   :  { %v7764_v57 = vadd.f32 %v7763_v52, %v12470_v49 }
0x291f   :  { %v11759_v18 = vpop.f32.mrf.mxu1  ;;  %v11764_v3 = vpop.f32.mrf.mxu0 }
0x2920   :  { %v7845_v6 = vsel %vm388_vm3, %v7764_v57, -inf }
0x2921   :  { %7846 = vmax.xlane.f32.xlu1 %v7845_v6  ;;  %v7841_v23 = vpop.f32.mrf.mxu1 }
0x2922   :  { %v7842_v8 = vadd.f32 %v7841_v23, %v12470_v49 }
0x2923   :  { %v11769_v46 = vpop.f32.mrf.mxu1 }
0x2924   :  { %v7848_v21 = vsel %vm388_vm3, %v7842_v8, -inf }
0x2925   :  { %7849 = vmax.xlane.f32.xlu0 %v7848_v21 }
0x29aa   :  { %v7847_v7 = vpop.xlane.xlu1 %7846 }
0x29ab   :  { %v7851_v11 = vsub.f32 %v7764_v57, %v7847_v7 }
0x29ad   :  { %v7853_v12 = vmul.f32 1.442695, %v7851_v11 }
0x29ae   :  { %v7850_v10 = vpop.xlane.xlu0 %7849 }
0x29af   :  { %12051 = vpow2.f32 %v7853_v12  ;;  %v7852_v16 = vsub.f32 %v7842_v8, %v7850_v10 }
0x29b1   :  { %v7855_v32 = vmul.f32 1.442695, %v7852_v16 }
0x29b3   :  { %12053 = vpow2.f32 %v7855_v32 }
0x29bc   :  { %v12052_v56 = vpop.eup %12051 }
0x29bd   :  { %v7857_v20 = vsel %vm388_vm3, %v12052_v56, 0.0 }
0x29be   :  { %7858 = vadd.xlane.f32.xlu0 %v7857_v20 }
0x29c0   :  { %v12054_v40 = vpop.eup %12053 }
0x29c1   :  { %v7860_v24 = vsel %vm388_vm3, %v12054_v40, 0.0 }
0x29c2   :  { %7861 = vadd.xlane.f32.xlu1 %v7860_v24 }
0x29d3   :  { %7943 = vrot.lane.b32.xlu1 %v13485_v15, %s12154_s7 }
0x29d4   :  { %7867 = vrot.lane.b32.xlu0 %v13473_v54, %s12154_s7  ;;  %s10361_s7 = sshll.u32 %s12156_s1, 4  ;;  %s10362_s7 = int_to_ptr.vmem [resolvable:$true] %s10361_s7 }
0x29d5   :  { %p12078_p1 = scmp.lt.s32.totalorder %s10362_s7, %s10362_s7 }
0x29d7   :  { %8021 = vrot.lane.b32.xlu1 %v13564_v13, %s12153_s2 }
0x29d8   :  { %8023 = vrot.lane.b32.xlu0 %v13566_v58, %s12153_s2 }
0x29db   :  { %8029 = vrot.lane.b32.xlu1 %v13604_v39, %s12151_s28 }
0x29dc   :  { %8031 = vrot.lane.b32.xlu0 %v13606_v42, %s12151_s28  ;;  %s14496_s28 = sld [smem:[#allocation6_spill]] }
0x29df   :  { %8037 = vrot.lane.b32.xlu1 %v13644_v0, %s12149_s23 }
0x29e0   :  { %8039 = vrot.lane.b32.xlu0 %v13646_v17, %s12149_s23  ;;  %v8238_v17 = vld [vmem:[%s14482_s10 + $0x38] sm:$0xff]  ;;  %s14493_s23 = sld [smem:[#allocation29_spill]] }
0x29e3   :  { %8045 = vrot.lane.b32.xlu1 %v13684_v5, %s12147_s18  ;;  %v8237_v5 = vld [vmem:[%s14482_s10 + $0x30] sm:$0xff] }
0x29e4   :  { %8047 = vrot.lane.b32.xlu0 %v13686_v63, %s12147_s18  ;;  %v8236_v63 = vld [vmem:[%s14482_s10 + $0x28] sm:$0xff]  ;;  %s14491_s18 = sld [smem:[#allocation25_spill]] }
0x29e7   :  { %8053 = vrot.lane.b32.xlu1 %v13724_v27, %s12145_s15  ;;  %v8235_v27 = vld [vmem:[%s14482_s10 + $0x20] sm:$0xff] }
0x29e8   :  { %8055 = vrot.lane.b32.xlu0 %v13726_v61, %s12145_s15  ;;  %v8234_v61 = vld [vmem:[%s14482_s10 + $0x18] sm:$0xff]  ;;  %s14489_s15 = sld [smem:[#allocation24_spill]] }
0x29eb   :  { %8061 = vrot.lane.b32.xlu1 %v7609_v41, %s12143_s29 }
0x29ec   :  { %8063 = vrot.lane.b32.xlu0 %v7685_v51, %s12143_s29  ;;  %s14487_s29 = sld [smem:[#allocation22_spill]] }
0x2a47   :  { %v7859_v49 = vpop.xlane.xlu0 %7858 }
0x2a48   :  { %12055 = vrcp.f32 %v7859_v49 }
0x2a4b   :  { %v7862_v54 = vpop.xlane.xlu1 %7861  ;;  %v7868_v15 = vpop.permute.xlu0 %7867 }
0x2a4c   :  { %12057 = vrcp.f32 %v7862_v54  ;;  %11771 = vmatpush3.msra.mxu0 %v7868_v15 }
0x2a4d   :  { %11780 = vmatprep.subr.mxu0 %v8096_v60 }
0x2a4f   :  { %v7944_v13 = vpop.permute.xlu1 %7943  ;;  %v8024_v52 = vpop.permute.xlu0 %8023 }
0x2a50   :  { %11776 = vmatpush3.msra.mxu1 %v7944_v13  ;;  %v8076_v32 = vsel %vm388_vm3, %v13526_v30, %v8024_v52 }
0x2a51   :  { %11799 = vmatprep.subr.mxu1 %v12137_v4 }
0x2a53   :  { %v8022_v51 = vpop.permute.xlu1 %8021  ;;  %v8032_v18 = vpop.permute.xlu0 %8031 }
0x2a54   :  { %v8075_v7 = vsel %vm388_vm3, %v13524_v22, %v8022_v51  ;;  %v8078_v20 = vsel %vm3080_vm5, %v8076_v32, %v8032_v18 }
0x2a55   :  { %v12056_v58 = vpop.eup %12055 }
0x2a56   :  { %v7865_v39 = vmul.f32 %v12056_v58, %v12052_v56 }
0x2a57   :  { %v8030_v57 = vpop.permute.xlu1 %8029  ;;  %v8040_v6 = vpop.permute.xlu0 %8039 }
0x2a58   :  { %11773 = vmatmul.mubr.msk.f32.vlgmr.msra.gmra.mxu0 %vm388_vm3, %v7865_v39  ;;  %v8077_v11 = vsel %vm3080_vm5, %v8075_v7, %v8030_v57  ;;  %v8080_v49 = vsel %vm3083_vm6, %v8078_v20, %v8040_v6  ;;  %v8323_v39 = vld [vmem:[%s14484_s0 + $0x38] sm:$0xff]  ;;  %v10553_v7 = vld [vmem:[%s14487_s29] ss:$0 sm:$0xff] }
0x2a59   :  { %v12058_v42 = vpop.eup %12057  ;;  %11781 = vmatpush3.msra.mxu0 %v8096_v60  ;;  %v10546_v60 = vld [vmem:[%s14486_s13] ss:$0 sm:$0xff] }
0x2a5a   :  { %v7866_v0 = vmul.f32 %v12058_v42, %v12054_v40  ;;  %11782 = vmatprep.subr.mxu0 %v8095_v25 }
0x2a5b   :  { %11783 = vmatpush3.msra.mxu0 %v8095_v25  ;;  %v8038_v3 = vpop.permute.xlu1 %8037  ;;  %v8048_v8 = vpop.permute.xlu0 %8047 }
0x2a5c   :  { %11778 = vmatmul.mubr.msk.f32.vlgmr.msra.gmra.mxu1 %vm388_vm3, %v7866_v0  ;;  %11784 = vmatprep.subr.mxu0 %v8094_v26  ;;  %v8079_v10 = vsel %vm3083_vm6, %v8077_v11, %v8038_v3  ;;  %v8082_v15 = vsel %vm3086_vm7, %v8080_v49, %v8048_v8  ;;  %v8322_v0 = vld [vmem:[%s14484_s0 + $0x30] sm:$0xff] }
0x2a5d   :  { %11800 = vmatpush3.msra.mxu1 %v8238_v17  ;;  %11815 = vmatprep.mubr.msk.f32.mxu1 %vm12138_vm1, %v12137_v4  ;;  %v8321_v17 = vld [vmem:[%s14484_s0 + $0x28] sm:$0xff] }
0x2a5e   :  { %11801 = vmatprep.subr.mxu1 %v12137_v4  ;;  %11785 = vmatpush3.msra.mxu0 %v8094_v26 }
0x2a5f   :  { %11802 = vmatpush3.msra.mxu1 %v8237_v5  ;;  %11786 = vmatprep.subr.mxu0 %v8093_v31  ;;  %v8046_v23 = vpop.permute.xlu1 %8045  ;;  %v8056_v21 = vpop.permute.xlu0 %8055  ;;  %v8320_v5 = vld [vmem:[%s14484_s0 + $0x20] sm:$0xff] }
0x2a60   :  { %11803 = vmatprep.subr.mxu1 %v12137_v4  ;;  %11787 = vmatpush3.msra.mxu0 %v8093_v31  ;;  %v8081_v16 = vsel %vm3086_vm7, %v8079_v10, %v8046_v23  ;;  %v8084_v30 = vsel %vm3089_vm8, %v8082_v15, %v8056_v21 }
0x2a61   :  { %11804 = vmatpush3.msra.mxu1 %v8236_v63  ;;  %11788 = vmatprep.subr.mxu0 %v8092_v34  ;;  %v8319_v63 = vld [vmem:[%s14484_s0 + $0x18] sm:$0xff] }
0x2a62   :  { %11805 = vmatprep.subr.mxu1 %v12137_v4  ;;  %11789 = vmatpush3.msra.mxu0 %v8092_v34 }
0x2a63   :  { %11806 = vmatpush3.msra.mxu1 %v8235_v27  ;;  %11790 = vmatprep.subr.mxu0 %v8091_v43  ;;  %v8054_v46 = vpop.permute.xlu1 %8053  ;;  %v8064_v40 = vpop.permute.xlu0 %8063  ;;  %v8318_v27 = vld [vmem:[%s14484_s0 + $0x10] sm:$0xff] }
0x2a64   :  { %11807 = vmatprep.subr.mxu1 %v12137_v4  ;;  %11791 = vmatpush3.msra.mxu0 %v8091_v43  ;;  %v8083_v56 = vsel %vm3089_vm8, %v8081_v16, %v8054_v46  ;;  %v8086_v13 = vsel %vm191_vm2, %v8084_v30, %v8064_v40 }
0x2a65   :  { %11808 = vmatpush3.msra.mxu1 %v8234_v61  ;;  %v8317_v61 = vld [vmem:[%s14484_s0 + $0x8] sm:$0xff] }
0x2a66   :  { %11809 = vmatprep.subr.mxu1 %v12137_v4 }
0x2a67   :  { %11810 = vmatpush3.msra.mxu1 %v8233_v36  ;;  %v8062_v12 = vpop.permute.xlu1 %8061 }
0x2a68   :  { %11811 = vmatprep.subr.mxu1 %v12137_v4  ;;  %v8085_v24 = vsel %vm191_vm2, %v8083_v56, %v8062_v12  ;;  %v10549_v56 = vld [vmem:[%s14488_s3] ss:$0 sm:$0xff] }
0x2a69   :  { %11812 = vmatpush3.msra.mxu1 %v8232_v62  ;;  %v8316_v62 = vld [vmem:[%s14484_s0] sm:$0xff] }
0x2a6a   :  { %11813 = vmatprep.subr.mxu1 %v12137_v4 }
0x2a6b   :  { %11814 = vmatpush3.msra.mxu1 %v8231_v9 }
0x2a6c   :  { %11816 = vmatmul.mubr.msk.f32.vlgmr.msra.gmra.mxu1 %vm299_vm0, %v12795_v14  ;;  %v8090_v14 = vld [vmem:[%s14483_s11 + $0x8] sm:$0xff] }
0x2a6d   :  { %8765 = vmatprep.mubr.f32.mxu1 %v12137_v4  ;;  %11792 = vmatprep.subr.mxu0 %v8090_v14 }
0x2a6e   :  { %11793 = vmatpush3.msra.mxu0 %v8090_v14 }
0x2a6f   :  { %11794 = vmatprep.subr.mxu0 %v8089_v45 }
0x2a70   :  { %11795 = vmatpush3.msra.mxu0 %v8089_v45 }
0x2a71   :  { %11818 = vmatprep.subr.mxu0 %v12137_v4 }
0x2b18   :  { %v7939_v35 = vpop.f32.mrf.mxu0 }
0x2b19   :  { %8069 = vrot.lane.b32.xlu1 %v7939_v35, %s12141_s9 }
0x2b1a   :  { %v11774_v50 = vpop.f32.mrf.mxu0 }
0x2b1c   :  { %v8015_v53 = vpop.f32.mrf.mxu1 }
0x2b1d   :  { %8071 = vrot.lane.b32.xlu0 %v8015_v53, %s12141_s9  ;;  %s14485_s9 = sld [smem:[#allocation20_spill]] }
0x2b1e   :  { %v11779_v59 = vpop.f32.mrf.mxu1 }
0x2b23   :  { %v10551_v36 = vld [vmem:[%s14485_s9] ss:$0 sm:$0xff] }
0x2b2c   :  { %v8312_v41 = vpop.f32.mrf.mxu1 }
0x2b2d   :  { %v8313_v9 = vadd.f32 %v10551_v36, %v8312_v41 }
0x2b2e   :  { %v11817_v48 = vpop.f32.mrf.mxu1 }
0x2b8b   :  { %v8070_v22 = vpop.permute.xlu1 %8069 }
0x2b8c   :  { %v8087_v54 = vsel %vm3094_vm9, %v8085_v24, %v8070_v22  ;;  %v10550_v22 = vld [vmem:[%s14489_s15] ss:$0 sm:$0xff] }
0x2b8d   :  { %11796 = vmatprep.mubr.msk.f32.mxu0 %vm299_vm0, %v8087_v54 }
0x2b8f   :  { %v8072_v58 = vpop.permute.xlu0 %8071 }
0x2b90   :  { %v8088_v42 = vsel %vm3094_vm9, %v8086_v13, %v8072_v58 }
0x2b91   :  { %11797 = vmatmul.mubr.msk.f32.vlgmr.msra.gmra.mxu0 %vm299_vm0, %v8088_v42 }
0x2b92   :  { %11819 = vmatpush3.msra.mxu0 %v8323_v39  ;;  %11834 = vmatprep.mubr.msk.f32.mxu0 %vm12138_vm1, %v12137_v4 }
0x2b93   :  { %11820 = vmatprep.subr.mxu0 %v12137_v4 }
0x2b94   :  { %11821 = vmatpush3.msra.mxu0 %v8322_v0 }
0x2b95   :  { %11822 = vmatprep.subr.mxu0 %v12137_v4 }
0x2b96   :  { %11823 = vmatpush3.msra.mxu0 %v8321_v17 }
0x2b97   :  { %11824 = vmatprep.subr.mxu0 %v12137_v4 }
0x2b98   :  { %11825 = vmatpush3.msra.mxu0 %v8320_v5 }
0x2b99   :  { %11826 = vmatprep.subr.mxu0 %v12137_v4 }
0x2b9a   :  { %11827 = vmatpush3.msra.mxu0 %v8319_v63 }
0x2b9b   :  { %11828 = vmatprep.subr.mxu0 %v12137_v4 }
0x2b9c   :  { %11829 = vmatpush3.msra.mxu0 %v8318_v27 }
0x2b9d   :  { %11830 = vmatprep.subr.mxu0 %v12137_v4 }
0x2b9e   :  { %11831 = vmatpush3.msra.mxu0 %v8317_v61 }
0x2b9f   :  { %11832 = vmatprep.subr.mxu0 %v12137_v4 }
0x2ba0   :  { %11833 = vmatpush3.msra.mxu0 %v8316_v62 }
0x2ba1   :  { %11835 = vmatmul.mubr.msk.f32.vlgmr.msra.gmra.mxu0 %vm299_vm0, %v8313_v9 }
0x2ba2   :  { %8842 = vmatprep.mubr.f32.mxu0 %v12137_v4 }
0x2c51   :  { %v11798_v25 = vpop.f32.mrf.mxu0 }
0x2c52   :  { %v8182_v26 = vadd.f32 %v11798_v25, %v10546_v60 }
0x2c53   :  { %v8176_v31 = vpop.f32.mrf.mxu0 }
0x2c54   :  { %v8186_v34 = vadd.f32 %v8182_v26, %v13451_v37  ;;  %v8177_v43 = vadd.f32 %v10546_v60, %v8176_v31 }
0x2c56   :  { %v8185_v14 = vadd.f32 %v8177_v43, %v13446_v29  ;;  %v8192_v45 = vsel %vm299_vm0, %v8186_v34, 0.0  ;;  %v8598_v43 = vld [vmem:[%s14490_s16 + $0x398] sm:$0xff] }
0x2c57   :  { %8193 = vadd.xlane.f32.xlu0 %v8192_v45  ;;  %8794 = vmatprep.subr.mxu0 %v8598_v43  ;;  %v8597_v45 = vld [vmem:[%s14490_s16 + $0x390] sm:$0xff]  ;;  %v8570_v43 = vld [vmem:[%s14490_s16 + $0x2b8] sm:$0xff] }
0x2c58   :  { %v8189_v35 = vsel %vm299_vm0, %v8185_v14, 0.0  ;;  %8795 = vmatpush1.msra.mxu0 %v8597_v45  ;;  %v8567_v45 = vld [vmem:[%s14490_s16 + $0x2a0] sm:$0xff] }
0x2c59   :  { %8190 = vadd.xlane.f32.xlu1 %v8189_v35  ;;  %v8580_v35 = vld [vmem:[%s14490_s16 + $0x308] sm:$0xff] }
0x2c61   :  { %v8400_v50 = vpop.f32.mrf.mxu0 }
0x2c62   :  { %v8401_v12 = vadd.f32 %v10553_v7, %v8400_v50  ;;  %v8582_v50 = vld [vmem:[%s14490_s16 + $0x318] sm:$0xff]  ;;  %v8515_v7 = vld [vmem:[%s14490_s16 + $0x100] sm:$0xff] }
0x2c63   :  { %v11836_v53 = vpop.f32.mrf.mxu0  ;;  %8796 = vmatprep.subr.mxu0 %v8582_v50  ;;  %v8552_v50 = vld [vmem:[%s14490_s16 + $0x228] sm:$0xff] }
0x2c64   :  { %v8411_v10 = vrot.slane %v8401_v12, %v12859_v55  ;;  %v8579_v53 = vld [vmem:[%s14490_s16 + $0x300] sm:$0xff]  ;;  %v8500_v12 = vld [vmem:[%s14490_s16 + $0x88] sm:$0xff] }
0x2c66   :  { %v8412_v16 = vcombine.high %v8411_v10, %v8411_v10  ;;  %v8419_v49 = vrot.slane %v8411_v10, %v12859_v55  ;;  %v8502_v10 = vld [vmem:[%s14490_s16 + $0x98] sm:$0xff] }
0x2c68   :  { %v8426_v20 = vrot.slane %v8412_v16, %v12859_v55  ;;  %v8430_v0 = vrot.slane %v8419_v49, %v12425_v28  ;;  %v8499_v16 = vld [vmem:[%s14490_s16 + $0x80] sm:$0xff]  ;;  %v8602_v49 = vld [vmem:[%s14490_s16 + $0x3b8] sm:$0xff] }
0x2c6a   :  { %v8434_v13 = vrot.slane %v8426_v20, %v12425_v28  ;;  %v8486_v20 = vld [vmem:[%s14490_s16 + $0x18] sm:$0xff] }
0x2ce0   :  { %v8194_v59 = vpop.xlane.xlu0 %8193 }
0x2ce1   :  { %v8196_v41 = vmul.f32 0.015625, %v8194_v59  ;;  %v8581_v59 = vld [vmem:[%s14490_s16 + $0x310] sm:$0xff] }
0x2ce2   :  { %v8191_v48 = vpop.xlane.xlu1 %8190  ;;  %8797 = vmatpush1.msra.mxu0 %v8581_v59  ;;  %v8551_v59 = vld [vmem:[%s14490_s16 + $0x220] sm:$0xff] }
0x2ce3   :  { %v8198_v51 = vsub.f32 %v8186_v34, %v8196_v41  ;;  %v8195_v52 = vmul.f32 0.015625, %v8191_v48  ;;  %v8596_v34 = vld [vmem:[%s14490_s16 + $0x388] sm:$0xff]  ;;  %v8566_v48 = vld [vmem:[%s14490_s16 + $0x298] sm:$0xff] }
0x2ce4   :  { %8717 = vmatprep.subr.mxu1 %v8596_v34  ;;  %v8564_v41 = vld [vmem:[%s14490_s16 + $0x288] sm:$0xff]  ;;  %8798 = vmatprep.subr.mxu0 %v8566_v48 }
0x2ce5   :  { %v8197_v57 = vsub.f32 %v8185_v14, %v8195_v52  ;;  %v8200_v18 = vmul.f32 %v8198_v51, %v8198_v51  ;;  %v8595_v14 = vld [vmem:[%s14490_s16 + $0x380] sm:$0xff]  ;;  %v8565_v52 = vld [vmem:[%s14490_s16 + $0x290] sm:$0xff]  ;;  %v8568_v34 = vld [vmem:[%s14490_s16 + $0x2a8] sm:$0xff] }
0x2ce6   :  { %8718 = vmatpush1.msra.mxu1 %v8595_v14  ;;  %8799 = vmatpush1.msra.mxu0 %v8565_v52  ;;  %v8536_v48 = vld [vmem:[%s14490_s16 + $0x1a8] sm:$0xff]  ;;  %v8535_v52 = vld [vmem:[%s14490_s16 + $0x1a0] sm:$0xff] }
0x2ce7   :  { %v8204_v37 = vsel %vm299_vm0, %v8200_v18, 0.0  ;;  %v8199_v3 = vmul.f32 %v8197_v57, %v8197_v57  ;;  %8719 = vmatprep.subr.mxu1 %v8580_v35  ;;  %v8550_v18 = vld [vmem:[%s14490_s16 + $0x218] sm:$0xff]  ;;  %v8569_v35 = vld [vmem:[%s14490_s16 + $0x2b0] sm:$0xff] }
0x2ce8   :  { %8205 = vadd.xlane.f32.xlu1 %v8204_v37  ;;  %8720 = vmatpush1.msra.mxu1 %v8579_v53  ;;  %v8547_v37 = vld [vmem:[%s14490_s16 + $0x200] sm:$0xff]  ;;  %v8554_v53 = vld [vmem:[%s14490_s16 + $0x238] sm:$0xff] }
0x2ce9   :  { %v8201_v29 = vsel %vm299_vm0, %v8199_v3, 0.0  ;;  %8721 = vmatprep.subr.mxu1 %v8564_v41  ;;  %8800 = vmatprep.subr.mxu0 %v8550_v18  ;;  %v8549_v3 = vld [vmem:[%s14490_s16 + $0x210] sm:$0xff]  ;;  %v8520_v18 = vld [vmem:[%s14490_s16 + $0x128] sm:$0xff] }
0x2cea   :  { %8202 = vadd.xlane.f32.xlu0 %v8201_v29  ;;  %8801 = vmatpush1.msra.mxu0 %v8549_v3  ;;  %v8532_v29 = vld [vmem:[%s14490_s16 + $0x188] sm:$0xff]  ;;  %v8553_v41 = vld [vmem:[%s14490_s16 + $0x230] sm:$0xff]  ;;  %v8519_v3 = vld [vmem:[%s14490_s16 + $0x120] sm:$0xff] }
0x2d71   :  { %v8206_v6 = vpop.xlane.xlu1 %8205 }
0x2d72   :  { %v8208_v23 = vmul.f32 0.015625, %v8206_v6  ;;  %v8534_v6 = vld [vmem:[%s14490_s16 + $0x198] sm:$0xff] }
0x2d73   :  { %v8203_v8 = vpop.xlane.xlu0 %8202  ;;  %8802 = vmatprep.subr.mxu0 %v8534_v6  ;;  %v8504_v6 = vld [vmem:[%s14490_s16 + $0xa8] sm:$0xff] }
0x2d74   :  { %v8210_v46 = vadd.f32 1e-05, %v8208_v23  ;;  %v8207_v21 = vmul.f32 0.015625, %v8203_v8  ;;  %v8531_v23 = vld [vmem:[%s14490_s16 + $0x180] sm:$0xff]  ;;  %v8533_v8 = vld [vmem:[%s14490_s16 + $0x190] sm:$0xff] }
0x2d75   :  { %8803 = vmatpush1.msra.mxu0 %v8533_v8  ;;  %v8503_v8 = vld [vmem:[%s14490_s16 + $0xa0] sm:$0xff] }
0x2d76   :  { %12059 = vrsqrt.f32 %v8210_v46  ;;  %v8209_v11 = vadd.f32 1e-05, %v8207_v21  ;;  %v8516_v46 = vld [vmem:[%s14490_s16 + $0x108] sm:$0xff]  ;;  %v8518_v21 = vld [vmem:[%s14490_s16 + $0x118] sm:$0xff] }
0x2d77   :  { %8804 = vmatprep.subr.mxu0 %v8518_v21  ;;  %v8488_v21 = vld [vmem:[%s14490_s16 + $0x28] sm:$0xff] }
0x2d78   :  { %12061 = vrsqrt.f32 %v8209_v11  ;;  %v8517_v11 = vld [vmem:[%s14490_s16 + $0x110] sm:$0xff] }
0x2d79   :  { %8805 = vmatpush1.msra.mxu0 %v8517_v11  ;;  %v8487_v11 = vld [vmem:[%s14490_s16 + $0x20] sm:$0xff] }
0x2d7a   :  { %8806 = vmatprep.subr.mxu0 %v8502_v10  ;;  %v8604_v10 = vld [vmem:[%s14490_s16 + $0x3c8] sm:$0xff] }
0x2d83   :  { %v12060_v32 = vpop.eup %12059 }
0x2d84   :  { %v8214_v40 = vmul.f32 %v12060_v32, %v8198_v51  ;;  %v8563_v51 = vld [vmem:[%s14490_s16 + $0x280] sm:$0xff]  ;;  %v8501_v32 = vld [vmem:[%s14490_s16 + $0x90] sm:$0xff] }
0x2d85   :  { %v12062_v24 = vpop.eup %12061  ;;  %8722 = vmatpush1.msra.mxu1 %v8563_v51  ;;  %8807 = vmatpush1.msra.mxu0 %v8501_v32  ;;  %v8538_v51 = vld [vmem:[%s14490_s16 + $0x1b8] sm:$0xff]  ;;  %v8603_v32 = vld [vmem:[%s14490_s16 + $0x3c0] sm:$0xff] }
0x2d86   :  { %v8222_v54 = vmul.f32 %v10549_v56, %v8214_v40  ;;  %v8213_v15 = vmul.f32 %v12062_v24, %v8197_v57  ;;  %v8548_v57 = vld [vmem:[%s14490_s16 + $0x208] sm:$0xff]  ;;  %8808 = vmatprep.subr.mxu0 %v8486_v20  ;;  %v8483_v40 = vld [vmem:[%s14490_s16] sm:$0xff]  ;;  %v8485_v24 = vld [vmem:[%s14490_s16 + $0x10] sm:$0xff] }
0x2d87   :  { %8723 = vmatprep.subr.mxu1 %v8548_v57  ;;  %8809 = vmatpush1.msra.mxu0 %v8485_v24  ;;  %v8537_v57 = vld [vmem:[%s14490_s16 + $0x1b0] sm:$0xff]  ;;  %v8588_v20 = vld [vmem:[%s14490_s16 + $0x348] sm:$0xff]  ;;  %v8587_v24 = vld [vmem:[%s14490_s16 + $0x340] sm:$0xff] }
0x2d88   :  { %v8230_v30 = vadd.f32 %v10550_v22, %v8222_v54  ;;  %v8221_v58 = vmul.f32 %v10549_v56, %v8213_v15  ;;  %8724 = vmatpush1.msra.mxu1 %v8547_v37  ;;  %v8484_v56 = vld [vmem:[%s14490_s16 + $0x8] sm:$0xff]  ;;  %8948 = vmatprep.subr.mxu0 %v8602_v49  ;;  %v8522_v37 = vld [vmem:[%s14490_s16 + $0x138] sm:$0xff] }
0x2d89   :  { %8725 = vmatprep.subr.mxu1 %v8532_v29  ;;  %v8521_v29 = vld [vmem:[%s14490_s16 + $0x130] sm:$0xff]  ;;  %v8572_v49 = vld [vmem:[%s14490_s16 + $0x2c8] sm:$0xff] }
0x2d8a   :  { %v8438_v39 = vadd.f32 %v8434_v13, %v8230_v30  ;;  %v8229_v42 = vadd.f32 %v10550_v22, %v8221_v58  ;;  %8726 = vmatpush1.msra.mxu1 %v8531_v23  ;;  %v8600_v22 = vld [vmem:[%s14490_s16 + $0x3a8] sm:$0xff]  ;;  %v8506_v23 = vld [vmem:[%s14490_s16 + $0xb8] sm:$0xff] }
0x2d8b   :  { %8727 = vmatprep.subr.mxu1 %v8516_v46  ;;  %v8505_v46 = vld [vmem:[%s14490_s16 + $0xb0] sm:$0xff] }
0x2d8c   :  { %v8444_v17 = vsel %vm299_vm0, %v8438_v39, 0.0  ;;  %v8437_v5 = vadd.f32 %v8430_v0, %v8229_v42  ;;  %8728 = vmatpush1.msra.mxu1 %v8515_v7  ;;  %v8490_v7 = vld [vmem:[%s14490_s16 + $0x38] sm:$0xff] }
0x2d8d   :  { %8445 = vadd.xlane.f32.xlu1 %v8444_v17  ;;  %8729 = vmatprep.subr.mxu1 %v8500_v12  ;;  %v8489_v12 = vld [vmem:[%s14490_s16 + $0x30] sm:$0xff] }
0x2d8e   :  { %v8441_v63 = vsel %vm299_vm0, %v8437_v5, 0.0  ;;  %8730 = vmatpush1.msra.mxu1 %v8499_v16  ;;  %v8606_v16 = vld [vmem:[%s14490_s16 + $0x3d8] sm:$0xff] }
0x2d8f   :  { %8442 = vadd.xlane.f32.xlu0 %v8441_v63  ;;  %8731 = vmatprep.subr.mxu1 %v8484_v56  ;;  %v8605_v56 = vld [vmem:[%s14490_s16 + $0x3d0] sm:$0xff] }
0x2d90   :  { %8732 = vmatpush1.msra.mxu1 %v8483_v40  ;;  %v8590_v40 = vld [vmem:[%s14490_s16 + $0x358] sm:$0xff] }
0x2d91   :  { %8871 = vmatprep.subr.mxu1 %v8600_v22  ;;  %v8589_v22 = vld [vmem:[%s14490_s16 + $0x350] sm:$0xff] }
0x2e16   :  { %v8446_v55 = vpop.xlane.xlu1 %8445 }
0x2e17   :  { %v8448_v27 = vmul.f32 0.015625, %v8446_v55 }
0x2e18   :  { %v8443_v61 = vpop.xlane.xlu0 %8442 }
0x2e19   :  { %v13885_v36 = vsub.f32 %v8438_v39, %v8448_v27  ;;  %v8447_v62 = vmul.f32 0.015625, %v8443_v61  ;;  %v10556_v27 = vld [vmem:[%s14492_s22] ss:$0 sm:$0xff] }
0x2e1b   :  { %v13887_v9 = vsub.f32 %v8437_v5, %v8447_v62  ;;  %v8452_v60 = vmul.f32 %v13885_v36, %v13885_v36  ;;  %v10555_v5 = vld [vmem:[%s14491_s18] ss:$0 sm:$0xff] }
0x2e1c   :  { %v8599_v62 = vld [vmem:[%s14490_s16 + $0x3a0] sm:$0xff] }
0x2e1d   :  { %v8456_v25 = vsel %vm299_vm0, %v8452_v60, 0.0  ;;  %v8451_v26 = vmul.f32 %v13887_v9, %v13887_v9  ;;  %v8601_v60 = vld [vmem:[%s14490_s16 + $0x3b0] sm:$0xff] }
0x2e1e   :  { %8457 = vadd.xlane.f32.xlu1 %v8456_v25  ;;  %v8584_v25 = vld [vmem:[%s14490_s16 + $0x328] sm:$0xff] }
0x2e1f   :  { %v8453_v31 = vsel %vm299_vm0, %v8451_v26, 0.0  ;;  %v8586_v26 = vld [vmem:[%s14490_s16 + $0x338] sm:$0xff] }
0x2e20   :  { %8454 = vadd.xlane.f32.xlu0 %v8453_v31 }
0x2ea7   :  { %v8458_v54 = vpop.xlane.xlu1 %8457 }
0x2ea8   :  { %v8460_v15 = vmul.f32 0.015625, %v8458_v54  ;;  %v8574_v54 = vld [vmem:[%s14490_s16 + $0x2d8] sm:$0xff] }
0x2ea9   :  { %v8455_v30 = vpop.xlane.xlu0 %8454 }
0x2eaa   :  { %v8462_v13 = vadd.f32 1e-05, %v8460_v15  ;;  %v8459_v58 = vmul.f32 0.015625, %v8455_v30  ;;  %v8571_v15 = vld [vmem:[%s14490_s16 + $0x2c0] sm:$0xff]  ;;  %v8573_v30 = vld [vmem:[%s14490_s16 + $0x2d0] sm:$0xff] }
0x2eac   :  { %v8461_v39 = vadd.f32 1e-05, %v8459_v58  ;;  %12063 = vrsqrt.f32 %v8462_v13  ;;  %v8556_v13 = vld [vmem:[%s14490_s16 + $0x248] sm:$0xff]  ;;  %v8558_v58 = vld [vmem:[%s14490_s16 + $0x258] sm:$0xff] }
0x2eae   :  { %12065 = vrsqrt.f32 %v8461_v39  ;;  %v8555_v39 = vld [vmem:[%s14490_s16 + $0x240] sm:$0xff] }
0x2eb9   :  { %v12064_v42 = vpop.eup %12063 }
0x2eba   :  { %v8466_v63 = vmul.f32 %v12064_v42, %v13885_v36  ;;  %v8583_v36 = vld [vmem:[%s14490_s16 + $0x320] sm:$0xff]  ;;  %v8557_v42 = vld [vmem:[%s14490_s16 + $0x250] sm:$0xff] }
0x2ebb   :  { %v12066_v0 = vpop.eup %12065 }
0x2ebc   :  { %v8465_v17 = vmul.f32 %v12066_v0, %v13887_v9  ;;  %v8474_v31 = vmul.f32 %v10555_v5, %v8466_v63  ;;  %v8585_v9 = vld [vmem:[%s14490_s16 + $0x330] sm:$0xff]  ;;  %v8540_v0 = vld [vmem:[%s14490_s16 + $0x1c8] sm:$0xff] }
0x2ebd   :  { %v8541_v63 = vld [vmem:[%s14490_s16 + $0x1d0] sm:$0xff] }
0x2ebe   :  { %v8473_v55 = vmul.f32 %v10555_v5, %v8465_v17  ;;  %v13947_v14 = vadd.f32 %v10556_v27, %v8474_v31  ;;  %v8542_v17 = vld [vmem:[%s14490_s16 + $0x1d8] sm:$0xff]  ;;  %v8539_v5 = vld [vmem:[%s14490_s16 + $0x1c0] sm:$0xff] }
0x2ebf   :  { %v8507_v31 = vld [vmem:[%s14490_s16 + $0xc0] sm:$0xff] }
0x2ec0   :  { %v13933_v61 = vadd.f32 %v10556_v27, %v8473_v55  ;;  %v8524_v55 = vld [vmem:[%s14490_s16 + $0x148] sm:$0xff]  ;;  %v8526_v27 = vld [vmem:[%s14490_s16 + $0x158] sm:$0xff] }
0x2ec2   :  { %10557 = vmatmul.mubr.msk.f32.vlgmr.msra.gmra.mxu1 %vm299_vm0, %v13933_v61  ;;  %10559 = vmatmul.mubr.msk.f32.vlgmr.msra.gmra.mxu0 %vm299_vm0, %v13933_v61 }
0x2ec3   :  { %8872 = vmatpush1.msra.mxu1 %v8599_v62  ;;  %8949 = vmatpush1.msra.mxu0 %v8601_v60  ;;  %v8523_v62 = vld [vmem:[%s14490_s16 + $0x140] sm:$0xff]  ;;  %v8525_v60 = vld [vmem:[%s14490_s16 + $0x150] sm:$0xff] }
0x2ec4   :  { %8873 = vmatprep.subr.mxu1 %v8584_v25  ;;  %8950 = vmatprep.subr.mxu0 %v8586_v26  ;;  %v8508_v25 = vld [vmem:[%s14490_s16 + $0xc8] sm:$0xff]  ;;  %v8510_v26 = vld [vmem:[%s14490_s16 + $0xd8] sm:$0xff] }
0x2ec5   :  { %8874 = vmatpush1.msra.mxu1 %v8583_v36  ;;  %8951 = vmatpush1.msra.mxu0 %v8585_v9  ;;  %v8509_v36 = vld [vmem:[%s14490_s16 + $0xd0] sm:$0xff]  ;;  %v8492_v9 = vld [vmem:[%s14490_s16 + $0x48] sm:$0xff] }
0x2ec6   :  { %8771 = vmatprep.mubr.f32.mxu1 %v12137_v4  ;;  %8848 = vmatprep.mubr.f32.mxu0 %v12137_v4 }
0x2ec7   :  { %8875 = vmatprep.subr.mxu1 %v8568_v34  ;;  %8952 = vmatprep.subr.mxu0 %v8570_v43  ;;  %v8494_v34 = vld [vmem:[%s14490_s16 + $0x58] sm:$0xff]  ;;  %v8491_v43 = vld [vmem:[%s14490_s16 + $0x40] sm:$0xff] }
0x2ec8   :  { %10558 = vmatmul.mubr.msk.f32.gmra.mxu1 %vm299_vm0, %v13947_v14  ;;  %10560 = vmatmul.mubr.msk.f32.gmra.mxu0 %vm299_vm0, %v13947_v14 }
0x2ec9   :  { %8876 = vmatpush1.msra.mxu1 %v8567_v45  ;;  %8953 = vmatpush1.msra.mxu0 %v8569_v35  ;;  %v8493_v45 = vld [vmem:[%s14490_s16 + $0x50] sm:$0xff]  ;;  %v8608_v35 = vld [vmem:[%s14490_s16 + $0x3e8] sm:$0xff] }
0x2eca   :  { %8877 = vmatprep.subr.mxu1 %v8552_v50  ;;  %8954 = vmatprep.subr.mxu0 %v8554_v53  ;;  %v8610_v50 = vld [vmem:[%s14490_s16 + $0x3f8] sm:$0xff]  ;;  %v8607_v53 = vld [vmem:[%s14490_s16 + $0x3e0] sm:$0xff] }
0x2ecb   :  { %8878 = vmatpush1.msra.mxu1 %v8551_v59  ;;  %8955 = vmatpush1.msra.mxu0 %v8553_v41  ;;  %v8609_v59 = vld [vmem:[%s14490_s16 + $0x3f0] sm:$0xff]  ;;  %v8592_v41 = vld [vmem:[%s14490_s16 + $0x368] sm:$0xff] }
0x2ecc   :  { %8879 = vmatprep.subr.mxu1 %v8536_v48  ;;  %8956 = vmatprep.subr.mxu0 %v8538_v51  ;;  %v8594_v48 = vld [vmem:[%s14490_s16 + $0x378] sm:$0xff]  ;;  %v8591_v51 = vld [vmem:[%s14490_s16 + $0x360] sm:$0xff] }
0x2ecd   :  { %8880 = vmatpush1.msra.mxu1 %v8535_v52  ;;  %8957 = vmatpush1.msra.mxu0 %v8537_v57  ;;  %v8593_v52 = vld [vmem:[%s14490_s16 + $0x370] sm:$0xff]  ;;  %v8576_v57 = vld [vmem:[%s14490_s16 + $0x2e8] sm:$0xff] }
0x2ece   :  { %8881 = vmatprep.subr.mxu1 %v8520_v18  ;;  %8958 = vmatprep.subr.mxu0 %v8522_v37  ;;  %v8578_v18 = vld [vmem:[%s14490_s16 + $0x2f8] sm:$0xff]  ;;  %v8575_v37 = vld [vmem:[%s14490_s16 + $0x2e0] sm:$0xff] }
0x2ecf   :  { %8882 = vmatpush1.msra.mxu1 %v8519_v3  ;;  %8959 = vmatpush1.msra.mxu0 %v8521_v29  ;;  %v8577_v3 = vld [vmem:[%s14490_s16 + $0x2f0] sm:$0xff]  ;;  %v8560_v29 = vld [vmem:[%s14490_s16 + $0x268] sm:$0xff] }
0x2ed0   :  { %8883 = vmatprep.subr.mxu1 %v8504_v6  ;;  %8960 = vmatprep.subr.mxu0 %v8506_v23  ;;  %v8562_v6 = vld [vmem:[%s14490_s16 + $0x278] sm:$0xff]  ;;  %v8559_v23 = vld [vmem:[%s14490_s16 + $0x260] sm:$0xff] }
0x2ed1   :  { %8884 = vmatpush1.msra.mxu1 %v8503_v8  ;;  %8961 = vmatpush1.msra.mxu0 %v8505_v46  ;;  %v8561_v8 = vld [vmem:[%s14490_s16 + $0x270] sm:$0xff]  ;;  %v8544_v46 = vld [vmem:[%s14490_s16 + $0x1e8] sm:$0xff] }
0x2ed2   :  { %8885 = vmatprep.subr.mxu1 %v8488_v21  ;;  %8962 = vmatprep.subr.mxu0 %v8490_v7  ;;  %v8546_v21 = vld [vmem:[%s14490_s16 + $0x1f8] sm:$0xff]  ;;  %v8543_v7 = vld [vmem:[%s14490_s16 + $0x1e0] sm:$0xff] }
0x2ed3   :  { %8886 = vmatpush1.msra.mxu1 %v8487_v11  ;;  %8919 = vmatprep.mubr.f32.mxu1 %v12137_v4  ;;  %v8545_v11 = vld [vmem:[%s14490_s16 + $0x1f0] sm:$0xff] }
0x2ed4   :  { %8963 = vmatpush1.msra.mxu0 %v8489_v12  ;;  %8996 = vmatprep.mubr.f32.mxu0 %v12137_v4  ;;  %v8528_v12 = vld [vmem:[%s14490_s16 + $0x168] sm:$0xff] }
0x2ed5   :  { %10561 = vmatmul.mubr.msk.f32.vlgmr.msra.gmra.mxu1 %vm299_vm0, %v13933_v61  ;;  %10563 = vmatmul.mubr.msk.f32.vlgmr.msra.gmra.mxu0 %vm299_vm0, %v13933_v61 }
0x2ed6   :  { %9025 = vmatprep.subr.mxu1 %v8604_v10  ;;  %9102 = vmatprep.subr.mxu0 %v8606_v16  ;;  %v8530_v10 = vld [vmem:[%s14490_s16 + $0x178] sm:$0xff]  ;;  %v8527_v16 = vld [vmem:[%s14490_s16 + $0x160] sm:$0xff] }
0x2ed7   :  { %9026 = vmatpush1.msra.mxu1 %v8603_v32  ;;  %9103 = vmatpush1.msra.mxu0 %v8605_v56  ;;  %v8529_v32 = vld [vmem:[%s14490_s16 + $0x170] sm:$0xff]  ;;  %v8512_v56 = vld [vmem:[%s14490_s16 + $0xe8] sm:$0xff] }
0x2ed8   :  { %9027 = vmatprep.subr.mxu1 %v8588_v20  ;;  %9104 = vmatprep.subr.mxu0 %v8590_v40  ;;  %v8514_v20 = vld [vmem:[%s14490_s16 + $0xf8] sm:$0xff]  ;;  %v8511_v40 = vld [vmem:[%s14490_s16 + $0xe0] sm:$0xff] }
0x2ed9   :  { %8925 = vmatprep.mubr.f32.mxu1 %v12137_v4  ;;  %9002 = vmatprep.mubr.f32.mxu0 %v12137_v4 }
0x2eda   :  { %9028 = vmatpush1.msra.mxu1 %v8587_v24  ;;  %9105 = vmatpush1.msra.mxu0 %v8589_v22  ;;  %v8513_v24 = vld [vmem:[%s14490_s16 + $0xf0] sm:$0xff]  ;;  %v8496_v22 = vld [vmem:[%s14490_s16 + $0x68] sm:$0xff] }
0x2edb   :  { %10562 = vmatmul.mubr.msk.f32.gmra.mxu1 %vm299_vm0, %v13947_v14  ;;  %10564 = vmatmul.mubr.msk.f32.gmra.mxu0 %vm299_vm0, %v13947_v14 }
0x2edc   :  { %9029 = vmatprep.subr.mxu1 %v8572_v49  ;;  %9106 = vmatprep.subr.mxu0 %v8574_v54  ;;  %v8498_v49 = vld [vmem:[%s14490_s16 + $0x78] sm:$0xff]  ;;  %v8495_v54 = vld [vmem:[%s14490_s16 + $0x60] sm:$0xff] }
0x2edd   :  { %9030 = vmatpush1.msra.mxu1 %v8571_v15  ;;  %9107 = vmatpush1.msra.mxu0 %v8573_v30  ;;  %v8497_v15 = vld [vmem:[%s14490_s16 + $0x70] sm:$0xff]  ;;  %v9380_v30 = vld [vmem:[%s14493_s23 + $0xf8] sm:$0xff] }
0x2ede   :  { %9031 = vmatprep.subr.mxu1 %v8556_v13  ;;  %9108 = vmatprep.subr.mxu0 %v8558_v58  ;;  %v9412_v13 = vld [vmem:[%s14493_s23 + $0x1f8] sm:$0xff] }
0x2edf   :  { %9032 = vmatpush1.msra.mxu1 %v8555_v39  ;;  %9109 = vmatpush1.msra.mxu0 %v8557_v42  ;;  %v9364_v58 = vld [vmem:[%s14493_s23 + $0x78] sm:$0xff]  ;;  %v9379_v42 = vld [vmem:[%s14493_s23 + $0xf0] sm:$0xff] }
0x2ee0   :  { %9033 = vmatprep.subr.mxu1 %v8540_v0  ;;  %9110 = vmatprep.subr.mxu0 %v8542_v17  ;;  %v9396_v39 = vld [vmem:[%s14493_s23 + $0x178] sm:$0xff]  ;;  %v9411_v0 = vld [vmem:[%s14493_s23 + $0x1f0] sm:$0xff] }
0x2ee1   :  { %9034 = vmatpush1.msra.mxu1 %v8539_v5  ;;  %9111 = vmatpush1.msra.mxu0 %v8541_v63  ;;  %v9363_v17 = vld [vmem:[%s14493_s23 + $0x70] sm:$0xff]  ;;  %v9410_v63 = vld [vmem:[%s14493_s23 + $0x1e8] sm:$0xff] }
0x2ee2   :  { %9035 = vmatprep.subr.mxu1 %v8524_v55  ;;  %9112 = vmatprep.subr.mxu0 %v8526_v27  ;;  %v9395_v5 = vld [vmem:[%s14493_s23 + $0x170] sm:$0xff]  ;;  %v9362_v55 = vld [vmem:[%s14493_s23 + $0x68] sm:$0xff] }
0x2ee3   :  { %9036 = vmatpush1.msra.mxu1 %v8523_v62  ;;  %9113 = vmatpush1.msra.mxu0 %v8525_v60  ;;  %v9394_v27 = vld [vmem:[%s14493_s23 + $0x168] sm:$0xff]  ;;  %v9377_v62 = vld [vmem:[%s14493_s23 + $0xe0] sm:$0xff] }
0x2ee4   :  { %9037 = vmatprep.subr.mxu1 %v8508_v25  ;;  %9114 = vmatprep.subr.mxu0 %v8510_v26  ;;  %v9409_v60 = vld [vmem:[%s14493_s23 + $0x1e0] sm:$0xff] }
0x2ee5   :  { %9038 = vmatpush1.msra.mxu1 %v8507_v31  ;;  %9115 = vmatpush1.msra.mxu0 %v8509_v36  ;;  %v9361_v25 = vld [vmem:[%s14493_s23 + $0x60] sm:$0xff]  ;;  %v9376_v31 = vld [vmem:[%s14493_s23 + $0xd8] sm:$0xff] }
0x2ee6   :  { %9039 = vmatprep.subr.mxu1 %v8492_v9  ;;  %9116 = vmatprep.subr.mxu0 %v8494_v34  ;;  %v9393_v26 = vld [vmem:[%s14493_s23 + $0x160] sm:$0xff]  ;;  %v9408_v36 = vld [vmem:[%s14493_s23 + $0x1d8] sm:$0xff] }
0x2ee7   :  { %9040 = vmatpush1.msra.mxu1 %v8491_v43  ;;  %9073 = vmatprep.mubr.f32.mxu1 %v12137_v4  ;;  %v9360_v9 = vld [vmem:[%s14493_s23 + $0x58] sm:$0xff]  ;;  %v9375_v43 = vld [vmem:[%s14493_s23 + $0xd0] sm:$0xff] }
0x2ee8   :  { %9117 = vmatpush1.msra.mxu0 %v8493_v45  ;;  %9150 = vmatprep.mubr.f32.mxu0 %v12137_v4  ;;  %v9392_v34 = vld [vmem:[%s14493_s23 + $0x158] sm:$0xff]  ;;  %v9407_v45 = vld [vmem:[%s14493_s23 + $0x1d0] sm:$0xff] }
0x2ee9   :  { %10565 = vmatmul.mubr.msk.f32.vlgmr.msra.gmra.mxu1 %vm299_vm0, %v13933_v61  ;;  %10567 = vmatmul.mubr.msk.f32.vlgmr.msra.gmra.mxu0 %vm299_vm0, %v13933_v61 }
0x2eea   :  { %9179 = vmatprep.subr.mxu1 %v8608_v35  ;;  %9256 = vmatprep.subr.mxu0 %v8610_v50  ;;  %v9359_v35 = vld [vmem:[%s14493_s23 + $0x50] sm:$0xff] }
0x2eeb   :  { %9180 = vmatpush1.msra.mxu1 %v8607_v53  ;;  %9257 = vmatpush1.msra.mxu0 %v8609_v59  ;;  %v9391_v50 = vld [vmem:[%s14493_s23 + $0x150] sm:$0xff]  ;;  %v9374_v53 = vld [vmem:[%s14493_s23 + $0xc8] sm:$0xff] }
0x2eec   :  { %9181 = vmatprep.subr.mxu1 %v8592_v41  ;;  %9258 = vmatprep.subr.mxu0 %v8594_v48  ;;  %v9406_v59 = vld [vmem:[%s14493_s23 + $0x1c8] sm:$0xff] }
0x2eed   :  { %9079 = vmatprep.mubr.f32.mxu1 %v12137_v4  ;;  %9156 = vmatprep.mubr.f32.mxu0 %v12137_v4  ;;  %v9358_v41 = vld [vmem:[%s14493_s23 + $0x48] sm:$0xff] }
0x2eee   :  { %9182 = vmatpush1.msra.mxu1 %v8591_v51  ;;  %9259 = vmatpush1.msra.mxu0 %v8593_v52  ;;  %v9390_v48 = vld [vmem:[%s14493_s23 + $0x148] sm:$0xff]  ;;  %v9373_v51 = vld [vmem:[%s14493_s23 + $0xc0] sm:$0xff] }
0x2eef   :  { %10566 = vmatmul.mubr.msk.f32.gmra.mxu1 %vm299_vm0, %v13947_v14  ;;  %10568 = vmatmul.mubr.msk.f32.gmra.mxu0 %vm299_vm0, %v13947_v14  ;;  %v9405_v52 = vld [vmem:[%s14493_s23 + $0x1c0] sm:$0xff] }
0x2ef0   :  { %9183 = vmatprep.subr.mxu1 %v8576_v57  ;;  %9260 = vmatprep.subr.mxu0 %v8578_v18  ;;  %v9357_v57 = vld [vmem:[%s14493_s23 + $0x40] sm:$0xff] }
0x2ef1   :  { %9184 = vmatpush1.msra.mxu1 %v8575_v37  ;;  %9261 = vmatpush1.msra.mxu0 %v8577_v3  ;;  %v9389_v18 = vld [vmem:[%s14493_s23 + $0x140] sm:$0xff]  ;;  %v9372_v37 = vld [vmem:[%s14493_s23 + $0xb8] sm:$0xff] }
0x2ef2   :  { %9185 = vmatprep.subr.mxu1 %v8560_v29  ;;  %9262 = vmatprep.subr.mxu0 %v8562_v6  ;;  %v9404_v3 = vld [vmem:[%s14493_s23 + $0x1b8] sm:$0xff] }
0x2ef3   :  { %9186 = vmatpush1.msra.mxu1 %v8559_v23  ;;  %9263 = vmatpush1.msra.mxu0 %v8561_v8  ;;  %v9356_v29 = vld [vmem:[%s14493_s23 + $0x38] sm:$0xff]  ;;  %v9371_v23 = vld [vmem:[%s14493_s23 + $0xb0] sm:$0xff] }
0x2ef4   :  { %9187 = vmatprep.subr.mxu1 %v8544_v46  ;;  %9264 = vmatprep.subr.mxu0 %v8546_v21  ;;  %v9388_v6 = vld [vmem:[%s14493_s23 + $0x138] sm:$0xff]  ;;  %v9403_v8 = vld [vmem:[%s14493_s23 + $0x1b0] sm:$0xff] }
0x2ef5   :  { %9188 = vmatpush1.msra.mxu1 %v8543_v7  ;;  %9265 = vmatpush1.msra.mxu0 %v8545_v11  ;;  %v9355_v46 = vld [vmem:[%s14493_s23 + $0x30] sm:$0xff]  ;;  %v9370_v7 = vld [vmem:[%s14493_s23 + $0xa8] sm:$0xff] }
0x2ef6   :  { %9189 = vmatprep.subr.mxu1 %v8528_v12  ;;  %9266 = vmatprep.subr.mxu0 %v8530_v10  ;;  %v9387_v21 = vld [vmem:[%s14493_s23 + $0x130] sm:$0xff]  ;;  %v9402_v11 = vld [vmem:[%s14493_s23 + $0x1a8] sm:$0xff] }
0x2ef7   :  { %9190 = vmatpush1.msra.mxu1 %v8527_v16  ;;  %9267 = vmatpush1.msra.mxu0 %v8529_v32  ;;  %v9354_v12 = vld [vmem:[%s14493_s23 + $0x28] sm:$0xff]  ;;  %v9369_v16 = vld [vmem:[%s14493_s23 + $0xa0] sm:$0xff] }
0x2ef8   :  { %9191 = vmatprep.subr.mxu1 %v8512_v56  ;;  %9268 = vmatprep.subr.mxu0 %v8514_v20  ;;  %v9386_v10 = vld [vmem:[%s14493_s23 + $0x128] sm:$0xff]  ;;  %v9401_v32 = vld [vmem:[%s14493_s23 + $0x1a0] sm:$0xff] }
0x2ef9   :  { %9192 = vmatpush1.msra.mxu1 %v8511_v40  ;;  %9269 = vmatpush1.msra.mxu0 %v8513_v24  ;;  %v9353_v56 = vld [vmem:[%s14493_s23 + $0x20] sm:$0xff]  ;;  %v9368_v40 = vld [vmem:[%s14493_s23 + $0x98] sm:$0xff] }
0x2efa   :  { %9193 = vmatprep.subr.mxu1 %v8496_v22  ;;  %9270 = vmatprep.subr.mxu0 %v8498_v49  ;;  %v9385_v20 = vld [vmem:[%s14493_s23 + $0x120] sm:$0xff]  ;;  %v9400_v24 = vld [vmem:[%s14493_s23 + $0x198] sm:$0xff] }
0x2efb   :  { %9194 = vmatpush1.msra.mxu1 %v8495_v54  ;;  %9227 = vmatprep.mubr.f32.mxu1 %v12137_v4  ;;  %v9352_v22 = vld [vmem:[%s14493_s23 + $0x18] sm:$0xff]  ;;  %v9367_v54 = vld [vmem:[%s14493_s23 + $0x90] sm:$0xff] }
0x2efc   :  { %9271 = vmatpush1.msra.mxu0 %v8497_v15  ;;  %9304 = vmatprep.mubr.f32.mxu0 %v12137_v4  ;;  %v9384_v49 = vld [vmem:[%s14493_s23 + $0x118] sm:$0xff]  ;;  %v9399_v15 = vld [vmem:[%s14493_s23 + $0x190] sm:$0xff] }
0x2efd   :  { %10569 = vmatmul.mubr.msk.f32.vlgmr.msra.gmra.mxu1 %vm299_vm0, %v13933_v61  ;;  %10571 = vmatmul.mubr.msk.f32.vlgmr.msra.gmra.mxu0 %vm299_vm0, %v13933_v61 }
0x2efe   :  { %9233 = vmatprep.mubr.f32.mxu1 %v12137_v4  ;;  %9310 = vmatprep.mubr.f32.mxu0 %v12137_v4  ;;  %v9378_v4 = vld [vmem:[%s14493_s23 + $0xe8] sm:$0xff] }
0x2eff   :  { %11074 = vmatprep.subr.mxu1 %v9380_v30  ;;  %11112 = vmatprep.subr.mxu0 %v9412_v13  ;;  %v9351_v30 = vld [vmem:[%s14493_s23 + $0x10] sm:$0xff] }
0x2f00   :  { %11075 = vmatpush3.msra.mxu1 %v9364_v58  ;;  %11113 = vmatpush3.msra.mxu0 %v9396_v39  ;;  %v9383_v13 = vld [vmem:[%s14493_s23 + $0x110] sm:$0xff]  ;;  %v9366_v58 = vld [vmem:[%s14493_s23 + $0x88] sm:$0xff] }
0x2f01   :  { %10570 = vmatmul.mubr.msk.f32.gmra.mxu1 %vm299_vm0, %v13947_v14  ;;  %10572 = vmatmul.mubr.msk.f32.gmra.mxu0 %vm299_vm0, %v13947_v14  ;;  %v9398_v39 = vld [vmem:[%s14493_s23 + $0x188] sm:$0xff] }
0x2f02   :  { %11076 = vmatprep.subr.mxu1 %v9379_v42  ;;  %11114 = vmatprep.subr.mxu0 %v9411_v0  ;;  %v9350_v42 = vld [vmem:[%s14493_s23 + $0x8] sm:$0xff] }
0x2f03   :  { %11077 = vmatpush3.msra.mxu1 %v9363_v17  ;;  %11115 = vmatpush3.msra.mxu0 %v9395_v5  ;;  %v9382_v0 = vld [vmem:[%s14493_s23 + $0x108] sm:$0xff]  ;;  %v9365_v17 = vld [vmem:[%s14493_s23 + $0x80] sm:$0xff] }
0x2f04   :  { %11078 = vmatprep.subr.mxu1 %v9378_v4  ;;  %11116 = vmatprep.subr.mxu0 %v9410_v63  ;;  %v9397_v5 = vld [vmem:[%s14493_s23 + $0x180] sm:$0xff] }
0x2f05   :  { %11079 = vmatpush3.msra.mxu1 %v9362_v55  ;;  %11117 = vmatpush3.msra.mxu0 %v9394_v27  ;;  %v9349_v4 = vld [vmem:[%s14493_s23] sm:$0xff]  ;;  %v9444_v55 = vld [vmem:[%s14493_s23 + $0x2f8] sm:$0xff] }
0x2f06   :  { %11080 = vmatprep.subr.mxu1 %v9377_v62  ;;  %11118 = vmatprep.subr.mxu0 %v9409_v60  ;;  %v9381_v63 = vld [vmem:[%s14493_s23 + $0x100] sm:$0xff]  ;;  %v9476_v27 = vld [vmem:[%s14493_s23 + $0x3f8] sm:$0xff] }
0x2f07   :  { %11081 = vmatpush3.msra.mxu1 %v9361_v25  ;;  %11119 = vmatpush3.msra.mxu0 %v9393_v26  ;;  %v14144_v62 = vld [vmem:[%s14494_s26] sm:$0xff] }
0x2f08   :  { %11082 = vmatprep.subr.mxu1 %v9376_v31  ;;  %11120 = vmatprep.subr.mxu0 %v9408_v36  ;;  %v8618_v60 = vrot.slane %v14144_v62, %v12425_v28  ;;  %v8626_v25 = vrot.slane %v14144_v62, %v13129_v38  ;;  %v8622_v26 = vrot.slane %v14144_v62, %v12432_v33 }
0x2f09   :  { %11083 = vmatpush3.msra.mxu1 %v9360_v9  ;;  %11121 = vmatpush3.msra.mxu0 %v9392_v34  ;;  %v8630_v31 = vrot.slane %v14144_v62, %v13135_v19 }
0x2f0a   :  { %11084 = vmatprep.subr.mxu1 %v9375_v43  ;;  %11122 = vmatprep.subr.mxu0 %v9407_v45 }
0x2f0b   :  { %11085 = vmatpush3.msra.mxu1 %v9359_v35  ;;  %11123 = vmatpush3.msra.mxu0 %v9391_v50 }
0x2f0c   :  { %11086 = vmatprep.subr.mxu1 %v9374_v53  ;;  %11124 = vmatprep.subr.mxu0 %v9406_v59 }
0x2f0d   :  { %11087 = vmatpush3.msra.mxu1 %v9358_v41  ;;  %11125 = vmatpush3.msra.mxu0 %v9390_v48 }
0x2f0e   :  { %11088 = vmatprep.subr.mxu1 %v9373_v51  ;;  %11126 = vmatprep.subr.mxu0 %v9405_v52 }
0x2f0f   :  { %11089 = vmatpush3.msra.mxu1 %v9357_v57  ;;  %11127 = vmatpush3.msra.mxu0 %v9389_v18  ;;  %v9428_v18 = vld [vmem:[%s14493_s23 + $0x278] sm:$0xff] }
0x2f10   :  { %11090 = vmatprep.subr.mxu1 %v9372_v37  ;;  %11128 = vmatprep.subr.mxu0 %v9404_v3  ;;  %v9460_v37 = vld [vmem:[%s14493_s23 + $0x378] sm:$0xff]  ;;  %v9443_v3 = vld [vmem:[%s14493_s23 + $0x2f0] sm:$0xff] }
0x2f11   :  { %11091 = vmatpush3.msra.mxu1 %v9356_v29  ;;  %11129 = vmatpush3.msra.mxu0 %v9388_v6  ;;  %v9475_v29 = vld [vmem:[%s14493_s23 + $0x3f0] sm:$0xff] }
0x2f12   :  { %11092 = vmatprep.subr.mxu1 %v9371_v23  ;;  %11130 = vmatprep.subr.mxu0 %v9403_v8 }
0x2f13   :  { %11093 = vmatpush3.msra.mxu1 %v9355_v46  ;;  %11131 = vmatpush3.msra.mxu0 %v9387_v21  ;;  %v9427_v21 = vld [vmem:[%s14493_s23 + $0x270] sm:$0xff] }
0x2f14   :  { %11094 = vmatprep.subr.mxu1 %v9370_v7  ;;  %11132 = vmatprep.subr.mxu0 %v9402_v11  ;;  %v9459_v7 = vld [vmem:[%s14493_s23 + $0x370] sm:$0xff] }
0x2f15   :  { %11095 = vmatpush3.msra.mxu1 %v9354_v12  ;;  %11133 = vmatpush3.msra.mxu0 %v9386_v10  ;;  %v9442_v10 = vld [vmem:[%s14493_s23 + $0x2e8] sm:$0xff] }
0x2f16   :  { %11096 = vmatprep.subr.mxu1 %v9369_v16  ;;  %11134 = vmatprep.subr.mxu0 %v9401_v32  ;;  %v9474_v16 = vld [vmem:[%s14493_s23 + $0x3e8] sm:$0xff] }
0x2f17   :  { %11097 = vmatpush3.msra.mxu1 %v9353_v56  ;;  %11135 = vmatpush3.msra.mxu0 %v9385_v20 }
0x2f18   :  { %11098 = vmatprep.subr.mxu1 %v9368_v40  ;;  %11136 = vmatprep.subr.mxu0 %v9400_v24  ;;  %v9426_v24 = vld [vmem:[%s14493_s23 + $0x268] sm:$0xff] }
0x2f19   :  { %11099 = vmatpush3.msra.mxu1 %v9352_v22  ;;  %11137 = vmatpush3.msra.mxu0 %v9384_v49  ;;  %v9458_v22 = vld [vmem:[%s14493_s23 + $0x368] sm:$0xff]  ;;  %v9441_v49 = vld [vmem:[%s14493_s23 + $0x2e0] sm:$0xff] }
0x2f1a   :  { %11100 = vmatprep.subr.mxu1 %v9367_v54  ;;  %11138 = vmatprep.subr.mxu0 %v9399_v15  ;;  %v9473_v54 = vld [vmem:[%s14493_s23 + $0x3e0] sm:$0xff] }
0x2f1b   :  { %11101 = vmatpush3.msra.mxu1 %v9351_v30  ;;  %11139 = vmatpush3.msra.mxu0 %v9383_v13  ;;  %v9425_v15 = vld [vmem:[%s14493_s23 + $0x260] sm:$0xff]  ;;  %v9440_v13 = vld [vmem:[%s14493_s23 + $0x2d8] sm:$0xff] }
0x2f1c   :  { %11102 = vmatprep.subr.mxu1 %v9366_v58  ;;  %11140 = vmatprep.subr.mxu0 %v9398_v39  ;;  %v9457_v30 = vld [vmem:[%s14493_s23 + $0x360] sm:$0xff]  ;;  %v9472_v58 = vld [vmem:[%s14493_s23 + $0x3d8] sm:$0xff] }
0x2f1d   :  { %11103 = vmatpush3.msra.mxu1 %v9350_v42  ;;  %11141 = vmatpush3.msra.mxu0 %v9382_v0  ;;  %v9424_v39 = vld [vmem:[%s14493_s23 + $0x258] sm:$0xff]  ;;  %v9439_v0 = vld [vmem:[%s14493_s23 + $0x2d0] sm:$0xff] }
0x2f1e   :  { %11104 = vmatprep.subr.mxu1 %v9365_v17  ;;  %11142 = vmatprep.subr.mxu0 %v9397_v5  ;;  %v9456_v42 = vld [vmem:[%s14493_s23 + $0x358] sm:$0xff]  ;;  %v9471_v17 = vld [vmem:[%s14493_s23 + $0x3d0] sm:$0xff]  ;;  %v14176_v5 = vrot.slane %v14144_v62, %v13160_v1 }
0x2f1f   :  { %11105 = vmatpush3.msra.mxu1 %v9349_v4  ;;  %11143 = vmatpush3.msra.mxu0 %v9381_v63  ;;  %v14180_v4 = vrot.slane %v14144_v62, %v13163_v2  ;;  %v9423_v63 = vld [vmem:[%s14493_s23 + $0x250] sm:$0xff] }
0x2f20   :  { %11150 = vmatprep.subr.mxu1 %v9444_v55  ;;  %11188 = vmatprep.subr.mxu0 %v9476_v27  ;;  %v9455_v55 = vld [vmem:[%s14493_s23 + $0x350] sm:$0xff] }
0x2f82   :  { %v8767_v36 = vpop.f32.mrf.mxu1  ;;  %v8844_v9 = vpop.f32.mrf.mxu0 }
0x2f83   :  { %v8768_v34 = vadd.f32 %v8767_v36, %v8618_v60  ;;  %v8845_v43 = vadd.f32 %v8844_v9, %v8626_v25  ;;  %v9454_v36 = vld [vmem:[%s14493_s23 + $0x348] sm:$0xff] }
0x2f84   :  { %v8769_v45 = vpop.f32.mrf.mxu1  ;;  %v8846_v35 = vpop.f32.mrf.mxu0 }
0x2f85   :  { %v8770_v50 = vadd.f32 %v8769_v45, %v8622_v26  ;;  %v8847_v53 = vadd.f32 %v8846_v35, %v8630_v31  ;;  %v9317_v48 = vmax.f32 %v8768_v34, 0.0  ;;  %v9319_v51 = vmax.f32 %v8845_v43, 0.0  ;;  %v9437_v43 = vld [vmem:[%s14493_s23 + $0x2c0] sm:$0xff] }
0x2f86   :  { %v9469_v45 = vld [vmem:[%s14493_s23 + $0x3c0] sm:$0xff] }
0x2f87   :  { %v9318_v59 = vmax.f32 %v8770_v50, 0.0  ;;  %v9320_v41 = vmax.f32 %v8847_v53, 0.0  ;;  %v9421_v53 = vld [vmem:[%s14493_s23 + $0x240] sm:$0xff] }
0x2f88   :  { %v8773_v52 = vpop.f32.mrf.mxu1  ;;  %v8850_v57 = vpop.f32.mrf.mxu0 }
0x2f89   :  { %9676 = vmatprep.mubr.f32.mxu1 %v9318_v59  ;;  %9751 = vmatprep.mubr.f32.mxu0 %v9320_v41  ;;  %v8774_v6 = vadd.f32 %v8773_v52, %v8618_v60  ;;  %v8851_v23 = vadd.f32 %v8850_v57, %v8626_v25  ;;  %v9438_v25 = vld [vmem:[%s14493_s23 + $0x2c8] sm:$0xff]  ;;  %v9453_v59 = vld [vmem:[%s14493_s23 + $0x340] sm:$0xff]  ;;  %v9468_v52 = vld [vmem:[%s14493_s23 + $0x3b8] sm:$0xff] }
0x2f8a   :  { %v8775_v8 = vpop.f32.mrf.mxu1  ;;  %v8852_v46 = vpop.f32.mrf.mxu0  ;;  %9677 = vmatmul.mubr.f32.vlgmr.msra.gmra.mxu1 %v9317_v48  ;;  %9752 = vmatmul.mubr.f32.vlgmr.msra.gmra.mxu0 %v9319_v51  ;;  %v9436_v51 = vld [vmem:[%s14493_s23 + $0x2b8] sm:$0xff] }
0x2f8b   :  { %v8776_v11 = vadd.f32 %v8775_v8, %v8622_v26  ;;  %v8853_v12 = vadd.f32 %v8852_v46, %v8630_v31  ;;  %11151 = vmatpush3.msra.mxu1 %v9428_v18  ;;  %11189 = vmatpush3.msra.mxu0 %v9460_v37  ;;  %v9333_v20 = vmax.f32 %v8774_v6, 0.0  ;;  %v9335_v40 = vmax.f32 %v8851_v23, 0.0  ;;  %v9470_v26 = vld [vmem:[%s14493_s23 + $0x3c8] sm:$0xff]  ;;  %v9420_v57 = vld [vmem:[%s14493_s23 + $0x238] sm:$0xff]  ;;  %v9435_v37 = vld [vmem:[%s14493_s23 + $0x2b0] sm:$0xff] }
0x2f8c   :  { %11152 = vmatprep.subr.mxu1 %v9443_v3  ;;  %11190 = vmatprep.subr.mxu0 %v9475_v29  ;;  %v9422_v31 = vld [vmem:[%s14493_s23 + $0x248] sm:$0xff]  ;;  %v9452_v18 = vld [vmem:[%s14493_s23 + $0x338] sm:$0xff]  ;;  %v9467_v3 = vld [vmem:[%s14493_s23 + $0x3b0] sm:$0xff] }
0x2f8d   :  { %v9334_v32 = vmax.f32 %v8776_v11, 0.0  ;;  %v9336_v56 = vmax.f32 %v8853_v12, 0.0  ;;  %11153 = vmatpush3.msra.mxu1 %v9427_v21  ;;  %11191 = vmatpush3.msra.mxu0 %v9459_v7  ;;  %v9419_v29 = vld [vmem:[%s14493_s23 + $0x230] sm:$0xff]  ;;  %v9434_v23 = vld [vmem:[%s14493_s23 + $0x2a8] sm:$0xff]  ;;  %v9433_v7 = vld [vmem:[%s14493_s23 + $0x2a0] sm:$0xff] }
0x2f8e   :  { %11154 = vmatprep.subr.mxu1 %v9442_v10  ;;  %11192 = vmatprep.subr.mxu0 %v9474_v16  ;;  %v9451_v6 = vld [vmem:[%s14493_s23 + $0x330] sm:$0xff]  ;;  %v9466_v8 = vld [vmem:[%s14493_s23 + $0x3a8] sm:$0xff]  ;;  %v9465_v11 = vld [vmem:[%s14493_s23 + $0x3a0] sm:$0xff] }
0x2f8f   :  { %9681 = vmatprep.mubr.f32.mxu1 %v9334_v32  ;;  %9756 = vmatprep.mubr.f32.mxu0 %v9336_v56  ;;  %v9418_v46 = vld [vmem:[%s14493_s23 + $0x228] sm:$0xff]  ;;  %v9417_v12 = vld [vmem:[%s14493_s23 + $0x220] sm:$0xff]  ;;  %v9432_v56 = vld [vmem:[%s14493_s23 + $0x298] sm:$0xff] }
0x2f90   :  { %9682 = vmatmul.mubr.f32.gmra.mxu1 %v9333_v20  ;;  %9757 = vmatmul.mubr.f32.gmra.mxu0 %v9335_v40  ;;  %v9450_v21 = vld [vmem:[%s14493_s23 + $0x328] sm:$0xff]  ;;  %v9449_v10 = vld [vmem:[%s14493_s23 + $0x320] sm:$0xff]  ;;  %v9464_v20 = vld [vmem:[%s14493_s23 + $0x398] sm:$0xff]  ;;  %v8634_v40 = vrot.slane %v14144_v62, %v13206_v44 }
0x2f91   :  { %11155 = vmatpush3.msra.mxu1 %v9426_v24  ;;  %11193 = vmatpush3.msra.mxu0 %v9458_v22  ;;  %v8642_v24 = vrot.slane %v14144_v62, %v13209_v47  ;;  %v9416_v22 = vld [vmem:[%s14493_s23 + $0x218] sm:$0xff] }
0x2f92   :  { %11156 = vmatprep.subr.mxu1 %v9441_v49  ;;  %11194 = vmatprep.subr.mxu0 %v9473_v54  ;;  %v9448_v49 = vld [vmem:[%s14493_s23 + $0x318] sm:$0xff]  ;;  %v9431_v54 = vld [vmem:[%s14493_s23 + $0x290] sm:$0xff] }
0x2f93   :  { %11157 = vmatpush3.msra.mxu1 %v9425_v15  ;;  %11195 = vmatpush3.msra.mxu0 %v9457_v30  ;;  %v9463_v15 = vld [vmem:[%s14493_s23 + $0x390] sm:$0xff] }
0x2f94   :  { %11158 = vmatprep.subr.mxu1 %v9440_v13  ;;  %11196 = vmatprep.subr.mxu0 %v9472_v58  ;;  %v9415_v30 = vld [vmem:[%s14493_s23 + $0x210] sm:$0xff] }
0x2f95   :  { %v14184_v27 = vpop.f32.mrf.mxu1  ;;  %v14186_v60 = vpop.f32.mrf.mxu0  ;;  %11159 = vmatpush3.msra.mxu1 %v9424_v39  ;;  %11197 = vmatpush3.msra.mxu0 %v9456_v42  ;;  %v9447_v13 = vld [vmem:[%s14493_s23 + $0x310] sm:$0xff]  ;;  %v9430_v39 = vld [vmem:[%s14493_s23 + $0x288] sm:$0xff] }
0x2f96   :  { %11160 = vmatprep.subr.mxu1 %v9439_v0  ;;  %11198 = vmatprep.subr.mxu0 %v9471_v17  ;;  %v9462_v42 = vld [vmem:[%s14493_s23 + $0x388] sm:$0xff]  ;;  %v8922_v0 = vadd.f32 %v14184_v27, %v8634_v40  ;;  %v8999_v17 = vadd.f32 %v14186_v60, %v8642_v24  ;;  %v9413_v60 = vld [vmem:[%s14493_s23 + $0x200] sm:$0xff] }
0x2f97   :  { %v8923_v9 = vpop.f32.mrf.mxu1  ;;  %v9000_v34 = vpop.f32.mrf.mxu0  ;;  %11161 = vmatpush3.msra.mxu1 %v9423_v63  ;;  %11199 = vmatpush3.msra.mxu0 %v9455_v55  ;;  %v9414_v63 = vld [vmem:[%s14493_s23 + $0x208] sm:$0xff] }
0x2f98   :  { %v8924_v35 = vadd.f32 %v8923_v9, %v14176_v5  ;;  %v9001_v50 = vadd.f32 %v9000_v34, %v14180_v4  ;;  %11162 = vmatprep.subr.mxu1 %v9438_v25  ;;  %11200 = vmatprep.subr.mxu0 %v9470_v26  ;;  %v9446_v55 = vld [vmem:[%s14493_s23 + $0x308] sm:$0xff]  ;;  %v9429_v25 = vld [vmem:[%s14493_s23 + $0x280] sm:$0xff] }
0x2f99   :  { %11163 = vmatpush3.msra.mxu1 %v9422_v31  ;;  %11201 = vmatpush3.msra.mxu0 %v9454_v36  ;;  %v9461_v26 = vld [vmem:[%s14493_s23 + $0x380] sm:$0xff] }
0x2f9a   :  { %v9322_v41 = vmax.f32 %v8924_v35, 0.0  ;;  %v9324_v48 = vmax.f32 %v9001_v50, 0.0  ;;  %11164 = vmatprep.subr.mxu1 %v9437_v43  ;;  %11202 = vmatprep.subr.mxu0 %v9469_v45  ;;  %v9445_v34 = vld [vmem:[%s14493_s23 + $0x300] sm:$0xff]  ;;  %v14243_v43 = vld [vmem:[%s14494_s26 + $0x8] sm:$0xff]  ;;  %v9321_v45 = vmax.f32 %v8922_v0, 0.0  ;;  %v9323_v35 = vmax.f32 %v8999_v17, 0.0 }
0x2f9b   :  { %11165 = vmatpush3.msra.mxu1 %v9421_v53  ;;  %11203 = vmatpush3.msra.mxu0 %v9453_v59  ;;  %v8927_v16 = vpop.f32.mrf.mxu1  ;;  %v9004_v32 = vpop.f32.mrf.mxu0  ;;  %v9540_v50 = vld [vmem:[%s14493_s23 + $0x5f8] sm:$0xff]  ;;  %v14253_v59 = vrot.slane %v14243_v43, %v13135_v19  ;;  %v9539_v19 = vld [vmem:[%s14493_s23 + $0x5f0] sm:$0xff]  ;;  %v9518_v0 = vld [vmem:[%s14493_s23 + $0x548] sm:$0xff] }
0x2f9c   :  { %9826 = vmatprep.mubr.f32.mxu1 %v9322_v41  ;;  %9901 = vmatprep.mubr.f32.mxu0 %v9324_v48  ;;  %v8928_v41 = vadd.f32 %v8927_v16, %v8634_v40  ;;  %v9005_v48 = vadd.f32 %v9004_v32, %v8642_v24  ;;  %v9505_v32 = vld [vmem:[%s14493_s23 + $0x4e0] sm:$0xff]  ;;  %v9504_v24 = vld [vmem:[%s14493_s23 + $0x4d8] sm:$0xff] }
0x2f9d   :  { %11166 = vmatprep.subr.mxu1 %v9436_v51  ;;  %11204 = vmatprep.subr.mxu0 %v9468_v52  ;;  %v8929_v58 = vpop.f32.mrf.mxu1  ;;  %v9006_v62 = vpop.f32.mrf.mxu0  ;;  %v9521_v40 = vld [vmem:[%s14493_s23 + $0x560] sm:$0xff] }
0x2f9e   :  { %11167 = vmatpush3.msra.mxu1 %v9420_v57  ;;  %11205 = vmatpush3.msra.mxu0 %v9452_v18  ;;  %v8930_v31 = vadd.f32 %v8929_v58, %v14176_v5  ;;  %v9007_v36 = vadd.f32 %v9006_v62, %v14180_v4  ;;  %v14247_v5 = vrot.slane %v14243_v43, %v12432_v33  ;;  %v9508_v4 = vld [vmem:[%s14493_s23 + $0x4f8] sm:$0xff]  ;;  %v9519_v58 = vld [vmem:[%s14493_s23 + $0x550] sm:$0xff]  ;;  %v9502_v62 = vld [vmem:[%s14493_s23 + $0x4c8] sm:$0xff] }
0x2f9f   :  { %11168 = vmatprep.subr.mxu1 %v9435_v37  ;;  %11206 = vmatprep.subr.mxu0 %v9467_v3  ;;  %v9492_v57 = vld [vmem:[%s14493_s23 + $0x478] sm:$0xff]  ;;  %v9507_v37 = vld [vmem:[%s14493_s23 + $0x4f0] sm:$0xff]  ;;  %v9501_v17 = vld [vmem:[%s14493_s23 + $0x4c0] sm:$0xff] }
0x2fa0   :  { %11169 = vmatpush3.msra.mxu1 %v9419_v29  ;;  %11207 = vmatpush3.msra.mxu0 %v9451_v6  ;;  %v9338_v33 = vmax.f32 %v8930_v31, 0.0  ;;  %v9340_v51 = vmax.f32 %v9007_v36, 0.0  ;;  %v9524_v18 = vld [vmem:[%s14493_s23 + $0x578] sm:$0xff]  ;;  %v9491_v29 = vld [vmem:[%s14493_s23 + $0x470] sm:$0xff] }
0x2fa1   :  { %11170 = vmatprep.subr.mxu1 %v9434_v23  ;;  %11208 = vmatprep.subr.mxu0 %v9466_v8  ;;  %v9523_v6 = vld [vmem:[%s14493_s23 + $0x570] sm:$0xff]  ;;  %v9337_v8 = vmax.f32 %v8928_v41, 0.0  ;;  %v9532_v31 = vld [vmem:[%s14493_s23 + $0x5b8] sm:$0xff]  ;;  %v9482_v41 = vld [vmem:[%s14493_s23 + $0x428] sm:$0xff] }
0x2fa2   :  { %11171 = vmatpush3.msra.mxu1 %v9418_v46  ;;  %11209 = vmatpush3.msra.mxu0 %v9450_v21  ;;  %v9339_v46 = vmax.f32 %v9005_v48, 0.0  ;;  %v9506_v21 = vld [vmem:[%s14493_s23 + $0x4e8] sm:$0xff]  ;;  %v9484_v36 = vld [vmem:[%s14493_s23 + $0x438] sm:$0xff] }
0x2fa3   :  { %11172 = vmatprep.subr.mxu1 %v9433_v7  ;;  %11210 = vmatprep.subr.mxu0 %v9465_v11  ;;  %v9538_v7 = vld [vmem:[%s14493_s23 + $0x5e8] sm:$0xff] }
0x2fa4   :  { %11173 = vmatpush3.msra.mxu1 %v9417_v12  ;;  %11211 = vmatpush3.msra.mxu0 %v9449_v10  ;;  %v9490_v11 = vld [vmem:[%s14493_s23 + $0x468] sm:$0xff] }
0x2fa5   :  { %11174 = vmatprep.subr.mxu1 %v9432_v56  ;;  %11212 = vmatprep.subr.mxu0 %v9464_v20  ;;  %v9522_v10 = vld [vmem:[%s14493_s23 + $0x568] sm:$0xff]  ;;  %v9537_v56 = vld [vmem:[%s14493_s23 + $0x5e0] sm:$0xff] }
0x2fa6   :  { %11175 = vmatpush3.msra.mxu1 %v9416_v22  ;;  %11213 = vmatpush3.msra.mxu0 %v9448_v49  ;;  %v9489_v20 = vld [vmem:[%s14493_s23 + $0x460] sm:$0xff]  ;;  %v9536_v22 = vld [vmem:[%s14493_s23 + $0x5d8] sm:$0xff]  ;;  %v9514_v48 = vld [vmem:[%s14493_s23 + $0x528] sm:$0xff] }
0x2fa7   :  { %11176 = vmatprep.subr.mxu1 %v9431_v54  ;;  %11214 = vmatprep.subr.mxu0 %v9463_v15  ;;  %v9488_v49 = vld [vmem:[%s14493_s23 + $0x458] sm:$0xff]  ;;  %v9503_v15 = vld [vmem:[%s14493_s23 + $0x4d0] sm:$0xff] }
0x2fa8   :  { %11177 = vmatpush3.msra.mxu1 %v9415_v30  ;;  %11215 = vmatpush3.msra.mxu0 %v9447_v13  ;;  %v9520_v54 = vld [vmem:[%s14493_s23 + $0x558] sm:$0xff]  ;;  %v9535_v30 = vld [vmem:[%s14493_s23 + $0x5d0] sm:$0xff] }
0x2fa9   :  { %v14236_v27 = vpop.f32.mrf.mxu1  ;;  %v14238_v9 = vpop.f32.mrf.mxu0  ;;  %11178 = vmatprep.subr.mxu1 %v9430_v39  ;;  %11216 = vmatprep.subr.mxu0 %v9462_v42  ;;  %v9487_v13 = vld [vmem:[%s14493_s23 + $0x450] sm:$0xff]  ;;  %v9534_v39 = vld [vmem:[%s14493_s23 + $0x5c8] sm:$0xff] }
0x2faa   :  { %11179 = vmatpush3.msra.mxu1 %v9414_v63  ;;  %11217 = vmatpush3.msra.mxu0 %v9446_v55  ;;  %v9486_v42 = vld [vmem:[%s14493_s23 + $0x448] sm:$0xff]  ;;  %v9533_v63 = vld [vmem:[%s14493_s23 + $0x5c0] sm:$0xff] }
0x2fab   :  { %11180 = vmatprep.subr.mxu1 %v9429_v25  ;;  %11218 = vmatprep.subr.mxu0 %v9461_v26  ;;  %v9077_v53 = vpop.f32.mrf.mxu1  ;;  %v9154_v52 = vpop.f32.mrf.mxu0  ;;  %v9485_v55 = vld [vmem:[%s14493_s23 + $0x440] sm:$0xff]  ;;  %v9500_v26 = vld [vmem:[%s14493_s23 + $0x4b8] sm:$0xff] }
0x2fac   :  { %11181 = vmatpush3.msra.mxu1 %v9413_v60  ;;  %11219 = vmatpush3.msra.mxu0 %v9445_v34  ;;  %v9078_v3 = vadd.f32 %v9077_v53, %v14247_v5  ;;  %v9155_v23 = vadd.f32 %v9154_v52, %v14253_v59  ;;  %v9517_v25 = vld [vmem:[%s14493_s23 + $0x540] sm:$0xff]  ;;  %v9516_v60 = vld [vmem:[%s14493_s23 + $0x538] sm:$0xff]  ;;  %v9499_v34 = vld [vmem:[%s14493_s23 + $0x4b0] sm:$0xff] }
0x2fad   :  { %9827 = vmatmul.mubr.f32.vlgmr.msra.gmra.mxu1 %v9321_v45  ;;  %9902 = vmatmul.mubr.f32.vlgmr.msra.gmra.mxu0 %v9323_v35  ;;  %v9531_v45 = vld [vmem:[%s14493_s23 + $0x5b0] sm:$0xff]  ;;  %v9530_v53 = vld [vmem:[%s14493_s23 + $0x5a8] sm:$0xff]  ;;  %v9481_v52 = vld [vmem:[%s14493_s23 + $0x420] sm:$0xff] }
0x2fae   :  { %11226 = vmatprep.subr.mxu1 %v9508_v4  ;;  %11264 = vmatprep.subr.mxu0 %v9540_v50  ;;  %v9326_v12 = vmax.f32 %v9078_v3, 0.0  ;;  %v9328_v16 = vmax.f32 %v9155_v23, 0.0  ;;  %v9483_v35 = vld [vmem:[%s14493_s23 + $0x430] sm:$0xff]  ;;  %v9498_v50 = vld [vmem:[%s14493_s23 + $0x4a8] sm:$0xff]  ;;  %v9528_v3 = vld [vmem:[%s14493_s23 + $0x598] sm:$0xff] }
0x2faf   :  { %9831 = vmatprep.mubr.f32.mxu1 %v9338_v33  ;;  %9906 = vmatprep.mubr.f32.mxu0 %v9340_v51  ;;  %v9515_v4 = vld [vmem:[%s14493_s23 + $0x530] sm:$0xff]  ;;  %v9497_v33 = vld [vmem:[%s14493_s23 + $0x4a0] sm:$0xff]  ;;  %v9480_v23 = vld [vmem:[%s14493_s23 + $0x418] sm:$0xff] }
0x2fb0   :  { %11227 = vmatpush3.msra.mxu1 %v9492_v57  ;;  %11265 = vmatpush3.msra.mxu0 %v9524_v18  ;;  %v9529_v51 = vld [vmem:[%s14493_s23 + $0x5a0] sm:$0xff]  ;;  %v9081_v18 = vpop.f32.mrf.mxu1 }
0x2fb1   :  { %11228 = vmatprep.subr.mxu1 %v9507_v37  ;;  %11266 = vmatprep.subr.mxu0 %v9539_v19  ;;  %v9513_v57 = vld [vmem:[%s14493_s23 + $0x520] sm:$0xff]  ;;  %v9158_v37 = vpop.f32.mrf.mxu0  ;;  %v9496_v19 = vld [vmem:[%s14493_s23 + $0x498] sm:$0xff] }
0x2fb2   :  { %11229 = vmatpush3.msra.mxu1 %v9491_v29  ;;  %11267 = vmatpush3.msra.mxu0 %v9523_v6  ;;  %v8650_v29 = vrot.slane %v14243_v43, %v12425_v28  ;;  %v8658_v6 = vrot.slane %v14243_v43, %v13129_v38  ;;  %v9083_v28 = vpop.f32.mrf.mxu1 }
0x2fb3   :  { %9832 = vmatmul.mubr.f32.gmra.mxu1 %v9337_v8  ;;  %9907 = vmatmul.mubr.f32.gmra.mxu0 %v9339_v46  ;;  %v9512_v8 = vld [vmem:[%s14493_s23 + $0x518] sm:$0xff]  ;;  %v9495_v46 = vld [vmem:[%s14493_s23 + $0x490] sm:$0xff]  ;;  %v9160_v38 = vpop.f32.mrf.mxu0 }
0x2fb4   :  { %11230 = vmatprep.subr.mxu1 %v9506_v21  ;;  %11268 = vmatprep.subr.mxu0 %v9538_v7  ;;  %v9527_v21 = vld [vmem:[%s14493_s23 + $0x590] sm:$0xff] }
0x2fb5   :  { %11231 = vmatpush3.msra.mxu1 %v9490_v11  ;;  %9976 = vmatprep.mubr.f32.mxu1 %v9326_v12  ;;  %v9479_v7 = vld [vmem:[%s14493_s23 + $0x410] sm:$0xff]  ;;  %v9494_v12 = vld [vmem:[%s14493_s23 + $0x488] sm:$0xff] }
0x2fb6   :  { %11269 = vmatpush3.msra.mxu0 %v9522_v10  ;;  %10051 = vmatprep.mubr.f32.mxu0 %v9328_v16  ;;  %v9511_v11 = vld [vmem:[%s14493_s23 + $0x510] sm:$0xff]  ;;  %v9526_v10 = vld [vmem:[%s14493_s23 + $0x588] sm:$0xff]  ;;  %v9076_v16 = vadd.f32 %v14236_v27, %v8650_v29  ;;  %v9161_v27 = vadd.f32 %v9160_v38, %v14253_v59  ;;  %v9604_v59 = vld [vmem:[%s14493_s23 + $0x7f8] sm:$0xff] }
0x2fb7   :  { %11232 = vmatprep.subr.mxu1 %v9505_v32  ;;  %11270 = vmatprep.subr.mxu0 %v9537_v56  ;;  %v9153_v32 = vadd.f32 %v14238_v9, %v8658_v6  ;;  %v9478_v56 = vld [vmem:[%s14493_s23 + $0x408] sm:$0xff]  ;;  %v9477_v9 = vld [vmem:[%s14493_s23 + $0x400] sm:$0xff] }
0x2fb8   :  { %11233 = vmatpush3.msra.mxu1 %v9489_v20  ;;  %11271 = vmatpush3.msra.mxu0 %v9521_v40  ;;  %v9510_v20 = vld [vmem:[%s14493_s23 + $0x508] sm:$0xff]  ;;  %v9565_v38 = vld [vmem:[%s14493_s23 + $0x6c0] sm:$0xff] }
0x2fb9   :  { %11234 = vmatprep.subr.mxu1 %v9504_v24  ;;  %11272 = vmatprep.subr.mxu0 %v9536_v22  ;;  %v9493_v24 = vld [vmem:[%s14493_s23 + $0x480] sm:$0xff] }
0x2fba   :  { %11235 = vmatpush3.msra.mxu1 %v9488_v49  ;;  %11273 = vmatpush3.msra.mxu0 %v9520_v54  ;;  %v9525_v22 = vld [vmem:[%s14493_s23 + $0x580] sm:$0xff]  ;;  %v9084_v49 = vadd.f32 %v9083_v28, %v14247_v5  ;;  %v9572_v5 = vld [vmem:[%s14493_s23 + $0x6f8] sm:$0xff]  ;;  %v9582_v28 = vld [vmem:[%s14493_s23 + $0x748] sm:$0xff] }
0x2fbb   :  { %11236 = vmatprep.subr.mxu1 %v9503_v15  ;;  %11274 = vmatprep.subr.mxu0 %v9535_v30  ;;  %v9509_v15 = vld [vmem:[%s14493_s23 + $0x500] sm:$0xff]  ;;  %v9325_v30 = vmax.f32 %v9076_v16, 0.0 }
0x2fbc   :  { %11237 = vmatpush3.msra.mxu1 %v9487_v13  ;;  %11275 = vmatpush3.msra.mxu0 %v9519_v58  ;;  %v9327_v13 = vmax.f32 %v9153_v32, 0.0  ;;  %v14333_v58 = vrot.slane %v14243_v43, %v13160_v1  ;;  %v9342_v1 = vmax.f32 %v9084_v49, 0.0  ;;  %v9581_v16 = vld [vmem:[%s14493_s23 + $0x740] sm:$0xff]  ;;  %v9564_v32 = vld [vmem:[%s14493_s23 + $0x6b8] sm:$0xff]  ;;  %v9595_v49 = vld [vmem:[%s14493_s23 + $0x7b0] sm:$0xff] }
0x2fbd   :  { %11238 = vmatprep.subr.mxu1 %v9502_v62  ;;  %11276 = vmatprep.subr.mxu0 %v9534_v39  ;;  %v14321_v40 = vpop.f32.mrf.mxu1  ;;  %v14327_v54 = vpop.f32.mrf.mxu0  ;;  %v14339_v39 = vrot.slane %v14243_v43, %v13163_v2  ;;  %v9603_v2 = vld [vmem:[%s14493_s23 + $0x7f0] sm:$0xff] }
0x2fbe   :  { %11239 = vmatpush3.msra.mxu1 %v9486_v42  ;;  %11277 = vmatpush3.msra.mxu0 %v9518_v0  ;;  %v9082_v42 = vadd.f32 %v9081_v18, %v8650_v29  ;;  %v9159_v0 = vadd.f32 %v9158_v37, %v8658_v6  ;;  %v9585_v18 = vld [vmem:[%s14493_s23 + $0x760] sm:$0xff]  ;;  %v9568_v37 = vld [vmem:[%s14493_s23 + $0x6d8] sm:$0xff]  ;;  %v9567_v6 = vld [vmem:[%s14493_s23 + $0x6d0] sm:$0xff] }
0x2fbf   :  { %11240 = vmatprep.subr.mxu1 %v9501_v17  ;;  %11278 = vmatprep.subr.mxu0 %v9533_v63  ;;  %v9231_v62 = vpop.f32.mrf.mxu1  ;;  %v9344_v17 = vmax.f32 %v9161_v27, 0.0  ;;  %v9308_v63 = vpop.f32.mrf.mxu0  ;;  %v9584_v29 = vld [vmem:[%s14493_s23 + $0x758] sm:$0xff]  ;;  %v9547_v27 = vld [vmem:[%s14493_s23 + $0x630] sm:$0xff] }
0x2fc0   :  { %11241 = vmatpush3.msra.mxu1 %v9485_v55  ;;  %11279 = vmatpush3.msra.mxu0 %v9517_v25  ;;  %v9556_v55 = vld [vmem:[%s14493_s23 + $0x678] sm:$0xff] }
0x2fc1   :  { %11242 = vmatprep.subr.mxu1 %v9500_v26  ;;  %11280 = vmatprep.subr.mxu0 %v9532_v31  ;;  %v9588_v25 = vld [vmem:[%s14493_s23 + $0x778] sm:$0xff]  ;;  %v9571_v26 = vld [vmem:[%s14493_s23 + $0x6f0] sm:$0xff]  ;;  %v9232_v31 = vadd.f32 %v9231_v62, %v14333_v58  ;;  %v9593_v62 = vld [vmem:[%s14493_s23 + $0x7a0] sm:$0xff] }
0x2fc2   :  { %11243 = vmatpush3.msra.mxu1 %v9484_v36  ;;  %11281 = vmatpush3.msra.mxu0 %v9516_v60  ;;  %v9555_v36 = vld [vmem:[%s14493_s23 + $0x670] sm:$0xff] }
0x2fc3   :  { %11244 = vmatprep.subr.mxu1 %v9499_v34  ;;  %11282 = vmatprep.subr.mxu0 %v9531_v45  ;;  %v9587_v60 = vld [vmem:[%s14493_s23 + $0x770] sm:$0xff]  ;;  %v9309_v34 = vadd.f32 %v9308_v63, %v14339_v39  ;;  %v9341_v45 = vmax.f32 %v9082_v42, 0.0  ;;  %v9235_v42 = vpop.f32.mrf.mxu1  ;;  %v9560_v63 = vld [vmem:[%s14493_s23 + $0x698] sm:$0xff] }
0x2fc4   :  { %11245 = vmatpush3.msra.mxu1 %v9483_v35  ;;  %11283 = vmatpush3.msra.mxu0 %v9515_v4  ;;  %v9343_v35 = vmax.f32 %v9159_v0, 0.0  ;;  %v9570_v4 = vld [vmem:[%s14493_s23 + $0x6e8] sm:$0xff]  ;;  %v9312_v0 = vpop.f32.mrf.mxu0 }
0x2fc5   :  { %11246 = vmatprep.subr.mxu1 %v9498_v50  ;;  %11284 = vmatprep.subr.mxu0 %v9530_v53  ;;  %v9602_v50 = vld [vmem:[%s14493_s23 + $0x7e8] sm:$0xff] }
0x2fc6   :  { %11247 = vmatpush3.msra.mxu1 %v9482_v41  ;;  %11285 = vmatpush3.msra.mxu0 %v9514_v48  ;;  %v9554_v53 = vld [vmem:[%s14493_s23 + $0x668] sm:$0xff]  ;;  %v9330_v41 = vmax.f32 %v9232_v31, 0.0  ;;  %v9576_v31 = vld [vmem:[%s14493_s23 + $0x718] sm:$0xff] }
0x2fc7   :  { %11248 = vmatprep.subr.mxu1 %v9497_v33  ;;  %11286 = vmatprep.subr.mxu0 %v9529_v51  ;;  %v9586_v48 = vld [vmem:[%s14493_s23 + $0x768] sm:$0xff]  ;;  %v9332_v33 = vmax.f32 %v9309_v34, 0.0  ;;  %v9569_v51 = vld [vmem:[%s14493_s23 + $0x6e0] sm:$0xff]  ;;  %v9237_v34 = vpop.f32.mrf.mxu1 }
0x2fc8   :  { %11249 = vmatpush3.msra.mxu1 %v9481_v52  ;;  %11287 = vmatpush3.msra.mxu0 %v9513_v57  ;;  %v9601_v52 = vld [vmem:[%s14493_s23 + $0x7e0] sm:$0xff] }
0x2fc9   :  { %11250 = vmatprep.subr.mxu1 %v9496_v19  ;;  %11288 = vmatprep.subr.mxu0 %v9528_v3  ;;  %v9553_v57 = vld [vmem:[%s14493_s23 + $0x660] sm:$0xff]  ;;  %v9600_v19 = vld [vmem:[%s14493_s23 + $0x7d8] sm:$0xff] }
0x2fca   :  { %11251 = vmatpush3.msra.mxu1 %v9480_v23  ;;  %11289 = vmatpush3.msra.mxu0 %v9512_v8  ;;  %v9552_v3 = vld [vmem:[%s14493_s23 + $0x658] sm:$0xff]  ;;  %v9599_v23 = vld [vmem:[%s14493_s23 + $0x7d0] sm:$0xff] }
0x2fcb   :  { %11252 = vmatprep.subr.mxu1 %v9495_v46  ;;  %11290 = vmatprep.subr.mxu0 %v9527_v21  ;;  %v9551_v8 = vld [vmem:[%s14493_s23 + $0x650] sm:$0xff]  ;;  %v9566_v21 = vld [vmem:[%s14493_s23 + $0x6c8] sm:$0xff] }
0x2fcc   :  { %11253 = vmatpush3.msra.mxu1 %v9479_v7  ;;  %11291 = vmatpush3.msra.mxu0 %v9511_v11  ;;  %v9583_v46 = vld [vmem:[%s14493_s23 + $0x750] sm:$0xff]  ;;  %v9598_v7 = vld [vmem:[%s14493_s23 + $0x7c8] sm:$0xff] }
0x2fcd   :  { %11254 = vmatprep.subr.mxu1 %v9494_v12  ;;  %11292 = vmatprep.subr.mxu0 %v9526_v10  ;;  %v9550_v11 = vld [vmem:[%s14493_s23 + $0x648] sm:$0xff]  ;;  %v9597_v12 = vld [vmem:[%s14493_s23 + $0x7c0] sm:$0xff] }
0x2fce   :  { %11255 = vmatpush3.msra.mxu1 %v9478_v56  ;;  %11293 = vmatpush3.msra.mxu0 %v9510_v20  ;;  %v9549_v10 = vld [vmem:[%s14493_s23 + $0x640] sm:$0xff]  ;;  %v9596_v56 = vld [vmem:[%s14493_s23 + $0x7b8] sm:$0xff] }
0x2fcf   :  { %11256 = vmatprep.subr.mxu1 %v9493_v24  ;;  %11294 = vmatprep.subr.mxu0 %v9525_v22  ;;  %v9548_v20 = vld [vmem:[%s14493_s23 + $0x638] sm:$0xff]  ;;  %v9563_v22 = vld [vmem:[%s14493_s23 + $0x6b0] sm:$0xff] }
0x2fd0   :  { %11257 = vmatpush3.msra.mxu1 %v9477_v9  ;;  %11295 = vmatpush3.msra.mxu0 %v9509_v15  ;;  %v9580_v24 = vld [vmem:[%s14493_s23 + $0x738] sm:$0xff]  ;;  %v9579_v9 = vld [vmem:[%s14493_s23 + $0x730] sm:$0xff]  ;;  %v9562_v15 = vld [vmem:[%s14493_s23 + $0x6a8] sm:$0xff] }
0x2fd1   :  { %9977 = vmatmul.mubr.f32.vlgmr.msra.gmra.mxu1 %v9325_v30  ;;  %10052 = vmatmul.mubr.f32.vlgmr.msra.gmra.mxu0 %v9327_v13  ;;  %v9594_v30 = vld [vmem:[%s14493_s23 + $0x7a8] sm:$0xff] }
0x2fd2   :  { %11302 = vmatprep.subr.mxu1 %v9572_v5  ;;  %11340 = vmatprep.subr.mxu0 %v9604_v59  ;;  %v9546_v13 = vld [vmem:[%s14493_s23 + $0x628] sm:$0xff]  ;;  %v9561_v59 = vld [vmem:[%s14493_s23 + $0x6a0] sm:$0xff] }
0x2fd3   :  { %9981 = vmatprep.mubr.f32.mxu1 %v9342_v1  ;;  %10056 = vmatprep.mubr.f32.mxu0 %v9344_v17  ;;  %v9578_v5 = vld [vmem:[%s14493_s23 + $0x728] sm:$0xff]  ;;  %v9545_v1 = vld [vmem:[%s14493_s23 + $0x620] sm:$0xff] }
0x2fd4   :  { %11303 = vmatpush3.msra.mxu1 %v9556_v55  ;;  %11341 = vmatpush3.msra.mxu0 %v9588_v25  ;;  %v9577_v17 = vld [vmem:[%s14493_s23 + $0x720] sm:$0xff]  ;;  %v9592_v55 = vld [vmem:[%s14493_s23 + $0x798] sm:$0xff]  ;;  %v8666_v25 = vrot.slane %v14243_v43, %v13206_v44  ;;  %v9543_v44 = vld [vmem:[%s14493_s23 + $0x610] sm:$0xff] }
0x2fd5   :  { %11304 = vmatprep.subr.mxu1 %v9571_v26  ;;  %11342 = vmatprep.subr.mxu0 %v9603_v2  ;;  %v8674_v26 = vrot.slane %v14243_v43, %v13209_v47  ;;  %v9544_v2 = vld [vmem:[%s14493_s23 + $0x618] sm:$0xff]  ;;  %v9558_v47 = vld [vmem:[%s14493_s23 + $0x688] sm:$0xff] }
0x2fd6   :  { %11305 = vmatpush3.msra.mxu1 %v9555_v36  ;;  %11343 = vmatpush3.msra.mxu0 %v9587_v60  ;;  %v9559_v36 = vld [vmem:[%s14493_s23 + $0x690] sm:$0xff]  ;;  %v9590_v43 = vld [vmem:[%s14493_s23 + $0x788] sm:$0xff] }
0x2fd7   :  { %9982 = vmatmul.mubr.f32.gmra.mxu1 %v9341_v45  ;;  %10057 = vmatmul.mubr.f32.gmra.mxu0 %v9343_v35  ;;  %v9591_v60 = vld [vmem:[%s14493_s23 + $0x790] sm:$0xff]  ;;  %v9314_v45 = vpop.f32.mrf.mxu0 }
0x2fd8   :  { %11306 = vmatprep.subr.mxu1 %v9570_v4  ;;  %11344 = vmatprep.subr.mxu0 %v9602_v50  ;;  %v9575_v35 = vld [vmem:[%s14493_s23 + $0x710] sm:$0xff]  ;;  %v9230_v4 = vadd.f32 %v14321_v40, %v8666_v25  ;;  %v9307_v50 = vadd.f32 %v14327_v54, %v8674_v26 }
0x2fd9   :  { %11307 = vmatpush3.msra.mxu1 %v9554_v53  ;;  %10126 = vmatprep.mubr.f32.mxu1 %v9330_v41  ;;  %v9542_v53 = vld [vmem:[%s14493_s23 + $0x608] sm:$0xff] }
0x2fda   :  { %11345 = vmatpush3.msra.mxu0 %v9586_v48  ;;  %10201 = vmatprep.mubr.f32.mxu0 %v9332_v33  ;;  %v9574_v41 = vld [vmem:[%s14493_s23 + $0x708] sm:$0xff]  ;;  %v9238_v48 = vadd.f32 %v9237_v34, %v14333_v58  ;;  %v9315_v33 = vadd.f32 %v9314_v45, %v14339_v39  ;;  %v9329_v40 = vmax.f32 %v9230_v4, 0.0  ;;  %v9331_v54 = vmax.f32 %v9307_v50, 0.0 }
0x2fdb   :  { %11308 = vmatprep.subr.mxu1 %v9569_v51  ;;  %11346 = vmatprep.subr.mxu0 %v9601_v52  ;;  %v9557_v51 = vld [vmem:[%s14493_s23 + $0x680] sm:$0xff] }
0x2fdc   :  { %11309 = vmatpush3.msra.mxu1 %v9553_v57  ;;  %11347 = vmatpush3.msra.mxu0 %v9585_v18  ;;  %v9589_v52 = vld [vmem:[%s14493_s23 + $0x780] sm:$0xff]  ;;  %v9348_v58 = vmax.f32 %v9315_v33, 0.0 }
0x2fdd   :  { %11310 = vmatprep.subr.mxu1 %v9568_v37  ;;  %11348 = vmatprep.subr.mxu0 %v9600_v19  ;;  %v9541_v57 = vld [vmem:[%s14493_s23 + $0x600] sm:$0xff]  ;;  %v9236_v37 = vadd.f32 %v9235_v42, %v8666_v25  ;;  %v9313_v19 = vadd.f32 %v9312_v0, %v8674_v26 }
0x2fde   :  { %11311 = vmatpush3.msra.mxu1 %v9552_v3  ;;  %11349 = vmatpush3.msra.mxu0 %v9584_v29  ;;  %v9573_v18 = vld [vmem:[%s14493_s23 + $0x700] sm:$0xff]  ;;  %v9346_v3 = vmax.f32 %v9238_v48, 0.0 }
0x2fdf   :  { %11312 = vmatprep.subr.mxu1 %v9567_v6  ;;  %11350 = vmatprep.subr.mxu0 %v9599_v23  ;;  %v9345_v39 = vmax.f32 %v9236_v37, 0.0  ;;  %v9347_v29 = vmax.f32 %v9313_v19, 0.0 }
0x2fe0   :  { %11313 = vmatpush3.msra.mxu1 %v9551_v8  ;;  %11351 = vmatpush3.msra.mxu0 %v9583_v46 }
0x2fe1   :  { %11314 = vmatprep.subr.mxu1 %v9566_v21  ;;  %11352 = vmatprep.subr.mxu0 %v9598_v7 }
0x2fe2   :  { %11315 = vmatpush3.msra.mxu1 %v9550_v11  ;;  %11353 = vmatpush3.msra.mxu0 %v9582_v28 }
0x2fe3   :  { %11316 = vmatprep.subr.mxu1 %v9565_v38  ;;  %11354 = vmatprep.subr.mxu0 %v9597_v12 }
0x2fe4   :  { %11317 = vmatpush3.msra.mxu1 %v9549_v10  ;;  %11355 = vmatpush3.msra.mxu0 %v9581_v16 }
0x2fe5   :  { %11318 = vmatprep.subr.mxu1 %v9564_v32  ;;  %11356 = vmatprep.subr.mxu0 %v9596_v56 }
0x2fe6   :  { %11319 = vmatpush3.msra.mxu1 %v9548_v20  ;;  %11357 = vmatpush3.msra.mxu0 %v9580_v24 }
0x2fe7   :  { %11320 = vmatprep.subr.mxu1 %v9563_v22  ;;  %11358 = vmatprep.subr.mxu0 %v9595_v49  ;;  %v10573_v22 = vld [vmem:[%s12361_s21] ss:$0 sm:$0xff]  ;;  %s14495_s21 = sld [smem:[#allocation5_spill]] }
0x2fe8   :  { %11321 = vmatpush3.msra.mxu1 %v9547_v27  ;;  %11359 = vmatpush3.msra.mxu0 %v9579_v9 }
0x2fe9   :  { %11322 = vmatprep.subr.mxu1 %v9562_v15  ;;  %11360 = vmatprep.subr.mxu0 %v9594_v30 }
0x2fea   :  { %11323 = vmatpush3.msra.mxu1 %v9546_v13  ;;  %11361 = vmatpush3.msra.mxu0 %v9578_v5 }
0x2feb   :  { %11324 = vmatprep.subr.mxu1 %v9561_v59  ;;  %11362 = vmatprep.subr.mxu0 %v9593_v62 }
0x2fec   :  { %11325 = vmatpush3.msra.mxu1 %v9545_v1  ;;  %11363 = vmatpush3.msra.mxu0 %v9577_v17 }
0x2fed   :  { %11326 = vmatprep.subr.mxu1 %v9560_v63  ;;  %11364 = vmatprep.subr.mxu0 %v9592_v55 }
0x2fee   :  { %11327 = vmatpush3.msra.mxu1 %v9544_v2  ;;  %11365 = vmatpush3.msra.mxu0 %v9576_v31 }
0x2fef   :  { %11328 = vmatprep.subr.mxu1 %v9559_v36  ;;  %11366 = vmatprep.subr.mxu0 %v9591_v60 }
0x2ff0   :  { %11329 = vmatpush3.msra.mxu1 %v9543_v44  ;;  %11367 = vmatpush3.msra.mxu0 %v9575_v35 }
0x2ff1   :  { %11330 = vmatprep.subr.mxu1 %v9558_v47  ;;  %11368 = vmatprep.subr.mxu0 %v9590_v43 }
0x2ff2   :  { %11331 = vmatpush3.msra.mxu1 %v9542_v53  ;;  %11369 = vmatpush3.msra.mxu0 %v9574_v41 }
0x2ff3   :  { %11332 = vmatprep.subr.mxu1 %v9557_v51  ;;  %11370 = vmatprep.subr.mxu0 %v9589_v52 }
0x2ff4   :  { %11333 = vmatpush3.msra.mxu1 %v9541_v57  ;;  %11371 = vmatpush3.msra.mxu0 %v9573_v18 }
0x2ff5   :  { %10127 = vmatmul.mubr.f32.vlgmr.msra.gmra.mxu1 %v9329_v40  ;;  %10202 = vmatmul.mubr.f32.vlgmr.msra.gmra.mxu0 %v9331_v54 }
0x2ff6   :  { %10131 = vmatprep.mubr.f32.mxu1 %v9346_v3  ;;  %10206 = vmatprep.mubr.f32.mxu0 %v9348_v58 }
0x2ff9   :  { %10132 = vmatmul.mubr.f32.gmra.mxu1 %v9345_v39  ;;  %10207 = vmatmul.mubr.f32.gmra.mxu0 %v9347_v29 }
0x304a   :  { %v11106_v6 = vpop.f32.mrf.mxu1  ;;  %v11144_v23 = vpop.f32.mrf.mxu0 }
0x304c   :  { %v11107_v8 = vpop.f32.mrf.mxu1  ;;  %v11145_v46 = vpop.f32.mrf.mxu0 }
0x304d   :  { %v11108_v24 = vadd.f32 %v11107_v8, %v11106_v6  ;;  %v11146_v5 = vadd.f32 %v11145_v46, %v11144_v23 }
0x304f   :  { %v9679_v15 = vadd.f32 %v11108_v24, %v10573_v22  ;;  %v10265_v24 = vld [vmem:[%s14495_s21 + $0x38] sm:$0xff] }
0x3050   :  { %v11109_v21 = vpop.f32.mrf.mxu1  ;;  %v11147_v7 = vpop.f32.mrf.mxu0  ;;  %11837 = vmatprep.subr.mxu1 %v10265_v24 }
0x3051   :  { %v9754_v42 = vadd.f32 %v11146_v5, %v9679_v15  ;;  %11838 = vmatpush3.msra.mxu1 %v10265_v24  ;;  %v10260_v15 = vld [vmem:[%s14495_s21 + $0x10] sm:$0xff] }
0x3052   :  { %v11110_v11 = vpop.f32.mrf.mxu1  ;;  %v11148_v28 = vpop.f32.mrf.mxu0 }
0x3053   :  { %v11111_v30 = vadd.f32 %v11110_v11, %v11109_v21  ;;  %v11149_v17 = vadd.f32 %v11148_v28, %v11147_v7 }
0x3055   :  { %v9684_v0 = vadd.f32 %v11111_v30, %v10573_v22  ;;  %v10264_v22 = vld [vmem:[%s14495_s21 + $0x30] sm:$0xff]  ;;  %v10259_v30 = vld [vmem:[%s14495_s21 + $0x8] sm:$0xff] }
0x3056   :  { %11839 = vmatprep.subr.mxu1 %v10264_v22 }
0x3057   :  { %v9759_v26 = vadd.f32 %v11149_v17, %v9684_v0  ;;  %11840 = vmatpush3.msra.mxu1 %v10264_v22 }
0x306d   :  { %v11182_v38 = vpop.f32.mrf.mxu1  ;;  %v11220_v12 = vpop.f32.mrf.mxu0 }
0x306f   :  { %v11183_v10 = vpop.f32.mrf.mxu1  ;;  %v11221_v16 = vpop.f32.mrf.mxu0 }
0x3070   :  { %v11184_v59 = vadd.f32 %v11183_v10, %v11182_v38  ;;  %v11222_v2 = vadd.f32 %v11221_v16, %v11220_v12 }
0x3072   :  { %v9829_v63 = vadd.f32 %v11184_v59, %v9754_v42 }
0x3073   :  { %v11185_v32 = vpop.f32.mrf.mxu1  ;;  %v11223_v56 = vpop.f32.mrf.mxu0 }
0x3074   :  { %v9904_v60 = vadd.f32 %v11222_v2, %v9829_v63  ;;  %v10574_v63 = vld [vmem:[%s12366_s27] ss:$0 sm:$0xff]  ;;  %s12073_s27 = scalar_lea.vmem %s10362_s7, 256 }
0x3075   :  { %v11186_v20 = vpop.f32.mrf.mxu1  ;;  %v11224_v49 = vpop.f32.mrf.mxu0  ;;  %p12074_p0 = scmp.ne.s32.totalorder %s10362_s7, %s12073_s27  ;;  %p12079_p2 = scmp.lt.s32.totalorder %s12073_s27, %s12073_s27 }
0x3076   :  { %v11187_v55 = vadd.f32 %v11186_v20, %v11185_v32  ;;  %v11225_v44 = vadd.f32 %v11224_v49, %v11223_v56  ;;  %v10263_v49 = vld [vmem:[%s14495_s21 + $0x28] sm:$0xff] }
0x3077   :  { %11841 = vmatprep.subr.mxu1 %v10263_v49  ;;  %p12080_p3 = por %p12079_p2, %p12078_p1 }
0x3078   :  { %v9834_v34 = vadd.f32 %v11187_v55, %v9759_v26  ;;  %11842 = vmatpush3.msra.mxu1 %v10263_v49 }
0x3079   :  { %p12081_p4 = pnand %p12080_p3, %p12074_p0 }
0x307a   :  { %v9909_v50 = vadd.f32 %v11225_v44, %v9834_v34 }
0x3091   :  { %v11258_v27 = vpop.f32.mrf.mxu1  ;;  %v11296_v9 = vpop.f32.mrf.mxu0 }
0x3093   :  { %v11259_v13 = vpop.f32.mrf.mxu1  ;;  %v11297_v62 = vpop.f32.mrf.mxu0 }
0x3094   :  { %v11260_v31 = vadd.f32 %v11259_v13, %v11258_v27  ;;  %v11298_v53 = vadd.f32 %v11297_v62, %v11296_v9  ;;  %v10262_v27 = vld [vmem:[%s14495_s21 + $0x20] sm:$0xff]  ;;  %v10261_v9 = vld [vmem:[%s14495_s21 + $0x18] sm:$0xff] }
0x3095   :  { %11843 = vmatprep.subr.mxu1 %v10262_v27  ;;  %v10258_v13 = vld [vmem:[%s14495_s21] sm:$0xff] }
0x3096   :  { %v9979_v35 = vadd.f32 %v11260_v31, %v9904_v60  ;;  %11844 = vmatpush3.msra.mxu1 %v10262_v27 }
0x3097   :  { %v11261_v1 = vpop.f32.mrf.mxu1  ;;  %v11299_v25 = vpop.f32.mrf.mxu0  ;;  %11845 = vmatprep.subr.mxu1 %v10261_v9 }
0x3098   :  { %v10054_v33 = vadd.f32 %v11298_v53, %v9979_v35  ;;  %11846 = vmatpush3.msra.mxu1 %v10261_v9 }
0x3099   :  { %v11262_v36 = vpop.f32.mrf.mxu1  ;;  %v11300_v45 = vpop.f32.mrf.mxu0  ;;  %11847 = vmatprep.subr.mxu1 %v10260_v15 }
0x309a   :  { %v11263_v47 = vadd.f32 %v11262_v36, %v11261_v1  ;;  %v11301_v40 = vadd.f32 %v11300_v45, %v11299_v25  ;;  %11848 = vmatpush3.msra.mxu1 %v10260_v15  ;;  %v10575_v25 = vld [vmem:[%s12371_s4] ss:$0 sm:$0xff] }
0x309b   :  { %11849 = vmatprep.subr.mxu1 %v10259_v30  ;;  %v10576_v45 = vld [vmem:[%s14496_s28] ss:$0 sm:$0xff] }
0x309c   :  { %v9984_v51 = vadd.f32 %v11263_v47, %v9909_v50  ;;  %11850 = vmatpush3.msra.mxu1 %v10259_v30 }
0x309d   :  { %11851 = vmatprep.subr.mxu1 %v10258_v13 }
0x309e   :  { %v10059_v58 = vadd.f32 %v11301_v40, %v9984_v51  ;;  %11852 = vmatpush3.msra.mxu1 %v10258_v13 }
0x30b5   :  { %v11334_v43 = vpop.f32.mrf.mxu1  ;;  %v11372_v4 = vpop.f32.mrf.mxu0 }
0x30b7   :  { %v11335_v41 = vpop.f32.mrf.mxu1  ;;  %v11373_v48 = vpop.f32.mrf.mxu0 }
0x30b8   :  { %v11336_v52 = vadd.f32 %v11335_v41, %v11334_v43  ;;  %v11374_v37 = vadd.f32 %v11373_v48, %v11372_v4 }
0x30b9   :  { %v11337_v57 = vpop.f32.mrf.mxu1  ;;  %v11375_v18 = vpop.f32.mrf.mxu0 }
0x30ba   :  { %v10129_v54 = vadd.f32 %v11336_v52, %v10054_v33 }
0x30bb   :  { %v11338_v19 = vpop.f32.mrf.mxu1  ;;  %v11376_v3 = vpop.f32.mrf.mxu0 }
0x30bc   :  { %v10204_v39 = vadd.f32 %v11374_v37, %v10129_v54  ;;  %v11339_v29 = vadd.f32 %v11338_v19, %v11337_v57  ;;  %v11377_v23 = vadd.f32 %v11376_v3, %v11375_v18 }
0x30be   :  { %v10134_v6 = vadd.f32 %v11339_v29, %v10059_v58  ;;  %v10212_v8 = vadd.f32 %v10204_v39, %v13933_v61 }
0x30c0   :  { %v10209_v46 = vadd.f32 %v11377_v23, %v10134_v6  ;;  %v10216_v21 = vsel %vm299_vm0, %v10212_v8, 0.0 }
0x30c1   :  { %10217 = vadd.xlane.f32.xlu0 %v10216_v21 }
0x30c2   :  { %v10213_v7 = vadd.f32 %v10209_v46, %v13947_v14 }
0x30c4   :  { %v10219_v11 = vsel %vm299_vm0, %v10213_v7, 0.0 }
0x30c5   :  { %10220 = vadd.xlane.f32.xlu1 %v10219_v11 }
0x314a   :  { %v10218_v28 = vpop.xlane.xlu0 %10217 }
0x314b   :  { %v10222_v38 = vmul.f32 0.015625, %v10218_v28 }
0x314d   :  { %v10224_v12 = vsub.f32 %v10212_v8, %v10222_v38 }
0x314e   :  { %v10221_v10 = vpop.xlane.xlu1 %10220 }
0x314f   :  { %v10223_v16 = vmul.f32 0.015625, %v10221_v10  ;;  %v10226_v32 = vmul.f32 %v10224_v12, %v10224_v12 }
0x3151   :  { %v10225_v61 = vsub.f32 %v10213_v7, %v10223_v16  ;;  %v10228_v56 = vsel %vm299_vm0, %v10226_v32, 0.0 }
0x3152   :  { %10229 = vadd.xlane.f32.xlu0 %v10228_v56 }
0x3153   :  { %v10227_v20 = vmul.f32 %v10225_v61, %v10225_v61 }
0x3155   :  { %v10231_v14 = vsel %vm299_vm0, %v10227_v20, 0.0 }
0x3156   :  { %10232 = vadd.xlane.f32.xlu1 %v10231_v14 }
0x31db   :  { %v10230_v5 = vpop.xlane.xlu0 %10229 }
0x31dc   :  { %v10234_v59 = vmul.f32 0.015625, %v10230_v5 }
0x31de   :  { %v10236_v62 = vadd.f32 1e-05, %v10234_v59 }
0x31df   :  { %v10233_v42 = vpop.xlane.xlu1 %10232 }
0x31e0   :  { %12067 = vrsqrt.f32 %v10236_v62  ;;  %v10235_v0 = vmul.f32 0.015625, %v10233_v42 }
0x31e2   :  { %v10237_v1 = vadd.f32 1e-05, %v10235_v0 }
0x31e4   :  { %12069 = vrsqrt.f32 %v10237_v1 }
0x31ed   :  { %v12068_v17 = vpop.eup %12067 }
0x31ee   :  { %v10240_v55 = vmul.f32 %v12068_v17, %v10224_v12 }
0x31f0   :  { %v10248_v26 = vmul.f32 %v10574_v63, %v10240_v55 }
0x31f1   :  { %v12070_v2 = vpop.eup %12069 }
0x31f2   :  { %v10241_v31 = vmul.f32 %v12070_v2, %v10225_v61  ;;  %v10256_v36 = vadd.f32 %v10575_v25, %v10248_v26 }
0x31f4   :  { %v10249_v60 = vmul.f32 %v10574_v63, %v10241_v31  ;;  %11853 = vmatprep.mubr.msk.f32.mxu1 %vm299_vm0, %v10256_v36 }
0x31f6   :  { %v10257_v34 = vadd.f32 %v10575_v25, %v10249_v60 }
0x31f8   :  { %11854 = vmatmul.mubr.msk.f32.vlgmr.msra.gmra.mxu1 %vm299_vm0, %v10257_v34 }
0x32b8   :  { %v11855_v44 = vpop.f32.mrf.mxu1 }
0x32b9   :  { %v10351_v35 = vadd.f32 %v11855_v44, %v10576_v45 }
0x32ba   :  { %v10345_v47 = vpop.f32.mrf.mxu1 }
0x32bb   :  { %10355 = vst [vmem:[#allocation2 + $0x8] sm:$0xff] %v10351_v35  ;;  %v10346_v43 = vadd.f32 %v10576_v45, %v10345_v47 }
0x32bd   :  { %10354 = vst [vmem:[#allocation2] sm:$0xff] %v10346_v43 }
0x32be   :  { %12084 = shalt.err (!%p12081_p4)
}
0x32bf   :  { %s12157_s4 = smov 128  }
0x32c0   :  { %10367 = dma.vmem_to_hbm [thread:$0]  %s10362_s7, 256, %s12376_s25, [#allocation3], %s12157_s4, %s12157_s4, %s12153_s2  }
0x32c1   :  { %12093 = dma.done.wait [#allocation3], 256  }
0x32c2   :  { %12094 = vsyncadd [#allocation3], 4294967040 }
0x32c3   :  { %10371 = vsyncpa [#allocation3], 1 }

</bundles_post_ra>
